<compile_context>
chip_gen: v6e
topology: v6e:2x2x1
jax: 0.10.0
libtpu: 0.0.40
codegen_flags: <defaults>
</compile_context>

<pallas_src>
import functools

import jax
import jax.numpy as jnp
from jax.experimental import pallas as pl
from jax.experimental.pallas import tpu as pltpu

HIDDEN = 1024
BOTTLENECK = 2
BOTTLENECK_PAD = 128  # pad 2 -> 128 lanes for TPU-friendly layout (exact, zeros)

VMEM_LIMIT_BYTES = 48 * 1024 * 1024  # fits v7x's 64 MiB physical VMEM


def _dense(h_f32, w_ref, b_ref, relu):
    """One Linear layer: bf16 MXU matmul, f32 accumulate, f32 bias/activation."""
    y = jnp.dot(h_f32.astype(jnp.bfloat16), w_ref[...],
                preferred_element_type=jnp.float32) + b_ref[...]
    if relu:
        y = jnp.maximum(y, 0.0)
    return y


def _mlp_kernel(x_ref,
                w1_ref, b1_ref,
                w2_ref, b2_ref,
                w3_ref, b3_ref,
                w4_ref, b4_ref,
                w5_ref, b5_ref,
                w6_ref, b6_ref,
                o_ref):
    """Whole autoencoder forward on one (TM, D) activation tile."""
    h = x_ref[...].astype(jnp.float32)

    # encoder
    h = _dense(h, w1_ref, b1_ref, relu=True)
    h = _dense(h, w2_ref, b2_ref, relu=True)

    # bottleneck (no activation between Linear(1024,2) and Linear(2,1024))
    z = _dense(h, w3_ref, b3_ref, relu=False)

    # decoder
    h = _dense(z, w4_ref, b4_ref, relu=True)
    h = _dense(h, w5_ref, b5_ref, relu=True)
    logits = _dense(h, w6_ref, b6_ref, relu=False)

    o_ref[...] = jax.nn.sigmoid(logits).astype(o_ref.dtype)


def _pick_batch_tile(B):
    """Batch tile size: 256 fills the 2x256x256 MXU on v6e/v7x; 128 for v5e /
    mid-size B; small multiples of 8 for tiny B (sublane constraint)."""
    if B >= 256 and B % 256 == 0:
        return 256
    if B >= 128:
        return 128
    return max(8, ((B + 7) // 8) * 8)


@functools.partial(jax.jit, static_argnames=())
def autoencoder_forward(x, params):
    """x: any shape (B, ...); returns same shape, like the torch Model."""
    inp_shape = x.shape
    B = inp_shape[0]
    x2d = x.reshape(B, -1).astype(jnp.float32)
    D = x2d.shape[1]

    # Pad batch up to a multiple of the tile size (zeros; sliced off at the end).
    TM = _pick_batch_tile(B)
    Bp = pl.cdiv(B, TM) * TM
    if Bp != B:
        x2d = jnp.pad(x2d, ((0, Bp - B), (0, 0)))
    grid = (Bp // TM,)

    flat_params = []
    in_specs = [pl.BlockSpec((TM, D), lambda i: (i, 0))]
    for (w, b) in params:
        flat_params.append(w)
        flat_params.append(b)
        # Constant index_map: weights/biases stay VMEM-resident across the grid.
        in_specs.append(pl.BlockSpec(w.shape, lambda i: (0, 0)))
        in_specs.append(pl.BlockSpec(b.shape, lambda i: (0, 0)))

    out2d = pl.pallas_call(
        _mlp_kernel,
        out_shape=jax.ShapeDtypeStruct((Bp, D), jnp.float32),
        grid=grid,
        in_specs=in_specs,
        out_specs=pl.BlockSpec((TM, D), lambda i: (i, 0)),
        compiler_params=pltpu.CompilerParams(
            dimension_semantics=("parallel",),
            vmem_limit_bytes=VMEM_LIMIT_BYTES,
        ),
    )(x2d, *flat_params)

    return out2d[:B].reshape(inp_shape)


def init_params(key, input_dim):
    """Deterministic init mimicking torch.nn.Linear default (U(-1/sqrt(fan_in), +)).

    Weights are stored transposed relative to PyTorch, i.e. (in, out), so the
    kernel computes h @ W + b.  Weights are cast to bf16 once (perf); biases
    stay f32.  The 2-wide bottleneck is zero-padded to 128 lanes (exact)."""
    dims = [
        (input_dim, HIDDEN),
        (HIDDEN, HIDDEN),
        (HIDDEN, BOTTLENECK),
        (BOTTLENECK, HIDDEN),
        (HIDDEN, HIDDEN),
        (HIDDEN, input_dim),
    ]
    params = []
    for (fan_in, fan_out) in dims:
        key, kw, kb = jax.random.split(key, 3)
        bound = 1.0 / jnp.sqrt(jnp.float32(fan_in))
        w = jax.random.uniform(kw, (fan_in, fan_out), jnp.float32, -bound, bound)
        b = jax.random.uniform(kb, (1, fan_out), jnp.float32, -bound, bound)
        params.append([w, b])

    # Zero-pad the bottleneck: padded output cols of layer 3 are bias=0 +
    # weights=0, and padded input rows of layer-4 weight are 0 -> exact math.
    w3, b3 = params[2]
    params[2][0] = jnp.zeros((HIDDEN, BOTTLENECK_PAD), jnp.float32).at[:, :BOTTLENECK].set(w3)
    params[2][1] = jnp.zeros((1, BOTTLENECK_PAD), jnp.float32).at[:, :BOTTLENECK].set(b3)

    w4, _ = params[3]
    params[3][0] = jnp.zeros((BOTTLENECK_PAD, HIDDEN), jnp.float32).at[:BOTTLENECK, :].set(w4)

    # Weights to bf16 (halved HBM traffic + native bf16 MXU); biases stay f32.
    return [(w.astype(jnp.bfloat16), b.astype(jnp.float32)) for (w, b) in params]


def reference_forward(x, params):
    """Pure-JAX reference with identical math (bf16 matmul operands, f32 accum)."""
    inp_shape = x.shape
    h = x.reshape(inp_shape[0], -1).astype(jnp.float32)
    relu_after = [True, True, False, True, True, False]
    for i, (w, b) in enumerate(params):
        h = jnp.dot(h.astype(jnp.bfloat16), w,
                    preferred_element_type=jnp.float32) + b
        if relu_after[i]:
            h = jnp.maximum(h, 0.0)
    h = jax.nn.sigmoid(h)
    return h.reshape(inp_shape)


if __name__ == "__main__":
    key = jax.random.PRNGKey(0)
    kx, kp = jax.random.split(key)

    # NCHW-style input; flatten(1) gives D = 4*16*16 = 1024
    x = jax.random.normal(kx, (2, 4, 16, 16), dtype=jnp.float32)
    params = init_params(kp, input_dim=4 * 16 * 16)

    out = autoencoder_forward(x, params)
    out = jax.block_until_ready(out)

    ref = reference_forward(x, params)
    assert out.shape == x.shape
    assert jnp.allclose(out, ref, atol=2e-3, rtol=2e-3), "mismatch vs JAX reference"

    print("KERNEL_OK")
</pallas_src>

<mosaic_0001>
module attributes {stable_mosaic.version = 11 : i64} {
  func.func @_mlp_kernel(%arg0: i32, %arg1: memref<8x1024xf32, #tpu.memory_space<vmem>>, %arg2: memref<1024x1024xbf16, #tpu.memory_space<vmem>>, %arg3: memref<1x1024xf32, #tpu.memory_space<vmem>>, %arg4: memref<1024x1024xbf16, #tpu.memory_space<vmem>>, %arg5: memref<1x1024xf32, #tpu.memory_space<vmem>>, %arg6: memref<1024x128xbf16, #tpu.memory_space<vmem>>, %arg7: memref<1x128xf32, #tpu.memory_space<vmem>>, %arg8: memref<128x1024xbf16, #tpu.memory_space<vmem>>, %arg9: memref<1x1024xf32, #tpu.memory_space<vmem>>, %arg10: memref<1024x1024xbf16, #tpu.memory_space<vmem>>, %arg11: memref<1x1024xf32, #tpu.memory_space<vmem>>, %arg12: memref<1024x1024xbf16, #tpu.memory_space<vmem>>, %arg13: memref<1x1024xf32, #tpu.memory_space<vmem>>, %arg14: memref<8x1024xf32, #tpu.memory_space<vmem>>) attributes {dimension_semantics = [#tpu.dimension_semantics<parallel>], iteration_bounds = array<i64: 1>, scalar_prefetch = 0 : i64, scratch_operands = 0 : i64, tpu.core_type = #tpu.core_type<tc>, window_params = [{transform_indices = @transform_0, window_bounds = array<i64: 8, 1024>}, {pipeline_mode = #tpu.pipeline_mode<synchronous>, transform_indices = @transform_1, window_bounds = array<i64: 1024, 1024>}, {pipeline_mode = #tpu.pipeline_mode<synchronous>, transform_indices = @transform_2, window_bounds = array<i64: 1, 1024>}, {pipeline_mode = #tpu.pipeline_mode<synchronous>, transform_indices = @transform_3, window_bounds = array<i64: 1024, 1024>}, {pipeline_mode = #tpu.pipeline_mode<synchronous>, transform_indices = @transform_4, window_bounds = array<i64: 1, 1024>}, {pipeline_mode = #tpu.pipeline_mode<synchronous>, transform_indices = @transform_5, window_bounds = array<i64: 1024, 128>}, {pipeline_mode = #tpu.pipeline_mode<synchronous>, transform_indices = @transform_6, window_bounds = array<i64: 1, 128>}, {pipeline_mode = #tpu.pipeline_mode<synchronous>, transform_indices = @transform_7, window_bounds = array<i64: 128, 1024>}, {pipeline_mode = #tpu.pipeline_mode<synchronous>, transform_indices = @transform_8, window_bounds = array<i64: 1, 1024>}, {pipeline_mode = #tpu.pipeline_mode<synchronous>, transform_indices = @transform_9, window_bounds = array<i64: 1024, 1024>}, {pipeline_mode = #tpu.pipeline_mode<synchronous>, transform_indices = @transform_10, window_bounds = array<i64: 1, 1024>}, {pipeline_mode = #tpu.pipeline_mode<synchronous>, transform_indices = @transform_11, window_bounds = array<i64: 1024, 1024>}, {pipeline_mode = #tpu.pipeline_mode<synchronous>, transform_indices = @transform_12, window_bounds = array<i64: 1, 1024>}, {transform_indices = @transform_13, window_bounds = array<i64: 8, 1024>}]} {
    %c0 = arith.constant 0 : index
    %c0_0 = arith.constant 0 : index
    %0 = vector.load %arg1[%c0, %c0_0] : memref<8x1024xf32, #tpu.memory_space<vmem>>, vector<8x1024xf32>
    %1 = arith.truncf %0 : vector<8x1024xf32> to vector<8x1024xbf16>
    %c0_1 = arith.constant 0 : index
    %c0_2 = arith.constant 0 : index
    %2 = vector.load %arg2[%c0_1, %c0_2] : memref<1024x1024xbf16, #tpu.memory_space<vmem>>, vector<1024x1024xbf16>
    %cst = arith.constant dense<0.000000e+00> : vector<8x1024xf32>
    %3 = tpu.matmul %1, %2, %cst {dimension_numbers = #tpu.dot_dimension_numbers<[1], [0], [0], [1], [0, 0, 1, 1], [], []>} : vector<8x1024xbf16>, vector<1024x1024xbf16>, vector<8x1024xf32> -> vector<8x1024xf32>
    %c0_3 = arith.constant 0 : index
    %c0_4 = arith.constant 0 : index
    %4 = vector.load %arg3[%c0_3, %c0_4] : memref<1x1024xf32, #tpu.memory_space<vmem>>, vector<1x1024xf32>
    %5 = vector.broadcast %4 : vector<1x1024xf32> to vector<8x1024xf32>
    %6 = arith.addf %3, %5 : vector<8x1024xf32>
    %cst_5 = arith.constant 0.000000e+00 : f32
    %7 = vector.broadcast %cst_5 : f32 to vector<8x1024xf32>
    %8 = arith.maximumf %6, %7 : vector<8x1024xf32>
    %9 = arith.truncf %8 : vector<8x1024xf32> to vector<8x1024xbf16>
    %c0_6 = arith.constant 0 : index
    %c0_7 = arith.constant 0 : index
    %10 = vector.load %arg4[%c0_6, %c0_7] : memref<1024x1024xbf16, #tpu.memory_space<vmem>>, vector<1024x1024xbf16>
    %cst_8 = arith.constant dense<0.000000e+00> : vector<8x1024xf32>
    %11 = tpu.matmul %9, %10, %cst_8 {dimension_numbers = #tpu.dot_dimension_numbers<[1], [0], [0], [1], [0, 0, 1, 1], [], []>} : vector<8x1024xbf16>, vector<1024x1024xbf16>, vector<8x1024xf32> -> vector<8x1024xf32>
    %c0_9 = arith.constant 0 : index
    %c0_10 = arith.constant 0 : index
    %12 = vector.load %arg5[%c0_9, %c0_10] : memref<1x1024xf32, #tpu.memory_space<vmem>>, vector<1x1024xf32>
    %13 = vector.broadcast %12 : vector<1x1024xf32> to vector<8x1024xf32>
    %14 = arith.addf %11, %13 : vector<8x1024xf32>
    %cst_11 = arith.constant 0.000000e+00 : f32
    %15 = vector.broadcast %cst_11 : f32 to vector<8x1024xf32>
    %16 = arith.maximumf %14, %15 : vector<8x1024xf32>
    %17 = arith.truncf %16 : vector<8x1024xf32> to vector<8x1024xbf16>
    %c0_12 = arith.constant 0 : index
    %c0_13 = arith.constant 0 : index
    %18 = vector.load %arg6[%c0_12, %c0_13] : memref<1024x128xbf16, #tpu.memory_space<vmem>>, vector<1024x128xbf16>
    %cst_14 = arith.constant dense<0.000000e+00> : vector<8x128xf32>
    %19 = tpu.matmul %17, %18, %cst_14 {dimension_numbers = #tpu.dot_dimension_numbers<[1], [0], [0], [1], [0, 0, 1, 1], [], []>} : vector<8x1024xbf16>, vector<1024x128xbf16>, vector<8x128xf32> -> vector<8x128xf32>
    %c0_15 = arith.constant 0 : index
    %c0_16 = arith.constant 0 : index
    %20 = vector.load %arg7[%c0_15, %c0_16] : memref<1x128xf32, #tpu.memory_space<vmem>>, vector<1x128xf32>
    %21 = vector.broadcast %20 : vector<1x128xf32> to vector<8x128xf32>
    %22 = arith.addf %19, %21 : vector<8x128xf32>
    %23 = arith.truncf %22 : vector<8x128xf32> to vector<8x128xbf16>
    %c0_17 = arith.constant 0 : index
    %c0_18 = arith.constant 0 : index
    %24 = vector.load %arg8[%c0_17, %c0_18] : memref<128x1024xbf16, #tpu.memory_space<vmem>>, vector<128x1024xbf16>
    %cst_19 = arith.constant dense<0.000000e+00> : vector<8x1024xf32>
    %25 = tpu.matmul %23, %24, %cst_19 {dimension_numbers = #tpu.dot_dimension_numbers<[1], [0], [0], [1], [0, 0, 1, 1], [], []>} : vector<8x128xbf16>, vector<128x1024xbf16>, vector<8x1024xf32> -> vector<8x1024xf32>
    %c0_20 = arith.constant 0 : index
    %c0_21 = arith.constant 0 : index
    %26 = vector.load %arg9[%c0_20, %c0_21] : memref<1x1024xf32, #tpu.memory_space<vmem>>, vector<1x1024xf32>
    %27 = vector.broadcast %26 : vector<1x1024xf32> to vector<8x1024xf32>
    %28 = arith.addf %25, %27 : vector<8x1024xf32>
    %cst_22 = arith.constant 0.000000e+00 : f32
    %29 = vector.broadcast %cst_22 : f32 to vector<8x1024xf32>
    %30 = arith.maximumf %28, %29 : vector<8x1024xf32>
    %31 = arith.truncf %30 : vector<8x1024xf32> to vector<8x1024xbf16>
    %c0_23 = arith.constant 0 : index
    %c0_24 = arith.constant 0 : index
    %32 = vector.load %arg10[%c0_23, %c0_24] : memref<1024x1024xbf16, #tpu.memory_space<vmem>>, vector<1024x1024xbf16>
    %cst_25 = arith.constant dense<0.000000e+00> : vector<8x1024xf32>
    %33 = tpu.matmul %31, %32, %cst_25 {dimension_numbers = #tpu.dot_dimension_numbers<[1], [0], [0], [1], [0, 0, 1, 1], [], []>} : vector<8x1024xbf16>, vector<1024x1024xbf16>, vector<8x1024xf32> -> vector<8x1024xf32>
    %c0_26 = arith.constant 0 : index
    %c0_27 = arith.constant 0 : index
    %34 = vector.load %arg11[%c0_26, %c0_27] : memref<1x1024xf32, #tpu.memory_space<vmem>>, vector<1x1024xf32>
    %35 = vector.broadcast %34 : vector<1x1024xf32> to vector<8x1024xf32>
    %36 = arith.addf %33, %35 : vector<8x1024xf32>
    %cst_28 = arith.constant 0.000000e+00 : f32
    %37 = vector.broadcast %cst_28 : f32 to vector<8x1024xf32>
    %38 = arith.maximumf %36, %37 : vector<8x1024xf32>
    %39 = arith.truncf %38 : vector<8x1024xf32> to vector<8x1024xbf16>
    %c0_29 = arith.constant 0 : index
    %c0_30 = arith.constant 0 : index
    %40 = vector.load %arg12[%c0_29, %c0_30] : memref<1024x1024xbf16, #tpu.memory_space<vmem>>, vector<1024x1024xbf16>
    %cst_31 = arith.constant dense<0.000000e+00> : vector<8x1024xf32>
    %41 = tpu.matmul %39, %40, %cst_31 {dimension_numbers = #tpu.dot_dimension_numbers<[1], [0], [0], [1], [0, 0, 1, 1], [], []>} : vector<8x1024xbf16>, vector<1024x1024xbf16>, vector<8x1024xf32> -> vector<8x1024xf32>
    %c0_32 = arith.constant 0 : index
    %c0_33 = arith.constant 0 : index
    %42 = vector.load %arg13[%c0_32, %c0_33] : memref<1x1024xf32, #tpu.memory_space<vmem>>, vector<1x1024xf32>
    %43 = vector.broadcast %42 : vector<1x1024xf32> to vector<8x1024xf32>
    %44 = arith.addf %41, %43 : vector<8x1024xf32>
    %45 = arith.negf %44 : vector<8x1024xf32>
    %46 = math.exp %45 : vector<8x1024xf32>
    %cst_34 = arith.constant 1.000000e+00 : f32
    %47 = vector.broadcast %cst_34 : f32 to vector<8x1024xf32>
    %48 = arith.addf %47, %46 : vector<8x1024xf32>
    %49 = arith.divf %47, %48 : vector<8x1024xf32>
    %c0_35 = arith.constant 0 : index
    %c0_36 = arith.constant 0 : index
    %50 = vector.load %arg14[%c0_35, %c0_36] : memref<8x1024xf32, #tpu.memory_space<vmem>>, vector<8x1024xf32>
    tpu.vector_store %arg14[%c0_35, %c0_36], %49 {strides = array<i32>} : memref<8x1024xf32, #tpu.memory_space<vmem>>, vector<8x1024xf32>,
    return
  }
  func.func @transform_0(%arg0: i32) -> (i32, i32) {
    %c0_i32 = arith.constant 0 : i32
    %c0_i32_0 = arith.constant 0 : i32
    return %arg0, %c0_i32 : i32, i32
  }
  func.func @transform_1(%arg0: i32) -> (i32, i32) {
    %c0_i32 = arith.constant 0 : i32
    %c0_i32_0 = arith.constant 0 : i32
    %c0_i32_1 = arith.constant 0 : i32
    return %c0_i32, %c0_i32_0 : i32, i32
  }
  func.func @transform_2(%arg0: i32) -> (i32, i32) {
    %c0_i32 = arith.constant 0 : i32
    %c0_i32_0 = arith.constant 0 : i32
    %c0_i32_1 = arith.constant 0 : i32
    return %c0_i32, %c0_i32_0 : i32, i32
  }
  func.func @transform_3(%arg0: i32) -> (i32, i32) {
    %c0_i32 = arith.constant 0 : i32
    %c0_i32_0 = arith.constant 0 : i32
    %c0_i32_1 = arith.constant 0 : i32
    return %c0_i32, %c0_i32_0 : i32, i32
  }
  func.func @transform_4(%arg0: i32) -> (i32, i32) {
    %c0_i32 = arith.constant 0 : i32
    %c0_i32_0 = arith.constant 0 : i32
    %c0_i32_1 = arith.constant 0 : i32
    return %c0_i32, %c0_i32_0 : i32, i32
  }
  func.func @transform_5(%arg0: i32) -> (i32, i32) {
    %c0_i32 = arith.constant 0 : i32
    %c0_i32_0 = arith.constant 0 : i32
    %c0_i32_1 = arith.constant 0 : i32
    return %c0_i32, %c0_i32_0 : i32, i32
  }
  func.func @transform_6(%arg0: i32) -> (i32, i32) {
    %c0_i32 = arith.constant 0 : i32
    %c0_i32_0 = arith.constant 0 : i32
    %c0_i32_1 = arith.constant 0 : i32
    return %c0_i32, %c0_i32_0 : i32, i32
  }
  func.func @transform_7(%arg0: i32) -> (i32, i32) {
    %c0_i32 = arith.constant 0 : i32
    %c0_i32_0 = arith.constant 0 : i32
    %c0_i32_1 = arith.constant 0 : i32
    return %c0_i32, %c0_i32_0 : i32, i32
  }
  func.func @transform_8(%arg0: i32) -> (i32, i32) {
    %c0_i32 = arith.constant 0 : i32
    %c0_i32_0 = arith.constant 0 : i32
    %c0_i32_1 = arith.constant 0 : i32
    return %c0_i32, %c0_i32_0 : i32, i32
  }
  func.func @transform_9(%arg0: i32) -> (i32, i32) {
    %c0_i32 = arith.constant 0 : i32
    %c0_i32_0 = arith.constant 0 : i32
    %c0_i32_1 = arith.constant 0 : i32
    return %c0_i32, %c0_i32_0 : i32, i32
  }
  func.func @transform_10(%arg0: i32) -> (i32, i32) {
    %c0_i32 = arith.constant 0 : i32
    %c0_i32_0 = arith.constant 0 : i32
    %c0_i32_1 = arith.constant 0 : i32
    return %c0_i32, %c0_i32_0 : i32, i32
  }
  func.func @transform_11(%arg0: i32) -> (i32, i32) {
    %c0_i32 = arith.constant 0 : i32
    %c0_i32_0 = arith.constant 0 : i32
    %c0_i32_1 = arith.constant 0 : i32
    return %c0_i32, %c0_i32_0 : i32, i32
  }
  func.func @transform_12(%arg0: i32) -> (i32, i32) {
    %c0_i32 = arith.constant 0 : i32
    %c0_i32_0 = arith.constant 0 : i32
    %c0_i32_1 = arith.constant 0 : i32
    return %c0_i32, %c0_i32_0 : i32, i32
  }
  func.func @transform_13(%arg0: i32) -> (i32, i32) {
    %c0_i32 = arith.constant 0 : i32
    %c0_i32_0 = arith.constant 0 : i32
    return %arg0, %c0_i32 : i32, i32
  }
}

</mosaic_0001>

<bundles_post_ra>
// kernel: autoencoder_forward.1
= control target key start
LH: loop header
LB: loop body
LE: loop exit
PB: predicated region body
PF: predicated region fallthrough
CT: control target
= control target key end

     0   :  { %18 = vsyncpa [#allocation3], 0  ;;  %s20074_s0 = inlined_call_operand.vmem [shape: f32[8,1024], index: 0, kind: input, shape index: {}]   ;;  %s20075_s1 = inlined_call_operand.hbm [shape: bf16[1024,1024], index: 1, kind: input, shape index: {}]   ;;  %s20076_s2 = inlined_call_operand.hbm [shape: f32[1,1024], index: 2, kind: input, shape index: {}]   ;;  %s20077_s3 = inlined_call_operand.hbm [shape: bf16[1024,1024], index: 3, kind: input, shape index: {}]   ;;  %s20078_s4 = inlined_call_operand.hbm [shape: f32[1,1024], index: 4, kind: input, shape index: {}]   ;;  %s20079_s5 = inlined_call_operand.hbm [shape: bf16[1024,128], index: 5, kind: input, shape index: {}]   ;;  %s20080_s6 = inlined_call_operand.hbm [shape: f32[1,128], index: 6, kind: input, shape index: {}]   ;;  %s20081_s7 = inlined_call_operand.hbm [shape: bf16[128,1024], index: 7, kind: input, shape index: {}]   ;;  %s20082_s8 = inlined_call_operand.hbm [shape: f32[1,1024], index: 8, kind: input, shape index: {}]   ;;  %s20083_s9 = inlined_call_operand.hbm [shape: bf16[1024,1024], index: 9, kind: input, shape index: {}]   ;;  %s20084_s10 = inlined_call_operand.hbm [shape: f32[1,1024], index: 10, kind: input, shape index: {}]   ;;  %s20085_s11 = inlined_call_operand.hbm [shape: bf16[1024,1024], index: 11, kind: input, shape index: {}]   ;;  %s20086_s12 = inlined_call_operand.hbm [shape: f32[1,1024], index: 12, kind: input, shape index: {}]   ;;  %s20087_s13 = inlined_call_operand.vmem [shape: f32[8,1024], index: 13, kind: output, shape index: {}]  }
   0x1   :  { %19 = vsyncpa [#allocation5], 0 }
   0x2   :  { %20 = vsyncpa [#allocation8], 0 }
   0x3   :  { %21 = vsyncpa [#allocation11], 0 }
   0x4   :  { %22 = vsyncpa [#allocation14], 0 }
   0x5   :  { %23 = vsyncpa [#allocation17], 0 }
   0x6   :  { %24 = vsyncpa [#allocation20], 0  ;;  %s19339_s25 = smov [#allocation4]   ;;  %s19340_s27 = smov [#allocation7]  }
   0x7   :  { %s45_s26 = sshll.u32 %s19339_s25, 4  ;;  %s67_s28 = sshll.u32 %s19340_s27, 4  ;;  %s46_s26 = int_to_ptr.vmem [resolvable:$true] %s45_s26  ;;  %s68_s28 = int_to_ptr.vmem [resolvable:$true] %s67_s28 }
   0x8   :  { %s19093_s29 = scalar_lea.vmem %s46_s26, 128  ;;  %p19098_p1 = scmp.lt.s32.totalorder %s46_s26, %s46_s26 }
   0x9   :  { %p19094_p0 = scmp.ne.s32.totalorder %s46_s26, %s19093_s29  ;;  %p19099_p2 = scmp.lt.s32.totalorder %s19093_s29, %s19093_s29 }
   0xb   :  { %p19100_p3 = por %p19099_p2, %p19098_p1 }
   0xd   :  { %p19101_p4 = pnand %p19100_p3, %p19094_p0 }
   0xf   :  { %19104 = shalt.err (!%p19101_p4)
}
  0x10   :  { %48 = dma.hbm_to_vmem [thread:$0]  %s20076_s2, 128, %s46_s26, [#allocation5]  }
  0x11   :  { %s19113_s15 = scalar_lea.vmem %s68_s28, 128  ;;  %p19118_p6 = scmp.lt.s32.totalorder %s68_s28, %s68_s28 }
  0x12   :  { %p19114_p5 = scmp.ne.s32.totalorder %s68_s28, %s19113_s15  ;;  %p19119_p7 = scmp.lt.s32.totalorder %s19113_s15, %s19113_s15 }
  0x14   :  { %p19120_p8 = por %p19119_p7, %p19118_p6 }
  0x16   :  { %p19121_p9 = pnand %p19120_p8, %p19114_p5 }
  0x18   :  { %19124 = shalt.err (!%p19121_p9)
}
  0x19   :  { %70 = dma.hbm_to_vmem [thread:$0]  %s20078_s4, 128, %s68_s28, [#allocation8]  }
  0x1a   :  { %s19341_s18 = smov [#allocation10]   ;;  %s19342_s20 = smov [#allocation13]  }
  0x1b   :  { %s89_s19 = sshll.u32 %s19341_s18, 4  ;;  %s111_s21 = sshll.u32 %s19342_s20, 4  ;;  %s90_s19 = int_to_ptr.vmem [resolvable:$true] %s89_s19  ;;  %s112_s21 = int_to_ptr.vmem [resolvable:$true] %s111_s21 }
  0x1c   :  { %s19133_s22 = scalar_lea.vmem %s90_s19, 16  ;;  %s19137_s2 = scalar_lea.vmem %s90_s19, 32 }
  0x1d   :  { %p19134_p10 = scmp.ne.s32.totalorder %s90_s19, %s19133_s22  ;;  %p19138_p11 = scmp.lt.s32.totalorder %s90_s19, %s90_s19 }
  0x1e   :  { %p19139_p12 = scmp.lt.s32.totalorder %s19137_s2, %s19133_s22 }
  0x20   :  { %p19140_p13 = por %p19139_p12, %p19138_p11 }
  0x22   :  { %p19141_p0 = pnand %p19140_p13, %p19134_p10 }
  0x24   :  { %19144 = shalt.err (!%p19141_p0)
}
  0x25   :  { %92 = dma.hbm_to_vmem [thread:$0]  %s20080_s6, 16, %s90_s19, [#allocation11]  }
  0x26   :  { %s19153_s25 = scalar_lea.vmem %s112_s21, 128  ;;  %p19158_p2 = scmp.lt.s32.totalorder %s112_s21, %s112_s21 }
  0x27   :  { %p19154_p1 = scmp.ne.s32.totalorder %s112_s21, %s19153_s25  ;;  %p19159_p3 = scmp.lt.s32.totalorder %s19153_s25, %s19153_s25 }
  0x29   :  { %p19160_p4 = por %p19159_p3, %p19158_p2 }
  0x2b   :  { %p19161_p5 = pnand %p19160_p4, %p19154_p1 }
  0x2d   :  { %19164 = shalt.err (!%p19161_p5)
}
  0x2e   :  { %114 = dma.hbm_to_vmem [thread:$0]  %s20082_s8, 128, %s112_s21, [#allocation14]  }
  0x2f   :  { %s19343_s27 = smov [#allocation16]   ;;  %s19344_s29 = smov [#allocation2]  }
  0x30   :  { %s133_s28 = sshll.u32 %s19343_s27, 4  ;;  %s32_s30 = sshll.u32 %s19344_s29, 4  ;;  %s134_s28 = int_to_ptr.vmem [resolvable:$true] %s133_s28  ;;  %s33_s30 = int_to_ptr.vmem [resolvable:$true] %s32_s30 }
  0x31   :  { %s19173_s14 = scalar_lea.vmem %s134_s28, 128  ;;  %p19178_p7 = scmp.lt.s32.totalorder %s134_s28, %s134_s28 }
  0x32   :  { %p19174_p6 = scmp.ne.s32.totalorder %s134_s28, %s19173_s14  ;;  %p19179_p8 = scmp.lt.s32.totalorder %s19173_s14, %s19173_s14 }
  0x34   :  { %p19180_p9 = por %p19179_p8, %p19178_p7 }
  0x36   :  { %p19181_p10 = pnand %p19180_p9, %p19174_p6 }
  0x38   :  { %19184 = shalt.err (!%p19181_p10)
}
  0x39   :  { %136 = dma.hbm_to_vmem [thread:$0]  %s20084_s10, 128, %s134_s28, [#allocation17]  }
  0x3a   :  { %s19193_s16 = scalar_lea.vmem %s33_s30, 65536  ;;  %p19198_p12 = scmp.lt.s32.totalorder %s33_s30, %s33_s30 }
  0x3b   :  { %p19194_p11 = scmp.ne.s32.totalorder %s33_s30, %s19193_s16  ;;  %p19199_p13 = scmp.lt.s32.totalorder %s19193_s16, %s19193_s16 }
  0x3d   :  { %p19200_p0 = por %p19199_p13, %p19198_p12 }
  0x3f   :  { %p19201_p1 = pnand %p19200_p0, %p19194_p11 }
  0x41   :  { %19204 = shalt.err (!%p19201_p1)
}
  0x42   :  { %s19345_s8 = smov 512   ;;  %s19346_s17 = smov 32  }
  0x43   :  { %38 = dma.hbm_to_vmem [thread:$0]  %s20075_s1, 65536, %s33_s30, [#allocation3], %s19345_s8, %s19345_s8, %s19346_s17  }
  0x44   :  { %s19347_s20 = smov [#allocation6]   ;;  %s19348_s22 = smov [#allocation9]  }
  0x45   :  { %s54_s21 = sshll.u32 %s19347_s20, 4  ;;  %s76_s10 = sshll.u32 %s19348_s22, 4  ;;  %s55_s21 = int_to_ptr.vmem [resolvable:$true] %s54_s21  ;;  %s77_s10 = int_to_ptr.vmem [resolvable:$true] %s76_s10 }
  0x46   :  { %s19213_s2 = scalar_lea.vmem %s55_s21, 65536  ;;  %p19218_p3 = scmp.lt.s32.totalorder %s55_s21, %s55_s21 }
  0x47   :  { %p19214_p2 = scmp.ne.s32.totalorder %s55_s21, %s19213_s2  ;;  %p19219_p4 = scmp.lt.s32.totalorder %s19213_s2, %s19213_s2 }
  0x49   :  { %p19220_p5 = por %p19219_p4, %p19218_p3 }
  0x4b   :  { %p19221_p6 = pnand %p19220_p5, %p19214_p2 }
  0x4d   :  { %19224 = shalt.err (!%p19221_p6)
}
  0x4e   :  { %60 = dma.hbm_to_vmem [thread:$0]  %s20077_s3, 65536, %s55_s21, [#allocation5], %s19345_s8, %s19345_s8, %s19346_s17  }
  0x4f   :  { %s19233_s1 = scalar_lea.vmem %s77_s10, 8192  ;;  %p19238_p8 = scmp.lt.s32.totalorder %s77_s10, %s77_s10 }
  0x50   :  { %p19234_p7 = scmp.ne.s32.totalorder %s77_s10, %s19233_s1  ;;  %p19239_p9 = scmp.lt.s32.totalorder %s19233_s1, %s19233_s1 }
  0x52   :  { %p19240_p10 = por %p19239_p9, %p19238_p8 }
  0x54   :  { %p19241_p11 = pnand %p19240_p10, %p19234_p7 }
  0x56   :  { %19244 = shalt.err (!%p19241_p11)
}
  0x57   :  { %s19349_s25 = smov 64   ;;  %s19350_s4 = smov 4  }
  0x58   :  { %82 = dma.hbm_to_vmem [thread:$0]  %s20079_s5, 8192, %s77_s10, [#allocation8], %s19349_s25, %s19349_s25, %s19350_s4  }
  0x59   :  { %s19351_s28 = smov [#allocation12]   ;;  %s19352_s30 = smov [#allocation15]  }
  0x5a   :  { %s98_s29 = sshll.u32 %s19351_s28, 4  ;;  %s120_s14 = sshll.u32 %s19352_s30, 4  ;;  %s99_s29 = int_to_ptr.vmem [resolvable:$true] %s98_s29  ;;  %s121_s14 = int_to_ptr.vmem [resolvable:$true] %s120_s14 }
  0x5b   :  { %s19253_s3 = scalar_lea.vmem %s99_s29, 8192  ;;  %p19258_p13 = scmp.lt.s32.totalorder %s99_s29, %s99_s29 }
  0x5c   :  { %p19254_p12 = scmp.ne.s32.totalorder %s99_s29, %s19253_s3  ;;  %p19259_p0 = scmp.lt.s32.totalorder %s19253_s3, %s19253_s3 }
  0x5e   :  { %p19260_p1 = por %p19259_p0, %p19258_p13 }
  0x60   :  { %p19261_p2 = pnand %p19260_p1, %p19254_p12 }
  0x62   :  { %19264 = shalt.err (!%p19261_p2)
}
  0x63   :  { %104 = dma.hbm_to_vmem [thread:$0]  %s20081_s7, 8192, %s99_s29, [#allocation11], %s19345_s8, %s19345_s8, %s19346_s17  }
  0x64   :  { %s19273_s5 = scalar_lea.vmem %s121_s14, 65536  ;;  %p19278_p4 = scmp.lt.s32.totalorder %s121_s14, %s121_s14 }
  0x65   :  { %p19274_p3 = scmp.ne.s32.totalorder %s121_s14, %s19273_s5  ;;  %p19279_p5 = scmp.lt.s32.totalorder %s19273_s5, %s19273_s5 }
  0x67   :  { %p19280_p6 = por %p19279_p5, %p19278_p4 }
  0x69   :  { %p19281_p7 = pnand %p19280_p6, %p19274_p3 }
  0x6b   :  { %19284 = shalt.err (!%p19281_p7)
}
  0x6c   :  { %126 = dma.hbm_to_vmem [thread:$0]  %s20083_s9, 65536, %s121_s14, [#allocation14], %s19345_s8, %s19345_s8, %s19346_s17  }
  0x6d   :  { %s19353_s19 = smov [#allocation18]   ;;  %s19354_s21 = smov [#allocation19]  }
  0x6e   :  { %s142_s20 = sshll.u32 %s19353_s19, 4  ;;  %s155_s22 = sshll.u32 %s19354_s21, 4  ;;  %s143_s20 = int_to_ptr.vmem [resolvable:$true] %s142_s20  ;;  %s156_s22 = int_to_ptr.vmem [resolvable:$true] %s155_s22 }
  0x6f   :  { %s19293_s7 = scalar_lea.vmem %s143_s20, 65536  ;;  %p19298_p9 = scmp.lt.s32.totalorder %s143_s20, %s143_s20 }
  0x70   :  { %p19294_p8 = scmp.ne.s32.totalorder %s143_s20, %s19293_s7  ;;  %p19299_p10 = scmp.lt.s32.totalorder %s19293_s7, %s19293_s7 }
  0x72   :  { %p19300_p11 = por %p19299_p10, %p19298_p9 }
  0x74   :  { %p19301_p12 = pnand %p19300_p11, %p19294_p8 }
  0x76   :  { %19304 = shalt.err (!%p19301_p12)
}
  0x77   :  { %148 = dma.hbm_to_vmem [thread:$0]  %s20085_s11, 65536, %s143_s20, [#allocation17], %s19345_s8, %s19345_s8, %s19346_s17  }
  0x78   :  { %s19313_s9 = scalar_lea.vmem %s156_s22, 128  ;;  %p19318_p0 = scmp.lt.s32.totalorder %s156_s22, %s156_s22 }
  0x79   :  { %p19314_p13 = scmp.ne.s32.totalorder %s156_s22, %s19313_s9  ;;  %p19319_p1 = scmp.lt.s32.totalorder %s19313_s9, %s19313_s9 }
  0x7b   :  { %p19320_p2 = por %p19319_p1, %p19318_p0 }
  0x7d   :  { %p19321_p3 = pnand %p19320_p2, %p19314_p13 }
  0x7f   :  { %19324 = shalt.err (!%p19321_p3)
}
  0x80   :  { %158 = dma.hbm_to_vmem [thread:$0]  %s20086_s12, 128, %s156_s22, [#allocation20]  }
  0x81   :  { %19325 = dma.done.wait [#allocation3], 65536  }
  0x82   :  { %19326 = vsyncadd [#allocation3], 4294901760 }
  0x83   :  { %19327 = dma.done.wait [#allocation5], 65664  }
  0x84   :  { %19328 = vsyncadd [#allocation5], 4294901632 }
  0x85   :  { %19329 = dma.done.wait [#allocation8], 8320  }
  0x86   :  { %19330 = vsyncadd [#allocation8], 4294958976 }
  0x87   :  { %19331 = dma.done.wait [#allocation11], 8208  }
  0x88   :  { %19332 = vsyncadd [#allocation11], 4294959088 }
  0x89   :  { %19333 = dma.done.wait [#allocation14], 65664  }
  0x8a   :  { %19334 = vsyncadd [#allocation14], 4294901632 }
  0x8b   :  { %19335 = dma.done.wait [#allocation17], 65664  }
  0x8c   :  { %19336 = vsyncadd [#allocation17], 4294901632 }
  0x8d   :  { %19337 = dma.done.wait [#allocation20], 128  }
  0x8e   :  { %19338 = vsyncadd [#allocation20], 4294967168  ;;  %v268_v0 = vld [vmem:[#allocation2 + $0x1c0] sm:$0xff]  ;;  %v197_v53 = vld [vmem:[%s20074_s0 + $0x8] sm:$0xff] }
  0x8f   :  { %v272_v1 = vld [vmem:[#allocation2 + $0x1e0] sm:$0xff]  ;;  %v199_v54 = vld [vmem:[%s20074_s0 + $0x18] sm:$0xff]  ;;  %v19483_v58 = vpack.c.bf16 %v197_v53, %v197_v53 }
  0x90   :  { %v396_v2 = vld [vmem:[#allocation2 + $0x5c0] sm:$0xff]  ;;  %v16750_v3 = vcombine.high %v268_v0, %v272_v1  ;;  %v16749_v5 = vcombine.low %v268_v0, %v272_v1  ;;  %v19485_v59 = vpack.c.bf16 %v199_v54, %v199_v54 }
  0x91   :  { %v400_v4 = vld [vmem:[#allocation2 + $0x5e0] sm:$0xff]  ;;  %3358 = vmatprep.mubr.bf16.mxu0 %v19483_v58 }
  0x92   :  { %v260_v6 = vld [vmem:[#allocation2 + $0x180] sm:$0xff]  ;;  %v16878_v8 = vcombine.high %v396_v2, %v400_v4  ;;  %v16877_v9 = vcombine.low %v396_v2, %v400_v4  ;;  %3326 = vmatprep.subr.bf16.mxu0 %v16750_v3  ;;  %3399 = vmatprep.mubr.bf16.mxu1 %v19485_v59 }
  0x93   :  { %v264_v7 = vld [vmem:[#allocation2 + $0x1a0] sm:$0xff]  ;;  %3327 = vmatpush1.bf16.msra.mxu0 %v16749_v5 }
  0x94   :  { %v16742_v10 = vcombine.high %v260_v6, %v264_v7  ;;  %v388_v11 = vld [vmem:[#allocation2 + $0x580] sm:$0xff]  ;;  %3367 = vmatprep.subr.bf16.mxu1 %v16878_v8  ;;  %v16741_v18 = vcombine.low %v260_v6, %v264_v7 }
  0x95   :  { %v392_v12 = vld [vmem:[#allocation2 + $0x5a0] sm:$0xff]  ;;  %3368 = vmatpush1.bf16.msra.mxu1 %v16877_v9 }
  0x96   :  { %v252_v13 = vld [vmem:[#allocation2 + $0x140] sm:$0xff]  ;;  %v16870_v14 = vcombine.high %v388_v11, %v392_v12  ;;  %3328 = vmatprep.subr.bf16.mxu0 %v16742_v10  ;;  %v16869_v19 = vcombine.low %v388_v11, %v392_v12 }
  0x97   :  { %v256_v15 = vld [vmem:[#allocation2 + $0x160] sm:$0xff]  ;;  %3329 = vmatpush1.bf16.msra.mxu0 %v16741_v18 }
  0x98   :  { %v380_v16 = vld [vmem:[#allocation2 + $0x540] sm:$0xff]  ;;  %v16734_v20 = vcombine.high %v252_v13, %v256_v15  ;;  %3369 = vmatprep.subr.bf16.mxu1 %v16870_v14  ;;  %v16733_v26 = vcombine.low %v252_v13, %v256_v15 }
  0x99   :  { %v384_v17 = vld [vmem:[#allocation2 + $0x560] sm:$0xff]  ;;  %3370 = vmatpush1.bf16.msra.mxu1 %v16869_v19 }
  0x9a   :  { %v16862_v21 = vcombine.high %v380_v16, %v384_v17  ;;  %v244_v22 = vld [vmem:[#allocation2 + $0x100] sm:$0xff]  ;;  %3330 = vmatprep.subr.bf16.mxu0 %v16734_v20  ;;  %v16861_v27 = vcombine.low %v380_v16, %v384_v17 }
  0x9b   :  { %v248_v23 = vld [vmem:[#allocation2 + $0x120] sm:$0xff]  ;;  %3331 = vmatpush1.bf16.msra.mxu0 %v16733_v26 }
  0x9c   :  { %v372_v24 = vld [vmem:[#allocation2 + $0x500] sm:$0xff]  ;;  %v16726_v28 = vcombine.high %v244_v22, %v248_v23  ;;  %3371 = vmatprep.subr.bf16.mxu1 %v16862_v21  ;;  %v16725_v34 = vcombine.low %v244_v22, %v248_v23 }
  0x9d   :  { %v376_v25 = vld [vmem:[#allocation2 + $0x520] sm:$0xff]  ;;  %3372 = vmatpush1.bf16.msra.mxu1 %v16861_v27 }
  0x9e   :  { %v16854_v29 = vcombine.high %v372_v24, %v376_v25  ;;  %v236_v30 = vld [vmem:[#allocation2 + $0xc0] sm:$0xff]  ;;  %3332 = vmatprep.subr.bf16.mxu0 %v16726_v28  ;;  %v16853_v35 = vcombine.low %v372_v24, %v376_v25 }
  0x9f   :  { %v240_v31 = vld [vmem:[#allocation2 + $0xe0] sm:$0xff]  ;;  %3333 = vmatpush1.bf16.msra.mxu0 %v16725_v34 }
  0xa0   :  { %v364_v32 = vld [vmem:[#allocation2 + $0x4c0] sm:$0xff]  ;;  %v16718_v36 = vcombine.high %v236_v30, %v240_v31  ;;  %3373 = vmatprep.subr.bf16.mxu1 %v16854_v29  ;;  %v16717_v42 = vcombine.low %v236_v30, %v240_v31 }
  0xa1   :  { %v368_v33 = vld [vmem:[#allocation2 + $0x4e0] sm:$0xff]  ;;  %3374 = vmatpush1.bf16.msra.mxu1 %v16853_v35 }
  0xa2   :  { %v16846_v37 = vcombine.high %v364_v32, %v368_v33  ;;  %v228_v38 = vld [vmem:[#allocation2 + $0x80] sm:$0xff]  ;;  %3334 = vmatprep.subr.bf16.mxu0 %v16718_v36  ;;  %v16845_v43 = vcombine.low %v364_v32, %v368_v33 }
  0xa3   :  { %v232_v39 = vld [vmem:[#allocation2 + $0xa0] sm:$0xff]  ;;  %3335 = vmatpush1.bf16.msra.mxu0 %v16717_v42 }
  0xa4   :  { %v356_v40 = vld [vmem:[#allocation2 + $0x480] sm:$0xff]  ;;  %v16710_v44 = vcombine.high %v228_v38, %v232_v39  ;;  %3375 = vmatprep.subr.bf16.mxu1 %v16846_v37  ;;  %v16709_v50 = vcombine.low %v228_v38, %v232_v39 }
  0xa5   :  { %v360_v41 = vld [vmem:[#allocation2 + $0x4a0] sm:$0xff]  ;;  %3376 = vmatpush1.bf16.msra.mxu1 %v16845_v43 }
  0xa6   :  { %v16838_v45 = vcombine.high %v356_v40, %v360_v41  ;;  %v220_v46 = vld [vmem:[#allocation2 + $0x40] sm:$0xff]  ;;  %3336 = vmatprep.subr.bf16.mxu0 %v16710_v44  ;;  %v16837_v51 = vcombine.low %v356_v40, %v360_v41 }
  0xa7   :  { %v224_v47 = vld [vmem:[#allocation2 + $0x60] sm:$0xff]  ;;  %3337 = vmatpush1.bf16.msra.mxu0 %v16709_v50 }
  0xa8   :  { %v348_v48 = vld [vmem:[#allocation2 + $0x440] sm:$0xff]  ;;  %v16702_v52 = vcombine.high %v220_v46, %v224_v47  ;;  %3377 = vmatprep.subr.bf16.mxu1 %v16838_v45  ;;  %v16701_v62 = vcombine.low %v220_v46, %v224_v47 }
  0xa9   :  { %v352_v49 = vld [vmem:[#allocation2 + $0x460] sm:$0xff]  ;;  %3378 = vmatpush1.bf16.msra.mxu1 %v16837_v51 }
  0xaa   :  { %v16830_v55 = vcombine.high %v348_v48, %v352_v49  ;;  %v212_v56 = vld [vmem:[#allocation2] sm:$0xff]  ;;  %3338 = vmatprep.subr.bf16.mxu0 %v16702_v52  ;;  %v16829_v63 = vcombine.low %v348_v48, %v352_v49 }
  0xab   :  { %v216_v57 = vld [vmem:[#allocation2 + $0x20] sm:$0xff]  ;;  %3339 = vmatpush1.bf16.msra.mxu0 %v16701_v62 }
  0xac   :  { %v340_v60 = vld [vmem:[#allocation2 + $0x400] sm:$0xff]  ;;  %v16694_v0 = vcombine.high %v212_v56, %v216_v57  ;;  %3379 = vmatprep.subr.bf16.mxu1 %v16830_v55  ;;  %v16693_v6 = vcombine.low %v212_v56, %v216_v57 }
  0xad   :  { %v344_v61 = vld [vmem:[#allocation2 + $0x420] sm:$0xff]  ;;  %3380 = vmatpush1.bf16.msra.mxu1 %v16829_v63 }
  0xae   :  { %v16822_v1 = vcombine.high %v340_v60, %v344_v61  ;;  %v332_v2 = vld [vmem:[#allocation2 + $0x3c0] sm:$0xff]  ;;  %3340 = vmatprep.subr.bf16.mxu0 %v16694_v0  ;;  %v16821_v7 = vcombine.low %v340_v60, %v344_v61 }
  0xaf   :  { %v336_v3 = vld [vmem:[#allocation2 + $0x3e0] sm:$0xff]  ;;  %3341 = vmatpush1.bf16.msra.mxu0 %v16693_v6 }
  0xb0   :  { %v460_v4 = vld [vmem:[#allocation2 + $0x7c0] sm:$0xff]  ;;  %v16814_v8 = vcombine.high %v332_v2, %v336_v3  ;;  %3381 = vmatprep.subr.bf16.mxu1 %v16822_v1  ;;  %v16813_v14 = vcombine.low %v332_v2, %v336_v3 }
  0xb1   :  { %v464_v5 = vld [vmem:[#allocation2 + $0x7e0] sm:$0xff]  ;;  %3382 = vmatpush1.bf16.msra.mxu1 %v16821_v7 }
  0xb2   :  { %v16942_v9 = vcombine.high %v460_v4, %v464_v5  ;;  %v324_v10 = vld [vmem:[#allocation2 + $0x380] sm:$0xff]  ;;  %3342 = vmatprep.subr.bf16.mxu0 %v16814_v8  ;;  %v16941_v15 = vcombine.low %v460_v4, %v464_v5 }
  0xb3   :  { %v328_v11 = vld [vmem:[#allocation2 + $0x3a0] sm:$0xff]  ;;  %3343 = vmatpush2.bf16.msra.mxu0 %v16813_v14 }
  0xb4   :  { %v452_v12 = vld [vmem:[#allocation2 + $0x780] sm:$0xff]  ;;  %v16806_v16 = vcombine.high %v324_v10, %v328_v11  ;;  %3383 = vmatprep.subr.bf16.mxu1 %v16942_v9  ;;  %v16805_v22 = vcombine.low %v324_v10, %v328_v11  ;;  %v198_v11 = vld [vmem:[%s20074_s0 + $0x10] sm:$0xff] }
  0xb5   :  { %v456_v13 = vld [vmem:[#allocation2 + $0x7a0] sm:$0xff]  ;;  %3384 = vmatpush2.bf16.msra.mxu1 %v16941_v15 }
  0xb6   :  { %v16934_v17 = vcombine.high %v452_v12, %v456_v13  ;;  %v316_v18 = vld [vmem:[#allocation2 + $0x340] sm:$0xff]  ;;  %3344 = vmatprep.subr.bf16.mxu0 %v16806_v16  ;;  %v16933_v23 = vcombine.low %v452_v12, %v456_v13 }
  0xb7   :  { %v320_v19 = vld [vmem:[#allocation2 + $0x360] sm:$0xff]  ;;  %3345 = vmatpush2.bf16.msra.mxu0 %v16805_v22  ;;  %v203_v22 = vld [vmem:[%s20074_s0 + $0x38] sm:$0xff] }
  0xb8   :  { %v444_v20 = vld [vmem:[#allocation2 + $0x740] sm:$0xff]  ;;  %v16798_v24 = vcombine.high %v316_v18, %v320_v19  ;;  %3385 = vmatprep.subr.bf16.mxu1 %v16934_v17  ;;  %v16797_v30 = vcombine.low %v316_v18, %v320_v19  ;;  %v201_v19 = vld [vmem:[%s20074_s0 + $0x28] sm:$0xff] }
  0xb9   :  { %v448_v21 = vld [vmem:[#allocation2 + $0x760] sm:$0xff]  ;;  %3386 = vmatpush2.bf16.msra.mxu1 %v16933_v23 }
  0xba   :  { %v16926_v25 = vcombine.high %v444_v20, %v448_v21  ;;  %v308_v26 = vld [vmem:[#allocation2 + $0x300] sm:$0xff]  ;;  %3346 = vmatprep.subr.bf16.mxu0 %v16798_v24  ;;  %v16925_v31 = vcombine.low %v444_v20, %v448_v21  ;;  %v19500_v20 = vpack.c.bf16 %v198_v11, %v198_v11 }
  0xbb   :  { %v312_v27 = vld [vmem:[#allocation2 + $0x320] sm:$0xff]  ;;  %3347 = vmatpush2.bf16.msra.mxu0 %v16797_v30 }
  0xbc   :  { %v436_v28 = vld [vmem:[#allocation2 + $0x700] sm:$0xff]  ;;  %v16790_v32 = vcombine.high %v308_v26, %v312_v27  ;;  %3387 = vmatprep.subr.bf16.mxu1 %v16926_v25  ;;  %v16789_v38 = vcombine.low %v308_v26, %v312_v27 }
  0xbd   :  { %v440_v29 = vld [vmem:[#allocation2 + $0x720] sm:$0xff]  ;;  %3388 = vmatpush2.bf16.msra.mxu1 %v16925_v31  ;;  %v19508_v31 = vpack.c.bf16 %v203_v22, %v203_v22 }
  0xbe   :  { %v16918_v33 = vcombine.high %v436_v28, %v440_v29  ;;  %v300_v34 = vld [vmem:[#allocation2 + $0x2c0] sm:$0xff]  ;;  %3348 = vmatprep.subr.bf16.mxu0 %v16790_v32  ;;  %v16917_v39 = vcombine.low %v436_v28, %v440_v29  ;;  %v19505_v28 = vpack.c.bf16 %v201_v19, %v201_v19 }
  0xbf   :  { %v304_v35 = vld [vmem:[#allocation2 + $0x2e0] sm:$0xff]  ;;  %3349 = vmatpush2.bf16.msra.mxu0 %v16789_v38 }
  0xc0   :  { %v428_v36 = vld [vmem:[#allocation2 + $0x6c0] sm:$0xff]  ;;  %v16782_v40 = vcombine.high %v300_v34, %v304_v35  ;;  %3389 = vmatprep.subr.bf16.mxu1 %v16918_v33  ;;  %v16781_v46 = vcombine.low %v300_v34, %v304_v35 }
  0xc1   :  { %v432_v37 = vld [vmem:[#allocation2 + $0x6e0] sm:$0xff]  ;;  %3390 = vmatpush2.bf16.msra.mxu1 %v16917_v39 }
  0xc2   :  { %v16910_v41 = vcombine.high %v428_v36, %v432_v37  ;;  %v292_v42 = vld [vmem:[#allocation2 + $0x280] sm:$0xff]  ;;  %3350 = vmatprep.subr.bf16.mxu0 %v16782_v40  ;;  %v16909_v47 = vcombine.low %v428_v36, %v432_v37 }
  0xc3   :  { %v296_v43 = vld [vmem:[#allocation2 + $0x2a0] sm:$0xff]  ;;  %3351 = vmatpush2.bf16.msra.mxu0 %v16781_v46 }
  0xc4   :  { %v420_v44 = vld [vmem:[#allocation2 + $0x680] sm:$0xff]  ;;  %v16774_v48 = vcombine.high %v292_v42, %v296_v43  ;;  %3391 = vmatprep.subr.bf16.mxu1 %v16910_v41  ;;  %v16773_v54 = vcombine.low %v292_v42, %v296_v43 }
  0xc5   :  { %v424_v45 = vld [vmem:[#allocation2 + $0x6a0] sm:$0xff]  ;;  %3392 = vmatpush2.bf16.msra.mxu1 %v16909_v47 }
  0xc6   :  { %v16902_v49 = vcombine.high %v420_v44, %v424_v45  ;;  %v284_v50 = vld [vmem:[#allocation2 + $0x240] sm:$0xff]  ;;  %3352 = vmatprep.subr.bf16.mxu0 %v16774_v48  ;;  %v16901_v55 = vcombine.low %v420_v44, %v424_v45 }
  0xc7   :  { %v288_v51 = vld [vmem:[#allocation2 + $0x260] sm:$0xff]  ;;  %3353 = vmatpush2.bf16.msra.mxu0 %v16773_v54 }
  0xc8   :  { %v412_v52 = vld [vmem:[#allocation2 + $0x640] sm:$0xff]  ;;  %v16766_v56 = vcombine.high %v284_v50, %v288_v51  ;;  %3393 = vmatprep.subr.bf16.mxu1 %v16902_v49  ;;  %v16765_v0 = vcombine.low %v284_v50, %v288_v51 }
  0xc9   :  { %v416_v53 = vld [vmem:[#allocation2 + $0x660] sm:$0xff]  ;;  %3394 = vmatpush2.bf16.msra.mxu1 %v16901_v55 }
  0xca   :  { %v16894_v57 = vcombine.high %v412_v52, %v416_v53  ;;  %v276_v60 = vld [vmem:[#allocation2 + $0x200] sm:$0xff]  ;;  %3354 = vmatprep.subr.bf16.mxu0 %v16766_v56  ;;  %v16893_v1 = vcombine.low %v412_v52, %v416_v53 }
  0xcb   :  { %v280_v61 = vld [vmem:[#allocation2 + $0x220] sm:$0xff]  ;;  %3355 = vmatpush2.bf16.msra.mxu0 %v16765_v0 }
  0xcc   :  { %v404_v62 = vld [vmem:[#allocation2 + $0x600] sm:$0xff]  ;;  %v16758_v2 = vcombine.high %v276_v60, %v280_v61  ;;  %3395 = vmatprep.subr.bf16.mxu1 %v16894_v57  ;;  %v16757_v8 = vcombine.low %v276_v60, %v280_v61 }
  0xcd   :  { %v408_v63 = vld [vmem:[#allocation2 + $0x620] sm:$0xff]  ;;  %3396 = vmatpush2.bf16.msra.mxu1 %v16893_v1 }
  0xce   :  { %v16886_v3 = vcombine.high %v404_v62, %v408_v63  ;;  %v524_v4 = vld [vmem:[#allocation2 + $0x9c0] sm:$0xff]  ;;  %3356 = vmatprep.subr.bf16.mxu0 %v16758_v2  ;;  %v16885_v10 = vcombine.low %v404_v62, %v408_v63 }
  0xcf   :  { %v528_v5 = vld [vmem:[#allocation2 + $0x9e0] sm:$0xff]  ;;  %3357 = vmatpush2.bf16.msra.mxu0 %v16757_v8 }
  0xd0   :  { %v652_v6 = vld [vmem:[#allocation2 + $0xdc0] sm:$0xff]  ;;  %v17006_v12 = vcombine.high %v524_v4, %v528_v5  ;;  %3397 = vmatprep.subr.bf16.mxu1 %v16886_v3  ;;  %v17005_v21 = vcombine.low %v524_v4, %v528_v5 }
  0xd1   :  { %v656_v7 = vld [vmem:[#allocation2 + $0xde0] sm:$0xff]  ;;  %3398 = vmatpush2.bf16.msra.mxu1 %v16885_v10 }
  0xd2   :  { %v196_v9 = vld [vmem:[%s20074_s0] sm:$0xff]  ;;  %v17134_v13 = vcombine.high %v652_v6, %v656_v7  ;;  %3408 = vmatprep.subr.bf16.mxu0 %v17006_v12  ;;  %v17133_v23 = vcombine.low %v652_v6, %v656_v7 }
  0xd3   :  { %v516_v14 = vld [vmem:[#allocation2 + $0x980] sm:$0xff]  ;;  %v19495_v16 = vpack.c.bf16 %v196_v9, %v196_v9 }
  0xd4   :  { %v520_v15 = vld [vmem:[#allocation2 + $0x9a0] sm:$0xff]  ;;  %3449 = vmatprep.subr.bf16.mxu1 %v17134_v13  ;;  %3400 = vmatmul.mubr.bf16.vlgmr.msra.gmra.mxu1 %v19500_v20 }
  0xd5   :  { %v644_v17 = vld [vmem:[#allocation2 + $0xd80] sm:$0xff]  ;;  %v16998_v24 = vcombine.high %v516_v14, %v520_v15  ;;  %3359 = vmatmul.mubr.bf16.vlgmr.msra.gmra.mxu0 %v19495_v16  ;;  %v16997_v32 = vcombine.low %v516_v14, %v520_v15  ;;  %3450 = vmatpush1.bf16.msra.mxu1 %v17133_v23 }
  0xd6   :  { %v648_v18 = vld [vmem:[#allocation2 + $0xda0] sm:$0xff]  ;;  %3409 = vmatpush1.bf16.msra.mxu0 %v17005_v21  ;;  %3440 = vmatprep.mubr.bf16.mxu0 %v19505_v28 }
  0xd7   :  { %v17126_v25 = vcombine.high %v644_v17, %v648_v18  ;;  %v508_v26 = vld [vmem:[#allocation2 + $0x940] sm:$0xff]  ;;  %3410 = vmatprep.subr.bf16.mxu0 %v16998_v24  ;;  %v17125_v33 = vcombine.low %v644_v17, %v648_v18  ;;  %3481 = vmatprep.mubr.bf16.mxu1 %v19508_v31 }
  0xd8   :  { %v512_v27 = vld [vmem:[#allocation2 + $0x960] sm:$0xff] }
  0xd9   :  { %v636_v29 = vld [vmem:[#allocation2 + $0xd40] sm:$0xff]  ;;  %v16990_v34 = vcombine.high %v508_v26, %v512_v27  ;;  %3451 = vmatprep.subr.bf16.mxu1 %v17126_v25  ;;  %v16989_v40 = vcombine.low %v508_v26, %v512_v27 }
  0xda   :  { %v640_v30 = vld [vmem:[#allocation2 + $0xd60] sm:$0xff]  ;;  %3411 = vmatpush1.bf16.msra.mxu0 %v16997_v32  ;;  %3452 = vmatpush1.bf16.msra.mxu1 %v17125_v33 }
  0xdb   :  { %v500_v35 = vld [vmem:[#allocation2 + $0x900] sm:$0xff]  ;;  %v17118_v38 = vcombine.high %v636_v29, %v640_v30  ;;  %3412 = vmatprep.subr.bf16.mxu0 %v16990_v34  ;;  %v17117_v41 = vcombine.low %v636_v29, %v640_v30 }
  0xdc   :  { %v504_v36 = vld [vmem:[#allocation2 + $0x920] sm:$0xff] }
  0xdd   :  { %v628_v37 = vld [vmem:[#allocation2 + $0xd00] sm:$0xff]  ;;  %v16982_v42 = vcombine.high %v500_v35, %v504_v36  ;;  %3453 = vmatprep.subr.bf16.mxu1 %v17118_v38  ;;  %v16981_v48 = vcombine.low %v500_v35, %v504_v36 }
  0xde   :  { %v632_v39 = vld [vmem:[#allocation2 + $0xd20] sm:$0xff]  ;;  %3413 = vmatpush1.bf16.msra.mxu0 %v16989_v40  ;;  %3454 = vmatpush1.bf16.msra.mxu1 %v17117_v41 }
  0xdf   :  { %v492_v43 = vld [vmem:[#allocation2 + $0x8c0] sm:$0xff]  ;;  %v17110_v46 = vcombine.high %v628_v37, %v632_v39  ;;  %3414 = vmatprep.subr.bf16.mxu0 %v16982_v42  ;;  %v17109_v49 = vcombine.low %v628_v37, %v632_v39 }
  0xe0   :  { %v496_v44 = vld [vmem:[#allocation2 + $0x8e0] sm:$0xff] }
  0xe1   :  { %v620_v45 = vld [vmem:[#allocation2 + $0xcc0] sm:$0xff]  ;;  %v16974_v50 = vcombine.high %v492_v43, %v496_v44  ;;  %3455 = vmatprep.subr.bf16.mxu1 %v17110_v46  ;;  %v16973_v56 = vcombine.low %v492_v43, %v496_v44 }
  0xe2   :  { %v624_v47 = vld [vmem:[#allocation2 + $0xce0] sm:$0xff]  ;;  %3415 = vmatpush1.bf16.msra.mxu0 %v16981_v48  ;;  %3456 = vmatpush1.bf16.msra.mxu1 %v17109_v49 }
  0xe3   :  { %v484_v51 = vld [vmem:[#allocation2 + $0x880] sm:$0xff]  ;;  %v17102_v54 = vcombine.high %v620_v45, %v624_v47  ;;  %3416 = vmatprep.subr.bf16.mxu0 %v16974_v50  ;;  %v17101_v57 = vcombine.low %v620_v45, %v624_v47 }
  0xe4   :  { %v488_v52 = vld [vmem:[#allocation2 + $0x8a0] sm:$0xff] }
  0xe5   :  { %v612_v53 = vld [vmem:[#allocation2 + $0xc80] sm:$0xff]  ;;  %v16966_v60 = vcombine.high %v484_v51, %v488_v52  ;;  %3457 = vmatprep.subr.bf16.mxu1 %v17102_v54  ;;  %v16965_v2 = vcombine.low %v484_v51, %v488_v52 }
  0xe6   :  { %v616_v55 = vld [vmem:[#allocation2 + $0xca0] sm:$0xff]  ;;  %3417 = vmatpush1.bf16.msra.mxu0 %v16973_v56  ;;  %3458 = vmatpush1.bf16.msra.mxu1 %v17101_v57 }
  0xe7   :  { %v476_v61 = vld [vmem:[#allocation2 + $0x840] sm:$0xff]  ;;  %v17094_v0 = vcombine.high %v612_v53, %v616_v55  ;;  %3418 = vmatprep.subr.bf16.mxu0 %v16966_v60  ;;  %v17093_v3 = vcombine.low %v612_v53, %v616_v55 }
  0xe8   :  { %v480_v62 = vld [vmem:[#allocation2 + $0x860] sm:$0xff] }
  0xe9   :  { %v604_v63 = vld [vmem:[#allocation2 + $0xc40] sm:$0xff]  ;;  %v16958_v4 = vcombine.high %v476_v61, %v480_v62  ;;  %3459 = vmatprep.subr.bf16.mxu1 %v17094_v0  ;;  %v16957_v10 = vcombine.low %v476_v61, %v480_v62 }
  0xea   :  { %v608_v1 = vld [vmem:[#allocation2 + $0xc60] sm:$0xff]  ;;  %3419 = vmatpush1.bf16.msra.mxu0 %v16965_v2  ;;  %3460 = vmatpush1.bf16.msra.mxu1 %v17093_v3 }
  0xeb   :  { %v468_v5 = vld [vmem:[#allocation2 + $0x800] sm:$0xff]  ;;  %v17086_v8 = vcombine.high %v604_v63, %v608_v1  ;;  %3420 = vmatprep.subr.bf16.mxu0 %v16958_v4  ;;  %v17085_v11 = vcombine.low %v604_v63, %v608_v1 }
  0xec   :  { %v472_v6 = vld [vmem:[#allocation2 + $0x820] sm:$0xff] }
  0xed   :  { %v596_v7 = vld [vmem:[#allocation2 + $0xc00] sm:$0xff]  ;;  %v16950_v12 = vcombine.high %v468_v5, %v472_v6  ;;  %3461 = vmatprep.subr.bf16.mxu1 %v17086_v8  ;;  %v16949_v19 = vcombine.low %v468_v5, %v472_v6 }
  0xee   :  { %v600_v9 = vld [vmem:[#allocation2 + $0xc20] sm:$0xff]  ;;  %3421 = vmatpush1.bf16.msra.mxu0 %v16957_v10  ;;  %3462 = vmatpush1.bf16.msra.mxu1 %v17085_v11 }
  0xef   :  { %v588_v13 = vld [vmem:[#allocation2 + $0xbc0] sm:$0xff]  ;;  %v17078_v17 = vcombine.high %v596_v7, %v600_v9  ;;  %3422 = vmatprep.subr.bf16.mxu0 %v16950_v12  ;;  %v17077_v21 = vcombine.low %v596_v7, %v600_v9 }
  0xf0   :  { %v592_v14 = vld [vmem:[#allocation2 + $0xbe0] sm:$0xff] }
  0xf1   :  { %v716_v15 = vld [vmem:[#allocation2 + $0xfc0] sm:$0xff]  ;;  %v17070_v22 = vcombine.high %v588_v13, %v592_v14  ;;  %3463 = vmatprep.subr.bf16.mxu1 %v17078_v17  ;;  %v17069_v29 = vcombine.low %v588_v13, %v592_v14 }
  0xf2   :  { %v720_v18 = vld [vmem:[#allocation2 + $0xfe0] sm:$0xff]  ;;  %3423 = vmatpush1.bf16.msra.mxu0 %v16949_v19  ;;  %3464 = vmatpush1.bf16.msra.mxu1 %v17077_v21  ;;  %v269_v21 = vld [vmem:[#allocation2 + $0x1c8] sm:$0xff] }
  0xf3   :  { %v580_v23 = vld [vmem:[#allocation2 + $0xb80] sm:$0xff]  ;;  %v17198_v26 = vcombine.high %v716_v15, %v720_v18  ;;  %3424 = vmatprep.subr.bf16.mxu0 %v17070_v22  ;;  %v17197_v30 = vcombine.low %v716_v15, %v720_v18  ;;  %v273_v22 = vld [vmem:[#allocation2 + $0x1e8] sm:$0xff] }
  0xf4   :  { %v584_v24 = vld [vmem:[#allocation2 + $0xba0] sm:$0xff] }
  0xf5   :  { %v708_v25 = vld [vmem:[#allocation2 + $0xf80] sm:$0xff]  ;;  %v17062_v32 = vcombine.high %v580_v23, %v584_v24  ;;  %3465 = vmatprep.subr.bf16.mxu1 %v17198_v26  ;;  %v17061_v38 = vcombine.low %v580_v23, %v584_v24  ;;  %v397_v23 = vld [vmem:[#allocation2 + $0x5c8] sm:$0xff] }
  0xf6   :  { %v712_v27 = vld [vmem:[#allocation2 + $0xfa0] sm:$0xff]  ;;  %3425 = vmatpush2.bf16.msra.mxu0 %v17069_v29  ;;  %3466 = vmatpush2.bf16.msra.mxu1 %v17197_v30  ;;  %v401_v26 = vld [vmem:[#allocation2 + $0x5e8] sm:$0xff] }
  0xf7   :  { %v572_v33 = vld [vmem:[#allocation2 + $0xb40] sm:$0xff]  ;;  %v17190_v36 = vcombine.high %v708_v25, %v712_v27  ;;  %3426 = vmatprep.subr.bf16.mxu0 %v17062_v32  ;;  %v17189_v39 = vcombine.low %v708_v25, %v712_v27  ;;  %v202_v27 = vld [vmem:[%s20074_s0 + $0x30] sm:$0xff]  ;;  %v16752_v32 = vcombine.high %v269_v21, %v273_v22 }
  0xf8   :  { %v576_v34 = vld [vmem:[#allocation2 + $0xb60] sm:$0xff] }
  0xf9   :  { %v700_v35 = vld [vmem:[#allocation2 + $0xf40] sm:$0xff]  ;;  %v17054_v40 = vcombine.high %v572_v33, %v576_v34  ;;  %3467 = vmatprep.subr.bf16.mxu1 %v17190_v36  ;;  %v17053_v46 = vcombine.low %v572_v33, %v576_v34  ;;  %v261_v33 = vld [vmem:[#allocation2 + $0x188] sm:$0xff]  ;;  %v16880_v36 = vcombine.high %v397_v23, %v401_v26 }
  0xfa   :  { %v704_v37 = vld [vmem:[#allocation2 + $0xf60] sm:$0xff]  ;;  %3427 = vmatpush2.bf16.msra.mxu0 %v17061_v38  ;;  %3468 = vmatpush2.bf16.msra.mxu1 %v17189_v39  ;;  %v265_v34 = vld [vmem:[#allocation2 + $0x1a8] sm:$0xff]  ;;  %v19521_v39 = vpack.c.bf16 %v202_v27, %v202_v27 }
  0xfb   :  { %v564_v41 = vld [vmem:[#allocation2 + $0xb00] sm:$0xff]  ;;  %v17182_v44 = vcombine.high %v700_v35, %v704_v37  ;;  %3428 = vmatprep.subr.bf16.mxu0 %v17054_v40  ;;  %v17181_v47 = vcombine.low %v700_v35, %v704_v37  ;;  %v389_v35 = vld [vmem:[#allocation2 + $0x588] sm:$0xff]  ;;  %v16751_v40 = vcombine.low %v269_v21, %v273_v22 }
  0xfc   :  { %v568_v42 = vld [vmem:[#allocation2 + $0xb20] sm:$0xff]  ;;  %v393_v37 = vld [vmem:[#allocation2 + $0x5a8] sm:$0xff] }
  0xfd   :  { %v692_v43 = vld [vmem:[#allocation2 + $0xf00] sm:$0xff]  ;;  %v17046_v48 = vcombine.high %v564_v41, %v568_v42  ;;  %3469 = vmatprep.subr.bf16.mxu1 %v17182_v44  ;;  %v17045_v54 = vcombine.low %v564_v41, %v568_v42  ;;  %v16879_v41 = vcombine.low %v397_v23, %v401_v26  ;;  %v16744_v42 = vcombine.high %v261_v33, %v265_v34  ;;  %v341_v26 = vld [vmem:[#allocation2 + $0x408] sm:$0xff] }
  0xfe   :  { %v696_v45 = vld [vmem:[#allocation2 + $0xf20] sm:$0xff]  ;;  %3429 = vmatpush2.bf16.msra.mxu0 %v17053_v46  ;;  %3470 = vmatpush2.bf16.msra.mxu1 %v17181_v47  ;;  %v16872_v44 = vcombine.high %v389_v35, %v393_v37  ;;  %v381_v46 = vld [vmem:[#allocation2 + $0x548] sm:$0xff] }
  0xff   :  { %v556_v49 = vld [vmem:[#allocation2 + $0xac0] sm:$0xff]  ;;  %v17174_v52 = vcombine.high %v692_v43, %v696_v45  ;;  %3430 = vmatprep.subr.bf16.mxu0 %v17046_v48  ;;  %v17173_v55 = vcombine.low %v692_v43, %v696_v45  ;;  %v253_v43 = vld [vmem:[#allocation2 + $0x148] sm:$0xff]  ;;  %v16743_v48 = vcombine.low %v261_v33, %v265_v34 }
 0x100   :  { %v560_v50 = vld [vmem:[#allocation2 + $0xae0] sm:$0xff]  ;;  %v257_v45 = vld [vmem:[#allocation2 + $0x168] sm:$0xff] }
 0x101   :  { %v684_v51 = vld [vmem:[#allocation2 + $0xec0] sm:$0xff]  ;;  %v17038_v56 = vcombine.high %v556_v49, %v560_v50  ;;  %3471 = vmatprep.subr.bf16.mxu1 %v17174_v52  ;;  %v17037_v0 = vcombine.low %v556_v49, %v560_v50  ;;  %v385_v47 = vld [vmem:[#allocation2 + $0x568] sm:$0xff]  ;;  %v16871_v49 = vcombine.low %v389_v35, %v393_v37  ;;  %v16736_v50 = vcombine.high %v253_v43, %v257_v45 }
 0x102   :  { %v688_v53 = vld [vmem:[#allocation2 + $0xee0] sm:$0xff]  ;;  %3431 = vmatpush2.bf16.msra.mxu0 %v17045_v54  ;;  %3472 = vmatpush2.bf16.msra.mxu1 %v17173_v55  ;;  %v245_v52 = vld [vmem:[#allocation2 + $0x108] sm:$0xff] }
 0x103   :  { %v548_v57 = vld [vmem:[#allocation2 + $0xa80] sm:$0xff]  ;;  %v17166_v62 = vcombine.high %v684_v51, %v688_v53  ;;  %3432 = vmatprep.subr.bf16.mxu0 %v17038_v56  ;;  %v17165_v1 = vcombine.low %v684_v51, %v688_v53  ;;  %v16864_v51 = vcombine.high %v381_v46, %v385_v47  ;;  %v249_v53 = vld [vmem:[#allocation2 + $0x128] sm:$0xff]  ;;  %v16735_v56 = vcombine.low %v253_v43, %v257_v45 }
 0x104   :  { %v552_v60 = vld [vmem:[#allocation2 + $0xaa0] sm:$0xff]  ;;  %v373_v54 = vld [vmem:[#allocation2 + $0x508] sm:$0xff] }
 0x105   :  { %v676_v61 = vld [vmem:[#allocation2 + $0xe80] sm:$0xff]  ;;  %v17030_v2 = vcombine.high %v548_v57, %v552_v60  ;;  %3473 = vmatprep.subr.bf16.mxu1 %v17166_v62  ;;  %v17029_v8 = vcombine.low %v548_v57, %v552_v60  ;;  %v377_v55 = vld [vmem:[#allocation2 + $0x528] sm:$0xff]  ;;  %v16863_v57 = vcombine.low %v381_v46, %v385_v47  ;;  %v16728_v60 = vcombine.high %v245_v52, %v249_v53 }
 0x106   :  { %v680_v63 = vld [vmem:[#allocation2 + $0xea0] sm:$0xff]  ;;  %3433 = vmatpush2.bf16.msra.mxu0 %v17037_v0  ;;  %3474 = vmatpush2.bf16.msra.mxu1 %v17165_v1  ;;  %v237_v62 = vld [vmem:[#allocation2 + $0xc8] sm:$0xff] }
 0x107   :  { %v540_v3 = vld [vmem:[#allocation2 + $0xa40] sm:$0xff]  ;;  %v17158_v6 = vcombine.high %v676_v61, %v680_v63  ;;  %3434 = vmatprep.subr.bf16.mxu0 %v17030_v2  ;;  %v17157_v9 = vcombine.low %v676_v61, %v680_v63  ;;  %v16856_v61 = vcombine.high %v373_v54, %v377_v55  ;;  %v241_v63 = vld [vmem:[#allocation2 + $0xe8] sm:$0xff]  ;;  %v16727_v2 = vcombine.low %v245_v52, %v249_v53 }
 0x108   :  { %v544_v4 = vld [vmem:[#allocation2 + $0xa60] sm:$0xff]  ;;  %v365_v0 = vld [vmem:[#allocation2 + $0x4c8] sm:$0xff] }
 0x109   :  { %v668_v5 = vld [vmem:[#allocation2 + $0xe40] sm:$0xff]  ;;  %v17022_v10 = vcombine.high %v540_v3, %v544_v4  ;;  %3475 = vmatprep.subr.bf16.mxu1 %v17158_v6  ;;  %v17021_v17 = vcombine.low %v540_v3, %v544_v4  ;;  %v369_v1 = vld [vmem:[#allocation2 + $0x4e8] sm:$0xff]  ;;  %v16855_v3 = vcombine.low %v373_v54, %v377_v55  ;;  %v16720_v4 = vcombine.high %v237_v62, %v241_v63 }
 0x10a   :  { %v672_v7 = vld [vmem:[#allocation2 + $0xe60] sm:$0xff]  ;;  %3435 = vmatpush2.bf16.msra.mxu0 %v17029_v8  ;;  %3476 = vmatpush2.bf16.msra.mxu1 %v17157_v9  ;;  %v229_v6 = vld [vmem:[#allocation2 + $0x88] sm:$0xff] }
 0x10b   :  { %v532_v11 = vld [vmem:[#allocation2 + $0xa00] sm:$0xff]  ;;  %v17150_v14 = vcombine.high %v668_v5, %v672_v7  ;;  %3436 = vmatprep.subr.bf16.mxu0 %v17022_v10  ;;  %v17149_v18 = vcombine.low %v668_v5, %v672_v7  ;;  %v16848_v5 = vcombine.high %v365_v0, %v369_v1  ;;  %v233_v7 = vld [vmem:[#allocation2 + $0xa8] sm:$0xff]  ;;  %v16719_v10 = vcombine.low %v237_v62, %v241_v63 }
 0x10c   :  { %v536_v12 = vld [vmem:[#allocation2 + $0xa20] sm:$0xff]  ;;  %v357_v8 = vld [vmem:[#allocation2 + $0x488] sm:$0xff] }
 0x10d   :  { %v660_v13 = vld [vmem:[#allocation2 + $0xe00] sm:$0xff]  ;;  %v17014_v19 = vcombine.high %v532_v11, %v536_v12  ;;  %3477 = vmatprep.subr.bf16.mxu1 %v17150_v14  ;;  %v17013_v29 = vcombine.low %v532_v11, %v536_v12  ;;  %v361_v9 = vld [vmem:[#allocation2 + $0x4a8] sm:$0xff]  ;;  %v16847_v11 = vcombine.low %v365_v0, %v369_v1  ;;  %v16712_v12 = vcombine.high %v229_v6, %v233_v7 }
 0x10e   :  { %v664_v15 = vld [vmem:[#allocation2 + $0xe20] sm:$0xff]  ;;  %3437 = vmatpush2.bf16.msra.mxu0 %v17021_v17  ;;  %3478 = vmatpush2.bf16.msra.mxu1 %v17149_v18  ;;  %v221_v14 = vld [vmem:[#allocation2 + $0x48] sm:$0xff]  ;;  %v16839_v21 = vcombine.low %v357_v8, %v361_v9 }
 0x10f   :  { %v17142_v24 = vcombine.high %v660_v13, %v664_v15  ;;  %v200_v25 = vld [vmem:[%s20074_s0 + $0x20] sm:$0xff]  ;;  %3438 = vmatprep.subr.bf16.mxu0 %v17014_v19  ;;  %v17141_v30 = vcombine.low %v660_v13, %v664_v15  ;;  %v16840_v13 = vcombine.high %v357_v8, %v361_v9  ;;  %v225_v15 = vld [vmem:[#allocation2 + $0x68] sm:$0xff]  ;;  %v16711_v19 = vcombine.low %v229_v6, %v233_v7 }
 0x110   :  { %v19519_v38 = vpack.c.bf16 %v200_v25, %v200_v25  ;;  %v349_v17 = vld [vmem:[#allocation2 + $0x448] sm:$0xff]  ;;  %v16704_v22 = vcombine.high %v221_v14, %v225_v15 }
 0x111   :  { %3479 = vmatprep.subr.bf16.mxu1 %v17142_v24  ;;  %v353_v18 = vld [vmem:[#allocation2 + $0x468] sm:$0xff] }
 0x112   :  { %3439 = vmatpush2.bf16.msra.mxu0 %v17013_v29  ;;  %3480 = vmatpush2.bf16.msra.mxu1 %v17141_v30  ;;  %v16832_v23 = vcombine.high %v349_v17, %v353_v18  ;;  %v213_v24 = vld [vmem:[#allocation2 + $0x8] sm:$0xff]  ;;  %v16703_v29 = vcombine.low %v221_v14, %v225_v15  ;;  %v16831_v30 = vcombine.low %v349_v17, %v353_v18 }
 0x113   :  { %3490 = vmatprep.subr.bf16.mxu0 %v16752_v32  ;;  %3531 = vmatprep.subr.bf16.mxu1 %v16880_v36  ;;  %v217_v25 = vld [vmem:[#allocation2 + $0x28] sm:$0xff] }
 0x114   :  { %v345_v27 = vld [vmem:[#allocation2 + $0x428] sm:$0xff]  ;;  %v16696_v32 = vcombine.high %v213_v24, %v217_v25 }
 0x115   :  { %3441 = vmatmul.mubr.bf16.vlgmr.msra.gmra.mxu0 %v19519_v38  ;;  %3482 = vmatmul.mubr.bf16.vlgmr.msra.gmra.mxu1 %v19521_v39  ;;  %v16824_v33 = vcombine.high %v341_v26, %v345_v27  ;;  %v333_v34 = vld [vmem:[#allocation2 + $0x3c8] sm:$0xff] }
 0x116   :  { %3491 = vmatpush1.bf16.msra.mxu0 %v16751_v40  ;;  %3532 = vmatpush1.bf16.msra.mxu1 %v16879_v41  ;;  %v337_v35 = vld [vmem:[#allocation2 + $0x3e8] sm:$0xff]  ;;  %v16695_v40 = vcombine.low %v213_v24, %v217_v25  ;;  %v16823_v41 = vcombine.low %v341_v26, %v345_v27 }
 0x117   :  { %3492 = vmatprep.subr.bf16.mxu0 %v16744_v42  ;;  %3533 = vmatprep.subr.bf16.mxu1 %v16872_v44  ;;  %v461_v36 = vld [vmem:[#allocation2 + $0x7c8] sm:$0xff]  ;;  %v16816_v42 = vcombine.high %v333_v34, %v337_v35 }
 0x118   :  { %3522 = vmatprep.mubr.bf16.mxu0 %v19483_v58  ;;  %3563 = vmatprep.mubr.bf16.mxu1 %v19485_v59  ;;  %v465_v37 = vld [vmem:[#allocation2 + $0x7e8] sm:$0xff] }
 0x119   :  { %v16944_v43 = vcombine.high %v461_v36, %v465_v37  ;;  %v325_v44 = vld [vmem:[#allocation2 + $0x388] sm:$0xff] }
 0x11a   :  { %3493 = vmatpush1.bf16.msra.mxu0 %v16743_v48  ;;  %3534 = vmatpush1.bf16.msra.mxu1 %v16871_v49  ;;  %v329_v45 = vld [vmem:[#allocation2 + $0x3a8] sm:$0xff]  ;;  %v16815_v48 = vcombine.low %v333_v34, %v337_v35  ;;  %v16943_v49 = vcombine.low %v461_v36, %v465_v37 }
 0x11b   :  { %3494 = vmatprep.subr.bf16.mxu0 %v16736_v50  ;;  %3535 = vmatprep.subr.bf16.mxu1 %v16864_v51  ;;  %v453_v46 = vld [vmem:[#allocation2 + $0x788] sm:$0xff]  ;;  %v16808_v50 = vcombine.high %v325_v44, %v329_v45 }
 0x11c   :  { %v457_v47 = vld [vmem:[#allocation2 + $0x7a8] sm:$0xff] }
 0x11d   :  { %v16936_v51 = vcombine.high %v453_v46, %v457_v47  ;;  %v317_v52 = vld [vmem:[#allocation2 + $0x348] sm:$0xff] }
 0x11e   :  { %3495 = vmatpush1.bf16.msra.mxu0 %v16735_v56  ;;  %3536 = vmatpush1.bf16.msra.mxu1 %v16863_v57  ;;  %v321_v53 = vld [vmem:[#allocation2 + $0x368] sm:$0xff]  ;;  %v16807_v56 = vcombine.low %v325_v44, %v329_v45  ;;  %v16935_v57 = vcombine.low %v453_v46, %v457_v47 }
 0x11f   :  { %3496 = vmatprep.subr.bf16.mxu0 %v16728_v60  ;;  %3537 = vmatprep.subr.bf16.mxu1 %v16856_v61  ;;  %v445_v54 = vld [vmem:[#allocation2 + $0x748] sm:$0xff]  ;;  %v16800_v60 = vcombine.high %v317_v52, %v321_v53 }
 0x120   :  { %v449_v55 = vld [vmem:[#allocation2 + $0x768] sm:$0xff] }
 0x121   :  { %v16928_v61 = vcombine.high %v445_v54, %v449_v55  ;;  %v309_v62 = vld [vmem:[#allocation2 + $0x308] sm:$0xff] }
 0x122   :  { %3497 = vmatpush1.bf16.msra.mxu0 %v16727_v2  ;;  %3538 = vmatpush1.bf16.msra.mxu1 %v16855_v3  ;;  %v313_v63 = vld [vmem:[#allocation2 + $0x328] sm:$0xff]  ;;  %v16799_v2 = vcombine.low %v317_v52, %v321_v53  ;;  %v16927_v3 = vcombine.low %v445_v54, %v449_v55 }
 0x123   :  { %3498 = vmatprep.subr.bf16.mxu0 %v16720_v4  ;;  %3539 = vmatprep.subr.bf16.mxu1 %v16848_v5  ;;  %v437_v0 = vld [vmem:[#allocation2 + $0x708] sm:$0xff]  ;;  %v16792_v4 = vcombine.high %v309_v62, %v313_v63 }
 0x124   :  { %v441_v1 = vld [vmem:[#allocation2 + $0x728] sm:$0xff] }
 0x125   :  { %v16920_v5 = vcombine.high %v437_v0, %v441_v1  ;;  %v301_v6 = vld [vmem:[#allocation2 + $0x2c8] sm:$0xff] }
 0x126   :  { %3499 = vmatpush1.bf16.msra.mxu0 %v16719_v10  ;;  %3540 = vmatpush1.bf16.msra.mxu1 %v16847_v11  ;;  %v305_v7 = vld [vmem:[#allocation2 + $0x2e8] sm:$0xff]  ;;  %v16791_v10 = vcombine.low %v309_v62, %v313_v63  ;;  %v16919_v11 = vcombine.low %v437_v0, %v441_v1 }
 0x127   :  { %3500 = vmatprep.subr.bf16.mxu0 %v16712_v12  ;;  %3541 = vmatprep.subr.bf16.mxu1 %v16840_v13  ;;  %v429_v8 = vld [vmem:[#allocation2 + $0x6c8] sm:$0xff]  ;;  %v16784_v12 = vcombine.high %v301_v6, %v305_v7 }
 0x128   :  { %v433_v9 = vld [vmem:[#allocation2 + $0x6e8] sm:$0xff] }
 0x129   :  { %v16912_v13 = vcombine.high %v429_v8, %v433_v9  ;;  %v293_v14 = vld [vmem:[#allocation2 + $0x288] sm:$0xff] }
 0x12a   :  { %3501 = vmatpush1.bf16.msra.mxu0 %v16711_v19  ;;  %3542 = vmatpush1.bf16.msra.mxu1 %v16839_v21  ;;  %v297_v15 = vld [vmem:[#allocation2 + $0x2a8] sm:$0xff]  ;;  %v16783_v19 = vcombine.low %v301_v6, %v305_v7  ;;  %v16911_v21 = vcombine.low %v429_v8, %v433_v9 }
 0x12b   :  { %3502 = vmatprep.subr.bf16.mxu0 %v16704_v22  ;;  %3543 = vmatprep.subr.bf16.mxu1 %v16832_v23  ;;  %v421_v17 = vld [vmem:[#allocation2 + $0x688] sm:$0xff]  ;;  %v16776_v22 = vcombine.high %v293_v14, %v297_v15 }
 0x12c   :  { %v425_v18 = vld [vmem:[#allocation2 + $0x6a8] sm:$0xff] }
 0x12d   :  { %v16904_v23 = vcombine.high %v421_v17, %v425_v18  ;;  %v285_v24 = vld [vmem:[#allocation2 + $0x248] sm:$0xff] }
 0x12e   :  { %3503 = vmatpush1.bf16.msra.mxu0 %v16703_v29  ;;  %3544 = vmatpush1.bf16.msra.mxu1 %v16831_v30  ;;  %v289_v25 = vld [vmem:[#allocation2 + $0x268] sm:$0xff]  ;;  %v16775_v29 = vcombine.low %v293_v14, %v297_v15  ;;  %v16903_v30 = vcombine.low %v421_v17, %v425_v18 }
 0x12f   :  { %3504 = vmatprep.subr.bf16.mxu0 %v16696_v32  ;;  %3545 = vmatprep.subr.bf16.mxu1 %v16824_v33  ;;  %v413_v26 = vld [vmem:[#allocation2 + $0x648] sm:$0xff]  ;;  %v16768_v32 = vcombine.high %v285_v24, %v289_v25 }
 0x130   :  { %v417_v27 = vld [vmem:[#allocation2 + $0x668] sm:$0xff] }
 0x131   :  { %v16896_v33 = vcombine.high %v413_v26, %v417_v27  ;;  %v277_v34 = vld [vmem:[#allocation2 + $0x208] sm:$0xff] }
 0x132   :  { %3505 = vmatpush1.bf16.msra.mxu0 %v16695_v40  ;;  %3546 = vmatpush1.bf16.msra.mxu1 %v16823_v41  ;;  %v281_v35 = vld [vmem:[#allocation2 + $0x228] sm:$0xff]  ;;  %v16767_v40 = vcombine.low %v285_v24, %v289_v25  ;;  %v16895_v41 = vcombine.low %v413_v26, %v417_v27 }
 0x133   :  { %3506 = vmatprep.subr.bf16.mxu0 %v16816_v42  ;;  %3547 = vmatprep.subr.bf16.mxu1 %v16944_v43  ;;  %v405_v36 = vld [vmem:[#allocation2 + $0x608] sm:$0xff]  ;;  %v16760_v42 = vcombine.high %v277_v34, %v281_v35 }
 0x134   :  { %v409_v37 = vld [vmem:[#allocation2 + $0x628] sm:$0xff] }
 0x135   :  { %v16888_v43 = vcombine.high %v405_v36, %v409_v37  ;;  %v525_v44 = vld [vmem:[#allocation2 + $0x9c8] sm:$0xff] }
 0x136   :  { %3507 = vmatpush2.bf16.msra.mxu0 %v16815_v48  ;;  %3548 = vmatpush2.bf16.msra.mxu1 %v16943_v49  ;;  %v529_v45 = vld [vmem:[#allocation2 + $0x9e8] sm:$0xff]  ;;  %v16759_v48 = vcombine.low %v277_v34, %v281_v35  ;;  %v16887_v49 = vcombine.low %v405_v36, %v409_v37 }
 0x137   :  { %3508 = vmatprep.subr.bf16.mxu0 %v16808_v50  ;;  %3549 = vmatprep.subr.bf16.mxu1 %v16936_v51  ;;  %v653_v46 = vld [vmem:[#allocation2 + $0xdc8] sm:$0xff]  ;;  %v17008_v50 = vcombine.high %v525_v44, %v529_v45 }
 0x138   :  { %v657_v47 = vld [vmem:[#allocation2 + $0xde8] sm:$0xff] }
 0x139   :  { %v17136_v51 = vcombine.high %v653_v46, %v657_v47  ;;  %v517_v52 = vld [vmem:[#allocation2 + $0x988] sm:$0xff] }
 0x13a   :  { %3509 = vmatpush2.bf16.msra.mxu0 %v16807_v56  ;;  %3550 = vmatpush2.bf16.msra.mxu1 %v16935_v57  ;;  %v521_v53 = vld [vmem:[#allocation2 + $0x9a8] sm:$0xff]  ;;  %v17007_v56 = vcombine.low %v525_v44, %v529_v45  ;;  %v17135_v57 = vcombine.low %v653_v46, %v657_v47 }
 0x13b   :  { %3510 = vmatprep.subr.bf16.mxu0 %v16800_v60  ;;  %3551 = vmatprep.subr.bf16.mxu1 %v16928_v61  ;;  %v645_v54 = vld [vmem:[#allocation2 + $0xd88] sm:$0xff]  ;;  %v17000_v60 = vcombine.high %v517_v52, %v521_v53 }
 0x13c   :  { %v649_v55 = vld [vmem:[#allocation2 + $0xda8] sm:$0xff] }
 0x13d   :  { %v17128_v61 = vcombine.high %v645_v54, %v649_v55  ;;  %v509_v62 = vld [vmem:[#allocation2 + $0x948] sm:$0xff] }
 0x13e   :  { %3511 = vmatpush2.bf16.msra.mxu0 %v16799_v2  ;;  %3552 = vmatpush2.bf16.msra.mxu1 %v16927_v3  ;;  %v513_v63 = vld [vmem:[#allocation2 + $0x968] sm:$0xff]  ;;  %v16999_v2 = vcombine.low %v517_v52, %v521_v53  ;;  %v17127_v3 = vcombine.low %v645_v54, %v649_v55 }
 0x13f   :  { %3512 = vmatprep.subr.bf16.mxu0 %v16792_v4  ;;  %3553 = vmatprep.subr.bf16.mxu1 %v16920_v5  ;;  %v637_v0 = vld [vmem:[#allocation2 + $0xd48] sm:$0xff]  ;;  %v16992_v4 = vcombine.high %v509_v62, %v513_v63 }
 0x140   :  { %v641_v1 = vld [vmem:[#allocation2 + $0xd68] sm:$0xff] }
 0x141   :  { %v17120_v5 = vcombine.high %v637_v0, %v641_v1  ;;  %v501_v6 = vld [vmem:[#allocation2 + $0x908] sm:$0xff] }
 0x142   :  { %3513 = vmatpush2.bf16.msra.mxu0 %v16791_v10  ;;  %3554 = vmatpush2.bf16.msra.mxu1 %v16919_v11  ;;  %v505_v7 = vld [vmem:[#allocation2 + $0x928] sm:$0xff]  ;;  %v16991_v10 = vcombine.low %v509_v62, %v513_v63  ;;  %v17119_v11 = vcombine.low %v637_v0, %v641_v1 }
 0x143   :  { %3514 = vmatprep.subr.bf16.mxu0 %v16784_v12  ;;  %3555 = vmatprep.subr.bf16.mxu1 %v16912_v13  ;;  %v629_v8 = vld [vmem:[#allocation2 + $0xd08] sm:$0xff]  ;;  %v16984_v12 = vcombine.high %v501_v6, %v505_v7 }
 0x144   :  { %v633_v9 = vld [vmem:[#allocation2 + $0xd28] sm:$0xff] }
 0x145   :  { %v17112_v13 = vcombine.high %v629_v8, %v633_v9  ;;  %v493_v14 = vld [vmem:[#allocation2 + $0x8c8] sm:$0xff] }
 0x146   :  { %3515 = vmatpush2.bf16.msra.mxu0 %v16783_v19  ;;  %3556 = vmatpush2.bf16.msra.mxu1 %v16911_v21  ;;  %v497_v15 = vld [vmem:[#allocation2 + $0x8e8] sm:$0xff]  ;;  %v16983_v19 = vcombine.low %v501_v6, %v505_v7  ;;  %v17111_v21 = vcombine.low %v629_v8, %v633_v9 }
 0x147   :  { %3516 = vmatprep.subr.bf16.mxu0 %v16776_v22  ;;  %3557 = vmatprep.subr.bf16.mxu1 %v16904_v23  ;;  %v621_v17 = vld [vmem:[#allocation2 + $0xcc8] sm:$0xff]  ;;  %v16976_v22 = vcombine.high %v493_v14, %v497_v15 }
 0x148   :  { %v625_v18 = vld [vmem:[#allocation2 + $0xce8] sm:$0xff] }
 0x149   :  { %v17104_v23 = vcombine.high %v621_v17, %v625_v18  ;;  %v485_v24 = vld [vmem:[#allocation2 + $0x888] sm:$0xff] }
 0x14a   :  { %3517 = vmatpush2.bf16.msra.mxu0 %v16775_v29  ;;  %3558 = vmatpush2.bf16.msra.mxu1 %v16903_v30  ;;  %v489_v25 = vld [vmem:[#allocation2 + $0x8a8] sm:$0xff]  ;;  %v16975_v29 = vcombine.low %v493_v14, %v497_v15  ;;  %v17103_v30 = vcombine.low %v621_v17, %v625_v18 }
 0x14b   :  { %3518 = vmatprep.subr.bf16.mxu0 %v16768_v32  ;;  %3559 = vmatprep.subr.bf16.mxu1 %v16896_v33  ;;  %v613_v26 = vld [vmem:[#allocation2 + $0xc88] sm:$0xff]  ;;  %v16968_v32 = vcombine.high %v485_v24, %v489_v25 }
 0x14c   :  { %v617_v27 = vld [vmem:[#allocation2 + $0xca8] sm:$0xff] }
 0x14d   :  { %v17096_v33 = vcombine.high %v613_v26, %v617_v27  ;;  %v477_v34 = vld [vmem:[#allocation2 + $0x848] sm:$0xff] }
 0x14e   :  { %3519 = vmatpush2.bf16.msra.mxu0 %v16767_v40  ;;  %3560 = vmatpush2.bf16.msra.mxu1 %v16895_v41  ;;  %v481_v35 = vld [vmem:[#allocation2 + $0x868] sm:$0xff]  ;;  %v16967_v40 = vcombine.low %v485_v24, %v489_v25  ;;  %v17095_v41 = vcombine.low %v613_v26, %v617_v27 }
 0x14f   :  { %3520 = vmatprep.subr.bf16.mxu0 %v16760_v42  ;;  %3561 = vmatprep.subr.bf16.mxu1 %v16888_v43  ;;  %v605_v36 = vld [vmem:[#allocation2 + $0xc48] sm:$0xff]  ;;  %v16960_v42 = vcombine.high %v477_v34, %v481_v35 }
 0x150   :  { %v609_v37 = vld [vmem:[#allocation2 + $0xc68] sm:$0xff] }
 0x151   :  { %v17088_v43 = vcombine.high %v605_v36, %v609_v37  ;;  %v469_v44 = vld [vmem:[#allocation2 + $0x808] sm:$0xff] }
 0x152   :  { %3521 = vmatpush2.bf16.msra.mxu0 %v16759_v48  ;;  %3562 = vmatpush2.bf16.msra.mxu1 %v16887_v49  ;;  %v473_v45 = vld [vmem:[#allocation2 + $0x828] sm:$0xff]  ;;  %v16959_v48 = vcombine.low %v477_v34, %v481_v35  ;;  %v17087_v49 = vcombine.low %v605_v36, %v609_v37 }
 0x153   :  { %3572 = vmatprep.subr.bf16.mxu0 %v17008_v50  ;;  %3613 = vmatprep.subr.bf16.mxu1 %v17136_v51  ;;  %v597_v46 = vld [vmem:[#allocation2 + $0xc08] sm:$0xff]  ;;  %v16952_v50 = vcombine.high %v469_v44, %v473_v45 }
 0x154   :  { %v601_v47 = vld [vmem:[#allocation2 + $0xc28] sm:$0xff] }
 0x155   :  { %3523 = vmatmul.mubr.bf16.vlgmr.msra.gmra.mxu0 %v19495_v16  ;;  %3564 = vmatmul.mubr.bf16.vlgmr.msra.gmra.mxu1 %v19500_v20  ;;  %v17080_v51 = vcombine.high %v597_v46, %v601_v47  ;;  %v589_v52 = vld [vmem:[#allocation2 + $0xbc8] sm:$0xff] }
 0x156   :  { %3573 = vmatpush1.bf16.msra.mxu0 %v17007_v56  ;;  %3614 = vmatpush1.bf16.msra.mxu1 %v17135_v57  ;;  %v593_v53 = vld [vmem:[#allocation2 + $0xbe8] sm:$0xff]  ;;  %v16951_v56 = vcombine.low %v469_v44, %v473_v45  ;;  %v17079_v57 = vcombine.low %v597_v46, %v601_v47 }
 0x157   :  { %3574 = vmatprep.subr.bf16.mxu0 %v17000_v60  ;;  %3615 = vmatprep.subr.bf16.mxu1 %v17128_v61  ;;  %v717_v54 = vld [vmem:[#allocation2 + $0xfc8] sm:$0xff]  ;;  %v17072_v60 = vcombine.high %v589_v52, %v593_v53 }
 0x158   :  { %3604 = vmatprep.mubr.bf16.mxu0 %v19505_v28  ;;  %3645 = vmatprep.mubr.bf16.mxu1 %v19508_v31  ;;  %v721_v55 = vld [vmem:[#allocation2 + $0xfe8] sm:$0xff] }
 0x159   :  { %v17200_v61 = vcombine.high %v717_v54, %v721_v55  ;;  %v581_v62 = vld [vmem:[#allocation2 + $0xb88] sm:$0xff] }
 0x15a   :  { %3575 = vmatpush1.bf16.msra.mxu0 %v16999_v2  ;;  %3616 = vmatpush1.bf16.msra.mxu1 %v17127_v3  ;;  %v585_v63 = vld [vmem:[#allocation2 + $0xba8] sm:$0xff]  ;;  %v17071_v2 = vcombine.low %v589_v52, %v593_v53  ;;  %v17199_v3 = vcombine.low %v717_v54, %v721_v55 }
 0x15b   :  { %3576 = vmatprep.subr.bf16.mxu0 %v16992_v4  ;;  %3617 = vmatprep.subr.bf16.mxu1 %v17120_v5  ;;  %v709_v0 = vld [vmem:[#allocation2 + $0xf88] sm:$0xff]  ;;  %v17064_v4 = vcombine.high %v581_v62, %v585_v63 }
 0x15c   :  { %v713_v1 = vld [vmem:[#allocation2 + $0xfa8] sm:$0xff] }
 0x15d   :  { %v17192_v5 = vcombine.high %v709_v0, %v713_v1  ;;  %v573_v6 = vld [vmem:[#allocation2 + $0xb48] sm:$0xff] }
 0x15e   :  { %3577 = vmatpush1.bf16.msra.mxu0 %v16991_v10  ;;  %3618 = vmatpush1.bf16.msra.mxu1 %v17119_v11  ;;  %v577_v7 = vld [vmem:[#allocation2 + $0xb68] sm:$0xff]  ;;  %v17063_v10 = vcombine.low %v581_v62, %v585_v63  ;;  %v17191_v11 = vcombine.low %v709_v0, %v713_v1  ;;  %v270_v0 = vld [vmem:[#allocation2 + $0x1d0] sm:$0xff] }
 0x15f   :  { %3578 = vmatprep.subr.bf16.mxu0 %v16984_v12  ;;  %3619 = vmatprep.subr.bf16.mxu1 %v17112_v13  ;;  %v701_v8 = vld [vmem:[#allocation2 + $0xf48] sm:$0xff]  ;;  %v17056_v12 = vcombine.high %v573_v6, %v577_v7  ;;  %v274_v1 = vld [vmem:[#allocation2 + $0x1f0] sm:$0xff] }
 0x160   :  { %v705_v9 = vld [vmem:[#allocation2 + $0xf68] sm:$0xff] }
 0x161   :  { %v17184_v13 = vcombine.high %v701_v8, %v705_v9  ;;  %v565_v14 = vld [vmem:[#allocation2 + $0xb08] sm:$0xff] }
 0x162   :  { %3579 = vmatpush1.bf16.msra.mxu0 %v16983_v19  ;;  %3620 = vmatpush1.bf16.msra.mxu1 %v17111_v21  ;;  %v569_v15 = vld [vmem:[#allocation2 + $0xb28] sm:$0xff]  ;;  %v17055_v19 = vcombine.low %v573_v6, %v577_v7  ;;  %v17183_v21 = vcombine.low %v701_v8, %v705_v9  ;;  %v19536_v7 = vld [vmem:[#allocation4] sm:$0xff]  ;;  %v16754_v8 = vcombine.high %v270_v0, %v274_v1 }
 0x163   :  { %3580 = vmatprep.subr.bf16.mxu0 %v16976_v22  ;;  %3621 = vmatprep.subr.bf16.mxu1 %v17104_v23  ;;  %v693_v17 = vld [vmem:[#allocation2 + $0xf08] sm:$0xff]  ;;  %v17048_v22 = vcombine.high %v565_v14, %v569_v15 }
 0x164   :  { %v697_v18 = vld [vmem:[#allocation2 + $0xf28] sm:$0xff] }
 0x165   :  { %v17176_v23 = vcombine.high %v693_v17, %v697_v18  ;;  %v557_v24 = vld [vmem:[#allocation2 + $0xac8] sm:$0xff] }
 0x166   :  { %3581 = vmatpush1.bf16.msra.mxu0 %v16975_v29  ;;  %3622 = vmatpush1.bf16.msra.mxu1 %v17103_v30  ;;  %v561_v25 = vld [vmem:[#allocation2 + $0xae8] sm:$0xff]  ;;  %v17047_v29 = vcombine.low %v565_v14, %v569_v15  ;;  %v17175_v30 = vcombine.low %v693_v17, %v697_v18  ;;  %v394_v14 = vld [vmem:[#allocation2 + $0x5b0] sm:$0xff]  ;;  %v16753_v17 = vcombine.low %v270_v0, %v274_v1 }
 0x167   :  { %3582 = vmatprep.subr.bf16.mxu0 %v16968_v32  ;;  %3623 = vmatprep.subr.bf16.mxu1 %v17096_v33  ;;  %v685_v26 = vld [vmem:[#allocation2 + $0xec8] sm:$0xff]  ;;  %v17040_v32 = vcombine.high %v557_v24, %v561_v25 }
 0x168   :  { %v689_v27 = vld [vmem:[#allocation2 + $0xee8] sm:$0xff] }
 0x169   :  { %v17168_v33 = vcombine.high %v685_v26, %v689_v27  ;;  %v549_v34 = vld [vmem:[#allocation2 + $0xa88] sm:$0xff] }
 0x16a   :  { %3583 = vmatpush1.bf16.msra.mxu0 %v16967_v40  ;;  %3624 = vmatpush1.bf16.msra.mxu1 %v17095_v41  ;;  %v553_v35 = vld [vmem:[#allocation2 + $0xaa8] sm:$0xff]  ;;  %v17039_v40 = vcombine.low %v557_v24, %v561_v25  ;;  %v17167_v41 = vcombine.low %v685_v26, %v689_v27  ;;  %v258_v24 = vld [vmem:[#allocation2 + $0x170] sm:$0xff] }
 0x16b   :  { %3584 = vmatprep.subr.bf16.mxu0 %v16960_v42  ;;  %3625 = vmatprep.subr.bf16.mxu1 %v17088_v43  ;;  %v677_v36 = vld [vmem:[#allocation2 + $0xe88] sm:$0xff]  ;;  %v17032_v42 = vcombine.high %v549_v34, %v553_v35  ;;  %v382_v26 = vld [vmem:[#allocation2 + $0x550] sm:$0xff] }
 0x16c   :  { %v681_v37 = vld [vmem:[#allocation2 + $0xea8] sm:$0xff]  ;;  %v386_v27 = vld [vmem:[#allocation2 + $0x570] sm:$0xff] }
 0x16d   :  { %v17160_v43 = vcombine.high %v677_v36, %v681_v37  ;;  %v541_v44 = vld [vmem:[#allocation2 + $0xa48] sm:$0xff] }
 0x16e   :  { %3585 = vmatpush1.bf16.msra.mxu0 %v16959_v48  ;;  %3626 = vmatpush1.bf16.msra.mxu1 %v17087_v49  ;;  %v545_v45 = vld [vmem:[#allocation2 + $0xa68] sm:$0xff]  ;;  %v17031_v48 = vcombine.low %v549_v34, %v553_v35  ;;  %v726_v49 = vlaneseq }
 0x16f   :  { %3586 = vmatprep.subr.bf16.mxu0 %v16952_v50  ;;  %3627 = vmatprep.subr.bf16.mxu1 %v17080_v51  ;;  %v669_v46 = vld [vmem:[#allocation2 + $0xe48] sm:$0xff]  ;;  %v17159_v50 = vcombine.low %v677_v36, %v681_v37  ;;  %v17024_v51 = vcombine.high %v541_v44, %v545_v45 }
 0x170   :  { %v673_v47 = vld [vmem:[#allocation2 + $0xe68] sm:$0xff] }
 0x171   :  { %v17152_v52 = vcombine.high %v669_v46, %v673_v47  ;;  %v533_v53 = vld [vmem:[#allocation2 + $0xa08] sm:$0xff] }
 0x172   :  { %3587 = vmatpush1.bf16.msra.mxu0 %v16951_v56  ;;  %3628 = vmatpush1.bf16.msra.mxu1 %v17079_v57  ;;  %v537_v54 = vld [vmem:[#allocation2 + $0xa28] sm:$0xff]  ;;  %v17023_v57 = vcombine.low %v541_v44, %v545_v45  ;;  %v374_v45 = vld [vmem:[#allocation2 + $0x510] sm:$0xff] }
 0x173   :  { %3588 = vmatprep.subr.bf16.mxu0 %v17072_v60  ;;  %3629 = vmatprep.subr.bf16.mxu1 %v17200_v61  ;;  %v661_v55 = vld [vmem:[#allocation2 + $0xe08] sm:$0xff]  ;;  %v19531_v60 = vshrl.u32 %v726_v49, 7  ;;  %v17151_v61 = vcombine.low %v669_v46, %v673_v47  ;;  %v17016_v62 = vcombine.high %v533_v53, %v537_v54  ;;  %v378_v46 = vld [vmem:[#allocation2 + $0x530] sm:$0xff] }
 0x174   :  { %v665_v56 = vld [vmem:[#allocation2 + $0xe28] sm:$0xff] }
 0x175   :  { %v17144_v63 = vcombine.high %v661_v55, %v665_v56  ;;  %v17143_v6 = vcombine.low %v661_v55, %v665_v56  ;;  %v238_v55 = vld [vmem:[#allocation2 + $0xd0] sm:$0xff] }
 0x176   :  { %3589 = vmatpush2.bf16.msra.mxu0 %v17071_v2  ;;  %3630 = vmatpush2.bf16.msra.mxu1 %v17199_v3  ;;  %v398_v2 = vld [vmem:[#allocation2 + $0x5d0] sm:$0xff] }
 0x177   :  { %3590 = vmatprep.subr.bf16.mxu0 %v17064_v4  ;;  %3631 = vmatprep.subr.bf16.mxu1 %v17192_v5  ;;  %v402_v3 = vld [vmem:[#allocation2 + $0x5f0] sm:$0xff]  ;;  %v17015_v4 = vcombine.low %v533_v53, %v537_v54  ;;  %v19534_v5 = vsub.s32 0, %v19531_v60  ;;  %v16858_v54 = vcombine.high %v374_v45, %v378_v46 }
 0x178   :  { %v16882_v9 = vcombine.high %v398_v2, %v402_v3  ;;  %v16881_v18 = vcombine.low %v398_v2, %v402_v3  ;;  %v242_v56 = vld [vmem:[#allocation2 + $0xf0] sm:$0xff] }
 0x179   :  { %v729_v15 = vrot.slane %v19536_v7, %v19534_v5  ;;  %v16722_v0 = vcombine.high %v238_v55, %v242_v56  ;;  %v230_v2 = vld [vmem:[#allocation2 + $0x90] sm:$0xff] }
 0x17a   :  { %3591 = vmatpush2.bf16.msra.mxu0 %v17063_v10  ;;  %3632 = vmatpush2.bf16.msra.mxu1 %v17191_v11  ;;  %v19539_v10 = vsub.s32 1, %v19531_v60  ;;  %v262_v11 = vld [vmem:[#allocation2 + $0x190] sm:$0xff] }
 0x17b   :  { %3592 = vmatprep.subr.bf16.mxu0 %v17056_v12  ;;  %3633 = vmatprep.subr.bf16.mxu1 %v17184_v13  ;;  %v266_v12 = vld [vmem:[#allocation2 + $0x1b0] sm:$0xff] }
 0x17c   :  { %v390_v13 = vld [vmem:[#allocation2 + $0x590] sm:$0xff] }
 0x17d   :  { %v16873_v34 = vcombine.low %v390_v13, %v394_v14  ;;  %v234_v3 = vld [vmem:[#allocation2 + $0xb0] sm:$0xff] }
 0x17e   :  { %3593 = vmatpush2.bf16.msra.mxu0 %v17055_v19  ;;  %3634 = vmatpush2.bf16.msra.mxu1 %v17183_v21  ;;  %v16746_v19 = vcombine.high %v262_v11, %v266_v12  ;;  %v733_v21 = vrot.slane %v19536_v7, %v19539_v10 }
 0x17f   :  { %3594 = vmatprep.subr.bf16.mxu0 %v17048_v22  ;;  %3635 = vmatprep.subr.bf16.mxu1 %v17176_v23  ;;  %v16874_v22 = vcombine.high %v390_v13, %v394_v14  ;;  %v254_v23 = vld [vmem:[#allocation2 + $0x150] sm:$0xff] }
 0x180   :  { %v16738_v35 = vcombine.high %v254_v23, %v258_v24  ;;  %v16737_v49 = vcombine.low %v254_v23, %v258_v24  ;;  %v222_v13 = vld [vmem:[#allocation2 + $0x50] sm:$0xff] }
 0x181   :  { %v226_v14 = vld [vmem:[#allocation2 + $0x70] sm:$0xff] }
 0x182   :  { %3595 = vmatpush2.bf16.msra.mxu0 %v17047_v29  ;;  %3636 = vmatpush2.bf16.msra.mxu1 %v17175_v30  ;;  %v214_v23 = vld [vmem:[#allocation2 + $0x10] sm:$0xff] }
 0x183   :  { %3596 = vmatprep.subr.bf16.mxu0 %v17040_v32  ;;  %3637 = vmatprep.subr.bf16.mxu1 %v17168_v33  ;;  %v16745_v32 = vcombine.low %v262_v11, %v266_v12  ;;  %v16714_v11 = vcombine.high %v230_v2, %v234_v3  ;;  %v218_v24 = vld [vmem:[#allocation2 + $0x30] sm:$0xff] }
 0x186   :  { %3597 = vmatpush2.bf16.msra.mxu0 %v17039_v40  ;;  %3638 = vmatpush2.bf16.msra.mxu1 %v17167_v41  ;;  %v16866_v41 = vcombine.high %v382_v26, %v386_v27 }
 0x187   :  { %3598 = vmatprep.subr.bf16.mxu0 %v17032_v42  ;;  %3639 = vmatprep.subr.bf16.mxu1 %v17160_v43  ;;  %v246_v42 = vld [vmem:[#allocation2 + $0x110] sm:$0xff] }
 0x188   :  { %v250_v43 = vld [vmem:[#allocation2 + $0x130] sm:$0xff] }
 0x18a   :  { %3599 = vmatpush2.bf16.msra.mxu0 %v17031_v48  ;;  %3640 = vmatpush2.bf16.msra.mxu1 %v17159_v50 }
 0x18b   :  { %3600 = vmatprep.subr.bf16.mxu0 %v17024_v51  ;;  %3641 = vmatprep.subr.bf16.mxu1 %v17152_v52  ;;  %v16865_v51 = vcombine.low %v382_v26, %v386_v27  ;;  %v16730_v52 = vcombine.high %v246_v42, %v250_v43  ;;  %v346_v26 = vld [vmem:[#allocation2 + $0x430] sm:$0xff]  ;;  %v16705_v27 = vcombine.low %v222_v13, %v226_v14 }
 0x18e   :  { %3601 = vmatpush2.bf16.msra.mxu0 %v17023_v57  ;;  %3642 = vmatpush2.bf16.msra.mxu1 %v17151_v61  ;;  %v366_v57 = vld [vmem:[#allocation2 + $0x4d0] sm:$0xff] }
 0x18f   :  { %3602 = vmatprep.subr.bf16.mxu0 %v17016_v62  ;;  %3643 = vmatprep.subr.bf16.mxu1 %v17144_v63  ;;  %v370_v61 = vld [vmem:[#allocation2 + $0x4f0] sm:$0xff]  ;;  %v16729_v62 = vcombine.low %v246_v42, %v250_v43  ;;  %v16857_v63 = vcombine.low %v374_v45, %v378_v46 }
 0x190   :  { %v16850_v1 = vcombine.high %v366_v57, %v370_v61  ;;  %v330_v45 = vld [vmem:[#allocation2 + $0x3b0] sm:$0xff] }
 0x191   :  { %v454_v46 = vld [vmem:[#allocation2 + $0x790] sm:$0xff] }
 0x192   :  { %3603 = vmatpush2.bf16.msra.mxu0 %v17015_v4  ;;  %3644 = vmatpush2.bf16.msra.mxu1 %v17143_v6  ;;  %v358_v4 = vld [vmem:[#allocation2 + $0x490] sm:$0xff] }
 0x193   :  { %3654 = vmatprep.subr.bf16.mxu0 %v16754_v8  ;;  %3695 = vmatprep.subr.bf16.mxu1 %v16882_v9  ;;  %v362_v6 = vld [vmem:[#allocation2 + $0x4b0] sm:$0xff]  ;;  %v16721_v8 = vcombine.low %v238_v55, %v242_v56  ;;  %v16849_v9 = vcombine.low %v366_v57, %v370_v61 }
 0x194   :  { %v3401_v30 = vpop.f32.mrf.mxu1  ;;  %v16842_v12 = vcombine.high %v358_v4, %v362_v6  ;;  %v446_v55 = vld [vmem:[#allocation2 + $0x750] sm:$0xff] }
 0x195   :  { %v3360_v25 = vpop.f32.mrf.mxu0  ;;  %3605 = vmatmul.mubr.bf16.vlgmr.msra.gmra.mxu0 %v19519_v38  ;;  %3646 = vmatmul.mubr.bf16.vlgmr.msra.gmra.mxu1 %v19521_v39  ;;  %v450_v56 = vld [vmem:[#allocation2 + $0x770] sm:$0xff] }
 0x196   :  { %v3361_v29 = vadd.f32 %v3360_v25, %v729_v15  ;;  %3655 = vmatpush1.bf16.msra.mxu0 %v16753_v17  ;;  %3696 = vmatpush1.bf16.msra.mxu1 %v16881_v18  ;;  %v3403_v40 = vpop.f32.mrf.mxu1  ;;  %v350_v15 = vld [vmem:[#allocation2 + $0x450] sm:$0xff]  ;;  %v16713_v18 = vcombine.low %v230_v2, %v234_v3 }
 0x197   :  { %v3362_v33 = vpop.f32.mrf.mxu0  ;;  %3656 = vmatprep.subr.bf16.mxu0 %v16746_v19  ;;  %3697 = vmatprep.subr.bf16.mxu1 %v16874_v22  ;;  %v354_v17 = vld [vmem:[#allocation2 + $0x470] sm:$0xff]  ;;  %v16841_v19 = vcombine.low %v358_v4, %v362_v6  ;;  %v16929_v6 = vcombine.low %v446_v55, %v450_v56 }
 0x198   :  { %v19547_v36 = vadd.f32 %v3401_v30, %v3361_v29  ;;  %v3363_v37 = vadd.f32 %v3362_v33, %v733_v21  ;;  %3686 = vmatprep.mubr.bf16.mxu0 %v19483_v58  ;;  %3727 = vmatprep.mubr.bf16.mxu1 %v19485_v59  ;;  %v3405_v48 = vpop.f32.mrf.mxu1  ;;  %v16706_v21 = vcombine.high %v222_v13, %v226_v14  ;;  %v342_v25 = vld [vmem:[#allocation2 + $0x410] sm:$0xff] }
 0x199   :  { %v3364_v44 = vpop.f32.mrf.mxu0  ;;  %v16834_v22 = vcombine.high %v350_v15, %v354_v17  ;;  %v16833_v29 = vcombine.low %v350_v15, %v354_v17  ;;  %v16698_v30 = vcombine.high %v214_v23, %v218_v24  ;;  %v334_v33 = vld [vmem:[#allocation2 + $0x3d0] sm:$0xff] }
 0x19a   :  { %v19551_v47 = vadd.f32 %v3403_v40, %v3363_v37  ;;  %3657 = vmatpush1.bf16.msra.mxu0 %v16745_v32  ;;  %3698 = vmatpush1.bf16.msra.mxu1 %v16873_v34  ;;  %v3406_v53 = vpop.f32.mrf.mxu1  ;;  %v16826_v32 = vcombine.high %v342_v25, %v346_v26  ;;  %v338_v34 = vld [vmem:[#allocation2 + $0x3f0] sm:$0xff]  ;;  %v16697_v40 = vcombine.low %v214_v23, %v218_v24 }
 0x19b   :  { %v3365_v50 = vpop.f32.mrf.mxu0  ;;  %3658 = vmatprep.subr.bf16.mxu0 %v16738_v35  ;;  %3699 = vmatprep.subr.bf16.mxu1 %v16866_v41  ;;  %v462_v35 = vld [vmem:[#allocation2 + $0x7d0] sm:$0xff]  ;;  %v16825_v41 = vcombine.low %v342_v25, %v346_v26  ;;  %v16818_v42 = vcombine.high %v334_v33, %v338_v34 }
 0x19c   :  { %v466_v37 = vld [vmem:[#allocation2 + $0x7f0] sm:$0xff] }
 0x19d   :  { %v16946_v43 = vcombine.high %v462_v35, %v466_v37  ;;  %v326_v44 = vld [vmem:[#allocation2 + $0x390] sm:$0xff]  ;;  %v16945_v50 = vcombine.low %v462_v35, %v466_v37 }
 0x19e   :  { %3659 = vmatpush1.bf16.msra.mxu0 %v16737_v49  ;;  %3700 = vmatpush1.bf16.msra.mxu1 %v16865_v51  ;;  %v458_v48 = vld [vmem:[#allocation2 + $0x7b0] sm:$0xff]  ;;  %v16817_v49 = vcombine.low %v334_v33, %v338_v34  ;;  %v16810_v51 = vcombine.high %v326_v44, %v330_v45  ;;  %v16809_v57 = vcombine.low %v326_v44, %v330_v45 }
 0x19f   :  { %3660 = vmatprep.subr.bf16.mxu0 %v16730_v52  ;;  %3701 = vmatprep.subr.bf16.mxu1 %v16858_v54  ;;  %v16938_v52 = vcombine.high %v454_v46, %v458_v48  ;;  %v318_v53 = vld [vmem:[#allocation2 + $0x350] sm:$0xff]  ;;  %v16937_v61 = vcombine.low %v454_v46, %v458_v48 }
 0x1a0   :  { %v322_v54 = vld [vmem:[#allocation2 + $0x370] sm:$0xff] }
 0x1a1   :  { %v438_v2 = vld [vmem:[#allocation2 + $0x710] sm:$0xff]  ;;  %v16801_v4 = vcombine.low %v318_v53, %v322_v54 }
 0x1a2   :  { %3661 = vmatpush1.bf16.msra.mxu0 %v16729_v62  ;;  %3702 = vmatpush1.bf16.msra.mxu1 %v16857_v63  ;;  %v16802_v62 = vcombine.high %v318_v53, %v322_v54  ;;  %v16930_v63 = vcombine.high %v446_v55, %v450_v56  ;;  %v442_v3 = vld [vmem:[#allocation2 + $0x730] sm:$0xff] }
 0x1a3   :  { %3662 = vmatprep.subr.bf16.mxu0 %v16722_v0  ;;  %3703 = vmatprep.subr.bf16.mxu1 %v16850_v1  ;;  %v310_v0 = vld [vmem:[#allocation2 + $0x310] sm:$0xff]  ;;  %v16921_v17 = vcombine.low %v438_v2, %v442_v3 }
 0x1a4   :  { %v314_v1 = vld [vmem:[#allocation2 + $0x330] sm:$0xff] }
 0x1a5   :  { %v430_v13 = vld [vmem:[#allocation2 + $0x6d0] sm:$0xff]  ;;  %v16793_v15 = vcombine.low %v310_v0, %v314_v1 }
 0x1a6   :  { %3663 = vmatpush1.bf16.msra.mxu0 %v16721_v8  ;;  %3704 = vmatpush1.bf16.msra.mxu1 %v16849_v9  ;;  %v16794_v8 = vcombine.high %v310_v0, %v314_v1  ;;  %v16922_v9 = vcombine.high %v438_v2, %v442_v3  ;;  %v434_v14 = vld [vmem:[#allocation2 + $0x6f0] sm:$0xff] }
 0x1a7   :  { %3664 = vmatprep.subr.bf16.mxu0 %v16714_v11  ;;  %3705 = vmatprep.subr.bf16.mxu1 %v16842_v12  ;;  %v302_v11 = vld [vmem:[#allocation2 + $0x2d0] sm:$0xff]  ;;  %v16913_v26 = vcombine.low %v430_v13, %v434_v14 }
 0x1a8   :  { %v306_v12 = vld [vmem:[#allocation2 + $0x2f0] sm:$0xff] }
 0x1a9   :  { %v422_v23 = vld [vmem:[#allocation2 + $0x690] sm:$0xff]  ;;  %v16785_v25 = vcombine.low %v302_v11, %v306_v12 }
 0x1aa   :  { %3665 = vmatpush1.bf16.msra.mxu0 %v16713_v18  ;;  %3706 = vmatpush1.bf16.msra.mxu1 %v16841_v19  ;;  %v16786_v18 = vcombine.high %v302_v11, %v306_v12  ;;  %v16914_v19 = vcombine.high %v430_v13, %v434_v14  ;;  %v426_v24 = vld [vmem:[#allocation2 + $0x6b0] sm:$0xff] }
 0x1ab   :  { %3666 = vmatprep.subr.bf16.mxu0 %v16706_v21  ;;  %3707 = vmatprep.subr.bf16.mxu1 %v16834_v22  ;;  %v294_v21 = vld [vmem:[#allocation2 + $0x290] sm:$0xff]  ;;  %v16905_v37 = vcombine.low %v422_v23, %v426_v24 }
 0x1ac   :  { %v298_v22 = vld [vmem:[#allocation2 + $0x2b0] sm:$0xff] }
 0x1ad   :  { %v414_v33 = vld [vmem:[#allocation2 + $0x650] sm:$0xff]  ;;  %v16777_v35 = vcombine.low %v294_v21, %v298_v22 }
 0x1ae   :  { %3667 = vmatpush1.bf16.msra.mxu0 %v16705_v27  ;;  %3708 = vmatpush1.bf16.msra.mxu1 %v16833_v29  ;;  %v16778_v27 = vcombine.high %v294_v21, %v298_v22  ;;  %v16906_v29 = vcombine.high %v422_v23, %v426_v24  ;;  %v418_v34 = vld [vmem:[#allocation2 + $0x670] sm:$0xff] }
 0x1af   :  { %3668 = vmatprep.subr.bf16.mxu0 %v16698_v30  ;;  %3709 = vmatprep.subr.bf16.mxu1 %v16826_v32  ;;  %v286_v30 = vld [vmem:[#allocation2 + $0x250] sm:$0xff]  ;;  %v16897_v48 = vcombine.low %v414_v33, %v418_v34 }
 0x1b0   :  { %v290_v32 = vld [vmem:[#allocation2 + $0x270] sm:$0xff] }
 0x1b1   :  { %v406_v44 = vld [vmem:[#allocation2 + $0x610] sm:$0xff]  ;;  %v16769_v46 = vcombine.low %v286_v30, %v290_v32 }
 0x1b2   :  { %3669 = vmatpush1.bf16.msra.mxu0 %v16697_v40  ;;  %3710 = vmatpush1.bf16.msra.mxu1 %v16825_v41  ;;  %v16770_v40 = vcombine.high %v286_v30, %v290_v32  ;;  %v16898_v41 = vcombine.high %v414_v33, %v418_v34  ;;  %v410_v45 = vld [vmem:[#allocation2 + $0x630] sm:$0xff] }
 0x1b3   :  { %3670 = vmatprep.subr.bf16.mxu0 %v16818_v42  ;;  %3711 = vmatprep.subr.bf16.mxu1 %v16946_v43  ;;  %v278_v42 = vld [vmem:[#allocation2 + $0x210] sm:$0xff]  ;;  %v16889_v56 = vcombine.low %v406_v44, %v410_v45 }
 0x1b4   :  { %v282_v43 = vld [vmem:[#allocation2 + $0x230] sm:$0xff] }
 0x1b5   :  { %v654_v53 = vld [vmem:[#allocation2 + $0xdd0] sm:$0xff]  ;;  %v16761_v55 = vcombine.low %v278_v42, %v282_v43 }
 0x1b6   :  { %3671 = vmatpush2.bf16.msra.mxu0 %v16817_v49  ;;  %3712 = vmatpush2.bf16.msra.mxu1 %v16945_v50  ;;  %v16762_v49 = vcombine.high %v278_v42, %v282_v43  ;;  %v16890_v50 = vcombine.high %v406_v44, %v410_v45  ;;  %v658_v54 = vld [vmem:[#allocation2 + $0xdf0] sm:$0xff] }
 0x1b7   :  { %3672 = vmatprep.subr.bf16.mxu0 %v16810_v51  ;;  %3713 = vmatprep.subr.bf16.mxu1 %v16938_v52  ;;  %v526_v51 = vld [vmem:[#allocation2 + $0x9d0] sm:$0xff]  ;;  %v17137_v3 = vcombine.low %v654_v53, %v658_v54 }
 0x1b8   :  { %v530_v52 = vld [vmem:[#allocation2 + $0x9f0] sm:$0xff] }
 0x1b9   :  { %v646_v0 = vld [vmem:[#allocation2 + $0xd90] sm:$0xff]  ;;  %v17009_v2 = vcombine.low %v526_v51, %v530_v52 }
 0x1ba   :  { %3673 = vmatpush2.bf16.msra.mxu0 %v16809_v57  ;;  %3714 = vmatpush2.bf16.msra.mxu1 %v16937_v61  ;;  %v17010_v57 = vcombine.high %v526_v51, %v530_v52  ;;  %v17138_v61 = vcombine.high %v654_v53, %v658_v54  ;;  %v650_v1 = vld [vmem:[#allocation2 + $0xdb0] sm:$0xff] }
 0x1bb   :  { %3674 = vmatprep.subr.bf16.mxu0 %v16802_v62  ;;  %3715 = vmatprep.subr.bf16.mxu1 %v16930_v63  ;;  %v518_v62 = vld [vmem:[#allocation2 + $0x990] sm:$0xff] }
 0x1bc   :  { %v522_v63 = vld [vmem:[#allocation2 + $0x9b0] sm:$0xff] }
 0x1bd   :  { %v638_v12 = vld [vmem:[#allocation2 + $0xd50] sm:$0xff] }
 0x1be   :  { %3675 = vmatpush2.bf16.msra.mxu0 %v16801_v4  ;;  %3716 = vmatpush2.bf16.msra.mxu1 %v16929_v6  ;;  %v17002_v4 = vcombine.high %v518_v62, %v522_v63  ;;  %v17130_v6 = vcombine.high %v646_v0, %v650_v1  ;;  %v642_v13 = vld [vmem:[#allocation2 + $0xd70] sm:$0xff] }
 0x1bf   :  { %3676 = vmatprep.subr.bf16.mxu0 %v16794_v8  ;;  %3717 = vmatprep.subr.bf16.mxu1 %v16922_v9  ;;  %v510_v8 = vld [vmem:[#allocation2 + $0x950] sm:$0xff] }
 0x1c0   :  { %v514_v9 = vld [vmem:[#allocation2 + $0x970] sm:$0xff] }
 0x1c1   :  { %v16994_v21 = vcombine.high %v510_v8, %v514_v9  ;;  %v634_v30 = vld [vmem:[#allocation2 + $0xd30] sm:$0xff]  ;;  %v16993_v34 = vcombine.low %v510_v8, %v514_v9 }
 0x1c2   :  { %3677 = vmatpush2.bf16.msra.mxu0 %v16793_v15  ;;  %3718 = vmatpush2.bf16.msra.mxu1 %v16921_v17  ;;  %v17001_v17 = vcombine.low %v518_v62, %v522_v63  ;;  %v494_v42 = vld [vmem:[#allocation2 + $0x8d0] sm:$0xff] }
 0x1c3   :  { %3678 = vmatprep.subr.bf16.mxu0 %v16786_v18  ;;  %3719 = vmatprep.subr.bf16.mxu1 %v16914_v19  ;;  %v17129_v19 = vcombine.low %v646_v0, %v650_v1  ;;  %v498_v43 = vld [vmem:[#allocation2 + $0x8f0] sm:$0xff] }
 0x1c4   :  { %v622_v44 = vld [vmem:[#allocation2 + $0xcd0] sm:$0xff] }
 0x1c5   :  { %v626_v45 = vld [vmem:[#allocation2 + $0xcf0] sm:$0xff] }
 0x1c6   :  { %3679 = vmatpush2.bf16.msra.mxu0 %v16785_v25  ;;  %3720 = vmatpush2.bf16.msra.mxu1 %v16913_v26  ;;  %v17122_v25 = vcombine.high %v638_v12, %v642_v13  ;;  %v502_v26 = vld [vmem:[#allocation2 + $0x910] sm:$0xff] }
 0x1c7   :  { %3680 = vmatprep.subr.bf16.mxu0 %v16778_v27  ;;  %3721 = vmatprep.subr.bf16.mxu1 %v16906_v29  ;;  %v506_v27 = vld [vmem:[#allocation2 + $0x930] sm:$0xff] }
 0x1c8   :  { %v630_v29 = vld [vmem:[#allocation2 + $0xd10] sm:$0xff] }
 0x1c9   :  { %v486_v51 = vld [vmem:[#allocation2 + $0x890] sm:$0xff] }
 0x1ca   :  { %3681 = vmatpush2.bf16.msra.mxu0 %v16777_v35  ;;  %3722 = vmatpush2.bf16.msra.mxu1 %v16905_v37  ;;  %v16986_v37 = vcombine.high %v502_v26, %v506_v27  ;;  %v490_v52 = vld [vmem:[#allocation2 + $0x8b0] sm:$0xff] }
 0x1cb   :  { %3682 = vmatprep.subr.bf16.mxu0 %v16770_v40  ;;  %3723 = vmatprep.subr.bf16.mxu1 %v16898_v41  ;;  %v17114_v41 = vcombine.high %v630_v29, %v634_v30  ;;  %v614_v53 = vld [vmem:[#allocation2 + $0xc90] sm:$0xff] }
 0x1cc   :  { %v618_v54 = vld [vmem:[#allocation2 + $0xcb0] sm:$0xff] }
 0x1cd   :  { %v478_v62 = vld [vmem:[#allocation2 + $0x850] sm:$0xff] }
 0x1ce   :  { %3683 = vmatpush2.bf16.msra.mxu0 %v16769_v46  ;;  %3724 = vmatpush2.bf16.msra.mxu1 %v16897_v48  ;;  %v16985_v46 = vcombine.low %v502_v26, %v506_v27  ;;  %v17113_v48 = vcombine.low %v630_v29, %v634_v30  ;;  %v482_v63 = vld [vmem:[#allocation2 + $0x870] sm:$0xff] }
 0x1cf   :  { %3684 = vmatprep.subr.bf16.mxu0 %v16762_v49  ;;  %3725 = vmatprep.subr.bf16.mxu1 %v16890_v50  ;;  %v16978_v49 = vcombine.high %v494_v42, %v498_v43  ;;  %v17106_v50 = vcombine.high %v622_v44, %v626_v45  ;;  %v606_v0 = vld [vmem:[#allocation2 + $0xc50] sm:$0xff] }
 0x1d0   :  { %v610_v1 = vld [vmem:[#allocation2 + $0xc70] sm:$0xff] }
 0x1d1   :  { %v470_v8 = vld [vmem:[#allocation2 + $0x810] sm:$0xff] }
 0x1d2   :  { %3685 = vmatpush2.bf16.msra.mxu0 %v16761_v55  ;;  %3726 = vmatpush2.bf16.msra.mxu1 %v16889_v56  ;;  %v16977_v55 = vcombine.low %v494_v42, %v498_v43  ;;  %v17105_v56 = vcombine.low %v622_v44, %v626_v45  ;;  %v474_v9 = vld [vmem:[#allocation2 + $0x830] sm:$0xff] }
 0x1d3   :  { %3736 = vmatprep.subr.bf16.mxu0 %v17010_v57  ;;  %3777 = vmatprep.subr.bf16.mxu1 %v17138_v61  ;;  %v16970_v57 = vcombine.high %v486_v51, %v490_v52  ;;  %v17098_v61 = vcombine.high %v614_v53, %v618_v54  ;;  %v586_v29 = vld [vmem:[#allocation2 + $0xbb0] sm:$0xff] }
 0x1d4   :  { %v710_v30 = vld [vmem:[#allocation2 + $0xf90] sm:$0xff] }
 0x1d5   :  { %v3442_v11 = vpop.f32.mrf.mxu0  ;;  %3687 = vmatmul.mubr.bf16.vlgmr.msra.gmra.mxu0 %v19495_v16  ;;  %v3483_v15 = vpop.f32.mrf.mxu1  ;;  %3728 = vmatmul.mubr.bf16.vlgmr.msra.gmra.mxu1 %v19500_v20  ;;  %v702_v42 = vld [vmem:[#allocation2 + $0xf50] sm:$0xff] }
 0x1d6   :  { %v3443_v14 = vadd.f32 %v3442_v11, %v19547_v36  ;;  %3737 = vmatpush1.bf16.msra.mxu0 %v17009_v2  ;;  %3778 = vmatpush1.bf16.msra.mxu1 %v17137_v3  ;;  %v16969_v2 = vcombine.low %v486_v51, %v490_v52  ;;  %v17097_v3 = vcombine.low %v614_v53, %v618_v54  ;;  %v598_v11 = vld [vmem:[#allocation2 + $0xc10] sm:$0xff] }
 0x1d7   :  { %v3444_v18 = vpop.f32.mrf.mxu0  ;;  %3738 = vmatprep.subr.bf16.mxu0 %v17002_v4  ;;  %v3485_v24 = vpop.f32.mrf.mxu1  ;;  %3779 = vmatprep.subr.bf16.mxu1 %v17130_v6  ;;  %v16962_v4 = vcombine.high %v478_v62, %v482_v63  ;;  %v17090_v6 = vcombine.high %v606_v0, %v610_v1  ;;  %v706_v43 = vld [vmem:[#allocation2 + $0xf70] sm:$0xff] }
 0x1d8   :  { %v19556_v22 = vadd.f32 %v3483_v15, %v3443_v14  ;;  %v3445_v23 = vadd.f32 %v3444_v18, %v19551_v47  ;;  %3768 = vmatprep.mubr.bf16.mxu0 %v19505_v28  ;;  %3809 = vmatprep.mubr.bf16.mxu1 %v19508_v31  ;;  %v17121_v47 = vcombine.low %v638_v12, %v642_v13  ;;  %v602_v12 = vld [vmem:[#allocation2 + $0xc30] sm:$0xff] }
 0x1d9   :  { %v3446_v36 = vpop.f32.mrf.mxu0  ;;  %v3487_v33 = vpop.f32.mrf.mxu1  ;;  %v16961_v13 = vcombine.low %v478_v62, %v482_v63  ;;  %v17089_v14 = vcombine.low %v606_v0, %v610_v1  ;;  %v16954_v15 = vcombine.high %v470_v8, %v474_v9  ;;  %v590_v18 = vld [vmem:[#allocation2 + $0xbd0] sm:$0xff]  ;;  %v17185_v54 = vcombine.low %v702_v42, %v706_v43 }
 0x1da   :  { %v19561_v32 = vadd.f32 %v3485_v24, %v3445_v23  ;;  %3739 = vmatpush1.bf16.msra.mxu0 %v17001_v17  ;;  %3780 = vmatpush1.bf16.msra.mxu1 %v17129_v19  ;;  %v17082_v17 = vcombine.high %v598_v11, %v602_v12  ;;  %v594_v19 = vld [vmem:[#allocation2 + $0xbf0] sm:$0xff]  ;;  %v16953_v24 = vcombine.low %v470_v8, %v474_v9 }
 0x1db   :  { %v3447_v35 = vpop.f32.mrf.mxu0  ;;  %3740 = vmatprep.subr.bf16.mxu0 %v16994_v21  ;;  %v3488_v40 = vpop.f32.mrf.mxu1  ;;  %3781 = vmatprep.subr.bf16.mxu1 %v17122_v25  ;;  %v718_v21 = vld [vmem:[#allocation2 + $0xfd0] sm:$0xff]  ;;  %v17081_v25 = vcombine.low %v598_v11, %v602_v12  ;;  %v17074_v26 = vcombine.high %v590_v18, %v594_v19 }
 0x1dc   :  { %v722_v23 = vld [vmem:[#allocation2 + $0xff0] sm:$0xff] }
 0x1dd   :  { %v17202_v27 = vcombine.high %v718_v21, %v722_v23  ;;  %v582_v36 = vld [vmem:[#allocation2 + $0xb90] sm:$0xff]  ;;  %v17201_v35 = vcombine.low %v718_v21, %v722_v23 }
 0x1de   :  { %3741 = vmatpush1.bf16.msra.mxu0 %v16993_v34  ;;  %3782 = vmatpush1.bf16.msra.mxu1 %v17121_v47  ;;  %v714_v33 = vld [vmem:[#allocation2 + $0xfb0] sm:$0xff]  ;;  %v17073_v34 = vcombine.low %v590_v18, %v594_v19  ;;  %v17066_v47 = vcombine.high %v582_v36, %v586_v29  ;;  %v17065_v44 = vcombine.low %v582_v36, %v586_v29 }
 0x1df   :  { %3742 = vmatprep.subr.bf16.mxu0 %v16986_v37  ;;  %3783 = vmatprep.subr.bf16.mxu1 %v17114_v41  ;;  %v17194_v37 = vcombine.high %v710_v30, %v714_v33  ;;  %v574_v40 = vld [vmem:[#allocation2 + $0xb50] sm:$0xff]  ;;  %v17193_v45 = vcombine.low %v710_v30, %v714_v33 }
 0x1e0   :  { %v578_v41 = vld [vmem:[#allocation2 + $0xb70] sm:$0xff] }
 0x1e1   :  { %v694_v51 = vld [vmem:[#allocation2 + $0xf10] sm:$0xff]  ;;  %v17057_v53 = vcombine.low %v574_v40, %v578_v41 }
 0x1e2   :  { %3743 = vmatpush1.bf16.msra.mxu0 %v16985_v46  ;;  %3784 = vmatpush1.bf16.msra.mxu1 %v17113_v48  ;;  %v17058_v46 = vcombine.high %v574_v40, %v578_v41  ;;  %v17186_v48 = vcombine.high %v702_v42, %v706_v43  ;;  %v698_v52 = vld [vmem:[#allocation2 + $0xf30] sm:$0xff]  ;;  %v399_v40 = vld [vmem:[#allocation2 + $0x5d8] sm:$0xff]  ;;  %v19564_v43 = vsub.s32 2, %v19531_v60 }
 0x1e3   :  { %3744 = vmatprep.subr.bf16.mxu0 %v16978_v49  ;;  %3785 = vmatprep.subr.bf16.mxu1 %v17106_v50  ;;  %v566_v49 = vld [vmem:[#allocation2 + $0xb10] sm:$0xff]  ;;  %v17177_v1 = vcombine.low %v694_v51, %v698_v52  ;;  %v403_v41 = vld [vmem:[#allocation2 + $0x5f8] sm:$0xff] }
 0x1e4   :  { %v570_v50 = vld [vmem:[#allocation2 + $0xb30] sm:$0xff] }
 0x1e5   :  { %v686_v62 = vld [vmem:[#allocation2 + $0xed0] sm:$0xff]  ;;  %v17049_v0 = vcombine.low %v566_v49, %v570_v50 }
 0x1e6   :  { %3745 = vmatpush1.bf16.msra.mxu0 %v16977_v55  ;;  %3786 = vmatpush1.bf16.msra.mxu1 %v17105_v56  ;;  %v17050_v55 = vcombine.high %v566_v49, %v570_v50  ;;  %v17178_v56 = vcombine.high %v694_v51, %v698_v52  ;;  %v690_v63 = vld [vmem:[#allocation2 + $0xef0] sm:$0xff]  ;;  %v263_v49 = vld [vmem:[#allocation2 + $0x198] sm:$0xff] }
 0x1e7   :  { %3746 = vmatprep.subr.bf16.mxu0 %v16970_v57  ;;  %3787 = vmatprep.subr.bf16.mxu1 %v17098_v61  ;;  %v558_v57 = vld [vmem:[#allocation2 + $0xad0] sm:$0xff]  ;;  %v17169_v12 = vcombine.low %v686_v62, %v690_v63  ;;  %v267_v50 = vld [vmem:[#allocation2 + $0x1b8] sm:$0xff] }
 0x1e8   :  { %v562_v61 = vld [vmem:[#allocation2 + $0xaf0] sm:$0xff]  ;;  %v391_v51 = vld [vmem:[#allocation2 + $0x598] sm:$0xff] }
 0x1e9   :  { %v678_v8 = vld [vmem:[#allocation2 + $0xe90] sm:$0xff]  ;;  %v17041_v11 = vcombine.low %v558_v57, %v562_v61  ;;  %v395_v52 = vld [vmem:[#allocation2 + $0x5b8] sm:$0xff] }
 0x1ea   :  { %3747 = vmatpush1.bf16.msra.mxu0 %v16969_v2  ;;  %3788 = vmatpush1.bf16.msra.mxu1 %v17097_v3  ;;  %v17042_v2 = vcombine.high %v558_v57, %v562_v61  ;;  %v17170_v3 = vcombine.high %v686_v62, %v690_v63  ;;  %v682_v9 = vld [vmem:[#allocation2 + $0xeb0] sm:$0xff]  ;;  %v16876_v61 = vcombine.high %v391_v51, %v395_v52  ;;  %v255_v62 = vld [vmem:[#allocation2 + $0x158] sm:$0xff] }
 0x1eb   :  { %3748 = vmatprep.subr.bf16.mxu0 %v16962_v4  ;;  %3789 = vmatprep.subr.bf16.mxu1 %v17090_v6  ;;  %v550_v4 = vld [vmem:[#allocation2 + $0xa90] sm:$0xff]  ;;  %v17161_v23 = vcombine.low %v678_v8, %v682_v9  ;;  %v259_v63 = vld [vmem:[#allocation2 + $0x178] sm:$0xff] }
 0x1ec   :  { %v554_v6 = vld [vmem:[#allocation2 + $0xab0] sm:$0xff] }
 0x1ed   :  { %v670_v18 = vld [vmem:[#allocation2 + $0xe50] sm:$0xff]  ;;  %v17033_v21 = vcombine.low %v550_v4, %v554_v6 }
 0x1ee   :  { %3749 = vmatpush1.bf16.msra.mxu0 %v16961_v13  ;;  %3790 = vmatpush1.bf16.msra.mxu1 %v17089_v14  ;;  %v17034_v13 = vcombine.high %v550_v4, %v554_v6  ;;  %v17162_v14 = vcombine.high %v678_v8, %v682_v9  ;;  %v674_v19 = vld [vmem:[#allocation2 + $0xe70] sm:$0xff]  ;;  %v16747_v6 = vcombine.low %v263_v49, %v267_v50 }
 0x1ef   :  { %3750 = vmatprep.subr.bf16.mxu0 %v16954_v15  ;;  %3791 = vmatprep.subr.bf16.mxu1 %v17082_v17  ;;  %v542_v15 = vld [vmem:[#allocation2 + $0xa50] sm:$0xff]  ;;  %v17153_v33 = vcombine.low %v670_v18, %v674_v19  ;;  %v16875_v9 = vcombine.low %v391_v51, %v395_v52  ;;  %v223_v52 = vld [vmem:[#allocation2 + $0x58] sm:$0xff] }
 0x1f0   :  { %v546_v17 = vld [vmem:[#allocation2 + $0xa70] sm:$0xff] }
 0x1f1   :  { %v662_v36 = vld [vmem:[#allocation2 + $0xe10] sm:$0xff]  ;;  %v17025_v30 = vcombine.low %v542_v15, %v546_v17 }
 0x1f2   :  { %3751 = vmatpush1.bf16.msra.mxu0 %v16953_v24  ;;  %3792 = vmatpush1.bf16.msra.mxu1 %v17081_v25  ;;  %v17026_v24 = vcombine.high %v542_v15, %v546_v17  ;;  %v17154_v25 = vcombine.high %v670_v18, %v674_v19  ;;  %v666_v29 = vld [vmem:[#allocation2 + $0xe30] sm:$0xff]  ;;  %v247_v15 = vld [vmem:[#allocation2 + $0x118] sm:$0xff] }
 0x1f3   :  { %3752 = vmatprep.subr.bf16.mxu0 %v17074_v26  ;;  %3793 = vmatprep.subr.bf16.mxu1 %v17202_v27  ;;  %v534_v26 = vld [vmem:[#allocation2 + $0xa10] sm:$0xff]  ;;  %v251_v17 = vld [vmem:[#allocation2 + $0x138] sm:$0xff] }
 0x1f4   :  { %v538_v27 = vld [vmem:[#allocation2 + $0xa30] sm:$0xff]  ;;  %v375_v19 = vld [vmem:[#allocation2 + $0x518] sm:$0xff] }
 0x1f5   :  { %v17017_v42 = vcombine.low %v534_v26, %v538_v27 }
 0x1f6   :  { %3753 = vmatpush2.bf16.msra.mxu0 %v17073_v34  ;;  %3794 = vmatpush2.bf16.msra.mxu1 %v17201_v35  ;;  %v17018_v34 = vcombine.high %v534_v26, %v538_v27  ;;  %v17146_v35 = vcombine.high %v662_v36, %v666_v29 }
 0x1f7   :  { %3754 = vmatprep.subr.bf16.mxu0 %v17066_v47  ;;  %3795 = vmatprep.subr.bf16.mxu1 %v17194_v37  ;;  %v271_v47 = vld [vmem:[#allocation2 + $0x1d8] sm:$0xff] }
 0x1f8   :  { %v275_v37 = vld [vmem:[#allocation2 + $0x1f8] sm:$0xff] }
 0x1fa   :  { %3755 = vmatpush2.bf16.msra.mxu0 %v17065_v44  ;;  %3796 = vmatpush2.bf16.msra.mxu1 %v17193_v45  ;;  %v17145_v44 = vcombine.low %v662_v36, %v666_v29  ;;  %v16756_v45 = vcombine.high %v271_v47, %v275_v37  ;;  %v16732_v36 = vcombine.high %v247_v15, %v251_v17 }
 0x1fb   :  { %3756 = vmatprep.subr.bf16.mxu0 %v17058_v46  ;;  %3797 = vmatprep.subr.bf16.mxu1 %v17186_v48  ;;  %v16884_v46 = vcombine.high %v399_v40, %v403_v41  ;;  %v19567_v48 = vsub.s32 3, %v19531_v60 }
 0x1fd   :  { %v741_v57 = vrot.slane %v19536_v7, %v19567_v48 }
 0x1fe   :  { %3757 = vmatpush2.bf16.msra.mxu0 %v17057_v53  ;;  %3798 = vmatpush2.bf16.msra.mxu1 %v17185_v54  ;;  %v737_v53 = vrot.slane %v19536_v7, %v19564_v43  ;;  %v16755_v54 = vcombine.low %v271_v47, %v275_v37  ;;  %v16731_v47 = vcombine.low %v247_v15, %v251_v17 }
 0x1ff   :  { %3758 = vmatprep.subr.bf16.mxu0 %v17050_v55  ;;  %3799 = vmatprep.subr.bf16.mxu1 %v17178_v56  ;;  %v16883_v55 = vcombine.low %v399_v40, %v403_v41  ;;  %v16748_v56 = vcombine.high %v263_v49, %v267_v50  ;;  %v231_v41 = vld [vmem:[#allocation2 + $0x98] sm:$0xff] }
 0x202   :  { %3759 = vmatpush2.bf16.msra.mxu0 %v17049_v0  ;;  %3800 = vmatpush2.bf16.msra.mxu1 %v17177_v1  ;;  %v383_v1 = vld [vmem:[#allocation2 + $0x558] sm:$0xff] }
 0x203   :  { %3760 = vmatprep.subr.bf16.mxu0 %v17042_v2  ;;  %3801 = vmatprep.subr.bf16.mxu1 %v17170_v3  ;;  %v387_v2 = vld [vmem:[#allocation2 + $0x578] sm:$0xff] }
 0x204   :  { %v16867_v27 = vcombine.low %v383_v1, %v387_v2 }
 0x206   :  { %3761 = vmatpush2.bf16.msra.mxu0 %v17041_v11  ;;  %3802 = vmatpush2.bf16.msra.mxu1 %v17169_v12  ;;  %v16740_v11 = vcombine.high %v255_v62, %v259_v63 }
 0x207   :  { %3762 = vmatprep.subr.bf16.mxu0 %v17034_v13  ;;  %3803 = vmatprep.subr.bf16.mxu1 %v17162_v14  ;;  %v16868_v14 = vcombine.high %v383_v1, %v387_v2  ;;  %v343_v1 = vld [vmem:[#allocation2 + $0x418] sm:$0xff] }
 0x208   :  { %v347_v2 = vld [vmem:[#allocation2 + $0x438] sm:$0xff] }
 0x209   :  { %v16827_v15 = vcombine.low %v343_v1, %v347_v2 }
 0x20a   :  { %3763 = vmatpush2.bf16.msra.mxu0 %v17033_v21  ;;  %3804 = vmatpush2.bf16.msra.mxu1 %v17161_v23  ;;  %v379_v21 = vld [vmem:[#allocation2 + $0x538] sm:$0xff] }
 0x20b   :  { %3764 = vmatprep.subr.bf16.mxu0 %v17026_v24  ;;  %3805 = vmatprep.subr.bf16.mxu1 %v17154_v25  ;;  %v16739_v25 = vcombine.low %v255_v62, %v259_v63  ;;  %v215_v63 = vld [vmem:[#allocation2 + $0x18] sm:$0xff] }
 0x20e   :  { %3765 = vmatpush2.bf16.msra.mxu0 %v17025_v30  ;;  %3806 = vmatpush2.bf16.msra.mxu1 %v17153_v33  ;;  %v16860_v30 = vcombine.high %v375_v19, %v379_v21  ;;  %v239_v33 = vld [vmem:[#allocation2 + $0xd8] sm:$0xff] }
 0x20f   :  { %3766 = vmatprep.subr.bf16.mxu0 %v17018_v34  ;;  %3807 = vmatprep.subr.bf16.mxu1 %v17146_v35  ;;  %v367_v34 = vld [vmem:[#allocation2 + $0x4d8] sm:$0xff] }
 0x210   :  { %v371_v35 = vld [vmem:[#allocation2 + $0x4f8] sm:$0xff] }
 0x211   :  { %v16852_v40 = vcombine.high %v367_v34, %v371_v35  ;;  %v16851_v49 = vcombine.low %v367_v34, %v371_v35  ;;  %v451_v34 = vld [vmem:[#allocation2 + $0x778] sm:$0xff] }
 0x212   :  { %3767 = vmatpush2.bf16.msra.mxu0 %v17017_v42  ;;  %3808 = vmatpush2.bf16.msra.mxu1 %v17145_v44  ;;  %v235_v42 = vld [vmem:[#allocation2 + $0xb8] sm:$0xff] }
 0x213   :  { %3818 = vmatprep.subr.bf16.mxu0 %v16756_v45  ;;  %3859 = vmatprep.subr.bf16.mxu1 %v16884_v46  ;;  %v359_v44 = vld [vmem:[#allocation2 + $0x498] sm:$0xff]  ;;  %v16716_v50 = vcombine.high %v231_v41, %v235_v42 }
 0x214   :  { %v363_v45 = vld [vmem:[#allocation2 + $0x4b8] sm:$0xff] }
 0x215   :  { %v3524_v0 = vpop.f32.mrf.mxu0  ;;  %3769 = vmatmul.mubr.bf16.vlgmr.msra.gmra.mxu0 %v19519_v38  ;;  %v3565_v4 = vpop.f32.mrf.mxu1  ;;  %3810 = vmatmul.mubr.bf16.vlgmr.msra.gmra.mxu1 %v19521_v39  ;;  %v16844_v51 = vcombine.high %v359_v44, %v363_v45 }
 0x216   :  { %v3525_v3 = vadd.f32 %v3524_v0, %v737_v53  ;;  %3819 = vmatpush1.bf16.msra.mxu0 %v16755_v54  ;;  %3860 = vmatpush1.bf16.msra.mxu1 %v16883_v55  ;;  %v227_v53 = vld [vmem:[#allocation2 + $0x78] sm:$0xff] }
 0x217   :  { %v3526_v8 = vpop.f32.mrf.mxu0  ;;  %3820 = vmatprep.subr.bf16.mxu0 %v16748_v56  ;;  %v3567_v13 = vpop.f32.mrf.mxu1  ;;  %3861 = vmatprep.subr.bf16.mxu1 %v16876_v61  ;;  %v351_v54 = vld [vmem:[#allocation2 + $0x458] sm:$0xff]  ;;  %v16715_v56 = vcombine.low %v231_v41, %v235_v42  ;;  %v16708_v61 = vcombine.high %v223_v52, %v227_v53 }
 0x218   :  { %v19575_v7 = vadd.f32 %v3565_v4, %v3525_v3  ;;  %v3527_v12 = vadd.f32 %v3526_v8, %v741_v57  ;;  %3850 = vmatprep.mubr.bf16.mxu0 %v19483_v58  ;;  %3891 = vmatprep.mubr.bf16.mxu1 %v19485_v59  ;;  %v243_v58 = vld [vmem:[#allocation2 + $0xf8] sm:$0xff]  ;;  %v16859_v59 = vcombine.low %v375_v19, %v379_v21 }
 0x219   :  { %v3528_v18 = vpop.f32.mrf.mxu0  ;;  %v3569_v24 = vpop.f32.mrf.mxu1  ;;  %v16724_v37 = vcombine.high %v239_v33, %v243_v58  ;;  %v16723_v46 = vcombine.low %v239_v33, %v243_v58  ;;  %v355_v55 = vld [vmem:[#allocation2 + $0x478] sm:$0xff]  ;;  %v16843_v57 = vcombine.low %v359_v44, %v363_v45  ;;  %v16707_v3 = vcombine.low %v223_v52, %v227_v53 }
 0x21a   :  { %v19579_v23 = vadd.f32 %v3567_v13, %v3527_v12  ;;  %3821 = vmatpush1.bf16.msra.mxu0 %v16747_v6  ;;  %3862 = vmatpush1.bf16.msra.mxu1 %v16875_v9  ;;  %v16836_v62 = vcombine.high %v351_v54, %v355_v55  ;;  %v219_v0 = vld [vmem:[#allocation2 + $0x38] sm:$0xff]  ;;  %v16835_v4 = vcombine.low %v351_v54, %v355_v55 }
 0x21b   :  { %v3529_v26 = vpop.f32.mrf.mxu0  ;;  %3822 = vmatprep.subr.bf16.mxu0 %v16740_v11  ;;  %v3570_v29 = vpop.f32.mrf.mxu1  ;;  %3863 = vmatprep.subr.bf16.mxu1 %v16868_v14  ;;  %v16700_v6 = vcombine.high %v215_v63, %v219_v0  ;;  %v16828_v8 = vcombine.high %v343_v1, %v347_v2  ;;  %v335_v9 = vld [vmem:[#allocation2 + $0x3d8] sm:$0xff]  ;;  %v16699_v14 = vcombine.low %v215_v63, %v219_v0 }
 0x21c   :  { %v339_v11 = vld [vmem:[#allocation2 + $0x3f8] sm:$0xff] }
 0x21d   :  { %v463_v12 = vld [vmem:[#allocation2 + $0x7d8] sm:$0xff]  ;;  %v16820_v17 = vcombine.high %v335_v9, %v339_v11  ;;  %v16819_v26 = vcombine.low %v335_v9, %v339_v11 }
 0x21e   :  { %3823 = vmatpush1.bf16.msra.mxu0 %v16739_v25  ;;  %3864 = vmatpush1.bf16.msra.mxu1 %v16867_v27  ;;  %v467_v13 = vld [vmem:[#allocation2 + $0x7f8] sm:$0xff] }
 0x21f   :  { %3824 = vmatprep.subr.bf16.mxu0 %v16732_v36  ;;  %3865 = vmatprep.subr.bf16.mxu1 %v16860_v30  ;;  %v16948_v18 = vcombine.high %v463_v12, %v467_v13  ;;  %v327_v19 = vld [vmem:[#allocation2 + $0x398] sm:$0xff]  ;;  %v16947_v27 = vcombine.low %v463_v12, %v467_v13 }
 0x220   :  { %v331_v21 = vld [vmem:[#allocation2 + $0x3b8] sm:$0xff] }
 0x221   :  { %v455_v24 = vld [vmem:[#allocation2 + $0x798] sm:$0xff]  ;;  %v16812_v36 = vcombine.high %v327_v19, %v331_v21  ;;  %v16811_v35 = vcombine.low %v327_v19, %v331_v21 }
 0x222   :  { %3825 = vmatpush1.bf16.msra.mxu0 %v16731_v47  ;;  %3866 = vmatpush1.bf16.msra.mxu1 %v16859_v59  ;;  %v459_v25 = vld [vmem:[#allocation2 + $0x7b8] sm:$0xff] }
 0x223   :  { %3826 = vmatprep.subr.bf16.mxu0 %v16724_v37  ;;  %3867 = vmatprep.subr.bf16.mxu1 %v16852_v40  ;;  %v16940_v29 = vcombine.high %v455_v24, %v459_v25  ;;  %v319_v30 = vld [vmem:[#allocation2 + $0x358] sm:$0xff]  ;;  %v16939_v47 = vcombine.low %v455_v24, %v459_v25 }
 0x224   :  { %v323_v33 = vld [vmem:[#allocation2 + $0x378] sm:$0xff] }
 0x225   :  { %v447_v58 = vld [vmem:[#allocation2 + $0x758] sm:$0xff]  ;;  %v16804_v59 = vcombine.high %v319_v30, %v323_v33  ;;  %v16803_v45 = vcombine.low %v319_v30, %v323_v33 }
 0x226   :  { %3827 = vmatpush1.bf16.msra.mxu0 %v16723_v46  ;;  %3868 = vmatpush1.bf16.msra.mxu1 %v16851_v49  ;;  %v16932_v37 = vcombine.high %v447_v58, %v451_v34  ;;  %v311_v40 = vld [vmem:[#allocation2 + $0x318] sm:$0xff]  ;;  %v16931_v46 = vcombine.low %v447_v58, %v451_v34 }
 0x227   :  { %3828 = vmatprep.subr.bf16.mxu0 %v16716_v50  ;;  %3869 = vmatprep.subr.bf16.mxu1 %v16844_v51  ;;  %v315_v41 = vld [vmem:[#allocation2 + $0x338] sm:$0xff] }
 0x228   :  { %v439_v42 = vld [vmem:[#allocation2 + $0x718] sm:$0xff]  ;;  %v16796_v49 = vcombine.high %v311_v40, %v315_v41  ;;  %v16795_v55 = vcombine.low %v311_v40, %v315_v41 }
 0x229   :  { %v443_v44 = vld [vmem:[#allocation2 + $0x738] sm:$0xff] }
 0x22a   :  { %3829 = vmatpush1.bf16.msra.mxu0 %v16715_v56  ;;  %3870 = vmatpush1.bf16.msra.mxu1 %v16843_v57  ;;  %v16924_v50 = vcombine.high %v439_v42, %v443_v44  ;;  %v303_v51 = vld [vmem:[#allocation2 + $0x2d8] sm:$0xff]  ;;  %v16923_v56 = vcombine.low %v439_v42, %v443_v44 }
 0x22b   :  { %3830 = vmatprep.subr.bf16.mxu0 %v16708_v61  ;;  %3871 = vmatprep.subr.bf16.mxu1 %v16836_v62  ;;  %v307_v52 = vld [vmem:[#allocation2 + $0x2f8] sm:$0xff] }
 0x22c   :  { %v431_v53 = vld [vmem:[#allocation2 + $0x6d8] sm:$0xff]  ;;  %v16788_v57 = vcombine.high %v303_v51, %v307_v52  ;;  %v16787_v2 = vcombine.low %v303_v51, %v307_v52 }
 0x22d   :  { %v435_v54 = vld [vmem:[#allocation2 + $0x6f8] sm:$0xff] }
 0x22e   :  { %3831 = vmatpush1.bf16.msra.mxu0 %v16707_v3  ;;  %3872 = vmatpush1.bf16.msra.mxu1 %v16835_v4  ;;  %v16916_v61 = vcombine.high %v431_v53, %v435_v54  ;;  %v295_v62 = vld [vmem:[#allocation2 + $0x298] sm:$0xff]  ;;  %v16915_v3 = vcombine.low %v431_v53, %v435_v54 }
 0x22f   :  { %3832 = vmatprep.subr.bf16.mxu0 %v16700_v6  ;;  %3873 = vmatprep.subr.bf16.mxu1 %v16828_v8  ;;  %v299_v63 = vld [vmem:[#allocation2 + $0x2b8] sm:$0xff] }
 0x230   :  { %v423_v0 = vld [vmem:[#allocation2 + $0x698] sm:$0xff]  ;;  %v16780_v4 = vcombine.high %v295_v62, %v299_v63  ;;  %v16779_v13 = vcombine.low %v295_v62, %v299_v63 }
 0x231   :  { %v427_v1 = vld [vmem:[#allocation2 + $0x6b8] sm:$0xff] }
 0x232   :  { %3833 = vmatpush1.bf16.msra.mxu0 %v16699_v14  ;;  %3874 = vmatpush1.bf16.msra.mxu1 %v16827_v15  ;;  %v16908_v6 = vcombine.high %v423_v0, %v427_v1  ;;  %v287_v8 = vld [vmem:[#allocation2 + $0x258] sm:$0xff]  ;;  %v16907_v14 = vcombine.low %v423_v0, %v427_v1 }
 0x233   :  { %3834 = vmatprep.subr.bf16.mxu0 %v16820_v17  ;;  %3875 = vmatprep.subr.bf16.mxu1 %v16948_v18  ;;  %v291_v9 = vld [vmem:[#allocation2 + $0x278] sm:$0xff] }
 0x234   :  { %v415_v11 = vld [vmem:[#allocation2 + $0x658] sm:$0xff]  ;;  %v16772_v15 = vcombine.high %v287_v8, %v291_v9  ;;  %v16771_v25 = vcombine.low %v287_v8, %v291_v9 }
 0x235   :  { %v419_v12 = vld [vmem:[#allocation2 + $0x678] sm:$0xff] }
 0x236   :  { %3835 = vmatpush2.bf16.msra.mxu0 %v16819_v26  ;;  %3876 = vmatpush2.bf16.msra.mxu1 %v16947_v27  ;;  %v16900_v17 = vcombine.high %v415_v11, %v419_v12  ;;  %v279_v18 = vld [vmem:[#allocation2 + $0x218] sm:$0xff]  ;;  %v16899_v26 = vcombine.low %v415_v11, %v419_v12 }
 0x237   :  { %3836 = vmatprep.subr.bf16.mxu0 %v16812_v36  ;;  %3877 = vmatprep.subr.bf16.mxu1 %v16940_v29  ;;  %v283_v19 = vld [vmem:[#allocation2 + $0x238] sm:$0xff] }
 0x238   :  { %v407_v21 = vld [vmem:[#allocation2 + $0x618] sm:$0xff]  ;;  %v16764_v27 = vcombine.high %v279_v18, %v283_v19  ;;  %v16763_v34 = vcombine.low %v279_v18, %v283_v19 }
 0x239   :  { %v411_v24 = vld [vmem:[#allocation2 + $0x638] sm:$0xff] }
 0x23a   :  { %3837 = vmatpush2.bf16.msra.mxu0 %v16811_v35  ;;  %3878 = vmatpush2.bf16.msra.mxu1 %v16939_v47  ;;  %v16892_v36 = vcombine.high %v407_v21, %v411_v24  ;;  %v527_v29 = vld [vmem:[#allocation2 + $0x9d8] sm:$0xff]  ;;  %v16891_v35 = vcombine.low %v407_v21, %v411_v24 }
 0x23b   :  { %3838 = vmatprep.subr.bf16.mxu0 %v16804_v59  ;;  %3879 = vmatprep.subr.bf16.mxu1 %v16932_v37  ;;  %v531_v30 = vld [vmem:[#allocation2 + $0x9f8] sm:$0xff] }
 0x23c   :  { %v655_v33 = vld [vmem:[#allocation2 + $0xdd8] sm:$0xff]  ;;  %v17012_v47 = vcombine.high %v527_v29, %v531_v30  ;;  %v17011_v44 = vcombine.low %v527_v29, %v531_v30 }
 0x23d   :  { %v659_v58 = vld [vmem:[#allocation2 + $0xdf8] sm:$0xff] }
 0x23e   :  { %3839 = vmatpush2.bf16.msra.mxu0 %v16803_v45  ;;  %3880 = vmatpush2.bf16.msra.mxu1 %v16931_v46  ;;  %v17140_v59 = vcombine.high %v655_v33, %v659_v58  ;;  %v519_v37 = vld [vmem:[#allocation2 + $0x998] sm:$0xff]  ;;  %v17139_v45 = vcombine.low %v655_v33, %v659_v58 }
 0x23f   :  { %3840 = vmatprep.subr.bf16.mxu0 %v16796_v49  ;;  %3881 = vmatprep.subr.bf16.mxu1 %v16924_v50  ;;  %v523_v40 = vld [vmem:[#allocation2 + $0x9b8] sm:$0xff] }
 0x240   :  { %v647_v41 = vld [vmem:[#allocation2 + $0xd98] sm:$0xff]  ;;  %v17004_v46 = vcombine.high %v519_v37, %v523_v40 }
 0x241   :  { %v651_v42 = vld [vmem:[#allocation2 + $0xdb8] sm:$0xff] }
 0x242   :  { %3841 = vmatpush2.bf16.msra.mxu0 %v16795_v55  ;;  %3882 = vmatpush2.bf16.msra.mxu1 %v16923_v56  ;;  %v17132_v49 = vcombine.high %v647_v41, %v651_v42  ;;  %v511_v50 = vld [vmem:[#allocation2 + $0x958] sm:$0xff]  ;;  %v17131_v62 = vcombine.low %v647_v41, %v651_v42 }
 0x243   :  { %3842 = vmatprep.subr.bf16.mxu0 %v16788_v57  ;;  %3883 = vmatprep.subr.bf16.mxu1 %v16916_v61  ;;  %v515_v51 = vld [vmem:[#allocation2 + $0x978] sm:$0xff]  ;;  %v17003_v57 = vcombine.low %v519_v37, %v523_v40 }
 0x244   :  { %v639_v53 = vld [vmem:[#allocation2 + $0xd58] sm:$0xff]  ;;  %v16996_v63 = vcombine.high %v511_v50, %v515_v51  ;;  %v16995_v8 = vcombine.low %v511_v50, %v515_v51 }
 0x245   :  { %v643_v54 = vld [vmem:[#allocation2 + $0xd78] sm:$0xff] }
 0x246   :  { %3843 = vmatpush2.bf16.msra.mxu0 %v16787_v2  ;;  %3884 = vmatpush2.bf16.msra.mxu1 %v16915_v3  ;;  %v503_v2 = vld [vmem:[#allocation2 + $0x918] sm:$0xff]  ;;  %v17123_v11 = vcombine.low %v639_v53, %v643_v54 }
 0x247   :  { %3844 = vmatprep.subr.bf16.mxu0 %v16780_v4  ;;  %3885 = vmatprep.subr.bf16.mxu1 %v16908_v6  ;;  %v507_v3 = vld [vmem:[#allocation2 + $0x938] sm:$0xff] }
 0x248   :  { %v635_v4 = vld [vmem:[#allocation2 + $0xd38] sm:$0xff]  ;;  %v16988_v12 = vcombine.high %v503_v2, %v507_v3  ;;  %v16987_v19 = vcombine.low %v503_v2, %v507_v3 }
 0x249   :  { %v623_v18 = vld [vmem:[#allocation2 + $0xcd8] sm:$0xff] }
 0x24a   :  { %3845 = vmatpush2.bf16.msra.mxu0 %v16779_v13  ;;  %3886 = vmatpush2.bf16.msra.mxu1 %v16907_v14  ;;  %v583_v3 = vld [vmem:[#allocation2 + $0xb98] sm:$0xff] }
 0x24b   :  { %3846 = vmatprep.subr.bf16.mxu0 %v16772_v15  ;;  %3887 = vmatprep.subr.bf16.mxu1 %v16900_v17  ;;  %v495_v15 = vld [vmem:[#allocation2 + $0x8d8] sm:$0xff] }
 0x24c   :  { %v499_v17 = vld [vmem:[#allocation2 + $0x8f8] sm:$0xff] }
 0x24d   :  { %v16980_v21 = vcombine.high %v495_v15, %v499_v17  ;;  %v16979_v29 = vcombine.low %v495_v15, %v499_v17  ;;  %v707_v15 = vld [vmem:[#allocation2 + $0xf78] sm:$0xff] }
 0x24e   :  { %3847 = vmatpush2.bf16.msra.mxu0 %v16771_v25  ;;  %3888 = vmatpush2.bf16.msra.mxu1 %v16899_v26  ;;  %v487_v25 = vld [vmem:[#allocation2 + $0x898] sm:$0xff] }
 0x24f   :  { %3848 = vmatprep.subr.bf16.mxu0 %v16764_v27  ;;  %3889 = vmatprep.subr.bf16.mxu1 %v16892_v36  ;;  %v491_v26 = vld [vmem:[#allocation2 + $0x8b8] sm:$0xff] }
 0x250   :  { %v615_v27 = vld [vmem:[#allocation2 + $0xc98] sm:$0xff]  ;;  %v16972_v33 = vcombine.high %v487_v25, %v491_v26  ;;  %v16971_v37 = vcombine.low %v487_v25, %v491_v26 }
 0x251   :  { %v619_v36 = vld [vmem:[#allocation2 + $0xcb8] sm:$0xff] }
 0x252   :  { %3849 = vmatpush2.bf16.msra.mxu0 %v16763_v34  ;;  %3890 = vmatpush2.bf16.msra.mxu1 %v16891_v35  ;;  %v17100_v58 = vcombine.high %v615_v27, %v619_v36  ;;  %v479_v34 = vld [vmem:[#allocation2 + $0x858] sm:$0xff]  ;;  %v17099_v40 = vcombine.low %v615_v27, %v619_v36 }
 0x253   :  { %3900 = vmatprep.subr.bf16.mxu0 %v17012_v47  ;;  %3941 = vmatprep.subr.bf16.mxu1 %v17140_v59  ;;  %v483_v35 = vld [vmem:[#allocation2 + $0x878] sm:$0xff] }
 0x254   :  { %v607_v47 = vld [vmem:[#allocation2 + $0xc58] sm:$0xff]  ;;  %v16964_v41 = vcombine.high %v479_v34, %v483_v35  ;;  %v16963_v50 = vcombine.low %v479_v34, %v483_v35 }
 0x255   :  { %v3606_v52 = vpop.f32.mrf.mxu0  ;;  %3851 = vmatmul.mubr.bf16.vlgmr.msra.gmra.mxu0 %v19495_v16  ;;  %v3647_v56 = vpop.f32.mrf.mxu1  ;;  %3892 = vmatmul.mubr.bf16.vlgmr.msra.gmra.mxu1 %v19500_v20  ;;  %v17124_v16 = vcombine.high %v639_v53, %v643_v54  ;;  %v631_v20 = vld [vmem:[#allocation2 + $0xd18] sm:$0xff] }
 0x256   :  { %v3607_v55 = vadd.f32 %v3606_v52, %v19575_v7  ;;  %3901 = vmatpush1.bf16.msra.mxu0 %v17011_v44  ;;  %3942 = vmatpush1.bf16.msra.mxu1 %v17139_v45  ;;  %v17116_v14 = vcombine.high %v631_v20, %v635_v4  ;;  %v611_v59 = vld [vmem:[#allocation2 + $0xc78] sm:$0xff] }
 0x257   :  { %v19584_v61 = vpop.f32.mrf.mxu0  ;;  %3902 = vmatprep.subr.bf16.mxu0 %v17004_v46  ;;  %v19588_v1 = vpop.f32.mrf.mxu1  ;;  %3943 = vmatprep.subr.bf16.mxu1 %v17132_v49  ;;  %v17092_v42 = vcombine.high %v607_v47, %v611_v59  ;;  %v471_v44 = vld [vmem:[#allocation2 + $0x818] sm:$0xff]  ;;  %v17091_v51 = vcombine.low %v607_v47, %v611_v59 }
 0x258   :  { %v19586_v0 = vadd.f32 %v3647_v56, %v3607_v55  ;;  %3932 = vmatprep.mubr.bf16.mxu0 %v19505_v28  ;;  %3973 = vmatprep.mubr.bf16.mxu1 %v19508_v31  ;;  %v627_v28 = vld [vmem:[#allocation2 + $0xcf8] sm:$0xff]  ;;  %v17115_v31 = vcombine.low %v631_v20, %v635_v4 }
 0x259   :  { %v3610_v7 = vpop.f32.mrf.mxu0  ;;  %v3651_v6 = vpop.f32.mrf.mxu1  ;;  %v17108_v24 = vcombine.high %v623_v18, %v627_v28  ;;  %v17107_v30 = vcombine.low %v623_v18, %v627_v28  ;;  %v475_v45 = vld [vmem:[#allocation2 + $0x838] sm:$0xff] }
 0x25a   :  { %3903 = vmatpush1.bf16.msra.mxu0 %v17003_v57  ;;  %3944 = vmatpush1.bf16.msra.mxu1 %v17131_v62  ;;  %v599_v46 = vld [vmem:[#allocation2 + $0xc18] sm:$0xff]  ;;  %v16956_v52 = vcombine.high %v471_v44, %v475_v45  ;;  %v16955_v62 = vcombine.low %v471_v44, %v475_v45 }
 0x25b   :  { %v3611_v9 = vpop.f32.mrf.mxu0  ;;  %3904 = vmatprep.subr.bf16.mxu0 %v16996_v63  ;;  %v3652_v13 = vpop.f32.mrf.mxu1  ;;  %3945 = vmatprep.subr.bf16.mxu1 %v17124_v16  ;;  %v603_v49 = vld [vmem:[#allocation2 + $0xc38] sm:$0xff] }
 0x25c   :  { %v17084_v53 = vcombine.high %v599_v46, %v603_v49  ;;  %v591_v54 = vld [vmem:[#allocation2 + $0xbd8] sm:$0xff]  ;;  %v17083_v63 = vcombine.low %v599_v46, %v603_v49 }
 0x25d   :  { %v595_v55 = vld [vmem:[#allocation2 + $0xbf8] sm:$0xff] }
 0x25e   :  { %3905 = vmatpush1.bf16.msra.mxu0 %v16995_v8  ;;  %3946 = vmatpush1.bf16.msra.mxu1 %v17123_v11  ;;  %v719_v56 = vld [vmem:[#allocation2 + $0xfd8] sm:$0xff]  ;;  %v17076_v16 = vcombine.high %v591_v54, %v595_v55  ;;  %v17075_v6 = vcombine.low %v591_v54, %v595_v55 }
 0x25f   :  { %3906 = vmatprep.subr.bf16.mxu0 %v16988_v12  ;;  %3947 = vmatprep.subr.bf16.mxu1 %v17116_v14  ;;  %v723_v57 = vld [vmem:[#allocation2 + $0xff8] sm:$0xff] }
 0x260   :  { %v17204_v2 = vcombine.high %v719_v56, %v723_v57  ;;  %v587_v7 = vld [vmem:[#allocation2 + $0xbb8] sm:$0xff]  ;;  %v17203_v8 = vcombine.low %v719_v56, %v723_v57 }
 0x261   :  { %v711_v20 = vld [vmem:[#allocation2 + $0xf98] sm:$0xff]  ;;  %v17068_v9 = vcombine.high %v583_v3, %v587_v7  ;;  %v17067_v17 = vcombine.low %v583_v3, %v587_v7  ;;  %v3609_v7 = vadd.f32 %v19584_v61, %v19579_v23 }
 0x262   :  { %3907 = vmatpush1.bf16.msra.mxu0 %v16987_v19  ;;  %3948 = vmatpush1.bf16.msra.mxu1 %v17115_v31  ;;  %v715_v4 = vld [vmem:[#allocation2 + $0xfb8] sm:$0xff] }
 0x263   :  { %3908 = vmatprep.subr.bf16.mxu0 %v16980_v21  ;;  %3949 = vmatprep.subr.bf16.mxu1 %v17108_v24  ;;  %v17196_v11 = vcombine.high %v711_v20, %v715_v4  ;;  %v575_v12 = vld [vmem:[#allocation2 + $0xb58] sm:$0xff]  ;;  %v17195_v18 = vcombine.low %v711_v20, %v715_v4 }
 0x264   :  { %v579_v13 = vld [vmem:[#allocation2 + $0xb78] sm:$0xff] }
 0x265   :  { %v703_v14 = vld [vmem:[#allocation2 + $0xf58] sm:$0xff]  ;;  %v17060_v28 = vcombine.high %v575_v12, %v579_v13  ;;  %v17059_v26 = vcombine.low %v575_v12, %v579_v13  ;;  %v4182_v12 = vld [vmem:[#allocation6 + $0x5c0] sm:$0xff] }
 0x266   :  { %3909 = vmatpush1.bf16.msra.mxu0 %v16979_v29  ;;  %3950 = vmatpush1.bf16.msra.mxu1 %v17107_v30  ;;  %v17188_v19 = vcombine.high %v703_v14, %v707_v15  ;;  %v567_v31 = vld [vmem:[#allocation2 + $0xb18] sm:$0xff]  ;;  %v17187_v27 = vcombine.low %v703_v14, %v707_v15  ;;  %v4186_v13 = vld [vmem:[#allocation6 + $0x5e0] sm:$0xff]  ;;  %v3650_v14 = vadd.f32 %v19588_v1, %v3609_v7 }
 0x267   :  { %3910 = vmatprep.subr.bf16.mxu0 %v16972_v33  ;;  %3951 = vmatprep.subr.bf16.mxu1 %v17100_v58  ;;  %v571_v21 = vld [vmem:[#allocation2 + $0xb38] sm:$0xff]  ;;  %v4150_v7 = vld [vmem:[#allocation6 + $0x4c0] sm:$0xff] }
 0x268   :  { %v695_v24 = vld [vmem:[#allocation2 + $0xf18] sm:$0xff]  ;;  %v17052_v36 = vcombine.high %v567_v31, %v571_v21  ;;  %v17051_v35 = vcombine.low %v567_v31, %v571_v21  ;;  %v4050_v31 = vld [vmem:[#allocation6 + $0x1a0] sm:$0xff]  ;;  %v3985_v21 = vmax.f32 %v3650_v14, 0.0 }
 0x269   :  { %v699_v25 = vld [vmem:[#allocation2 + $0xf38] sm:$0xff]  ;;  %v4146_v14 = vld [vmem:[#allocation6 + $0x4a0] sm:$0xff] }
 0x26a   :  { %3911 = vmatpush1.bf16.msra.mxu0 %v16971_v37  ;;  %3952 = vmatpush1.bf16.msra.mxu1 %v17099_v40  ;;  %v17180_v29 = vcombine.high %v695_v24, %v699_v25  ;;  %v559_v30 = vld [vmem:[#allocation2 + $0xad8] sm:$0xff]  ;;  %v17179_v47 = vcombine.low %v695_v24, %v699_v25  ;;  %v19599_v24 = vld [vmem:[#allocation4] sm:$0xff] }
 0x26b   :  { %3912 = vmatprep.subr.bf16.mxu0 %v16964_v41  ;;  %3953 = vmatprep.subr.bf16.mxu1 %v17092_v42  ;;  %v563_v33 = vld [vmem:[#allocation2 + $0xaf8] sm:$0xff] }
 0x26c   :  { %v687_v58 = vld [vmem:[#allocation2 + $0xed8] sm:$0xff]  ;;  %v17044_v59 = vcombine.high %v559_v30, %v563_v33  ;;  %v17043_v45 = vcombine.low %v559_v30, %v563_v33  ;;  %v4038_v30 = vld [vmem:[#allocation6 + $0x140] sm:$0xff] }
 0x26d   :  { %v691_v34 = vld [vmem:[#allocation2 + $0xef8] sm:$0xff]  ;;  %v4042_v33 = vld [vmem:[#allocation6 + $0x160] sm:$0xff] }
 0x26e   :  { %3913 = vmatpush1.bf16.msra.mxu0 %v16963_v50  ;;  %3954 = vmatpush1.bf16.msra.mxu1 %v17091_v51  ;;  %v17172_v37 = vcombine.high %v687_v58, %v691_v34  ;;  %v551_v40 = vld [vmem:[#allocation2 + $0xa98] sm:$0xff]  ;;  %v17171_v46 = vcombine.low %v687_v58, %v691_v34 }
 0x26f   :  { %3914 = vmatprep.subr.bf16.mxu0 %v16956_v52  ;;  %3955 = vmatprep.subr.bf16.mxu1 %v17084_v53  ;;  %v555_v41 = vld [vmem:[#allocation2 + $0xab8] sm:$0xff] }
 0x270   :  { %v679_v42 = vld [vmem:[#allocation2 + $0xe98] sm:$0xff]  ;;  %v17036_v49 = vcombine.high %v551_v40, %v555_v41  ;;  %v17035_v55 = vcombine.low %v551_v40, %v555_v41 }
 0x271   :  { %v683_v44 = vld [vmem:[#allocation2 + $0xeb8] sm:$0xff] }
 0x272   :  { %3915 = vmatpush1.bf16.msra.mxu0 %v16955_v62  ;;  %3956 = vmatpush1.bf16.msra.mxu1 %v17083_v63  ;;  %v17164_v50 = vcombine.high %v679_v42, %v683_v44  ;;  %v543_v51 = vld [vmem:[#allocation2 + $0xa58] sm:$0xff]  ;;  %v17163_v56 = vcombine.low %v679_v42, %v683_v44 }
 0x273   :  { %3916 = vmatprep.subr.bf16.mxu0 %v17076_v16  ;;  %3957 = vmatprep.subr.bf16.mxu1 %v17204_v2  ;;  %v547_v52 = vld [vmem:[#allocation2 + $0xa78] sm:$0xff] }
 0x274   :  { %v671_v53 = vld [vmem:[#allocation2 + $0xe58] sm:$0xff]  ;;  %v17028_v57 = vcombine.high %v543_v51, %v547_v52  ;;  %v17027_v20 = vcombine.low %v543_v51, %v547_v52  ;;  %v4034_v51 = vld [vmem:[#allocation6 + $0x120] sm:$0xff] }
 0x275   :  { %v675_v54 = vld [vmem:[#allocation2 + $0xe78] sm:$0xff]  ;;  %v4158_v52 = vld [vmem:[#allocation6 + $0x500] sm:$0xff] }
 0x276   :  { %3917 = vmatpush2.bf16.msra.mxu0 %v17075_v6  ;;  %3958 = vmatpush2.bf16.msra.mxu1 %v17203_v8  ;;  %v17156_v62 = vcombine.high %v671_v53, %v675_v54  ;;  %v535_v63 = vld [vmem:[#allocation2 + $0xa18] sm:$0xff]  ;;  %v17155_v4 = vcombine.low %v671_v53, %v675_v54  ;;  %v4162_v53 = vld [vmem:[#allocation6 + $0x520] sm:$0xff] }
 0x277   :  { %3918 = vmatprep.subr.bf16.mxu0 %v17068_v9  ;;  %3959 = vmatprep.subr.bf16.mxu1 %v17196_v11  ;;  %v539_v16 = vld [vmem:[#allocation2 + $0xa38] sm:$0xff]  ;;  %v4054_v9 = vld [vmem:[#allocation6 + $0x1c0] sm:$0xff] }
 0x278   :  { %v663_v2 = vld [vmem:[#allocation2 + $0xe18] sm:$0xff]  ;;  %v17020_v6 = vcombine.high %v535_v63, %v539_v16  ;;  %v4058_v11 = vld [vmem:[#allocation6 + $0x1e0] sm:$0xff]  ;;  %v17019_v15 = vcombine.low %v535_v63, %v539_v16  ;;  %v17366_v16 = vcombine.high %v4158_v52, %v4162_v53 }
 0x279   :  { %v667_v3 = vld [vmem:[#allocation2 + $0xe38] sm:$0xff]  ;;  %v17262_v61 = vcombine.high %v4054_v9, %v4058_v11  ;;  %v17261_v25 = vcombine.low %v4054_v9, %v4058_v11  ;;  %v4014_v11 = vld [vmem:[#allocation6 + $0x80] sm:$0xff] }
 0x27a   :  { %3919 = vmatpush2.bf16.msra.mxu0 %v17067_v17  ;;  %3960 = vmatpush2.bf16.msra.mxu1 %v17195_v18  ;;  %v17148_v8 = vcombine.high %v663_v2, %v667_v3  ;;  %v19596_v17 = vsub.s32 4, %v19531_v60  ;;  %v17147_v23 = vcombine.low %v663_v2, %v667_v3  ;;  %v17390_v18 = vcombine.high %v4182_v12, %v4186_v13  ;;  %v4022_v2 = vld [vmem:[#allocation6 + $0xc0] sm:$0xff] }
 0x27b   :  { %3920 = vmatprep.subr.bf16.mxu0 %v17060_v28  ;;  %3961 = vmatprep.subr.bf16.mxu1 %v17188_v19  ;;  %v3983_v28 = vmax.f32 %v19561_v32, 0.0  ;;  %v4046_v19 = vld [vmem:[#allocation6 + $0x180] sm:$0xff] }
 0x27c   :  { %v745_v1 = vrot.slane %v19599_v24, %v19596_v17  ;;  %v17253_v41 = vcombine.low %v4046_v19, %v4050_v31  ;;  %v4026_v3 = vld [vmem:[#allocation6 + $0xe0] sm:$0xff] }
 0x27d   :  { %v19603_v32 = vpack.c.bf16 %v3983_v28, %v3983_v28  ;;  %v4006_v28 = vld [vmem:[#allocation6 + $0x40] sm:$0xff] }
 0x27e   :  { %3921 = vmatpush2.bf16.msra.mxu0 %v17059_v26  ;;  %3962 = vmatpush2.bf16.msra.mxu1 %v17187_v27  ;;  %v4174_v26 = vld [vmem:[#allocation6 + $0x580] sm:$0xff] }
 0x27f   :  { %3922 = vmatprep.subr.bf16.mxu0 %v17052_v36  ;;  %3963 = vmatprep.subr.bf16.mxu1 %v17180_v29  ;;  %v4178_v27 = vld [vmem:[#allocation6 + $0x5a0] sm:$0xff]  ;;  %v17389_v36 = vcombine.low %v4182_v12, %v4186_v13  ;;  %v17254_v29 = vcombine.high %v4046_v19, %v4050_v31 }
 0x280   :  { %v17382_v34 = vcombine.high %v4174_v26, %v4178_v27  ;;  %v17381_v44 = vcombine.low %v4174_v26, %v4178_v27  ;;  %v4018_v12 = vld [vmem:[#allocation6 + $0xa0] sm:$0xff] }
 0x281   :  { %v4142_v13 = vld [vmem:[#allocation6 + $0x480] sm:$0xff] }
 0x282   :  { %3923 = vmatpush2.bf16.msra.mxu0 %v17051_v35  ;;  %3964 = vmatpush2.bf16.msra.mxu1 %v17179_v47  ;;  %v4166_v35 = vld [vmem:[#allocation6 + $0x540] sm:$0xff] }
 0x283   :  { %3924 = vmatprep.subr.bf16.mxu0 %v17044_v59  ;;  %3965 = vmatprep.subr.bf16.mxu1 %v17172_v37  ;;  %v4170_v47 = vld [vmem:[#allocation6 + $0x560] sm:$0xff]  ;;  %v19606_v59 = vpack.c.bf16 %v3985_v21, %v3985_v21 }
 0x284   :  { %v4010_v19 = vld [vmem:[#allocation6 + $0x60] sm:$0xff] }
 0x285   :  { %v4134_v31 = vld [vmem:[#allocation6 + $0x440] sm:$0xff]  ;;  %v17214_v26 = vcombine.high %v4006_v28, %v4010_v19 }
 0x286   :  { %3925 = vmatpush2.bf16.msra.mxu0 %v17043_v45  ;;  %3966 = vmatpush2.bf16.msra.mxu1 %v17171_v46  ;;  %v17246_v45 = vcombine.high %v4038_v30, %v4042_v33  ;;  %v4138_v21 = vld [vmem:[#allocation6 + $0x460] sm:$0xff] }
 0x287   :  { %3926 = vmatprep.subr.bf16.mxu0 %v17036_v49  ;;  %3967 = vmatprep.subr.bf16.mxu1 %v17164_v50  ;;  %v17374_v49 = vcombine.high %v4166_v35, %v4170_v47  ;;  %v4030_v50 = vld [vmem:[#allocation6 + $0x100] sm:$0xff]  ;;  %v17342_v27 = vcombine.high %v4134_v31, %v4138_v21 }
 0x28a   :  { %3927 = vmatpush2.bf16.msra.mxu0 %v17035_v55  ;;  %3968 = vmatpush2.bf16.msra.mxu1 %v17163_v56  ;;  %v17245_v55 = vcombine.low %v4038_v30, %v4042_v33  ;;  %v4126_v30 = vld [vmem:[#allocation6 + $0x400] sm:$0xff] }
 0x28b   :  { %3928 = vmatprep.subr.bf16.mxu0 %v17028_v57  ;;  %3969 = vmatprep.subr.bf16.mxu1 %v17156_v62  ;;  %v17373_v57 = vcombine.low %v4166_v35, %v4170_v47  ;;  %v17238_v62 = vcombine.high %v4030_v50, %v4034_v51  ;;  %v4130_v33 = vld [vmem:[#allocation6 + $0x420] sm:$0xff] }
 0x28c   :  { %v17334_v47 = vcombine.high %v4126_v30, %v4130_v33 }
 0x28e   :  { %3929 = vmatpush2.bf16.msra.mxu0 %v17027_v20  ;;  %3970 = vmatpush2.bf16.msra.mxu1 %v17155_v4  ;;  %v4154_v20 = vld [vmem:[#allocation6 + $0x4e0] sm:$0xff]  ;;  %v17237_v4 = vcombine.low %v4030_v50, %v4034_v51 }
 0x28f   :  { %3930 = vmatprep.subr.bf16.mxu0 %v17020_v6  ;;  %3971 = vmatprep.subr.bf16.mxu1 %v17148_v8  ;;  %v17365_v6 = vcombine.low %v4158_v52, %v4162_v53  ;;  %v17230_v8 = vcombine.high %v4022_v2, %v4026_v3  ;;  %v17358_v9 = vcombine.high %v4150_v7, %v4154_v20  ;;  %v4114_v52 = vld [vmem:[#allocation6 + $0x3a0] sm:$0xff] }
 0x290   :  { %v4238_v53 = vld [vmem:[#allocation6 + $0x780] sm:$0xff] }
 0x292   :  { %3931 = vmatpush2.bf16.msra.mxu0 %v17019_v15  ;;  %3972 = vmatpush2.bf16.msra.mxu1 %v17147_v23  ;;  %v17229_v15 = vcombine.low %v4022_v2, %v4026_v3  ;;  %v17357_v23 = vcombine.low %v4150_v7, %v4154_v20  ;;  %v4230_v2 = vld [vmem:[#allocation6 + $0x740] sm:$0xff] }
 0x293   :  { %7112 = vmatprep.subr.bf16.mxu0 %v17262_v61  ;;  %7153 = vmatprep.subr.bf16.mxu1 %v17390_v18  ;;  %v17222_v61 = vcombine.high %v4014_v11, %v4018_v12  ;;  %v17350_v18 = vcombine.high %v4142_v13, %v4146_v14  ;;  %v4234_v3 = vld [vmem:[#allocation6 + $0x760] sm:$0xff] }
 0x295   :  { %v3688_v58 = vpop.f32.mrf.mxu0  ;;  %3933 = vmatmul.mubr.bf16.vlgmr.msra.gmra.mxu0 %v19519_v38  ;;  %v3729_v40 = vpop.f32.mrf.mxu1  ;;  %3974 = vmatmul.mubr.bf16.vlgmr.msra.gmra.mxu1 %v19521_v39 }
 0x296   :  { %v3689_v37 = vadd.f32 %v3688_v58, %v745_v1  ;;  %7113 = vmatpush1.bf16.msra.mxu0 %v17261_v25  ;;  %7144 = vmatprep.mubr.bf16.mxu0 %v19603_v32  ;;  %v17221_v1 = vcombine.low %v4014_v11, %v4018_v12  ;;  %v17349_v25 = vcombine.low %v4142_v13, %v4146_v14  ;;  %v4222_v11 = vld [vmem:[#allocation6 + $0x700] sm:$0xff] }
 0x297   :  { %7154 = vmatpush1.bf16.msra.mxu1 %v17389_v36  ;;  %v19610_v42 = vpop.f32.mrf.mxu0  ;;  %7185 = vmatprep.mubr.bf16.mxu1 %v19606_v59  ;;  %v19615_v38 = vpop.f32.mrf.mxu1  ;;  %v3998_v36 = vld [vmem:[#allocation6] sm:$0xff]  ;;  %v17213_v58 = vcombine.low %v4006_v28, %v4010_v19  ;;  %v17437_v14 = vcombine.low %v4230_v2, %v4234_v3 }
 0x298   :  { %v19612_v46 = vadd.f32 %v3729_v40, %v3689_v37  ;;  %7114 = vmatprep.subr.bf16.mxu0 %v17254_v29  ;;  %7155 = vmatprep.subr.bf16.mxu1 %v17382_v34  ;;  %v4002_v29 = vld [vmem:[#allocation6 + $0x20] sm:$0xff]  ;;  %v17341_v34 = vcombine.low %v4134_v31, %v4138_v21 }
 0x299   :  { %v3692_v39 = vpop.f32.mrf.mxu0  ;;  %v3733_v54 = vpop.f32.mrf.mxu1  ;;  %v17206_v35 = vcombine.high %v3998_v36, %v4002_v29  ;;  %v4118_v37 = vld [vmem:[#allocation6 + $0x3c0] sm:$0xff] }
 0x29a   :  { %7115 = vmatpush1.bf16.msra.mxu0 %v17253_v41  ;;  %v4122_v40 = vld [vmem:[#allocation6 + $0x3e0] sm:$0xff] }
 0x29b   :  { %7156 = vmatpush1.bf16.msra.mxu1 %v17381_v44  ;;  %v3693_v56 = vpop.f32.mrf.mxu0  ;;  %7116 = vmatprep.subr.bf16.mxu0 %v17246_v45  ;;  %v3734_v63 = vpop.f32.mrf.mxu1  ;;  %v4246_v41 = vld [vmem:[#allocation6 + $0x7c0] sm:$0xff]  ;;  %v17205_v45 = vcombine.low %v3998_v36, %v4002_v29  ;;  %v17326_v50 = vcombine.high %v4118_v37, %v4122_v40 }
 0x29c   :  { %7157 = vmatprep.subr.bf16.mxu1 %v17374_v49  ;;  %v4250_v44 = vld [vmem:[#allocation6 + $0x7e0] sm:$0xff]  ;;  %v17333_v49 = vcombine.low %v4126_v30, %v4130_v33 }
 0x29d   :  { %v17454_v51 = vcombine.high %v4246_v41, %v4250_v44  ;;  %v4110_v39 = vld [vmem:[#allocation6 + $0x380] sm:$0xff]  ;;  %v17453_v56 = vcombine.low %v4246_v41, %v4250_v44 }
 0x29e   :  { %7117 = vmatpush1.bf16.msra.mxu0 %v17245_v55  ;;  %v4242_v54 = vld [vmem:[#allocation6 + $0x7a0] sm:$0xff]  ;;  %v17325_v55 = vcombine.low %v4118_v37, %v4122_v40  ;;  %v17317_v7 = vcombine.low %v4110_v39, %v4114_v52 }
 0x29f   :  { %7158 = vmatpush1.bf16.msra.mxu1 %v17373_v57  ;;  %7118 = vmatprep.subr.bf16.mxu0 %v17238_v62  ;;  %v17318_v57 = vcombine.high %v4110_v39, %v4114_v52  ;;  %v17446_v62 = vcombine.high %v4238_v53, %v4242_v54  ;;  %v4102_v63 = vld [vmem:[#allocation6 + $0x340] sm:$0xff]  ;;  %v17445_v20 = vcombine.low %v4238_v53, %v4242_v54  ;;  %v19618_v53 = vsub.s32 5, %v19531_v60 }
 0x2a0   :  { %7159 = vmatprep.subr.bf16.mxu1 %v17366_v16  ;;  %v4106_v16 = vld [vmem:[#allocation6 + $0x360] sm:$0xff] }
 0x2a1   :  { %v4226_v12 = vld [vmem:[#allocation6 + $0x720] sm:$0xff]  ;;  %v17309_v13 = vcombine.low %v4102_v63, %v4106_v16 }
 0x2a2   :  { %7119 = vmatpush1.bf16.msra.mxu0 %v17237_v4  ;;  %v17310_v4 = vcombine.high %v4102_v63, %v4106_v16  ;;  %v4214_v28 = vld [vmem:[#allocation6 + $0x6c0] sm:$0xff]  ;;  %v17429_v21 = vcombine.low %v4222_v11, %v4226_v12 }
 0x2a3   :  { %7160 = vmatpush1.bf16.msra.mxu1 %v17365_v6  ;;  %7120 = vmatprep.subr.bf16.mxu0 %v17230_v8  ;;  %v17438_v6 = vcombine.high %v4230_v2, %v4234_v3  ;;  %v4094_v8 = vld [vmem:[#allocation6 + $0x300] sm:$0xff]  ;;  %v749_v3 = vrot.slane %v19599_v24, %v19618_v53 }
 0x2a4   :  { %7161 = vmatprep.subr.bf16.mxu1 %v17358_v9  ;;  %v4098_v9 = vld [vmem:[#allocation6 + $0x320] sm:$0xff] }
 0x2a5   :  { %v4218_v19 = vld [vmem:[#allocation6 + $0x6e0] sm:$0xff]  ;;  %v17301_v31 = vcombine.low %v4094_v8, %v4098_v9 }
 0x2a6   :  { %7121 = vmatpush1.bf16.msra.mxu0 %v17229_v15  ;;  %v17302_v15 = vcombine.high %v4094_v8, %v4098_v9  ;;  %v4206_v36 = vld [vmem:[#allocation6 + $0x680] sm:$0xff]  ;;  %v17421_v33 = vcombine.low %v4214_v28, %v4218_v19  ;;  %v3984_v8 = vmax.f32 %v19586_v0, 0.0 }
 0x2a7   :  { %7162 = vmatpush1.bf16.msra.mxu1 %v17357_v23  ;;  %7122 = vmatprep.subr.bf16.mxu0 %v17222_v61  ;;  %v17430_v23 = vcombine.high %v4222_v11, %v4226_v12  ;;  %v4086_v61 = vld [vmem:[#allocation6 + $0x2c0] sm:$0xff] }
 0x2a8   :  { %7163 = vmatprep.subr.bf16.mxu1 %v17350_v18  ;;  %v4090_v18 = vld [vmem:[#allocation6 + $0x2e0] sm:$0xff] }
 0x2a9   :  { %v4210_v29 = vld [vmem:[#allocation6 + $0x6a0] sm:$0xff]  ;;  %v17293_v30 = vcombine.low %v4086_v61, %v4090_v18 }
 0x2aa   :  { %7123 = vmatpush1.bf16.msra.mxu0 %v17221_v1  ;;  %v17294_v1 = vcombine.high %v4086_v61, %v4090_v18  ;;  %v4198_v37 = vld [vmem:[#allocation6 + $0x640] sm:$0xff]  ;;  %v17413_v44 = vcombine.low %v4206_v36, %v4210_v29  ;;  %v19627_v18 = vpack.c.bf16 %v3984_v8, %v3984_v8 }
 0x2ab   :  { %7164 = vmatpush1.bf16.msra.mxu1 %v17349_v25  ;;  %7124 = vmatprep.subr.bf16.mxu0 %v17214_v26  ;;  %v17422_v25 = vcombine.high %v4214_v28, %v4218_v19  ;;  %v4078_v26 = vld [vmem:[#allocation6 + $0x280] sm:$0xff] }
 0x2ac   :  { %7165 = vmatprep.subr.bf16.mxu1 %v17342_v27  ;;  %v4082_v27 = vld [vmem:[#allocation6 + $0x2a0] sm:$0xff] }
 0x2ad   :  { %v4202_v40 = vld [vmem:[#allocation6 + $0x660] sm:$0xff]  ;;  %v17285_v41 = vcombine.low %v4078_v26, %v4082_v27 }
 0x2ae   :  { %7125 = vmatpush1.bf16.msra.mxu0 %v17213_v58  ;;  %v17286_v58 = vcombine.high %v4078_v26, %v4082_v27  ;;  %v4190_v39 = vld [vmem:[#allocation6 + $0x600] sm:$0xff] }
 0x2af   :  { %7166 = vmatpush1.bf16.msra.mxu1 %v17341_v34  ;;  %7126 = vmatprep.subr.bf16.mxu0 %v17206_v35  ;;  %v17414_v34 = vcombine.high %v4206_v36, %v4210_v29  ;;  %v4070_v35 = vld [vmem:[#allocation6 + $0x240] sm:$0xff] }
 0x2b0   :  { %7167 = vmatprep.subr.bf16.mxu1 %v17334_v47  ;;  %v4074_v47 = vld [vmem:[#allocation6 + $0x260] sm:$0xff] }
 0x2b1   :  { %v4194_v52 = vld [vmem:[#allocation6 + $0x620] sm:$0xff]  ;;  %v17277_v54 = vcombine.low %v4070_v35, %v4074_v47 }
 0x2b2   :  { %7127 = vmatpush1.bf16.msra.mxu0 %v17205_v45  ;;  %v17278_v45 = vcombine.high %v4070_v35, %v4074_v47  ;;  %v4314_v63 = vld [vmem:[#allocation6 + $0x9e0] sm:$0xff] }
 0x2b3   :  { %7168 = vmatpush1.bf16.msra.mxu1 %v17333_v49  ;;  %7128 = vmatprep.subr.bf16.mxu0 %v17326_v50  ;;  %v17406_v49 = vcombine.high %v4198_v37, %v4202_v40  ;;  %v4062_v50 = vld [vmem:[#allocation6 + $0x200] sm:$0xff] }
 0x2b4   :  { %7169 = vmatprep.subr.bf16.mxu1 %v17454_v51  ;;  %v4066_v51 = vld [vmem:[#allocation6 + $0x220] sm:$0xff] }
 0x2b5   :  { %v4438_v16 = vld [vmem:[#allocation6 + $0xdc0] sm:$0xff] }
 0x2b6   :  { %7129 = vmatpush2.bf16.msra.mxu0 %v17325_v55  ;;  %v17405_v55 = vcombine.low %v4198_v37, %v4202_v40  ;;  %v4442_v2 = vld [vmem:[#allocation6 + $0xde0] sm:$0xff] }
 0x2b7   :  { %7170 = vmatpush2.bf16.msra.mxu1 %v17453_v56  ;;  %7130 = vmatprep.subr.bf16.mxu0 %v17318_v57  ;;  %v17270_v56 = vcombine.high %v4062_v50, %v4066_v51  ;;  %v17398_v57 = vcombine.high %v4190_v39, %v4194_v52  ;;  %v4302_v9 = vld [vmem:[#allocation6 + $0x980] sm:$0xff]  ;;  %v17646_v12 = vcombine.high %v4438_v16, %v4442_v2 }
 0x2b8   :  { %7171 = vmatprep.subr.bf16.mxu1 %v17446_v62  ;;  %v4310_v62 = vld [vmem:[#allocation6 + $0x9c0] sm:$0xff]  ;;  %v17645_v61 = vcombine.low %v4438_v16, %v4442_v2 }
 0x2b9   :  { %v4306_v11 = vld [vmem:[#allocation6 + $0x9a0] sm:$0xff]  ;;  %v17517_v24 = vcombine.low %v4310_v62, %v4314_v63 }
 0x2ba   :  { %7131 = vmatpush2.bf16.msra.mxu0 %v17317_v7  ;;  %v17269_v7 = vcombine.low %v4062_v50, %v4066_v51  ;;  %v4294_v28 = vld [vmem:[#allocation6 + $0x940] sm:$0xff]  ;;  %v17509_v26 = vcombine.low %v4302_v9, %v4306_v11 }
 0x2bb   :  { %7172 = vmatpush2.bf16.msra.mxu1 %v17445_v20  ;;  %7132 = vmatprep.subr.bf16.mxu0 %v17310_v4  ;;  %v3982_v20 = vmax.f32 %v19556_v22, 0.0  ;;  %v17397_v4 = vcombine.low %v4190_v39, %v4194_v52  ;;  %v17510_v22 = vcombine.high %v4302_v9, %v4306_v11  ;;  %v4298_v0 = vld [vmem:[#allocation6 + $0x960] sm:$0xff] }
 0x2bc   :  { %7173 = vmatprep.subr.bf16.mxu1 %v17438_v6  ;;  %v17518_v6 = vcombine.high %v4310_v62, %v4314_v63  ;;  %v17502_v36 = vcombine.high %v4294_v28, %v4298_v0  ;;  %v4414_v37 = vld [vmem:[#allocation6 + $0xd00] sm:$0xff] }
 0x2bd   :  { %v4278_v52 = vld [vmem:[#allocation6 + $0x8c0] sm:$0xff] }
 0x2be   :  { %7133 = vmatpush2.bf16.msra.mxu0 %v17309_v13  ;;  %v4430_v13 = vld [vmem:[#allocation6 + $0xd80] sm:$0xff] }
 0x2bf   :  { %7174 = vmatpush2.bf16.msra.mxu1 %v17437_v14  ;;  %7134 = vmatprep.subr.bf16.mxu0 %v17302_v15  ;;  %v4434_v14 = vld [vmem:[#allocation6 + $0xda0] sm:$0xff]  ;;  %v3691_v15 = vadd.f32 %v19610_v42, %v749_v3  ;;  %v19638_v3 = vld [vmem:[#allocation6 + $0x5c8] sm:$0xff] }
 0x2c0   :  { %7175 = vmatprep.subr.bf16.mxu1 %v17430_v23  ;;  %v19625_v23 = vpack.c.bf16 %v3982_v20, %v3982_v20  ;;  %v17638_v19 = vcombine.high %v4430_v13, %v4434_v14  ;;  %v4426_v42 = vld [vmem:[#allocation6 + $0xd60] sm:$0xff]  ;;  %v17637_v29 = vcombine.low %v4430_v13, %v4434_v14 }
 0x2c1   :  { %v4270_v20 = vld [vmem:[#allocation6 + $0x880] sm:$0xff] }
 0x2c2   :  { %7135 = vmatpush2.bf16.msra.mxu0 %v17301_v31  ;;  %v4398_v9 = vld [vmem:[#allocation6 + $0xc80] sm:$0xff] }
 0x2c3   :  { %7176 = vmatpush2.bf16.msra.mxu1 %v17429_v21  ;;  %7136 = vmatprep.subr.bf16.mxu0 %v17294_v1  ;;  %v4422_v21 = vld [vmem:[#allocation6 + $0xd40] sm:$0xff]  ;;  %v3732_v1 = vadd.f32 %v19615_v38, %v3691_v15 }
 0x2c4   :  { %7177 = vmatprep.subr.bf16.mxu1 %v17422_v25  ;;  %v17630_v35 = vcombine.high %v4422_v21, %v4426_v42  ;;  %v4418_v38 = vld [vmem:[#allocation6 + $0xd20] sm:$0xff]  ;;  %v17629_v50 = vcombine.low %v4422_v21, %v4426_v42 }
 0x2c5   :  { %v17621_v2 = vcombine.low %v4414_v37, %v4418_v38  ;;  %v4402_v11 = vld [vmem:[#allocation6 + $0xca0] sm:$0xff] }
 0x2c6   :  { %7137 = vmatpush2.bf16.msra.mxu0 %v17293_v30  ;;  %v4262_v15 = vld [vmem:[#allocation6 + $0x840] sm:$0xff]  ;;  %v17605_v21 = vcombine.low %v4398_v9, %v4402_v11 }
 0x2c7   :  { %7178 = vmatpush2.bf16.msra.mxu1 %v17421_v33  ;;  %7138 = vmatprep.subr.bf16.mxu0 %v17286_v58  ;;  %v4286_v58 = vld [vmem:[#allocation6 + $0x900] sm:$0xff] }
 0x2c8   :  { %7179 = vmatprep.subr.bf16.mxu1 %v17414_v34  ;;  %v4290_v34 = vld [vmem:[#allocation6 + $0x920] sm:$0xff] }
 0x2c9   :  { %v17493_v63 = vcombine.low %v4286_v58, %v4290_v34  ;;  %v4254_v42 = vld [vmem:[#allocation6 + $0x800] sm:$0xff] }
 0x2ca   :  { %7139 = vmatpush2.bf16.msra.mxu0 %v17285_v41 }
 0x2cb   :  { %7180 = vmatpush2.bf16.msra.mxu1 %v17413_v44  ;;  %7140 = vmatprep.subr.bf16.mxu0 %v17278_v45  ;;  %v17501_v44 = vcombine.low %v4294_v28, %v4298_v0  ;;  %v4394_v28 = vld [vmem:[#allocation6 + $0xc60] sm:$0xff] }
 0x2cc   :  { %7181 = vmatprep.subr.bf16.mxu1 %v17406_v49  ;;  %v17494_v49 = vcombine.high %v4286_v58, %v4290_v34  ;;  %v4374_v58 = vld [vmem:[#allocation6 + $0xbc0] sm:$0xff] }
 0x2cd   :  { %v4378_v34 = vld [vmem:[#allocation6 + $0xbe0] sm:$0xff] }
 0x2ce   :  { %7141 = vmatpush2.bf16.msra.mxu0 %v17277_v54  ;;  %v4282_v54 = vld [vmem:[#allocation6 + $0x8e0] sm:$0xff] }
 0x2cf   :  { %7182 = vmatpush2.bf16.msra.mxu1 %v17405_v55  ;;  %7142 = vmatprep.subr.bf16.mxu0 %v17270_v56  ;;  %v17622_v55 = vcombine.high %v4414_v37, %v4418_v38  ;;  %v4406_v56 = vld [vmem:[#allocation6 + $0xcc0] sm:$0xff]  ;;  %v17486_v16 = vcombine.high %v4278_v52, %v4282_v54 }
 0x2d0   :  { %7183 = vmatprep.subr.bf16.mxu1 %v17398_v57  ;;  %v4410_v57 = vld [vmem:[#allocation6 + $0xce0] sm:$0xff] }
 0x2d1   :  { %v17613_v14 = vcombine.low %v4406_v56, %v4410_v57  ;;  %v4506_v37 = vld [vmem:[#allocation6 + $0xfe0] sm:$0xff] }
 0x2d2   :  { %7143 = vmatpush2.bf16.msra.mxu0 %v17269_v7  ;;  %v19640_v7 = vld [vmem:[#allocation6 + $0x5e8] sm:$0xff] }
 0x2d3   :  { %7184 = vmatpush2.bf16.msra.mxu1 %v17397_v4  ;;  %7194 = vmatprep.subr.bf16.mxu0 %v17518_v6  ;;  %v4274_v4 = vld [vmem:[#allocation6 + $0x8a0] sm:$0xff]  ;;  %v17614_v6 = vcombine.high %v4406_v56, %v4410_v57  ;;  %v17391_v8 = vcombine.low %v19638_v3, %v19640_v7 }
 0x2d4   :  { %7235 = vmatprep.subr.bf16.mxu1 %v17646_v12  ;;  %v17485_v12 = vcombine.low %v4278_v52, %v4282_v54  ;;  %v17478_v13 = vcombine.high %v4270_v20, %v4274_v4  ;;  %v17477_v0 = vcombine.low %v4270_v20, %v4274_v4  ;;  %v4362_v56 = vld [vmem:[#allocation6 + $0xb60] sm:$0xff] }
 0x2d5   :  { %v19629_v31 = vpop.f32.mrf.mxu0  ;;  %7145 = vmatmul.mubr.bf16.vlgmr.msra.gmra.mxu0 %v19625_v23  ;;  %v19633_v25 = vpop.f32.mrf.mxu1 }
 0x2d6   :  { %7186 = vmatmul.mubr.bf16.vlgmr.msra.gmra.mxu1 %v19627_v18  ;;  %7195 = vmatpush1.bf16.msra.mxu0 %v17517_v24  ;;  %v4266_v24 = vld [vmem:[#allocation6 + $0x860] sm:$0xff] }
 0x2d7   :  { %v3772_v27 = vpop.f32.mrf.mxu0  ;;  %7196 = vmatprep.subr.bf16.mxu0 %v17510_v22  ;;  %7236 = vmatpush1.bf16.msra.mxu1 %v17645_v61  ;;  %v3813_v33 = vpop.f32.mrf.mxu1  ;;  %v17606_v22 = vcombine.high %v4398_v9, %v4402_v11  ;;  %v4390_v61 = vld [vmem:[#allocation6 + $0xc40] sm:$0xff] }
 0x2d8   :  { %v3773_v30 = vadd.f32 %v3772_v27, %v3732_v1  ;;  %7237 = vmatprep.subr.bf16.mxu1 %v17638_v19  ;;  %v17470_v19 = vcombine.high %v4262_v15, %v4266_v24  ;;  %v4258_v1 = vld [vmem:[#allocation6 + $0x820] sm:$0xff] }
 0x2d9   :  { %v3774_v47 = vpop.f32.mrf.mxu0  ;;  %v3815_v41 = vpop.f32.mrf.mxu1  ;;  %v4382_v27 = vld [vmem:[#allocation6 + $0xc00] sm:$0xff]  ;;  %v17461_v38 = vcombine.low %v4254_v42, %v4258_v1 }
 0x2da   :  { %v3814_v40 = vadd.f32 %v3813_v33, %v3773_v30  ;;  %7197 = vmatpush1.bf16.msra.mxu0 %v17509_v26  ;;  %v17598_v26 = vcombine.high %v4390_v61, %v4394_v28  ;;  %v17462_v30 = vcombine.high %v4254_v42, %v4258_v1  ;;  %v17597_v33 = vcombine.low %v4390_v61, %v4394_v28  ;;  %v4502_v47 = vld [vmem:[#allocation6 + $0xfc0] sm:$0xff] }
 0x2db   :  { %v3775_v45 = vpop.f32.mrf.mxu0  ;;  %7198 = vmatprep.subr.bf16.mxu0 %v17502_v36  ;;  %7238 = vmatpush1.bf16.msra.mxu1 %v17637_v29  ;;  %v3816_v39 = vpop.f32.mrf.mxu1  ;;  %v4386_v36 = vld [vmem:[#allocation6 + $0xc20] sm:$0xff]  ;;  %v17469_v29 = vcombine.low %v4262_v15, %v4266_v24  ;;  %v17709_v54 = vcombine.low %v4502_v47, %v4506_v37 }
 0x2dc   :  { %v3987_v51 = vmax.f32 %v3814_v40, 0.0  ;;  %7239 = vmatprep.subr.bf16.mxu1 %v17630_v35  ;;  %v17590_v35 = vcombine.high %v4382_v27, %v4386_v36  ;;  %v17582_v40 = vcombine.high %v4374_v58, %v4378_v34  ;;  %v17589_v41 = vcombine.low %v4382_v27, %v4386_v36  ;;  %v4370_v45 = vld [vmem:[#allocation6 + $0xba0] sm:$0xff] }
 0x2dd   :  { %v17581_v39 = vcombine.low %v4374_v58, %v4378_v34  ;;  %v4354_v9 = vld [vmem:[#allocation6 + $0xb20] sm:$0xff] }
 0x2de   :  { %v19636_v62 = vpack.c.bf16 %v3987_v51, %v3987_v51  ;;  %7199 = vmatpush1.bf16.msra.mxu0 %v17501_v44  ;;  %v4366_v44 = vld [vmem:[#allocation6 + $0xb80] sm:$0xff] }
 0x2df   :  { %7200 = vmatprep.subr.bf16.mxu0 %v17494_v49  ;;  %7240 = vmatpush1.bf16.msra.mxu1 %v17629_v50  ;;  %v17710_v49 = vcombine.high %v4502_v47, %v4506_v37  ;;  %v4494_v50 = vld [vmem:[#allocation6 + $0xf80] sm:$0xff]  ;;  %v17574_v52 = vcombine.high %v4366_v44, %v4370_v45 }
 0x2e0   :  { %7226 = vmatprep.mubr.bf16.mxu0 %v19636_v62  ;;  %7241 = vmatprep.subr.bf16.mxu1 %v17622_v55  ;;  %v4498_v51 = vld [vmem:[#allocation6 + $0xfa0] sm:$0xff] }
 0x2e1   :  { %v4358_v55 = vld [vmem:[#allocation6 + $0xb40] sm:$0xff]  ;;  %v17702_v57 = vcombine.high %v4494_v50, %v4498_v51  ;;  %v17701_v4 = vcombine.low %v4494_v50, %v4498_v51 }
 0x2e2   :  { %7201 = vmatpush1.bf16.msra.mxu0 %v17493_v63  ;;  %v4486_v63 = vld [vmem:[#allocation6 + $0xf40] sm:$0xff]  ;;  %v17566_v20 = vcombine.high %v4358_v55, %v4362_v56 }
 0x2e3   :  { %7202 = vmatprep.subr.bf16.mxu0 %v17486_v16  ;;  %7242 = vmatpush1.bf16.msra.mxu1 %v17621_v2  ;;  %v4490_v16 = vld [vmem:[#allocation6 + $0xf60] sm:$0xff]  ;;  %v17573_v2 = vcombine.low %v4366_v44, %v4370_v45  ;;  %v3771_v44 = vadd.f32 %v19629_v31, %v19612_v46  ;;  %v4059_v46 = vld [vmem:[#allocation6 + $0x1e8] sm:$0xff] }
 0x2e4   :  { %7243 = vmatprep.subr.bf16.mxu1 %v17614_v6  ;;  %v4350_v6 = vld [vmem:[#allocation6 + $0xb00] sm:$0xff]  ;;  %v17694_v11 = vcombine.high %v4486_v63, %v4490_v16  ;;  %v17693_v24 = vcombine.low %v4486_v63, %v4490_v16  ;;  %v4055_v16 = vld [vmem:[#allocation6 + $0x1c8] sm:$0xff] }
 0x2e5   :  { %v17558_v15 = vcombine.high %v4350_v6, %v4354_v9  ;;  %v4346_v61 = vld [vmem:[#allocation6 + $0xae0] sm:$0xff] }
 0x2e6   :  { %7203 = vmatpush1.bf16.msra.mxu0 %v17485_v12  ;;  %v4478_v12 = vld [vmem:[#allocation6 + $0xf00] sm:$0xff] }
 0x2e7   :  { %7204 = vmatprep.subr.bf16.mxu0 %v17478_v13  ;;  %7244 = vmatpush1.bf16.msra.mxu1 %v17613_v14  ;;  %v4482_v13 = vld [vmem:[#allocation6 + $0xf20] sm:$0xff]  ;;  %v17565_v14 = vcombine.low %v4358_v55, %v4362_v56  ;;  %v3812_v56 = vadd.f32 %v19633_v25, %v3771_v44  ;;  %v17392_v25 = vcombine.high %v19638_v3, %v19640_v7  ;;  %v4007_v44 = vld [vmem:[#allocation6 + $0x48] sm:$0xff] }
 0x2e8   :  { %7245 = vmatprep.subr.bf16.mxu1 %v17606_v22  ;;  %v4342_v22 = vld [vmem:[#allocation6 + $0xac0] sm:$0xff]  ;;  %v17686_v28 = vcombine.high %v4478_v12, %v4482_v13  ;;  %v17685_v1 = vcombine.low %v4478_v12, %v4482_v13  ;;  %v17263_v12 = vcombine.low %v4055_v16, %v4059_v46 }
 0x2e9   :  { %v17550_v42 = vcombine.high %v4342_v22, %v4346_v61  ;;  %v4338_v27 = vld [vmem:[#allocation6 + $0xaa0] sm:$0xff] }
 0x2ea   :  { %7205 = vmatpush1.bf16.msra.mxu0 %v17477_v0  ;;  %v4470_v0 = vld [vmem:[#allocation6 + $0xec0] sm:$0xff] }
 0x2eb   :  { %7206 = vmatprep.subr.bf16.mxu0 %v17470_v19  ;;  %7246 = vmatpush1.bf16.msra.mxu1 %v17605_v21  ;;  %v4474_v19 = vld [vmem:[#allocation6 + $0xee0] sm:$0xff]  ;;  %v17557_v21 = vcombine.low %v4350_v6, %v4354_v9  ;;  %v4047_v9 = vld [vmem:[#allocation6 + $0x188] sm:$0xff] }
 0x2ec   :  { %7247 = vmatprep.subr.bf16.mxu1 %v17598_v26  ;;  %v4334_v26 = vld [vmem:[#allocation6 + $0xa80] sm:$0xff]  ;;  %v17678_v36 = vcombine.high %v4470_v0, %v4474_v19  ;;  %v17677_v34 = vcombine.low %v4470_v0, %v4474_v19 }
 0x2ed   :  { %v17542_v58 = vcombine.high %v4334_v26, %v4338_v27  ;;  %v4330_v47 = vld [vmem:[#allocation6 + $0xa60] sm:$0xff] }
 0x2ee   :  { %7207 = vmatpush1.bf16.msra.mxu0 %v17469_v29  ;;  %v4462_v29 = vld [vmem:[#allocation6 + $0xe80] sm:$0xff] }
 0x2ef   :  { %7208 = vmatprep.subr.bf16.mxu0 %v17462_v30  ;;  %7248 = vmatpush1.bf16.msra.mxu1 %v17597_v33  ;;  %v4466_v30 = vld [vmem:[#allocation6 + $0xea0] sm:$0xff]  ;;  %v17549_v33 = vcombine.low %v4342_v22, %v4346_v61 }
 0x2f0   :  { %7249 = vmatprep.subr.bf16.mxu1 %v17590_v35  ;;  %v4326_v35 = vld [vmem:[#allocation6 + $0xa40] sm:$0xff]  ;;  %v17670_v37 = vcombine.high %v4462_v29, %v4466_v30 }
 0x2f1   :  { %v17534_v45 = vcombine.high %v4326_v35, %v4330_v47  ;;  %v4318_v50 = vld [vmem:[#allocation6 + $0xa00] sm:$0xff]  ;;  %v17533_v55 = vcombine.low %v4326_v35, %v4330_v47 }
 0x2f2   :  { %7209 = vmatpush1.bf16.msra.mxu0 %v17461_v38  ;;  %v4454_v38 = vld [vmem:[#allocation6 + $0xe40] sm:$0xff] }
 0x2f3   :  { %7210 = vmatprep.subr.bf16.mxu0 %v17582_v40  ;;  %7250 = vmatpush1.bf16.msra.mxu1 %v17589_v41  ;;  %v4458_v40 = vld [vmem:[#allocation6 + $0xe60] sm:$0xff]  ;;  %v17541_v41 = vcombine.low %v4334_v26, %v4338_v27 }
 0x2f4   :  { %7251 = vmatprep.subr.bf16.mxu1 %v17710_v49  ;;  %v17669_v49 = vcombine.low %v4462_v29, %v4466_v30  ;;  %v4322_v51 = vld [vmem:[#allocation6 + $0xa20] sm:$0xff]  ;;  %v17661_v63 = vcombine.low %v4454_v38, %v4458_v40 }
 0x2f6   :  { %7211 = vmatpush2.bf16.msra.mxu0 %v17581_v39  ;;  %v17662_v39 = vcombine.high %v4454_v38, %v4458_v40  ;;  %v4019_v38 = vld [vmem:[#allocation6 + $0xa8] sm:$0xff] }
 0x2f7   :  { %7212 = vmatprep.subr.bf16.mxu0 %v17574_v52  ;;  %7252 = vmatpush2.bf16.msra.mxu1 %v17709_v54  ;;  %v4446_v52 = vld [vmem:[#allocation6 + $0xe00] sm:$0xff] }
 0x2f8   :  { %7253 = vmatprep.subr.bf16.mxu1 %v17702_v57  ;;  %v4450_v54 = vld [vmem:[#allocation6 + $0xe20] sm:$0xff]  ;;  %v17526_v57 = vcombine.high %v4318_v50, %v4322_v51 }
 0x2f9   :  { %v17654_v31 = vcombine.high %v4446_v52, %v4450_v54  ;;  %v17653_v6 = vcombine.low %v4446_v52, %v4450_v54 }
 0x2fa   :  { %7213 = vmatpush2.bf16.msra.mxu0 %v17573_v2  ;;  %v17525_v2 = vcombine.low %v4318_v50, %v4322_v51  ;;  %v3999_v51 = vld [vmem:[#allocation6 + $0x8] sm:$0xff] }
 0x2fb   :  { %7214 = vmatprep.subr.bf16.mxu0 %v17566_v20  ;;  %7254 = vmatpush2.bf16.msra.mxu1 %v17701_v4  ;;  %v3986_v20 = vmax.f32 %v3812_v56, 0.0  ;;  %v17264_v4 = vcombine.high %v4055_v16, %v4059_v46  ;;  %v4123_v56 = vld [vmem:[#allocation6 + $0x3e8] sm:$0xff] }
 0x2fc   :  { %7255 = vmatprep.subr.bf16.mxu1 %v17694_v11  ;;  %v4051_v11 = vld [vmem:[#allocation6 + $0x1a8] sm:$0xff] }
 0x2fd   :  { %v19650_v13 = vpack.c.bf16 %v3986_v20, %v3986_v20  ;;  %v4111_v16 = vld [vmem:[#allocation6 + $0x388] sm:$0xff] }
 0x2fe   :  { %7215 = vmatpush2.bf16.msra.mxu0 %v17565_v14  ;;  %v17256_v14 = vcombine.high %v4047_v9, %v4051_v11  ;;  %v4115_v46 = vld [vmem:[#allocation6 + $0x3a8] sm:$0xff] }
 0x2ff   :  { %7216 = vmatprep.subr.bf16.mxu0 %v17558_v15  ;;  %7256 = vmatpush2.bf16.msra.mxu1 %v17693_v24  ;;  %v4039_v15 = vld [vmem:[#allocation6 + $0x148] sm:$0xff] }
 0x300   :  { %7257 = vmatprep.subr.bf16.mxu1 %v17686_v28  ;;  %v4043_v24 = vld [vmem:[#allocation6 + $0x168] sm:$0xff]  ;;  %v17255_v28 = vcombine.low %v4047_v9, %v4051_v11 }
 0x301   :  { %v17248_v19 = vcombine.high %v4039_v15, %v4043_v24  ;;  %v4103_v20 = vld [vmem:[#allocation6 + $0x348] sm:$0xff] }
 0x302   :  { %7217 = vmatpush2.bf16.msra.mxu0 %v17557_v21  ;;  %v4095_v11 = vld [vmem:[#allocation6 + $0x308] sm:$0xff] }
 0x303   :  { %7218 = vmatprep.subr.bf16.mxu0 %v17550_v42  ;;  %7258 = vmatpush2.bf16.msra.mxu1 %v17685_v1  ;;  %v4031_v42 = vld [vmem:[#allocation6 + $0x108] sm:$0xff] }
 0x304   :  { %7259 = vmatprep.subr.bf16.mxu1 %v17678_v36  ;;  %v4035_v1 = vld [vmem:[#allocation6 + $0x128] sm:$0xff]  ;;  %v17247_v36 = vcombine.low %v4039_v15, %v4043_v24 }
 0x305   :  { %v17240_v30 = vcombine.high %v4031_v42, %v4035_v1  ;;  %v17239_v35 = vcombine.low %v4031_v42, %v4035_v1  ;;  %v4087_v15 = vld [vmem:[#allocation6 + $0x2c8] sm:$0xff] }
 0x306   :  { %7219 = vmatpush2.bf16.msra.mxu0 %v17549_v33  ;;  %v4091_v24 = vld [vmem:[#allocation6 + $0x2e8] sm:$0xff] }
 0x307   :  { %7220 = vmatprep.subr.bf16.mxu0 %v17542_v58  ;;  %7260 = vmatpush2.bf16.msra.mxu1 %v17677_v34  ;;  %v4023_v58 = vld [vmem:[#allocation6 + $0xc8] sm:$0xff] }
 0x308   :  { %7261 = vmatprep.subr.bf16.mxu1 %v17670_v37  ;;  %v4027_v34 = vld [vmem:[#allocation6 + $0xe8] sm:$0xff] }
 0x309   :  { %v17232_v47 = vcombine.high %v4023_v58, %v4027_v34  ;;  %v4015_v37 = vld [vmem:[#allocation6 + $0x88] sm:$0xff]  ;;  %v17231_v40 = vcombine.low %v4023_v58, %v4027_v34  ;;  %v19663_v58 = vsub.s32 6, %v19531_v60 }
 0x30a   :  { %7221 = vmatpush2.bf16.msra.mxu0 %v17541_v41  ;;  %v17224_v41 = vcombine.high %v4015_v37, %v4019_v38  ;;  %v4079_v42 = vld [vmem:[#allocation6 + $0x288] sm:$0xff] }
 0x30b   :  { %7222 = vmatprep.subr.bf16.mxu0 %v17534_v45  ;;  %7262 = vmatpush2.bf16.msra.mxu1 %v17669_v49  ;;  %v4011_v45 = vld [vmem:[#allocation6 + $0x68] sm:$0xff]  ;;  %v17223_v49 = vcombine.low %v4015_v37, %v4019_v38 }
 0x30c   :  { %7263 = vmatprep.subr.bf16.mxu1 %v17662_v39  ;;  %v17216_v50 = vcombine.high %v4007_v44, %v4011_v45  ;;  %v4003_v39 = vld [vmem:[#allocation6 + $0x28] sm:$0xff]  ;;  %v17215_v52 = vcombine.low %v4007_v44, %v4011_v45 }
 0x30d   :  { %v17208_v54 = vcombine.high %v3999_v51, %v4003_v39  ;;  %v4083_v1 = vld [vmem:[#allocation6 + $0x2a8] sm:$0xff] }
 0x30e   :  { %7223 = vmatpush2.bf16.msra.mxu0 %v17533_v55  ;;  %v4119_v55 = vld [vmem:[#allocation6 + $0x3c8] sm:$0xff] }
 0x30f   :  { %7224 = vmatprep.subr.bf16.mxu0 %v17526_v57  ;;  %7264 = vmatpush2.bf16.msra.mxu1 %v17661_v63  ;;  %v17207_v57 = vcombine.low %v3999_v51, %v4003_v39  ;;  %v17328_v63 = vcombine.high %v4119_v55, %v4123_v56  ;;  %v4063_v34 = vld [vmem:[#allocation6 + $0x208] sm:$0xff] }
 0x310   :  { %7265 = vmatprep.subr.bf16.mxu1 %v17654_v31  ;;  %v17327_v31 = vcombine.low %v4119_v55, %v4123_v56  ;;  %v4311_v44 = vld [vmem:[#allocation6 + $0x9c8] sm:$0xff] }
 0x311   :  { %v4315_v45 = vld [vmem:[#allocation6 + $0x9e8] sm:$0xff] }
 0x312   :  { %7225 = vmatpush2.bf16.msra.mxu0 %v17525_v2  ;;  %v17320_v2 = vcombine.high %v4111_v16, %v4115_v46  ;;  %v17520_v51 = vcombine.high %v4311_v44, %v4315_v45  ;;  %v17519_v55 = vcombine.low %v4311_v44, %v4315_v45  ;;  %v4275_v44 = vld [vmem:[#allocation6 + $0x8a8] sm:$0xff] }
 0x313   :  { %7276 = vmatprep.subr.bf16.mxu0 %v17264_v4  ;;  %7266 = vmatpush2.bf16.msra.mxu1 %v17653_v6  ;;  %v4107_v4 = vld [vmem:[#allocation6 + $0x368] sm:$0xff]  ;;  %v17319_v6 = vcombine.low %v4111_v16, %v4115_v46 }
 0x314   :  { %7317 = vmatprep.subr.bf16.mxu1 %v17392_v25  ;;  %v17312_v9 = vcombine.high %v4103_v20, %v4107_v4  ;;  %v4099_v25 = vld [vmem:[#allocation6 + $0x328] sm:$0xff] }
 0x315   :  { %v19652_v22 = vpop.f32.mrf.mxu0  ;;  %7227 = vmatmul.mubr.bf16.vlgmr.msra.gmra.mxu0 %v19650_v13  ;;  %v19655_v61 = vpop.f32.mrf.mxu1  ;;  %v4299_v16 = vld [vmem:[#allocation6 + $0x968] sm:$0xff] }
 0x316   :  { %7277 = vmatpush1.bf16.msra.mxu0 %v17263_v12  ;;  %7308 = vmatprep.mubr.bf16.mxu0 %v19603_v32  ;;  %v17311_v12 = vcombine.low %v4103_v20, %v4107_v4 }
 0x317   :  { %v19658_v0 = vpop.f32.mrf.mxu0  ;;  %7278 = vmatprep.subr.bf16.mxu0 %v17256_v14  ;;  %v19660_v21 = vpop.f32.mrf.mxu1  ;;  %v17304_v14 = vcombine.high %v4095_v11, %v4099_v25 }
 0x319   :  { %v3856_v26 = vpop.f32.mrf.mxu0  ;;  %v3897_v27 = vpop.f32.mrf.mxu1 }
 0x31a   :  { %7279 = vmatpush1.bf16.msra.mxu0 %v17255_v28  ;;  %v17303_v28 = vcombine.low %v4095_v11, %v4099_v25  ;;  %v17295_v26 = vcombine.low %v4087_v15, %v4091_v24  ;;  %v17288_v27 = vcombine.high %v4079_v42, %v4083_v1  ;;  %v4291_v25 = vld [vmem:[#allocation6 + $0x928] sm:$0xff] }
 0x31b   :  { %v3857_v29 = vpop.f32.mrf.mxu0  ;;  %7280 = vmatprep.subr.bf16.mxu0 %v17248_v19  ;;  %v3898_v33 = vpop.f32.mrf.mxu1  ;;  %v17296_v19 = vcombine.high %v4087_v15, %v4091_v24 }
 0x31c   :  { %v4075_v29 = vld [vmem:[#allocation6 + $0x268] sm:$0xff] }
 0x31e   :  { %7281 = vmatpush1.bf16.msra.mxu0 %v17247_v36  ;;  %v4071_v36 = vld [vmem:[#allocation6 + $0x248] sm:$0xff] }
 0x31f   :  { %7282 = vmatprep.subr.bf16.mxu0 %v17240_v30  ;;  %v17287_v30 = vcombine.low %v4079_v42, %v4083_v1  ;;  %v17280_v33 = vcombine.high %v4071_v36, %v4075_v29  ;;  %v17279_v37 = vcombine.low %v4071_v36, %v4075_v29  ;;  %v4279_v36 = vld [vmem:[#allocation6 + $0x8c8] sm:$0xff] }
 0x320   :  { %v4283_v29 = vld [vmem:[#allocation6 + $0x8e8] sm:$0xff] }
 0x322   :  { %7283 = vmatpush1.bf16.msra.mxu0 %v17239_v35  ;;  %v4067_v35 = vld [vmem:[#allocation6 + $0x228] sm:$0xff] }
 0x323   :  { %7284 = vmatprep.subr.bf16.mxu0 %v17232_v47  ;;  %v19666_v47 = vsub.s32 7, %v19531_v60  ;;  %v17272_v38 = vcombine.high %v4063_v34, %v4067_v35  ;;  %v4307_v60 = vld [vmem:[#allocation6 + $0x9a8] sm:$0xff] }
 0x326   :  { %7285 = vmatpush1.bf16.msra.mxu0 %v17231_v40  ;;  %v19080_v40 = vld [vmem:[#allocation4] sm:$0xff] }
 0x327   :  { %7286 = vmatprep.subr.bf16.mxu0 %v17224_v41  ;;  %v753_v41 = vrot.slane %v19080_v40, %v19663_v58 }
 0x329   :  { %v3853_v39 = vadd.f32 %v19652_v22, %v753_v41  ;;  %v4271_v41 = vld [vmem:[#allocation6 + $0x888] sm:$0xff] }
 0x32a   :  { %7287 = vmatpush1.bf16.msra.mxu0 %v17223_v49  ;;  %v757_v49 = vrot.slane %v19080_v40, %v19666_v47  ;;  %v4171_v40 = vld [vmem:[#allocation6 + $0x568] sm:$0xff] }
 0x32b   :  { %7288 = vmatprep.subr.bf16.mxu0 %v17216_v50  ;;  %v17271_v50 = vcombine.low %v4063_v34, %v4067_v35 }
 0x32e   :  { %7289 = vmatpush1.bf16.msra.mxu0 %v17215_v52  ;;  %v4303_v52 = vld [vmem:[#allocation6 + $0x988] sm:$0xff] }
 0x32f   :  { %7290 = vmatprep.subr.bf16.mxu0 %v17208_v54  ;;  %v3855_v54 = vadd.f32 %v19658_v0, %v757_v49  ;;  %v17512_v56 = vcombine.high %v4303_v52, %v4307_v60  ;;  %v17511_v22 = vcombine.low %v4303_v52, %v4307_v60  ;;  %v17487_v49 = vcombine.low %v4279_v36, %v4283_v29  ;;  %v4163_v52 = vld [vmem:[#allocation6 + $0x528] sm:$0xff] }
 0x330   :  { %v4263_v60 = vld [vmem:[#allocation6 + $0x848] sm:$0xff] }
 0x332   :  { %7291 = vmatpush1.bf16.msra.mxu0 %v17207_v57  ;;  %v3894_v57 = vadd.f32 %v19655_v61, %v3853_v39  ;;  %v4287_v61 = vld [vmem:[#allocation6 + $0x908] sm:$0xff] }
 0x333   :  { %7292 = vmatprep.subr.bf16.mxu0 %v17328_v63  ;;  %v4295_v63 = vld [vmem:[#allocation6 + $0x948] sm:$0xff]  ;;  %v17495_v34 = vcombine.low %v4287_v61, %v4291_v25 }
 0x334   :  { %v17504_v4 = vcombine.high %v4295_v63, %v4299_v16  ;;  %v17503_v24 = vcombine.low %v4295_v63, %v4299_v16  ;;  %v4159_v39 = vld [vmem:[#allocation6 + $0x508] sm:$0xff] }
 0x335   :  { %v17368_v3 = vcombine.high %v4159_v39, %v4163_v52  ;;  %v4255_v63 = vld [vmem:[#allocation6 + $0x808] sm:$0xff] }
 0x336   :  { %7293 = vmatpush2.bf16.msra.mxu0 %v17327_v31  ;;  %v3896_v31 = vadd.f32 %v19660_v21, %v3855_v54  ;;  %v4267_v54 = vld [vmem:[#allocation6 + $0x868] sm:$0xff] }
 0x337   :  { %7294 = vmatprep.subr.bf16.mxu0 %v17320_v2  ;;  %v17472_v7 = vcombine.high %v4263_v60, %v4267_v54  ;;  %v4259_v16 = vld [vmem:[#allocation6 + $0x828] sm:$0xff] }
 0x33a   :  { %7295 = vmatpush2.bf16.msra.mxu0 %v17319_v6 }
 0x33b   :  { %7296 = vmatprep.subr.bf16.mxu0 %v17312_v9 }
 0x33e   :  { %7297 = vmatpush2.bf16.msra.mxu0 %v17311_v12 }
 0x33f   :  { %7298 = vmatprep.subr.bf16.mxu0 %v17304_v14 }
 0x342   :  { %7299 = vmatpush2.bf16.msra.mxu0 %v17303_v28 }
 0x343   :  { %7300 = vmatprep.subr.bf16.mxu0 %v17296_v19  ;;  %v17496_v19 = vcombine.high %v4287_v61, %v4291_v25 }
 0x346   :  { %7301 = vmatpush2.bf16.msra.mxu0 %v17295_v26  ;;  %v4175_v26 = vld [vmem:[#allocation6 + $0x588] sm:$0xff] }
 0x347   :  { %7302 = vmatprep.subr.bf16.mxu0 %v17288_v27  ;;  %v4179_v27 = vld [vmem:[#allocation6 + $0x5a8] sm:$0xff] }
 0x348   :  { %v17384_v35 = vcombine.high %v4175_v26, %v4179_v27  ;;  %v17383_v45 = vcombine.low %v4175_v26, %v4179_v27  ;;  %v4131_v26 = vld [vmem:[#allocation6 + $0x428] sm:$0xff] }
 0x349   :  { %v4359_v27 = vld [vmem:[#allocation6 + $0xb48] sm:$0xff] }
 0x34a   :  { %7303 = vmatpush2.bf16.msra.mxu0 %v17287_v30 }
 0x34b   :  { %7304 = vmatprep.subr.bf16.mxu0 %v17280_v33 }
 0x34e   :  { %7305 = vmatpush2.bf16.msra.mxu0 %v17279_v37  ;;  %v17488_v37 = vcombine.high %v4279_v36, %v4283_v29  ;;  %v4363_v36 = vld [vmem:[#allocation6 + $0xb68] sm:$0xff] }
 0x34f   :  { %7306 = vmatprep.subr.bf16.mxu0 %v17272_v38  ;;  %v4167_v38 = vld [vmem:[#allocation6 + $0x548] sm:$0xff] }
 0x352   :  { %7307 = vmatpush2.bf16.msra.mxu0 %v17271_v50  ;;  %v17376_v50 = vcombine.high %v4167_v38, %v4171_v40 }
 0x353   :  { %7358 = vmatprep.subr.bf16.mxu0 %v17520_v51  ;;  %v17480_v51 = vcombine.high %v4271_v41, %v4275_v44 }
 0x355   :  { %v3934_v46 = vpop.f32.mrf.mxu0  ;;  %7309 = vmatmul.mubr.bf16.vlgmr.msra.gmra.mxu0 %v19625_v23  ;;  %v3975_v20 = vpop.f32.mrf.mxu1 }
 0x356   :  { %v3935_v2 = vadd.f32 %v3934_v46, %v3894_v57  ;;  %7359 = vmatpush1.bf16.msra.mxu0 %v17519_v55  ;;  %7390 = vmatprep.mubr.bf16.mxu0 %v19636_v62  ;;  %v17375_v55 = vcombine.low %v4167_v38, %v4171_v40  ;;  %v4155_v57 = vld [vmem:[#allocation6 + $0x4e8] sm:$0xff]  ;;  %v17367_v46 = vcombine.low %v4159_v39, %v4163_v52 }
 0x357   :  { %v3936_v0 = vpop.f32.mrf.mxu0  ;;  %7360 = vmatprep.subr.bf16.mxu0 %v17512_v56  ;;  %v3977_v11 = vpop.f32.mrf.mxu1  ;;  %v17479_v56 = vcombine.low %v4271_v41, %v4275_v44  ;;  %v4247_v38 = vld [vmem:[#allocation6 + $0x7c8] sm:$0xff] }
 0x358   :  { %v3976_v6 = vadd.f32 %v3975_v20, %v3935_v2  ;;  %v3937_v9 = vadd.f32 %v3936_v0, %v3896_v31  ;;  %v17471_v31 = vcombine.low %v4263_v60, %v4267_v54  ;;  %v17464_v20 = vcombine.high %v4255_v63, %v4259_v16  ;;  %v4147_v0 = vld [vmem:[#allocation6 + $0x4a8] sm:$0xff] }
 0x359   :  { %v3938_v12 = vpop.f32.mrf.mxu0  ;;  %v3979_v15 = vpop.f32.mrf.mxu1  ;;  %v4251_v40 = vld [vmem:[#allocation6 + $0x7e8] sm:$0xff] }
 0x35a   :  { %v3978_v14 = vadd.f32 %v3977_v11, %v3937_v9  ;;  %7361 = vmatpush1.bf16.msra.mxu0 %v17511_v22  ;;  %v3988_v21 = vmax.f32 %v3976_v6, 0.0  ;;  %v4143_v22 = vld [vmem:[#allocation6 + $0x488] sm:$0xff]  ;;  %v17463_v11 = vcombine.low %v4255_v63, %v4259_v16 }
 0x35b   :  { %v3939_v28 = vpop.f32.mrf.mxu0  ;;  %7362 = vmatprep.subr.bf16.mxu0 %v17504_v4  ;;  %v3980_v1 = vpop.f32.mrf.mxu1  ;;  %v4375_v4 = vld [vmem:[#allocation6 + $0xbc8] sm:$0xff]  ;;  %v17352_v61 = vcombine.high %v4143_v22, %v4147_v0 }
 0x35c   :  { %v3989_v42 = vmax.f32 %v3978_v14, 0.0  ;;  %v19678_v33 = vpack.c.bf16 %v3988_v21, %v3988_v21  ;;  %v4379_v6 = vld [vmem:[#allocation6 + $0xbe8] sm:$0xff]  ;;  %v17351_v21 = vcombine.low %v4143_v22, %v4147_v0 }
 0x35d   :  { %v17584_v25 = vcombine.high %v4375_v4, %v4379_v6  ;;  %v4135_v12 = vld [vmem:[#allocation6 + $0x448] sm:$0xff]  ;;  %v17583_v28 = vcombine.low %v4375_v4, %v4379_v6 }
 0x35e   :  { %v19676_v30 = vpack.c.bf16 %v3989_v42, %v3989_v42  ;;  %7363 = vmatpush1.bf16.msra.mxu0 %v17503_v24  ;;  %v4139_v14 = vld [vmem:[#allocation6 + $0x468] sm:$0xff] }
 0x35f   :  { %7364 = vmatprep.subr.bf16.mxu0 %v17496_v19  ;;  %v4367_v15 = vld [vmem:[#allocation6 + $0xb88] sm:$0xff]  ;;  %v17344_v19 = vcombine.high %v4135_v12, %v4139_v14  ;;  %v17343_v29 = vcombine.low %v4135_v12, %v4139_v14 }
 0x360   :  { %7267 = vmatprep.mubr.bf16.mxu1 %v19676_v30  ;;  %v4371_v24 = vld [vmem:[#allocation6 + $0xba8] sm:$0xff] }
 0x361   :  { %7268 = vmatmul.mubr.bf16.vlgmr.msra.gmra.mxu1 %v19678_v33  ;;  %v17576_v42 = vcombine.high %v4367_v15, %v4371_v24  ;;  %v4127_v1 = vld [vmem:[#allocation6 + $0x408] sm:$0xff] }
 0x362   :  { %7318 = vmatpush1.bf16.msra.mxu1 %v17391_v8  ;;  %7349 = vmatprep.mubr.bf16.mxu1 %v19606_v59  ;;  %v4151_v8 = vld [vmem:[#allocation6 + $0x4c8] sm:$0xff] }
 0x363   :  { %7365 = vmatpush1.bf16.msra.mxu0 %v17495_v34  ;;  %7319 = vmatprep.subr.bf16.mxu1 %v17384_v35  ;;  %v17360_v2 = vcombine.high %v4151_v8, %v4155_v57  ;;  %v17359_v9 = vcombine.low %v4151_v8, %v4155_v57  ;;  %v17575_v34 = vcombine.low %v4367_v15, %v4371_v24  ;;  %v4351_v41 = vld [vmem:[#allocation6 + $0xb08] sm:$0xff] }
 0x364   :  { %7366 = vmatprep.subr.bf16.mxu0 %v17488_v37  ;;  %v17336_v35 = vcombine.high %v4127_v1, %v4131_v26  ;;  %v17568_v37 = vcombine.high %v4359_v27, %v4363_v36  ;;  %v4355_v44 = vld [vmem:[#allocation6 + $0xb28] sm:$0xff] }
 0x365   :  { %v4239_v39 = vld [vmem:[#allocation6 + $0x788] sm:$0xff] }
 0x366   :  { %7320 = vmatpush1.bf16.msra.mxu1 %v17383_v45  ;;  %v17335_v45 = vcombine.low %v4127_v1, %v4131_v26  ;;  %v4243_v52 = vld [vmem:[#allocation6 + $0x7a8] sm:$0xff] }
 0x367   :  { %7367 = vmatpush1.bf16.msra.mxu0 %v17487_v49  ;;  %7321 = vmatprep.subr.bf16.mxu1 %v17376_v50  ;;  %v17567_v49 = vcombine.low %v4359_v27, %v4363_v36  ;;  %v17456_v50 = vcombine.high %v4247_v38, %v4251_v40  ;;  %v4343_v60 = vld [vmem:[#allocation6 + $0xac8] sm:$0xff]  ;;  %v4056_v27 = vld [vmem:[#allocation6 + $0x1d0] sm:$0xff] }
 0x368   :  { %7368 = vmatprep.subr.bf16.mxu0 %v17480_v51  ;;  %v17560_v51 = vcombine.high %v4351_v41, %v4355_v44  ;;  %v4347_v54 = vld [vmem:[#allocation6 + $0xae8] sm:$0xff]  ;;  %v4060_v36 = vld [vmem:[#allocation6 + $0x1f0] sm:$0xff] }
 0x369   :  { %v4231_v8 = vld [vmem:[#allocation6 + $0x748] sm:$0xff] }
 0x36a   :  { %7322 = vmatpush1.bf16.msra.mxu1 %v17375_v55  ;;  %v17455_v55 = vcombine.low %v4247_v38, %v4251_v40  ;;  %v4235_v57 = vld [vmem:[#allocation6 + $0x768] sm:$0xff]  ;;  %v17266_v38 = vcombine.high %v4056_v27, %v4060_v36 }
 0x36b   :  { %7369 = vmatpush1.bf16.msra.mxu0 %v17479_v56  ;;  %7323 = vmatprep.subr.bf16.mxu1 %v17368_v3  ;;  %v17559_v56 = vcombine.low %v4351_v41, %v4355_v44  ;;  %v17448_v3 = vcombine.high %v4239_v39, %v4243_v52  ;;  %v4335_v63 = vld [vmem:[#allocation6 + $0xa88] sm:$0xff]  ;;  %v4048_v44 = vld [vmem:[#allocation6 + $0x190] sm:$0xff] }
 0x36c   :  { %7370 = vmatprep.subr.bf16.mxu0 %v17472_v7  ;;  %v17552_v7 = vcombine.high %v4343_v60, %v4347_v54  ;;  %v4339_v16 = vld [vmem:[#allocation6 + $0xaa8] sm:$0xff] }
 0x36d   :  { %v4223_v22 = vld [vmem:[#allocation6 + $0x708] sm:$0xff] }
 0x36e   :  { %7324 = vmatpush1.bf16.msra.mxu1 %v17367_v46  ;;  %v17447_v46 = vcombine.low %v4239_v39, %v4243_v52  ;;  %v4227_v0 = vld [vmem:[#allocation6 + $0x728] sm:$0xff] }
 0x36f   :  { %7371 = vmatpush1.bf16.msra.mxu0 %v17471_v31  ;;  %7325 = vmatprep.subr.bf16.mxu1 %v17360_v2  ;;  %v17551_v31 = vcombine.low %v4343_v60, %v4347_v54  ;;  %v17440_v2 = vcombine.high %v4231_v8, %v4235_v57  ;;  %v4327_v4 = vld [vmem:[#allocation6 + $0xa48] sm:$0xff] }
 0x370   :  { %7372 = vmatprep.subr.bf16.mxu0 %v17464_v20  ;;  %v17544_v20 = vcombine.high %v4335_v63, %v4339_v16  ;;  %v4331_v6 = vld [vmem:[#allocation6 + $0xa68] sm:$0xff] }
 0x371   :  { %v4215_v12 = vld [vmem:[#allocation6 + $0x6c8] sm:$0xff] }
 0x372   :  { %7326 = vmatpush1.bf16.msra.mxu1 %v17359_v9  ;;  %v17439_v9 = vcombine.low %v4231_v8, %v4235_v57  ;;  %v4219_v14 = vld [vmem:[#allocation6 + $0x6e8] sm:$0xff] }
 0x373   :  { %7373 = vmatpush1.bf16.msra.mxu0 %v17463_v11  ;;  %7327 = vmatprep.subr.bf16.mxu1 %v17352_v61  ;;  %v17543_v11 = vcombine.low %v4335_v63, %v4339_v16  ;;  %v17432_v61 = vcombine.high %v4223_v22, %v4227_v0  ;;  %v4319_v15 = vld [vmem:[#allocation6 + $0xa08] sm:$0xff] }
 0x374   :  { %7374 = vmatprep.subr.bf16.mxu0 %v17584_v25  ;;  %v17536_v25 = vcombine.high %v4327_v4, %v4331_v6  ;;  %v4323_v24 = vld [vmem:[#allocation6 + $0xa28] sm:$0xff] }
 0x375   :  { %v4207_v1 = vld [vmem:[#allocation6 + $0x688] sm:$0xff] }
 0x376   :  { %7328 = vmatpush1.bf16.msra.mxu1 %v17351_v21  ;;  %v17431_v21 = vcombine.low %v4223_v22, %v4227_v0  ;;  %v4211_v26 = vld [vmem:[#allocation6 + $0x6a8] sm:$0xff] }
 0x377   :  { %7375 = vmatpush2.bf16.msra.mxu0 %v17583_v28  ;;  %7329 = vmatprep.subr.bf16.mxu1 %v17344_v19  ;;  %v17535_v28 = vcombine.low %v4327_v4, %v4331_v6  ;;  %v17424_v19 = vcombine.high %v4215_v12, %v4219_v14  ;;  %v4199_v40 = vld [vmem:[#allocation6 + $0x648] sm:$0xff] }
 0x378   :  { %7376 = vmatprep.subr.bf16.mxu0 %v17576_v42  ;;  %v17528_v42 = vcombine.high %v4319_v15, %v4323_v24  ;;  %v4203_v41 = vld [vmem:[#allocation6 + $0x668] sm:$0xff] }
 0x379   :  { %v17408_v52 = vcombine.high %v4199_v40, %v4203_v41  ;;  %v4191_v54 = vld [vmem:[#allocation6 + $0x608] sm:$0xff]  ;;  %v17407_v63 = vcombine.low %v4199_v40, %v4203_v41  ;;  %v4016_v40 = vld [vmem:[#allocation6 + $0x90] sm:$0xff] }
 0x37a   :  { %7330 = vmatpush1.bf16.msra.mxu1 %v17343_v29  ;;  %v17423_v29 = vcombine.low %v4215_v12, %v4219_v14  ;;  %v4439_v4 = vld [vmem:[#allocation6 + $0xdc8] sm:$0xff]  ;;  %v4020_v41 = vld [vmem:[#allocation6 + $0xb0] sm:$0xff] }
 0x37b   :  { %7377 = vmatpush2.bf16.msra.mxu0 %v17575_v34  ;;  %7331 = vmatprep.subr.bf16.mxu1 %v17336_v35  ;;  %v17527_v34 = vcombine.low %v4319_v15, %v4323_v24  ;;  %v17416_v35 = vcombine.high %v4207_v1, %v4211_v26  ;;  %v4443_v6 = vld [vmem:[#allocation6 + $0xde8] sm:$0xff] }
 0x37c   :  { %7378 = vmatprep.subr.bf16.mxu0 %v17568_v37  ;;  %v4510_v37 = vld [vmem:[#allocation7] sm:$0xff] }
 0x37d   :  { %v4519_v39 = vrot.slane %v4510_v37, %v19539_v10 }
 0x37e   :  { %7332 = vmatpush1.bf16.msra.mxu1 %v17335_v45  ;;  %v4052_v45 = vld [vmem:[#allocation6 + $0x1b0] sm:$0xff] }
 0x37f   :  { %7379 = vmatpush2.bf16.msra.mxu0 %v17567_v49  ;;  %7333 = vmatprep.subr.bf16.mxu1 %v17456_v50  ;;  %v17415_v49 = vcombine.low %v4207_v1, %v4211_v26  ;;  %v4515_v50 = vrot.slane %v4510_v37, %v19534_v5  ;;  %v17258_v60 = vcombine.high %v4048_v44, %v4052_v45  ;;  %v4435_v1 = vld [vmem:[#allocation6 + $0xda8] sm:$0xff]  ;;  %v4024_v26 = vld [vmem:[#allocation6 + $0xd0] sm:$0xff] }
 0x380   :  { %7380 = vmatprep.subr.bf16.mxu0 %v17560_v51  ;;  %v17265_v51 = vcombine.low %v4056_v27, %v4060_v36  ;;  %v4028_v27 = vld [vmem:[#allocation6 + $0xf0] sm:$0xff]  ;;  %v17647_v36 = vcombine.low %v4439_v4, %v4443_v6  ;;  %v4423_v37 = vld [vmem:[#allocation6 + $0xd48] sm:$0xff] }
 0x382   :  { %7334 = vmatpush2.bf16.msra.mxu1 %v17455_v55  ;;  %v4195_v55 = vld [vmem:[#allocation6 + $0x628] sm:$0xff] }
 0x383   :  { %7381 = vmatpush2.bf16.msra.mxu0 %v17559_v56  ;;  %7335 = vmatprep.subr.bf16.mxu1 %v17448_v3  ;;  %v4040_v3 = vld [vmem:[#allocation6 + $0x150] sm:$0xff]  ;;  %v17399_v14 = vcombine.low %v4191_v54, %v4195_v55 }
 0x384   :  { %7382 = vmatprep.subr.bf16.mxu0 %v17552_v7  ;;  %v4044_v7 = vld [vmem:[#allocation6 + $0x170] sm:$0xff] }
 0x385   :  { %v17250_v0 = vcombine.high %v4040_v3, %v4044_v7  ;;  %v17249_v24 = vcombine.low %v4040_v3, %v4044_v7  ;;  %v4407_v7 = vld [vmem:[#allocation6 + $0xcc8] sm:$0xff] }
 0x386   :  { %7336 = vmatpush2.bf16.msra.mxu1 %v17447_v46  ;;  %v17257_v46 = vcombine.low %v4048_v44, %v4052_v45  ;;  %v17233_v45 = vcombine.low %v4024_v26, %v4028_v27 }
 0x387   :  { %7383 = vmatpush2.bf16.msra.mxu0 %v17551_v31  ;;  %7337 = vmatprep.subr.bf16.mxu1 %v17440_v2  ;;  %v17400_v31 = vcombine.high %v4191_v54, %v4195_v55  ;;  %v17225_v55 = vcombine.low %v4016_v40, %v4020_v41 }
 0x388   :  { %7384 = vmatprep.subr.bf16.mxu0 %v17544_v20 }
 0x38a   :  { %7338 = vmatpush2.bf16.msra.mxu1 %v17439_v9 }
 0x38b   :  { %7385 = vmatpush2.bf16.msra.mxu0 %v17543_v11  ;;  %7339 = vmatprep.subr.bf16.mxu1 %v17432_v61  ;;  %v4032_v11 = vld [vmem:[#allocation6 + $0x110] sm:$0xff] }
 0x38c   :  { %7386 = vmatprep.subr.bf16.mxu0 %v17536_v25  ;;  %v4036_v61 = vld [vmem:[#allocation6 + $0x130] sm:$0xff] }
 0x38e   :  { %7340 = vmatpush2.bf16.msra.mxu1 %v17431_v21  ;;  %v17648_v21 = vcombine.high %v4439_v4, %v4443_v6  ;;  %v4120_v4 = vld [vmem:[#allocation6 + $0x3d0] sm:$0xff] }
 0x38f   :  { %7387 = vmatpush2.bf16.msra.mxu0 %v17535_v28  ;;  %7341 = vmatprep.subr.bf16.mxu1 %v17424_v19  ;;  %v17242_v19 = vcombine.high %v4032_v11, %v4036_v61  ;;  %v4124_v6 = vld [vmem:[#allocation6 + $0x3f0] sm:$0xff] }
 0x390   :  { %7388 = vmatprep.subr.bf16.mxu0 %v17528_v42  ;;  %v4431_v42 = vld [vmem:[#allocation6 + $0xd88] sm:$0xff] }
 0x391   :  { %v17639_v44 = vcombine.low %v4431_v42, %v4435_v1 }
 0x392   :  { %7342 = vmatpush2.bf16.msra.mxu1 %v17423_v29  ;;  %v17241_v29 = vcombine.low %v4032_v11, %v4036_v61 }
 0x393   :  { %7389 = vmatpush2.bf16.msra.mxu0 %v17527_v34  ;;  %7343 = vmatprep.subr.bf16.mxu1 %v17416_v35  ;;  %v17640_v34 = vcombine.high %v4431_v42, %v4435_v1  ;;  %v17234_v35 = vcombine.high %v4024_v26, %v4028_v27  ;;  %v4383_v26 = vld [vmem:[#allocation6 + $0xc08] sm:$0xff] }
 0x394   :  { %7440 = vmatprep.subr.bf16.mxu0 %v17266_v38  ;;  %v4427_v38 = vld [vmem:[#allocation6 + $0xd68] sm:$0xff] }
 0x395   :  { %v7146_v56 = vpop.f32.mrf.mxu0  ;;  %v17631_v54 = vcombine.low %v4423_v37, %v4427_v38  ;;  %v4387_v27 = vld [vmem:[#allocation6 + $0xc28] sm:$0xff] }
 0x396   :  { %v7147_v8 = vadd.f32 %v7146_v56, %v4515_v50  ;;  %v7187_v57 = vpop.f32.mrf.mxu1  ;;  %7344 = vmatpush2.bf16.msra.mxu1 %v17415_v49  ;;  %7391 = vmatmul.mubr.bf16.vlgmr.msra.gmra.mxu0 %v19650_v13  ;;  %v17632_v49 = vcombine.high %v4423_v37, %v4427_v38  ;;  %v17226_v50 = vcombine.high %v4016_v40, %v4020_v41  ;;  %v4503_v40 = vld [vmem:[#allocation6 + $0xfc8] sm:$0xff] }
 0x397   :  { %7441 = vmatpush1.bf16.msra.mxu0 %v17265_v51  ;;  %7472 = vmatprep.mubr.bf16.mxu0 %v19603_v32  ;;  %v7148_v16 = vpop.f32.mrf.mxu0  ;;  %v4415_v51 = vld [vmem:[#allocation6 + $0xd08] sm:$0xff]  ;;  %v17592_v37 = vcombine.high %v4383_v26, %v4387_v27 }
 0x398   :  { %v19690_v2 = vadd.f32 %v7187_v57, %v7147_v8  ;;  %v7149_v20 = vadd.f32 %v7148_v16, %v4519_v39  ;;  %v7189_v22 = vpop.f32.mrf.mxu1  ;;  %7345 = vmatprep.subr.bf16.mxu1 %v17408_v52  ;;  %7442 = vmatprep.subr.bf16.mxu0 %v17258_v60  ;;  %v4419_v39 = vld [vmem:[#allocation6 + $0xd28] sm:$0xff]  ;;  %v4008_v52 = vld [vmem:[#allocation6 + $0x50] sm:$0xff] }
 0x399   :  { %v7150_v9 = vpop.f32.mrf.mxu0  ;;  %v4012_v60 = vld [vmem:[#allocation6 + $0x70] sm:$0xff]  ;;  %v17624_v56 = vcombine.high %v4415_v51, %v4419_v39  ;;  %v4411_v8 = vld [vmem:[#allocation6 + $0xce8] sm:$0xff]  ;;  %v17623_v16 = vcombine.low %v4415_v51, %v4419_v39 }
 0x39a   :  { %v19692_v25 = vadd.f32 %v7189_v22, %v7149_v20  ;;  %v7191_v12 = vpop.f32.mrf.mxu1  ;;  %7346 = vmatpush2.bf16.msra.mxu1 %v17407_v63  ;;  %v17218_v3 = vcombine.high %v4008_v52, %v4012_v60  ;;  %v4000_v57 = vld [vmem:[#allocation6 + $0x10] sm:$0xff]  ;;  %v4399_v22 = vld [vmem:[#allocation6 + $0xc88] sm:$0xff]  ;;  %v17615_v9 = vcombine.low %v4407_v7, %v4411_v8 }
 0x39b   :  { %7443 = vmatpush1.bf16.msra.mxu0 %v17257_v46  ;;  %v7151_v15 = vpop.f32.mrf.mxu0  ;;  %7347 = vmatprep.subr.bf16.mxu1 %v17400_v31  ;;  %v4004_v63 = vld [vmem:[#allocation6 + $0x30] sm:$0xff]  ;;  %v17217_v46 = vcombine.low %v4008_v52, %v4012_v60  ;;  %v17616_v31 = vcombine.high %v4407_v7, %v4411_v8  ;;  %v17330_v12 = vcombine.high %v4120_v4, %v4124_v6  ;;  %v4507_v41 = vld [vmem:[#allocation6 + $0xfe8] sm:$0xff] }
 0x39c   :  { %v7192_v28 = vpop.f32.mrf.mxu1  ;;  %7444 = vmatprep.subr.bf16.mxu0 %v17250_v0  ;;  %v17210_v20 = vcombine.high %v4000_v57, %v4004_v63  ;;  %v4403_v0 = vld [vmem:[#allocation6 + $0xca8] sm:$0xff]  ;;  %v17209_v11 = vcombine.low %v4000_v57, %v4004_v63  ;;  %v17712_v51 = vcombine.high %v4503_v40, %v4507_v41 }
 0x39d   :  { %v17608_v61 = vcombine.high %v4399_v22, %v4403_v0  ;;  %v4395_v15 = vld [vmem:[#allocation6 + $0xc68] sm:$0xff]  ;;  %v17607_v28 = vcombine.low %v4399_v22, %v4403_v0 }
 0x39e   :  { %7348 = vmatpush2.bf16.msra.mxu1 %v17399_v14  ;;  %v4391_v14 = vld [vmem:[#allocation6 + $0xc48] sm:$0xff] }
 0x39f   :  { %7445 = vmatpush1.bf16.msra.mxu0 %v17249_v24  ;;  %7399 = vmatprep.subr.bf16.mxu1 %v17648_v21  ;;  %v4112_v24 = vld [vmem:[#allocation6 + $0x390] sm:$0xff]  ;;  %v17600_v42 = vcombine.high %v4391_v14, %v4395_v15  ;;  %v4495_v52 = vld [vmem:[#allocation6 + $0xf88] sm:$0xff] }
 0x3a0   :  { %7446 = vmatprep.subr.bf16.mxu0 %v17242_v19  ;;  %v4116_v21 = vld [vmem:[#allocation6 + $0x3b0] sm:$0xff]  ;;  %v17329_v19 = vcombine.low %v4120_v4, %v4124_v6  ;;  %v4499_v60 = vld [vmem:[#allocation6 + $0xfa8] sm:$0xff] }
 0x3a1   :  { %7350 = vmatmul.mubr.bf16.vlgmr.msra.gmra.mxu1 %v19627_v18  ;;  %v17322_v1 = vcombine.high %v4112_v24, %v4116_v21  ;;  %v17704_v7 = vcombine.high %v4495_v52, %v4499_v60  ;;  %v4487_v57 = vld [vmem:[#allocation6 + $0xf48] sm:$0xff] }
 0x3a2   :  { %7400 = vmatpush1.bf16.msra.mxu1 %v17647_v36  ;;  %7431 = vmatprep.mubr.bf16.mxu1 %v19676_v30  ;;  %v4104_v36 = vld [vmem:[#allocation6 + $0x350] sm:$0xff]  ;;  %v4491_v63 = vld [vmem:[#allocation6 + $0xf68] sm:$0xff] }
 0x3a3   :  { %7447 = vmatpush1.bf16.msra.mxu0 %v17241_v29  ;;  %7401 = vmatprep.subr.bf16.mxu1 %v17640_v34  ;;  %v4108_v29 = vld [vmem:[#allocation6 + $0x370] sm:$0xff]  ;;  %v17599_v34 = vcombine.low %v4391_v14, %v4395_v15  ;;  %v17696_v22 = vcombine.high %v4487_v57, %v4491_v63  ;;  %v4479_v4 = vld [vmem:[#allocation6 + $0xf08] sm:$0xff] }
 0x3a4   :  { %7448 = vmatprep.subr.bf16.mxu0 %v17234_v35  ;;  %v17321_v35 = vcombine.low %v4112_v24, %v4116_v21  ;;  %v17314_v38 = vcombine.high %v4104_v36, %v4108_v29  ;;  %v4483_v6 = vld [vmem:[#allocation6 + $0xf28] sm:$0xff] }
 0x3a5   :  { %v17688_v14 = vcombine.high %v4479_v4, %v4483_v6  ;;  %v4471_v24 = vld [vmem:[#allocation6 + $0xec8] sm:$0xff] }
 0x3a6   :  { %7402 = vmatpush1.bf16.msra.mxu1 %v17639_v44  ;;  %v4096_v44 = vld [vmem:[#allocation6 + $0x310] sm:$0xff]  ;;  %v4475_v21 = vld [vmem:[#allocation6 + $0xee8] sm:$0xff] }
 0x3a7   :  { %7449 = vmatpush1.bf16.msra.mxu0 %v17233_v45  ;;  %7403 = vmatprep.subr.bf16.mxu1 %v17632_v49  ;;  %v4100_v45 = vld [vmem:[#allocation6 + $0x330] sm:$0xff]  ;;  %v17591_v49 = vcombine.low %v4383_v26, %v4387_v27  ;;  %v17680_v26 = vcombine.high %v4471_v24, %v4475_v21 }
 0x3a8   :  { %7450 = vmatprep.subr.bf16.mxu0 %v17226_v50  ;;  %v17313_v50 = vcombine.low %v4104_v36, %v4108_v29  ;;  %v17306_v39 = vcombine.high %v4096_v44, %v4100_v45  ;;  %v4463_v36 = vld [vmem:[#allocation6 + $0xe88] sm:$0xff] }
 0x3a9   :  { %v4467_v29 = vld [vmem:[#allocation6 + $0xea8] sm:$0xff] }
 0x3aa   :  { %7404 = vmatpush1.bf16.msra.mxu1 %v17631_v54  ;;  %v4088_v54 = vld [vmem:[#allocation6 + $0x2d0] sm:$0xff] }
 0x3ab   :  { %7451 = vmatpush1.bf16.msra.mxu0 %v17225_v55  ;;  %7405 = vmatprep.subr.bf16.mxu1 %v17624_v56  ;;  %v4092_v55 = vld [vmem:[#allocation6 + $0x2f0] sm:$0xff]  ;;  %v17711_v56 = vcombine.low %v4503_v40, %v4507_v41  ;;  %v17672_v40 = vcombine.high %v4463_v36, %v4467_v29 }
 0x3ac   :  { %7452 = vmatprep.subr.bf16.mxu0 %v17218_v3  ;;  %v17305_v3 = vcombine.low %v4096_v44, %v4100_v45  ;;  %v17298_v8 = vcombine.high %v4088_v54, %v4092_v55  ;;  %v4455_v44 = vld [vmem:[#allocation6 + $0xe48] sm:$0xff] }
 0x3ad   :  { %v4459_v45 = vld [vmem:[#allocation6 + $0xe68] sm:$0xff] }
 0x3ae   :  { %7406 = vmatpush1.bf16.msra.mxu1 %v17623_v16  ;;  %v4080_v16 = vld [vmem:[#allocation6 + $0x290] sm:$0xff] }
 0x3af   :  { %7453 = vmatpush1.bf16.msra.mxu0 %v17217_v46  ;;  %7407 = vmatprep.subr.bf16.mxu1 %v17616_v31  ;;  %v4084_v46 = vld [vmem:[#allocation6 + $0x2b0] sm:$0xff]  ;;  %v17703_v31 = vcombine.low %v4495_v52, %v4499_v60  ;;  %v17664_v52 = vcombine.high %v4455_v44, %v4459_v45 }
 0x3b0   :  { %7454 = vmatprep.subr.bf16.mxu0 %v17210_v20  ;;  %v17297_v20 = vcombine.low %v4088_v54, %v4092_v55  ;;  %v17290_v0 = vcombine.high %v4080_v16, %v4084_v46  ;;  %v4447_v54 = vld [vmem:[#allocation6 + $0xe08] sm:$0xff] }
 0x3b1   :  { %v4451_v55 = vld [vmem:[#allocation6 + $0xe28] sm:$0xff] }
 0x3b2   :  { %7408 = vmatpush1.bf16.msra.mxu1 %v17615_v9  ;;  %v4072_v9 = vld [vmem:[#allocation6 + $0x250] sm:$0xff] }
 0x3b3   :  { %7455 = vmatpush1.bf16.msra.mxu0 %v17209_v11  ;;  %7409 = vmatprep.subr.bf16.mxu1 %v17608_v61  ;;  %v4076_v11 = vld [vmem:[#allocation6 + $0x270] sm:$0xff]  ;;  %v17695_v61 = vcombine.low %v4487_v57, %v4491_v63  ;;  %v17663_v57 = vcombine.low %v4455_v44, %v4459_v45 }
 0x3b4   :  { %7456 = vmatprep.subr.bf16.mxu0 %v17330_v12  ;;  %v17289_v12 = vcombine.low %v4080_v16, %v4084_v46  ;;  %v17282_v15 = vcombine.high %v4072_v9, %v4076_v11  ;;  %v17656_v46 = vcombine.high %v4447_v54, %v4451_v55  ;;  %v4264_v44 = vld [vmem:[#allocation6 + $0x850] sm:$0xff] }
 0x3b5   :  { %v4268_v45 = vld [vmem:[#allocation6 + $0x870] sm:$0xff] }
 0x3b6   :  { %7410 = vmatpush1.bf16.msra.mxu1 %v17607_v28  ;;  %v4064_v28 = vld [vmem:[#allocation6 + $0x210] sm:$0xff] }
 0x3b7   :  { %7457 = vmatpush2.bf16.msra.mxu0 %v17329_v19  ;;  %7411 = vmatprep.subr.bf16.mxu1 %v17600_v42  ;;  %v4068_v19 = vld [vmem:[#allocation6 + $0x230] sm:$0xff]  ;;  %v17687_v42 = vcombine.low %v4479_v4, %v4483_v6 }
 0x3b8   :  { %7458 = vmatprep.subr.bf16.mxu0 %v17322_v1  ;;  %v17281_v1 = vcombine.low %v4072_v9, %v4076_v11  ;;  %v17274_v27 = vcombine.high %v4064_v28, %v4068_v19  ;;  %v4288_v4 = vld [vmem:[#allocation6 + $0x910] sm:$0xff]  ;;  %v17655_v9 = vcombine.low %v4447_v54, %v4451_v55 }
 0x3b9   :  { %v4292_v6 = vld [vmem:[#allocation6 + $0x930] sm:$0xff] }
 0x3ba   :  { %7412 = vmatpush1.bf16.msra.mxu1 %v17599_v34  ;;  %v4312_v34 = vld [vmem:[#allocation6 + $0x9d0] sm:$0xff] }
 0x3bb   :  { %7459 = vmatpush2.bf16.msra.mxu0 %v17321_v35  ;;  %7413 = vmatprep.subr.bf16.mxu1 %v17592_v37  ;;  %v4316_v35 = vld [vmem:[#allocation6 + $0x9f0] sm:$0xff]  ;;  %v17679_v37 = vcombine.low %v4471_v24, %v4475_v21 }
 0x3bc   :  { %7460 = vmatprep.subr.bf16.mxu0 %v17314_v38  ;;  %v17273_v38 = vcombine.low %v4064_v28, %v4068_v19  ;;  %v17522_v41 = vcombine.high %v4312_v34, %v4316_v35  ;;  %v4280_v24 = vld [vmem:[#allocation6 + $0x8d0] sm:$0xff]  ;;  %v17497_v19 = vcombine.low %v4288_v4, %v4292_v6 }
 0x3bd   :  { %v4284_v21 = vld [vmem:[#allocation6 + $0x8f0] sm:$0xff] }
 0x3be   :  { %7414 = vmatpush1.bf16.msra.mxu1 %v17591_v49  ;;  %v4304_v49 = vld [vmem:[#allocation6 + $0x990] sm:$0xff] }
 0x3bf   :  { %7461 = vmatpush2.bf16.msra.mxu0 %v17313_v50  ;;  %7415 = vmatprep.subr.bf16.mxu1 %v17712_v51  ;;  %v4308_v50 = vld [vmem:[#allocation6 + $0x9b0] sm:$0xff]  ;;  %v17671_v51 = vcombine.low %v4463_v36, %v4467_v29 }
 0x3c0   :  { %7462 = vmatprep.subr.bf16.mxu0 %v17306_v39  ;;  %v17521_v39 = vcombine.low %v4312_v34, %v4316_v35  ;;  %v17514_v60 = vcombine.high %v4304_v49, %v4308_v50  ;;  %v17513_v16 = vcombine.low %v4304_v49, %v4308_v50  ;;  %v4272_v36 = vld [vmem:[#allocation6 + $0x890] sm:$0xff]  ;;  %v17489_v35 = vcombine.low %v4280_v24, %v4284_v21 }
 0x3c1   :  { %v4276_v29 = vld [vmem:[#allocation6 + $0x8b0] sm:$0xff] }
 0x3c2   :  { %7416 = vmatpush2.bf16.msra.mxu1 %v17711_v56  ;;  %v17481_v50 = vcombine.low %v4272_v36, %v4276_v29  ;;  %v4256_v54 = vld [vmem:[#allocation6 + $0x810] sm:$0xff] }
 0x3c3   :  { %7463 = vmatpush2.bf16.msra.mxu0 %v17305_v3  ;;  %7417 = vmatprep.subr.bf16.mxu1 %v17704_v7  ;;  %v4296_v3 = vld [vmem:[#allocation6 + $0x950] sm:$0xff] }
 0x3c4   :  { %7464 = vmatprep.subr.bf16.mxu0 %v17298_v8  ;;  %v4300_v7 = vld [vmem:[#allocation6 + $0x970] sm:$0xff] }
 0x3c5   :  { %v4260_v55 = vld [vmem:[#allocation6 + $0x830] sm:$0xff] }
 0x3c6   :  { %7418 = vmatpush2.bf16.msra.mxu1 %v17703_v31 }
 0x3c7   :  { %7465 = vmatpush2.bf16.msra.mxu0 %v17297_v20  ;;  %7419 = vmatprep.subr.bf16.mxu1 %v17696_v22  ;;  %v17506_v20 = vcombine.high %v4296_v3, %v4300_v7  ;;  %v4184_v22 = vld [vmem:[#allocation6 + $0x5d0] sm:$0xff] }
 0x3c8   :  { %7466 = vmatprep.subr.bf16.mxu0 %v17290_v0  ;;  %v4188_v0 = vld [vmem:[#allocation6 + $0x5f0] sm:$0xff] }
 0x3c9   :  { %v17393_v28 = vcombine.low %v4184_v22, %v4188_v0 }
 0x3ca   :  { %7420 = vmatpush2.bf16.msra.mxu1 %v17695_v61  ;;  %v17505_v61 = vcombine.low %v4296_v3, %v4300_v7  ;;  %v17473_v3 = vcombine.low %v4264_v44, %v4268_v45 }
 0x3cb   :  { %7467 = vmatpush2.bf16.msra.mxu0 %v17289_v12  ;;  %7421 = vmatprep.subr.bf16.mxu1 %v17688_v14  ;;  %v17394_v12 = vcombine.high %v4184_v22, %v4188_v0  ;;  %v17498_v14 = vcombine.high %v4288_v4, %v4292_v6  ;;  %v17465_v0 = vcombine.low %v4256_v54, %v4260_v55  ;;  %v4136_v6 = vld [vmem:[#allocation6 + $0x450] sm:$0xff] }
 0x3cc   :  { %7468 = vmatprep.subr.bf16.mxu0 %v17282_v15  ;;  %v4176_v15 = vld [vmem:[#allocation6 + $0x590] sm:$0xff] }
 0x3ce   :  { %7422 = vmatpush2.bf16.msra.mxu1 %v17687_v42 }
 0x3cf   :  { %7469 = vmatpush2.bf16.msra.mxu0 %v17281_v1  ;;  %7423 = vmatprep.subr.bf16.mxu1 %v17680_v26  ;;  %v17490_v1 = vcombine.high %v4280_v24, %v4284_v21  ;;  %v4168_v26 = vld [vmem:[#allocation6 + $0x550] sm:$0xff] }
 0x3d0   :  { %7470 = vmatprep.subr.bf16.mxu0 %v17274_v27  ;;  %v4172_v27 = vld [vmem:[#allocation6 + $0x570] sm:$0xff] }
 0x3d1   :  { %v17377_v49 = vcombine.low %v4168_v26, %v4172_v27  ;;  %v4128_v24 = vld [vmem:[#allocation6 + $0x410] sm:$0xff] }
 0x3d2   :  { %7424 = vmatpush2.bf16.msra.mxu1 %v17679_v37  ;;  %v17378_v37 = vcombine.high %v4168_v26, %v4172_v27  ;;  %v4132_v21 = vld [vmem:[#allocation6 + $0x430] sm:$0xff] }
 0x3d3   :  { %7471 = vmatpush2.bf16.msra.mxu0 %v17273_v38  ;;  %7425 = vmatprep.subr.bf16.mxu1 %v17672_v40  ;;  %v17482_v38 = vcombine.high %v4272_v36, %v4276_v29  ;;  %v4160_v40 = vld [vmem:[#allocation6 + $0x510] sm:$0xff]  ;;  %v17338_v26 = vcombine.high %v4128_v24, %v4132_v21 }
 0x3d4   :  { %7522 = vmatprep.subr.bf16.mxu0 %v17522_v41  ;;  %v4164_v41 = vld [vmem:[#allocation6 + $0x530] sm:$0xff] }
 0x3d5   :  { %v7228_v56 = vpop.f32.mrf.mxu0  ;;  %v4248_v36 = vld [vmem:[#allocation6 + $0x7d0] sm:$0xff] }
 0x3d6   :  { %v19697_v8 = vadd.f32 %v7228_v56, %v19690_v2  ;;  %7426 = vmatpush2.bf16.msra.mxu1 %v17671_v51  ;;  %7473 = vmatmul.mubr.bf16.vlgmr.msra.gmra.mxu0 %v19625_v23  ;;  %v17370_v51 = vcombine.high %v4160_v40, %v4164_v41  ;;  %v17369_v56 = vcombine.low %v4160_v40, %v4164_v41  ;;  %v4252_v29 = vld [vmem:[#allocation6 + $0x7f0] sm:$0xff] }
 0x3d7   :  { %7523 = vmatpush1.bf16.msra.mxu0 %v17521_v39  ;;  %7554 = vmatprep.mubr.bf16.mxu0 %v19636_v62  ;;  %v7230_v63 = vpop.f32.mrf.mxu0  ;;  %v17474_v39 = vcombine.high %v4264_v44, %v4268_v45  ;;  %v17458_v40 = vcombine.high %v4248_v36, %v4252_v29  ;;  %v4240_v44 = vld [vmem:[#allocation6 + $0x790] sm:$0xff] }
 0x3d8   :  { %v19702_v31 = vadd.f32 %v7230_v63, %v19692_v25  ;;  %7427 = vmatprep.subr.bf16.mxu1 %v17664_v52  ;;  %7524 = vmatprep.subr.bf16.mxu0 %v17514_v60  ;;  %v4180_v25 = vld [vmem:[#allocation6 + $0x5b0] sm:$0xff] }
 0x3d9   :  { %v7232_v2 = vpop.f32.mrf.mxu0  ;;  %v17386_v42 = vcombine.high %v4176_v15, %v4180_v25  ;;  %v17385_v34 = vcombine.low %v4176_v15, %v4180_v25  ;;  %v4152_v52 = vld [vmem:[#allocation6 + $0x4d0] sm:$0xff] }
 0x3da   :  { %7428 = vmatpush2.bf16.msra.mxu1 %v17663_v57  ;;  %v4156_v60 = vld [vmem:[#allocation6 + $0x4f0] sm:$0xff]  ;;  %v17466_v57 = vcombine.high %v4256_v54, %v4260_v55 }
 0x3db   :  { %7525 = vmatpush1.bf16.msra.mxu0 %v17513_v16  ;;  %v7233_v11 = vpop.f32.mrf.mxu0  ;;  %7429 = vmatprep.subr.bf16.mxu1 %v17656_v46  ;;  %v17362_v7 = vcombine.high %v4152_v52, %v4156_v60  ;;  %v4144_v63 = vld [vmem:[#allocation6 + $0x490] sm:$0xff]  ;;  %v17361_v22 = vcombine.low %v4152_v52, %v4156_v60 }
 0x3dc   :  { %7526 = vmatprep.subr.bf16.mxu0 %v17506_v20  ;;  %v4148_v16 = vld [vmem:[#allocation6 + $0x4b0] sm:$0xff] }
 0x3dd   :  { %v4376_v46 = vld [vmem:[#allocation6 + $0xbd0] sm:$0xff]  ;;  %v17354_v2 = vcombine.high %v4144_v63, %v4148_v16 }
 0x3de   :  { %7430 = vmatpush2.bf16.msra.mxu1 %v17655_v9  ;;  %v4380_v20 = vld [vmem:[#allocation6 + $0xbf0] sm:$0xff] }
 0x3df   :  { %7527 = vmatpush1.bf16.msra.mxu0 %v17505_v61  ;;  %7481 = vmatprep.subr.bf16.mxu1 %v17394_v12  ;;  %v17586_v4 = vcombine.high %v4376_v46, %v4380_v20  ;;  %v4140_v9 = vld [vmem:[#allocation6 + $0x470] sm:$0xff]  ;;  %v17353_v12 = vcombine.low %v4144_v63, %v4148_v16 }
 0x3e0   :  { %7528 = vmatprep.subr.bf16.mxu0 %v17498_v14  ;;  %v4368_v11 = vld [vmem:[#allocation6 + $0xb90] sm:$0xff]  ;;  %v17585_v14 = vcombine.low %v4376_v46, %v4380_v20  ;;  %v17346_v15 = vcombine.high %v4136_v6, %v4140_v9 }
 0x3e1   :  { %7432 = vmatmul.mubr.bf16.vlgmr.msra.gmra.mxu1 %v19678_v33  ;;  %v4372_v61 = vld [vmem:[#allocation6 + $0xbb0] sm:$0xff] }
 0x3e2   :  { %7482 = vmatpush1.bf16.msra.mxu1 %v17393_v28  ;;  %7513 = vmatprep.mubr.bf16.mxu1 %v19606_v59  ;;  %v17578_v25 = vcombine.high %v4368_v11, %v4372_v61  ;;  %v4360_v28 = vld [vmem:[#allocation6 + $0xb50] sm:$0xff] }
 0x3e3   :  { %7529 = vmatpush1.bf16.msra.mxu0 %v17497_v19  ;;  %7483 = vmatprep.subr.bf16.mxu1 %v17386_v42  ;;  %v4364_v19 = vld [vmem:[#allocation6 + $0xb70] sm:$0xff]  ;;  %v17345_v42 = vcombine.low %v4136_v6, %v4140_v9 }
 0x3e4   :  { %7530 = vmatprep.subr.bf16.mxu0 %v17490_v1  ;;  %v17577_v1 = vcombine.low %v4368_v11, %v4372_v61  ;;  %v17570_v27 = vcombine.high %v4360_v28, %v4364_v19  ;;  %v4244_v45 = vld [vmem:[#allocation6 + $0x7b0] sm:$0xff] }
 0x3e5   :  { %v17450_v52 = vcombine.high %v4240_v44, %v4244_v45  ;;  %v4232_v54 = vld [vmem:[#allocation6 + $0x750] sm:$0xff] }
 0x3e6   :  { %7484 = vmatpush1.bf16.msra.mxu1 %v17385_v34  ;;  %v4352_v34 = vld [vmem:[#allocation6 + $0xb10] sm:$0xff] }
 0x3e7   :  { %7531 = vmatpush1.bf16.msra.mxu0 %v17489_v35  ;;  %7485 = vmatprep.subr.bf16.mxu1 %v17378_v37  ;;  %v4356_v35 = vld [vmem:[#allocation6 + $0xb30] sm:$0xff]  ;;  %v17337_v37 = vcombine.low %v4128_v24, %v4132_v21 }
 0x3e8   :  { %7532 = vmatprep.subr.bf16.mxu0 %v17482_v38  ;;  %v17569_v38 = vcombine.low %v4360_v28, %v4364_v19  ;;  %v17562_v41 = vcombine.high %v4352_v34, %v4356_v35  ;;  %v4236_v55 = vld [vmem:[#allocation6 + $0x770] sm:$0xff] }
 0x3e9   :  { %v17442_v63 = vcombine.high %v4232_v54, %v4236_v55  ;;  %v4224_v46 = vld [vmem:[#allocation6 + $0x710] sm:$0xff] }
 0x3ea   :  { %7486 = vmatpush1.bf16.msra.mxu1 %v17377_v49  ;;  %v4344_v49 = vld [vmem:[#allocation6 + $0xad0] sm:$0xff] }
 0x3eb   :  { %7533 = vmatpush1.bf16.msra.mxu0 %v17481_v50  ;;  %7487 = vmatprep.subr.bf16.mxu1 %v17370_v51  ;;  %v4348_v50 = vld [vmem:[#allocation6 + $0xaf0] sm:$0xff]  ;;  %v17457_v51 = vcombine.low %v4248_v36, %v4252_v29 }
 0x3ec   :  { %7534 = vmatprep.subr.bf16.mxu0 %v17474_v39  ;;  %v17561_v39 = vcombine.low %v4352_v34, %v4356_v35  ;;  %v17554_v60 = vcombine.high %v4344_v49, %v4348_v50  ;;  %v4228_v20 = vld [vmem:[#allocation6 + $0x730] sm:$0xff] }
 0x3ed   :  { %v17434_v6 = vcombine.high %v4224_v46, %v4228_v20  ;;  %v4216_v11 = vld [vmem:[#allocation6 + $0x6d0] sm:$0xff] }
 0x3ee   :  { %7488 = vmatpush1.bf16.msra.mxu1 %v17369_v56  ;;  %v4336_v56 = vld [vmem:[#allocation6 + $0xa90] sm:$0xff] }
 0x3ef   :  { %7535 = vmatpush1.bf16.msra.mxu0 %v17473_v3  ;;  %7489 = vmatprep.subr.bf16.mxu1 %v17362_v7  ;;  %v4340_v3 = vld [vmem:[#allocation6 + $0xab0] sm:$0xff]  ;;  %v17449_v7 = vcombine.low %v4240_v44, %v4244_v45 }
 0x3f0   :  { %7536 = vmatprep.subr.bf16.mxu0 %v17466_v57  ;;  %v17553_v57 = vcombine.low %v4344_v49, %v4348_v50  ;;  %v17546_v16 = vcombine.high %v4336_v56, %v4340_v3  ;;  %v4220_v61 = vld [vmem:[#allocation6 + $0x6f0] sm:$0xff] }
 0x3f1   :  { %v17426_v24 = vcombine.high %v4216_v11, %v4220_v61  ;;  %v4208_v28 = vld [vmem:[#allocation6 + $0x690] sm:$0xff] }
 0x3f2   :  { %7490 = vmatpush1.bf16.msra.mxu1 %v17361_v22  ;;  %v4328_v22 = vld [vmem:[#allocation6 + $0xa50] sm:$0xff] }
 0x3f3   :  { %7537 = vmatpush1.bf16.msra.mxu0 %v17465_v0  ;;  %7491 = vmatprep.subr.bf16.mxu1 %v17354_v2  ;;  %v4332_v0 = vld [vmem:[#allocation6 + $0xa70] sm:$0xff]  ;;  %v17441_v2 = vcombine.low %v4232_v54, %v4236_v55 }
 0x3f4   :  { %7538 = vmatprep.subr.bf16.mxu0 %v17586_v4  ;;  %v17545_v4 = vcombine.low %v4336_v56, %v4340_v3  ;;  %v17538_v9 = vcombine.high %v4328_v22, %v4332_v0  ;;  %v4212_v19 = vld [vmem:[#allocation6 + $0x6b0] sm:$0xff] }
 0x3f5   :  { %v17418_v36 = vcombine.high %v4208_v28, %v4212_v19  ;;  %v4200_v34 = vld [vmem:[#allocation6 + $0x650] sm:$0xff] }
 0x3f6   :  { %7492 = vmatpush1.bf16.msra.mxu1 %v17353_v12  ;;  %v4320_v12 = vld [vmem:[#allocation6 + $0xa10] sm:$0xff] }
 0x3f7   :  { %7539 = vmatpush2.bf16.msra.mxu0 %v17585_v14  ;;  %7493 = vmatprep.subr.bf16.mxu1 %v17346_v15  ;;  %v4324_v14 = vld [vmem:[#allocation6 + $0xa30] sm:$0xff]  ;;  %v17433_v15 = vcombine.low %v4224_v46, %v4228_v20  ;;  %v4037_v46 = vld [vmem:[#allocation6 + $0x138] sm:$0xff] }
 0x3f8   :  { %7540 = vmatprep.subr.bf16.mxu0 %v17578_v25  ;;  %v17537_v25 = vcombine.low %v4328_v22, %v4332_v0  ;;  %v17530_v21 = vcombine.high %v4320_v12, %v4324_v14  ;;  %v4204_v35 = vld [vmem:[#allocation6 + $0x670] sm:$0xff] }
 0x3f9   :  { %v17410_v44 = vcombine.high %v4200_v34, %v4204_v35  ;;  %v4192_v49 = vld [vmem:[#allocation6 + $0x610] sm:$0xff] }
 0x3fa   :  { %7494 = vmatpush1.bf16.msra.mxu1 %v17345_v42  ;;  %v4057_v42 = vld [vmem:[#allocation6 + $0x1d8] sm:$0xff]  ;;  %v4196_v50 = vld [vmem:[#allocation6 + $0x630] sm:$0xff] }
 0x3fb   :  { %7541 = vmatpush2.bf16.msra.mxu0 %v17577_v1  ;;  %7495 = vmatprep.subr.bf16.mxu1 %v17338_v26  ;;  %v4061_v1 = vld [vmem:[#allocation6 + $0x1f8] sm:$0xff]  ;;  %v17425_v26 = vcombine.low %v4216_v11, %v4220_v61  ;;  %v17402_v56 = vcombine.high %v4192_v49, %v4196_v50  ;;  %v17401_v20 = vcombine.low %v4192_v49, %v4196_v50 }
 0x3fc   :  { %7542 = vmatprep.subr.bf16.mxu0 %v17570_v27  ;;  %v17529_v27 = vcombine.low %v4320_v12, %v4324_v14  ;;  %v17268_v29 = vcombine.high %v4057_v42, %v4061_v1  ;;  %v4029_v11 = vld [vmem:[#allocation6 + $0xf8] sm:$0xff] }
 0x3fe   :  { %7496 = vmatpush1.bf16.msra.mxu1 %v17337_v37  ;;  %v4049_v37 = vld [vmem:[#allocation6 + $0x198] sm:$0xff] }
 0x3ff   :  { %7543 = vmatpush2.bf16.msra.mxu0 %v17569_v38  ;;  %7497 = vmatprep.subr.bf16.mxu1 %v17458_v40  ;;  %v4053_v38 = vld [vmem:[#allocation6 + $0x1b8] sm:$0xff]  ;;  %v17417_v40 = vcombine.low %v4208_v28, %v4212_v19 }
 0x400   :  { %7544 = vmatprep.subr.bf16.mxu0 %v17562_v41  ;;  %v17267_v41 = vcombine.low %v4057_v42, %v4061_v1  ;;  %v17260_v45 = vcombine.high %v4049_v37, %v4053_v38  ;;  %v17259_v55 = vcombine.low %v4049_v37, %v4053_v38  ;;  %v4017_v28 = vld [vmem:[#allocation6 + $0x98] sm:$0xff]  ;;  %v4420_v37 = vld [vmem:[#allocation6 + $0xd30] sm:$0xff] }
 0x401   :  { %v4021_v19 = vld [vmem:[#allocation6 + $0xb8] sm:$0xff] }
 0x402   :  { %7498 = vmatpush2.bf16.msra.mxu1 %v17457_v51 }
 0x403   :  { %7545 = vmatpush2.bf16.msra.mxu0 %v17561_v39  ;;  %7499 = vmatprep.subr.bf16.mxu1 %v17450_v52  ;;  %v4041_v39 = vld [vmem:[#allocation6 + $0x158] sm:$0xff] }
 0x404   :  { %7546 = vmatprep.subr.bf16.mxu0 %v17554_v60  ;;  %v4045_v52 = vld [vmem:[#allocation6 + $0x178] sm:$0xff]  ;;  %v17409_v60 = vcombine.low %v4200_v34, %v4204_v35  ;;  %v17228_v34 = vcombine.high %v4017_v28, %v4021_v19  ;;  %v4416_v35 = vld [vmem:[#allocation6 + $0xd10] sm:$0xff] }
 0x405   :  { %v17252_v3 = vcombine.high %v4041_v39, %v4045_v52  ;;  %v17251_v0 = vcombine.low %v4041_v39, %v4045_v52  ;;  %v17626_v49 = vcombine.high %v4416_v35, %v4420_v37  ;;  %v4408_v39 = vld [vmem:[#allocation6 + $0xcd0] sm:$0xff] }
 0x406   :  { %7500 = vmatpush2.bf16.msra.mxu1 %v17449_v7  ;;  %v4440_v7 = vld [vmem:[#allocation6 + $0xdd0] sm:$0xff] }
 0x407   :  { %7547 = vmatpush2.bf16.msra.mxu0 %v17553_v57  ;;  %7501 = vmatprep.subr.bf16.mxu1 %v17442_v63  ;;  %v4444_v57 = vld [vmem:[#allocation6 + $0xdf0] sm:$0xff] }
 0x408   :  { %7548 = vmatprep.subr.bf16.mxu0 %v17546_v16  ;;  %v4033_v16 = vld [vmem:[#allocation6 + $0x118] sm:$0xff]  ;;  %v17649_v61 = vcombine.low %v4440_v7, %v4444_v57  ;;  %v4412_v52 = vld [vmem:[#allocation6 + $0xcf0] sm:$0xff] }
 0x409   :  { %v17243_v12 = vcombine.low %v4033_v16, %v4037_v46 }
 0x40a   :  { %7502 = vmatpush2.bf16.msra.mxu1 %v17441_v2  ;;  %v17650_v2 = vcombine.high %v4440_v7, %v4444_v57  ;;  %v4400_v57 = vld [vmem:[#allocation6 + $0xc90] sm:$0xff] }
 0x40b   :  { %7549 = vmatpush2.bf16.msra.mxu0 %v17545_v4  ;;  %7503 = vmatprep.subr.bf16.mxu1 %v17434_v6  ;;  %v4432_v4 = vld [vmem:[#allocation6 + $0xd90] sm:$0xff] }
 0x40c   :  { %7550 = vmatprep.subr.bf16.mxu0 %v17538_v9  ;;  %v4436_v6 = vld [vmem:[#allocation6 + $0xdb0] sm:$0xff]  ;;  %v4025_v9 = vld [vmem:[#allocation6 + $0xd8] sm:$0xff] }
 0x40d   :  { %v17642_v14 = vcombine.high %v4432_v4, %v4436_v6  ;;  %v17641_v1 = vcombine.low %v4432_v4, %v4436_v6  ;;  %v4396_v4 = vld [vmem:[#allocation6 + $0xc70] sm:$0xff]  ;;  %v4113_v6 = vld [vmem:[#allocation6 + $0x398] sm:$0xff] }
 0x40e   :  { %7504 = vmatpush2.bf16.msra.mxu1 %v17433_v15  ;;  %v17236_v15 = vcombine.high %v4025_v9, %v4029_v11 }
 0x40f   :  { %7551 = vmatpush2.bf16.msra.mxu0 %v17537_v25  ;;  %7505 = vmatprep.subr.bf16.mxu1 %v17426_v24  ;;  %v4424_v25 = vld [vmem:[#allocation6 + $0xd50] sm:$0xff] }
 0x410   :  { %7552 = vmatprep.subr.bf16.mxu0 %v17530_v21  ;;  %v4428_v24 = vld [vmem:[#allocation6 + $0xd70] sm:$0xff] }
 0x412   :  { %7506 = vmatpush2.bf16.msra.mxu1 %v17425_v26 }
 0x413   :  { %7553 = vmatpush2.bf16.msra.mxu0 %v17529_v27  ;;  %7507 = vmatprep.subr.bf16.mxu1 %v17418_v36  ;;  %v17235_v27 = vcombine.low %v4025_v9, %v4029_v11  ;;  %v17634_v36 = vcombine.high %v4424_v25, %v4428_v24  ;;  %v4117_v9 = vld [vmem:[#allocation6 + $0x3b8] sm:$0xff] }
 0x414   :  { %7604 = vmatprep.subr.bf16.mxu0 %v17268_v29 }
 0x415   :  { %v19706_v51 = vpop.f32.mrf.mxu0 }
 0x416   :  { %7508 = vmatpush2.bf16.msra.mxu1 %v17417_v40  ;;  %7555 = vmatmul.mubr.bf16.vlgmr.msra.gmra.mxu0 %v19650_v13  ;;  %v4009_v40 = vld [vmem:[#allocation6 + $0x58] sm:$0xff] }
 0x417   :  { %7605 = vmatpush1.bf16.msra.mxu0 %v17267_v41  ;;  %7636 = vmatprep.mubr.bf16.mxu0 %v19603_v32  ;;  %v19710_v54 = vpop.f32.mrf.mxu0  ;;  %v17244_v32 = vcombine.high %v4033_v16, %v4037_v46  ;;  %v17633_v41 = vcombine.low %v4424_v25, %v4428_v24  ;;  %v4121_v16 = vld [vmem:[#allocation6 + $0x3d8] sm:$0xff]  ;;  %v4388_v25 = vld [vmem:[#allocation6 + $0xc30] sm:$0xff] }
 0x418   :  { %7509 = vmatprep.subr.bf16.mxu1 %v17410_v44  ;;  %7606 = vmatprep.subr.bf16.mxu0 %v17260_v45  ;;  %v17227_v45 = vcombine.low %v4017_v28, %v4021_v19  ;;  %v4125_v46 = vld [vmem:[#allocation6 + $0x3f8] sm:$0xff]  ;;  %v17323_v19 = vcombine.low %v4113_v6, %v4117_v9 }
 0x419   :  { %v7314_v63 = vpop.f32.mrf.mxu0  ;;  %v4105_v24 = vld [vmem:[#allocation6 + $0x358] sm:$0xff] }
 0x41a   :  { %7510 = vmatpush2.bf16.msra.mxu1 %v17409_v60  ;;  %v4005_v60 = vld [vmem:[#allocation6 + $0x38] sm:$0xff]  ;;  %v4404_v63 = vld [vmem:[#allocation6 + $0xcb0] sm:$0xff] }
 0x41b   :  { %7607 = vmatpush1.bf16.msra.mxu0 %v17259_v55  ;;  %v7315_v22 = vpop.f32.mrf.mxu0  ;;  %7511 = vmatprep.subr.bf16.mxu1 %v17402_v56  ;;  %v17625_v55 = vcombine.low %v4416_v35, %v4420_v37  ;;  %v17609_v11 = vcombine.low %v4400_v57, %v4404_v63  ;;  %v4101_v35 = vld [vmem:[#allocation6 + $0x338] sm:$0xff] }
 0x41c   :  { %7608 = vmatprep.subr.bf16.mxu0 %v17252_v3  ;;  %v17618_v3 = vcombine.high %v4408_v39, %v4412_v52 }
 0x41e   :  { %7512 = vmatpush2.bf16.msra.mxu1 %v17401_v20  ;;  %v17617_v20 = vcombine.low %v4408_v39, %v4412_v52 }
 0x41f   :  { %7609 = vmatpush1.bf16.msra.mxu0 %v17251_v0  ;;  %7563 = vmatprep.subr.bf16.mxu1 %v17650_v2  ;;  %v17610_v0 = vcombine.high %v4400_v57, %v4404_v63  ;;  %v17332_v2 = vcombine.high %v4121_v16, %v4125_v46 }
 0x420   :  { %7610 = vmatprep.subr.bf16.mxu0 %v17244_v32  ;;  %v4392_v32 = vld [vmem:[#allocation6 + $0xc50] sm:$0xff] }
 0x421   :  { %7514 = vmatmul.mubr.bf16.vlgmr.msra.gmra.mxu1 %v19627_v18  ;;  %v7269_v21 = vpop.f32.mrf.mxu1  ;;  %v17601_v28 = vcombine.low %v4392_v32, %v4396_v4 }
 0x422   :  { %v19714_v42 = vadd.f32 %v7269_v21, %v19697_v8  ;;  %7564 = vmatpush1.bf16.msra.mxu1 %v17649_v61  ;;  %7595 = vmatprep.mubr.bf16.mxu1 %v19676_v30  ;;  %v4013_v8 = vld [vmem:[#allocation6 + $0x78] sm:$0xff]  ;;  %v17331_v61 = vcombine.low %v4121_v16, %v4125_v46  ;;  %v4480_v46 = vld [vmem:[#allocation6 + $0xf10] sm:$0xff] }
 0x423   :  { %7611 = vmatpush1.bf16.msra.mxu0 %v17243_v12  ;;  %v7271_v26 = vpop.f32.mrf.mxu1  ;;  %7565 = vmatprep.subr.bf16.mxu1 %v17642_v14  ;;  %v17220_v50 = vcombine.high %v4009_v40, %v4013_v8  ;;  %v17219_v56 = vcombine.low %v4009_v40, %v4013_v8  ;;  %v17602_v12 = vcombine.high %v4392_v32, %v4396_v4  ;;  %v4109_v21 = vld [vmem:[#allocation6 + $0x378] sm:$0xff] }
 0x424   :  { %v19718_v29 = vadd.f32 %v7271_v26, %v19702_v31  ;;  %7612 = vmatprep.subr.bf16.mxu0 %v17236_v15  ;;  %v4001_v31 = vld [vmem:[#allocation6 + $0x18] sm:$0xff]  ;;  %v17324_v14 = vcombine.high %v4113_v6, %v4117_v9  ;;  %v4384_v15 = vld [vmem:[#allocation6 + $0xc10] sm:$0xff]  ;;  %v17316_v26 = vcombine.high %v4105_v24, %v4109_v21 }
 0x425   :  { %v7273_v38 = vpop.f32.mrf.mxu1  ;;  %v17212_v7 = vcombine.high %v4001_v31, %v4005_v60  ;;  %v17211_v22 = vcombine.low %v4001_v31, %v4005_v60  ;;  %v17593_v37 = vcombine.low %v4384_v15, %v4388_v25  ;;  %v4488_v60 = vld [vmem:[#allocation6 + $0xf50] sm:$0xff] }
 0x426   :  { %7566 = vmatpush1.bf16.msra.mxu1 %v17641_v1  ;;  %v17594_v1 = vcombine.high %v4384_v15, %v4388_v25  ;;  %v17315_v38 = vcombine.low %v4105_v24, %v4109_v21  ;;  %v4472_v9 = vld [vmem:[#allocation6 + $0xed0] sm:$0xff] }
 0x427   :  { %7613 = vmatpush1.bf16.msra.mxu0 %v17235_v27  ;;  %v7274_v44 = vpop.f32.mrf.mxu1  ;;  %7567 = vmatprep.subr.bf16.mxu1 %v17634_v36  ;;  %v4504_v27 = vld [vmem:[#allocation6 + $0xfd0] sm:$0xff] }
 0x428   :  { %7614 = vmatprep.subr.bf16.mxu0 %v17228_v34  ;;  %v4508_v36 = vld [vmem:[#allocation6 + $0xff0] sm:$0xff]  ;;  %v4097_v34 = vld [vmem:[#allocation6 + $0x318] sm:$0xff] }
 0x429   :  { %v17714_v40 = vcombine.high %v4504_v27, %v4508_v36  ;;  %v17308_v8 = vcombine.high %v4097_v34, %v4101_v35  ;;  %v4500_v44 = vld [vmem:[#allocation6 + $0xfb0] sm:$0xff]  ;;  %v17307_v39 = vcombine.low %v4097_v34, %v4101_v35 }
 0x42a   :  { %7568 = vmatpush1.bf16.msra.mxu1 %v17633_v41  ;;  %v4496_v41 = vld [vmem:[#allocation6 + $0xf90] sm:$0xff] }
 0x42b   :  { %7615 = vmatpush1.bf16.msra.mxu0 %v17227_v45  ;;  %7569 = vmatprep.subr.bf16.mxu1 %v17626_v49  ;;  %v4089_v45 = vld [vmem:[#allocation6 + $0x2d8] sm:$0xff]  ;;  %v17706_v52 = vcombine.high %v4496_v41, %v4500_v44  ;;  %v4464_v21 = vld [vmem:[#allocation6 + $0xe90] sm:$0xff] }
 0x42c   :  { %7616 = vmatprep.subr.bf16.mxu0 %v17220_v50  ;;  %v4093_v49 = vld [vmem:[#allocation6 + $0x2f8] sm:$0xff]  ;;  %v17713_v50 = vcombine.low %v4504_v27, %v4508_v36  ;;  %v4456_v35 = vld [vmem:[#allocation6 + $0xe50] sm:$0xff] }
 0x42d   :  { %v17300_v31 = vcombine.high %v4089_v45, %v4093_v49  ;;  %v17299_v57 = vcombine.low %v4089_v45, %v4093_v49  ;;  %v4448_v49 = vld [vmem:[#allocation6 + $0xe10] sm:$0xff] }
 0x42e   :  { %7570 = vmatpush1.bf16.msra.mxu1 %v17625_v55  ;;  %v4492_v55 = vld [vmem:[#allocation6 + $0xf70] sm:$0xff] }
 0x42f   :  { %7617 = vmatpush1.bf16.msra.mxu0 %v17219_v56  ;;  %7571 = vmatprep.subr.bf16.mxu1 %v17618_v3  ;;  %v4081_v56 = vld [vmem:[#allocation6 + $0x298] sm:$0xff]  ;;  %v17698_v63 = vcombine.high %v4488_v60, %v4492_v55 }
 0x430   :  { %7618 = vmatprep.subr.bf16.mxu0 %v17212_v7  ;;  %v4085_v3 = vld [vmem:[#allocation6 + $0x2b8] sm:$0xff]  ;;  %v17705_v7 = vcombine.low %v4496_v41, %v4500_v44 }
 0x431   :  { %v17292_v16 = vcombine.high %v4081_v56, %v4085_v3  ;;  %v17291_v32 = vcombine.low %v4081_v56, %v4085_v3 }
 0x432   :  { %7572 = vmatpush1.bf16.msra.mxu1 %v17617_v20  ;;  %v4484_v20 = vld [vmem:[#allocation6 + $0xf30] sm:$0xff] }
 0x433   :  { %7619 = vmatpush1.bf16.msra.mxu0 %v17211_v22  ;;  %7573 = vmatprep.subr.bf16.mxu1 %v17610_v0  ;;  %v4073_v22 = vld [vmem:[#allocation6 + $0x258] sm:$0xff]  ;;  %v17690_v4 = vcombine.high %v4480_v46, %v4484_v20 }
 0x434   :  { %7620 = vmatprep.subr.bf16.mxu0 %v17332_v2  ;;  %v4077_v0 = vld [vmem:[#allocation6 + $0x278] sm:$0xff]  ;;  %v17697_v2 = vcombine.low %v4488_v60, %v4492_v55 }
 0x435   :  { %v17284_v6 = vcombine.high %v4073_v22, %v4077_v0  ;;  %v17283_v15 = vcombine.low %v4073_v22, %v4077_v0 }
 0x436   :  { %7574 = vmatpush1.bf16.msra.mxu1 %v17609_v11  ;;  %v4476_v11 = vld [vmem:[#allocation6 + $0xef0] sm:$0xff] }
 0x437   :  { %7621 = vmatpush2.bf16.msra.mxu0 %v17331_v61  ;;  %7575 = vmatprep.subr.bf16.mxu1 %v17602_v12  ;;  %v4065_v61 = vld [vmem:[#allocation6 + $0x218] sm:$0xff]  ;;  %v17682_v25 = vcombine.high %v4472_v9, %v4476_v11 }
 0x438   :  { %7622 = vmatprep.subr.bf16.mxu0 %v17324_v14  ;;  %v4069_v12 = vld [vmem:[#allocation6 + $0x238] sm:$0xff]  ;;  %v17689_v14 = vcombine.low %v4480_v46, %v4484_v20 }
 0x439   :  { %v17276_v24 = vcombine.high %v4065_v61, %v4069_v12  ;;  %v17275_v27 = vcombine.low %v4065_v61, %v4069_v12  ;;  %v4293_v46 = vld [vmem:[#allocation6 + $0x938] sm:$0xff] }
 0x43a   :  { %7576 = vmatpush1.bf16.msra.mxu1 %v17601_v28  ;;  %v4468_v28 = vld [vmem:[#allocation6 + $0xeb0] sm:$0xff]  ;;  %v4285_v61 = vld [vmem:[#allocation6 + $0x8f8] sm:$0xff] }
 0x43b   :  { %7623 = vmatpush2.bf16.msra.mxu0 %v17323_v19  ;;  %7577 = vmatprep.subr.bf16.mxu1 %v17594_v1  ;;  %v4313_v19 = vld [vmem:[#allocation6 + $0x9d8] sm:$0xff]  ;;  %v17674_v36 = vcombine.high %v4464_v21, %v4468_v28 }
 0x43c   :  { %7624 = vmatprep.subr.bf16.mxu0 %v17316_v26  ;;  %v4317_v1 = vld [vmem:[#allocation6 + $0x9f8] sm:$0xff]  ;;  %v17681_v26 = vcombine.low %v4472_v9, %v4476_v11 }
 0x43d   :  { %v17524_v34 = vcombine.high %v4313_v19, %v4317_v1  ;;  %v17523_v41 = vcombine.low %v4313_v19, %v4317_v1  ;;  %v4181_v9 = vld [vmem:[#allocation6 + $0x5b8] sm:$0xff] }
 0x43e   :  { %7578 = vmatpush1.bf16.msra.mxu1 %v17593_v37  ;;  %v4460_v37 = vld [vmem:[#allocation6 + $0xe70] sm:$0xff]  ;;  %v4281_v11 = vld [vmem:[#allocation6 + $0x8d8] sm:$0xff] }
 0x43f   :  { %7625 = vmatpush2.bf16.msra.mxu0 %v17315_v38  ;;  %7579 = vmatprep.subr.bf16.mxu1 %v17714_v40  ;;  %v4305_v38 = vld [vmem:[#allocation6 + $0x998] sm:$0xff]  ;;  %v17666_v44 = vcombine.high %v4456_v35, %v4460_v37  ;;  %v17665_v60 = vcombine.low %v4456_v35, %v4460_v37 }
 0x440   :  { %7626 = vmatprep.subr.bf16.mxu0 %v17308_v8  ;;  %v4309_v40 = vld [vmem:[#allocation6 + $0x9b8] sm:$0xff]  ;;  %v17673_v8 = vcombine.low %v4464_v21, %v4468_v28  ;;  %v17492_v21 = vcombine.high %v4281_v11, %v4285_v61 }
 0x441   :  { %v17516_v45 = vcombine.high %v4305_v38, %v4309_v40  ;;  %v17515_v55 = vcombine.low %v4305_v38, %v4309_v40  ;;  %v4169_v28 = vld [vmem:[#allocation6 + $0x558] sm:$0xff] }
 0x442   :  { %7580 = vmatpush2.bf16.msra.mxu1 %v17713_v50  ;;  %v4452_v50 = vld [vmem:[#allocation6 + $0xe30] sm:$0xff]  ;;  %v4173_v19 = vld [vmem:[#allocation6 + $0x578] sm:$0xff] }
 0x443   :  { %7627 = vmatpush2.bf16.msra.mxu0 %v17307_v39  ;;  %7581 = vmatprep.subr.bf16.mxu1 %v17706_v52  ;;  %v4297_v39 = vld [vmem:[#allocation6 + $0x958] sm:$0xff]  ;;  %v17658_v56 = vcombine.high %v4448_v49, %v4452_v50  ;;  %v17657_v22 = vcombine.low %v4448_v49, %v4452_v50  ;;  %v17380_v38 = vcombine.high %v4169_v28, %v4173_v19 }
 0x444   :  { %7628 = vmatprep.subr.bf16.mxu0 %v17300_v31  ;;  %v4301_v52 = vld [vmem:[#allocation6 + $0x978] sm:$0xff] }
 0x445   :  { %v4269_v50 = vld [vmem:[#allocation6 + $0x878] sm:$0xff] }
 0x446   :  { %7582 = vmatpush2.bf16.msra.mxu1 %v17705_v7  ;;  %v17508_v7 = vcombine.high %v4297_v39, %v4301_v52 }
 0x447   :  { %7629 = vmatpush2.bf16.msra.mxu0 %v17299_v57  ;;  %7583 = vmatprep.subr.bf16.mxu1 %v17698_v63  ;;  %v4185_v57 = vld [vmem:[#allocation6 + $0x5d8] sm:$0xff] }
 0x448   :  { %7630 = vmatprep.subr.bf16.mxu0 %v17292_v16  ;;  %v4189_v63 = vld [vmem:[#allocation6 + $0x5f8] sm:$0xff] }
 0x449   :  { %v4289_v16 = vld [vmem:[#allocation6 + $0x918] sm:$0xff]  ;;  %v17396_v0 = vcombine.high %v4185_v57, %v4189_v63 }
 0x44a   :  { %7584 = vmatpush2.bf16.msra.mxu1 %v17697_v2  ;;  %v19724_v2 = vld [vmem:[#allocation7] sm:$0xff] }
 0x44b   :  { %7631 = vmatpush2.bf16.msra.mxu0 %v17291_v32  ;;  %7585 = vmatprep.subr.bf16.mxu1 %v17690_v4  ;;  %v17500_v4 = vcombine.high %v4289_v16, %v4293_v46  ;;  %v4527_v12 = vrot.slane %v19724_v2, %v19567_v48 }
 0x44c   :  { %7632 = vmatprep.subr.bf16.mxu0 %v17284_v6  ;;  %v4177_v6 = vld [vmem:[#allocation6 + $0x598] sm:$0xff] }
 0x44d   :  { %v17387_v35 = vcombine.low %v4177_v6, %v4181_v9 }
 0x44e   :  { %7586 = vmatpush2.bf16.msra.mxu1 %v17689_v14  ;;  %v17395_v14 = vcombine.low %v4185_v57, %v4189_v63  ;;  %v4157_v57 = vld [vmem:[#allocation6 + $0x4f8] sm:$0xff] }
 0x44f   :  { %7633 = vmatpush2.bf16.msra.mxu0 %v17283_v15  ;;  %7587 = vmatprep.subr.bf16.mxu1 %v17682_v25  ;;  %v17499_v15 = vcombine.low %v4289_v16, %v4293_v46  ;;  %v17388_v25 = vcombine.high %v4177_v6, %v4181_v9  ;;  %v4257_v63 = vld [vmem:[#allocation6 + $0x818] sm:$0xff] }
 0x450   :  { %7634 = vmatprep.subr.bf16.mxu0 %v17276_v24  ;;  %v4261_v16 = vld [vmem:[#allocation6 + $0x838] sm:$0xff] }
 0x452   :  { %7588 = vmatpush2.bf16.msra.mxu1 %v17681_v26  ;;  %v4273_v26 = vld [vmem:[#allocation6 + $0x898] sm:$0xff] }
 0x453   :  { %7635 = vmatpush2.bf16.msra.mxu0 %v17275_v27  ;;  %7589 = vmatprep.subr.bf16.mxu1 %v17674_v36  ;;  %v4277_v27 = vld [vmem:[#allocation6 + $0x8b8] sm:$0xff]  ;;  %v7313_v36 = vadd.f32 %v19710_v54, %v4527_v12 }
 0x454   :  { %7686 = vmatprep.subr.bf16.mxu0 %v17524_v34  ;;  %v4265_v54 = vld [vmem:[#allocation6 + $0x858] sm:$0xff] }
 0x455   :  { %v17475_v46 = vcombine.low %v4265_v54, %v4269_v50  ;;  %v4369_v12 = vld [vmem:[#allocation6 + $0xb98] sm:$0xff] }
 0x456   :  { %v19720_v31 = vpop.f32.mrf.mxu0  ;;  %7590 = vmatpush2.bf16.msra.mxu1 %v17673_v8  ;;  %7637 = vmatmul.mubr.bf16.vlgmr.msra.gmra.mxu0 %v19625_v23  ;;  %v17507_v23 = vcombine.low %v4297_v39, %v4301_v52  ;;  %v17484_v8 = vcombine.high %v4273_v26, %v4277_v27  ;;  %v17379_v39 = vcombine.low %v4169_v28, %v4173_v19  ;;  %v4129_v28 = vld [vmem:[#allocation6 + $0x418] sm:$0xff] }
 0x457   :  { %7687 = vmatpush1.bf16.msra.mxu0 %v17523_v41  ;;  %7718 = vmatprep.mubr.bf16.mxu0 %v19636_v62  ;;  %v4523_v62 = vrot.slane %v19724_v2, %v19564_v43  ;;  %v4161_v41 = vld [vmem:[#allocation6 + $0x518] sm:$0xff] }
 0x458   :  { %v7394_v3 = vpop.f32.mrf.mxu0  ;;  %7591 = vmatprep.subr.bf16.mxu1 %v17666_v44  ;;  %7688 = vmatprep.subr.bf16.mxu0 %v17516_v45  ;;  %v4165_v44 = vld [vmem:[#allocation6 + $0x538] sm:$0xff] }
 0x459   :  { %v7311_v24 = vadd.f32 %v19706_v51, %v4523_v62  ;;  %v17491_v51 = vcombine.low %v4281_v11, %v4285_v61  ;;  %v4381_v62 = vld [vmem:[#allocation6 + $0xbf8] sm:$0xff] }
 0x45a   :  { %v7396_v20 = vpop.f32.mrf.mxu0  ;;  %7592 = vmatpush2.bf16.msra.mxu1 %v17665_v60  ;;  %v17483_v60 = vcombine.low %v4273_v26, %v4277_v27  ;;  %v4137_v11 = vld [vmem:[#allocation6 + $0x458] sm:$0xff] }
 0x45b   :  { %7689 = vmatpush1.bf16.msra.mxu0 %v17515_v55  ;;  %7593 = vmatprep.subr.bf16.mxu1 %v17658_v56  ;;  %v17372_v55 = vcombine.high %v4161_v41, %v4165_v44  ;;  %v17476_v56 = vcombine.high %v4265_v54, %v4269_v50  ;;  %v4141_v61 = vld [vmem:[#allocation6 + $0x478] sm:$0xff] }
 0x45c   :  { %v7397_v32 = vpop.f32.mrf.mxu0  ;;  %7690 = vmatprep.subr.bf16.mxu0 %v17508_v7  ;;  %v4153_v7 = vld [vmem:[#allocation6 + $0x4d8] sm:$0xff]  ;;  %v17347_v27 = vcombine.low %v4137_v11, %v4141_v61 }
 0x45d   :  { %v17364_v20 = vcombine.high %v4153_v7, %v4157_v57  ;;  %v17363_v32 = vcombine.low %v4153_v7, %v4157_v57  ;;  %v4133_v19 = vld [vmem:[#allocation6 + $0x438] sm:$0xff] }
 0x45e   :  { %7594 = vmatpush2.bf16.msra.mxu1 %v17657_v22  ;;  %v4145_v22 = vld [vmem:[#allocation6 + $0x498] sm:$0xff] }
 0x45f   :  { %7691 = vmatpush1.bf16.msra.mxu0 %v17507_v23  ;;  %7645 = vmatprep.subr.bf16.mxu1 %v17396_v0  ;;  %v4149_v23 = vld [vmem:[#allocation6 + $0x4b8] sm:$0xff] }
 0x460   :  { %7692 = vmatprep.subr.bf16.mxu0 %v17500_v4  ;;  %v4377_v0 = vld [vmem:[#allocation6 + $0xbd8] sm:$0xff]  ;;  %v17467_v4 = vcombine.low %v4257_v63, %v4261_v16  ;;  %v17356_v6 = vcombine.high %v4145_v22, %v4149_v23 }
 0x461   :  { %v7351_v1 = vpop.f32.mrf.mxu1  ;;  %7596 = vmatmul.mubr.bf16.vlgmr.msra.gmra.mxu1 %v19678_v33  ;;  %v17588_v9 = vcombine.high %v4377_v0, %v4381_v62  ;;  %v4365_v26 = vld [vmem:[#allocation6 + $0xb78] sm:$0xff] }
 0x462   :  { %v7352_v34 = vadd.f32 %v7351_v1, %v7311_v24  ;;  %7646 = vmatpush1.bf16.msra.mxu1 %v17395_v14  ;;  %7677 = vmatprep.mubr.bf16.mxu1 %v19606_v59  ;;  %v4373_v14 = vld [vmem:[#allocation6 + $0xbb8] sm:$0xff]  ;;  %v17348_v24 = vcombine.high %v4137_v11, %v4141_v61 }
 0x463   :  { %v7353_v37 = vpop.f32.mrf.mxu1  ;;  %7693 = vmatpush1.bf16.msra.mxu0 %v17499_v15  ;;  %7647 = vmatprep.subr.bf16.mxu1 %v17388_v25  ;;  %v17355_v15 = vcombine.low %v4145_v22, %v4149_v23  ;;  %v17587_v25 = vcombine.low %v4377_v0, %v4381_v62  ;;  %v4361_v1 = vld [vmem:[#allocation6 + $0xb58] sm:$0xff] }
 0x464   :  { %v7354_v40 = vadd.f32 %v7353_v37, %v7313_v36  ;;  %7694 = vmatprep.subr.bf16.mxu0 %v17492_v21  ;;  %v19735_v45 = vadd.f32 %v19720_v31, %v7352_v34  ;;  %v17371_v31 = vcombine.low %v4161_v41, %v4165_v44  ;;  %v17580_v21 = vcombine.high %v4369_v12, %v4373_v14  ;;  %v4249_v37 = vld [vmem:[#allocation6 + $0x7d8] sm:$0xff] }
 0x465   :  { %v7355_v49 = vpop.f32.mrf.mxu1  ;;  %v17579_v36 = vcombine.low %v4369_v12, %v4373_v14  ;;  %v17340_v34 = vcombine.high %v4129_v28, %v4133_v19  ;;  %v17571_v41 = vcombine.low %v4361_v1, %v4365_v26  ;;  %v4241_v54 = vld [vmem:[#allocation6 + $0x798] sm:$0xff] }
 0x466   :  { %7648 = vmatpush1.bf16.msra.mxu1 %v17387_v35  ;;  %v19737_v59 = vadd.f32 %v7394_v3, %v7354_v40  ;;  %v17468_v3 = vcombine.high %v4257_v63, %v4261_v16  ;;  %v17572_v35 = vcombine.high %v4361_v1, %v4365_v26  ;;  %v4357_v40 = vld [vmem:[#allocation6 + $0xb38] sm:$0xff] }
 0x467   :  { %v7356_v52 = vpop.f32.mrf.mxu1  ;;  %7695 = vmatpush1.bf16.msra.mxu0 %v17491_v51  ;;  %7649 = vmatprep.subr.bf16.mxu1 %v17380_v38  ;;  %v4253_v51 = vld [vmem:[#allocation6 + $0x7f8] sm:$0xff] }
 0x468   :  { %7696 = vmatprep.subr.bf16.mxu0 %v17484_v8  ;;  %v4353_v38 = vld [vmem:[#allocation6 + $0xb18] sm:$0xff]  ;;  %v17339_v8 = vcombine.low %v4129_v28, %v4133_v19  ;;  %v17460_v44 = vcombine.high %v4249_v37, %v4253_v51 }
 0x469   :  { %v17564_v49 = vcombine.high %v4353_v38, %v4357_v40  ;;  %v4245_v50 = vld [vmem:[#allocation6 + $0x7b8] sm:$0xff] }
 0x46a   :  { %7650 = vmatpush1.bf16.msra.mxu1 %v17379_v39  ;;  %v4345_v39 = vld [vmem:[#allocation6 + $0xad8] sm:$0xff] }
 0x46b   :  { %7697 = vmatpush1.bf16.msra.mxu0 %v17483_v60  ;;  %7651 = vmatprep.subr.bf16.mxu1 %v17372_v55  ;;  %v4349_v52 = vld [vmem:[#allocation6 + $0xaf8] sm:$0xff]  ;;  %v17459_v60 = vcombine.low %v4249_v37, %v4253_v51  ;;  %v17563_v55 = vcombine.low %v4353_v38, %v4357_v40  ;;  %v18984_v40 = vld [vmem:[#allocation9 + $0x38] sm:$0xff]  }
 0x46c   :  { %7698 = vmatprep.subr.bf16.mxu0 %v17476_v56  ;;  %v17452_v56 = vcombine.high %v4241_v54, %v4245_v50  ;;  %v17556_v7 = vcombine.high %v4345_v39, %v4349_v52  ;;  %v4233_v57 = vld [vmem:[#allocation6 + $0x758] sm:$0xff] }
 0x46d   :  { %v4237_v63 = vld [vmem:[#allocation6 + $0x778] sm:$0xff] }
 0x46e   :  { %7652 = vmatpush1.bf16.msra.mxu1 %v17371_v31  ;;  %v4337_v16 = vld [vmem:[#allocation6 + $0xa98] sm:$0xff] }
 0x46f   :  { %7699 = vmatpush1.bf16.msra.mxu0 %v17475_v46  ;;  %7653 = vmatprep.subr.bf16.mxu1 %v17364_v20  ;;  %v4341_v31 = vld [vmem:[#allocation6 + $0xab8] sm:$0xff]  ;;  %v17451_v46 = vcombine.low %v4241_v54, %v4245_v50  ;;  %v17555_v20 = vcombine.low %v4345_v39, %v4349_v52 }
 0x470   :  { %7700 = vmatprep.subr.bf16.mxu0 %v17468_v3  ;;  %v17444_v3 = vcombine.high %v4233_v57, %v4237_v63  ;;  %v17548_v22 = vcombine.high %v4337_v16, %v4341_v31  ;;  %v4225_v23 = vld [vmem:[#allocation6 + $0x718] sm:$0xff] }
 0x471   :  { %v4229_v0 = vld [vmem:[#allocation6 + $0x738] sm:$0xff] }
 0x472   :  { %7654 = vmatpush1.bf16.msra.mxu1 %v17363_v32  ;;  %v4329_v62 = vld [vmem:[#allocation6 + $0xa58] sm:$0xff] }
 0x473   :  { %7701 = vmatpush1.bf16.msra.mxu0 %v17467_v4  ;;  %7655 = vmatprep.subr.bf16.mxu1 %v17356_v6  ;;  %v4333_v32 = vld [vmem:[#allocation6 + $0xa78] sm:$0xff]  ;;  %v17443_v4 = vcombine.low %v4233_v57, %v4237_v63  ;;  %v17547_v6 = vcombine.low %v4337_v16, %v4341_v31  ;;  %v18988_v16 = vld [vmem:[#allocation9 + $0x28] sm:$0xff]  }
 0x474   :  { %7702 = vmatprep.subr.bf16.mxu0 %v17588_v9  ;;  %v17436_v9 = vcombine.high %v4225_v23, %v4229_v0  ;;  %v17540_v11 = vcombine.high %v4329_v62, %v4333_v32  ;;  %v4217_v61 = vld [vmem:[#allocation6 + $0x6d8] sm:$0xff] }
 0x475   :  { %v4221_v12 = vld [vmem:[#allocation6 + $0x6f8] sm:$0xff] }
 0x476   :  { %7656 = vmatpush1.bf16.msra.mxu1 %v17355_v15  ;;  %v4321_v14 = vld [vmem:[#allocation6 + $0xa18] sm:$0xff]  ;;  %v17427_v26 = vcombine.low %v4217_v61, %v4221_v12 }
 0x477   :  { %7703 = vmatpush2.bf16.msra.mxu0 %v17587_v25  ;;  %7657 = vmatprep.subr.bf16.mxu1 %v17348_v24  ;;  %v4325_v15 = vld [vmem:[#allocation6 + $0xa38] sm:$0xff]  ;;  %v17435_v25 = vcombine.low %v4225_v23, %v4229_v0  ;;  %v17539_v24 = vcombine.low %v4329_v62, %v4333_v32  ;;  %v18990_v23 = vld [vmem:[#allocation9 + $0x20] sm:$0xff]   ;;  %v18991_v62 = vld [vmem:[#allocation9 + $0x58] sm:$0xff]  }
 0x478   :  { %7704 = vmatprep.subr.bf16.mxu0 %v17580_v21  ;;  %v17428_v21 = vcombine.high %v4217_v61, %v4221_v12  ;;  %v17532_v28 = vcombine.high %v4321_v14, %v4325_v15  ;;  %v4209_v19 = vld [vmem:[#allocation6 + $0x698] sm:$0xff]  ;;  %v18992_v12 = vld [vmem:[#allocation9 + $0x18] sm:$0xff]  }
 0x479   :  { %v4213_v1 = vld [vmem:[#allocation6 + $0x6b8] sm:$0xff] }
 0x47a   :  { %7658 = vmatpush1.bf16.msra.mxu1 %v17347_v27  ;;  %v17531_v27 = vcombine.low %v4321_v14, %v4325_v15  ;;  %v4201_v37 = vld [vmem:[#allocation6 + $0x658] sm:$0xff]  ;;  %v17419_v38 = vcombine.low %v4209_v19, %v4213_v1 }
 0x47b   :  { %7705 = vmatpush2.bf16.msra.mxu0 %v17579_v36  ;;  %7659 = vmatprep.subr.bf16.mxu1 %v17340_v34  ;;  %v17420_v36 = vcombine.high %v4209_v19, %v4213_v1  ;;  %v18983_v34 = vld [vmem:[#allocation9 + $0x78] sm:$0xff]   ;;  %v4205_v51 = vld [vmem:[#allocation6 + $0x678] sm:$0xff] }
 0x47c   :  { %7706 = vmatprep.subr.bf16.mxu0 %v17572_v35  ;;  %v7769_v35 = vmax.f32 %v19718_v29, 0.0  ;;  %v17411_v39 = vcombine.low %v4201_v37, %v4205_v51  ;;  %v18986_v29 = vld [vmem:[#allocation9 + $0x30] sm:$0xff]  }
 0x47d   :  { %v4425_v32 = vld [vmem:[#allocation6 + $0xd58] sm:$0xff] }
 0x47e   :  { %7660 = vmatpush1.bf16.msra.mxu1 %v17339_v8  ;;  %v17412_v8 = vcombine.high %v4201_v37, %v4205_v51  ;;  %v7777_v54 = vpack.c.bf16 %v7769_v35, %v7769_v35  ;;  %v18993_v15 = vld [vmem:[#allocation9 + $0x50] sm:$0xff]   ;;  %v18997_v35 = vld [vmem:[#allocation9 + $0x40] sm:$0xff]  }
 0x47f   :  { %7707 = vmatpush2.bf16.msra.mxu0 %v17571_v41  ;;  %7661 = vmatprep.subr.bf16.mxu1 %v17460_v44  ;;  %v18985_v41 = vld [vmem:[#allocation9 + $0x70] sm:$0xff]  }
 0x480   :  { %7708 = vmatprep.subr.bf16.mxu0 %v17564_v49  ;;  %v4193_v44 = vld [vmem:[#allocation6 + $0x618] sm:$0xff] }
 0x481   :  { %v4197_v49 = vld [vmem:[#allocation6 + $0x638] sm:$0xff] }
 0x482   :  { %7662 = vmatpush2.bf16.msra.mxu1 %v17459_v60  ;;  %v17404_v52 = vcombine.high %v4193_v44, %v4197_v49  ;;  %v17403_v63 = vcombine.low %v4193_v44, %v4197_v49  ;;  %v4409_v1 = vld [vmem:[#allocation6 + $0xcd8] sm:$0xff] }
 0x483   :  { %7709 = vmatpush2.bf16.msra.mxu0 %v17563_v55  ;;  %7663 = vmatprep.subr.bf16.mxu1 %v17452_v56  ;;  %v18987_v55 = vld [vmem:[#allocation9 + $0x68] sm:$0xff]   ;;  %v4441_v56 = vld [vmem:[#allocation6 + $0xdd8] sm:$0xff] }
 0x484   :  { %7710 = vmatprep.subr.bf16.mxu0 %v17556_v7  ;;  %v4445_v7 = vld [vmem:[#allocation6 + $0xdf8] sm:$0xff] }
 0x485   :  { %v17652_v31 = vcombine.high %v4441_v56, %v4445_v7  ;;  %v4401_v37 = vld [vmem:[#allocation6 + $0xc98] sm:$0xff] }
 0x486   :  { %7664 = vmatpush2.bf16.msra.mxu1 %v17451_v46  ;;  %v18989_v46 = vld [vmem:[#allocation9 + $0x60] sm:$0xff]   ;;  %v4405_v51 = vld [vmem:[#allocation6 + $0xcb8] sm:$0xff] }
 0x487   :  { %7711 = vmatpush2.bf16.msra.mxu0 %v17555_v20  ;;  %7665 = vmatprep.subr.bf16.mxu1 %v17444_v3  ;;  %v4433_v20 = vld [vmem:[#allocation6 + $0xd98] sm:$0xff] }
 0x488   :  { %7712 = vmatprep.subr.bf16.mxu0 %v17548_v22  ;;  %v4437_v3 = vld [vmem:[#allocation6 + $0xdb8] sm:$0xff]  ;;  %v17651_v22 = vcombine.low %v4441_v56, %v4445_v7 }
 0x489   :  { %v17644_v0 = vcombine.high %v4433_v20, %v4437_v3  ;;  %v4393_v44 = vld [vmem:[#allocation6 + $0xc58] sm:$0xff] }
 0x48a   :  { %7666 = vmatpush2.bf16.msra.mxu1 %v17443_v4  ;;  %v4429_v4 = vld [vmem:[#allocation6 + $0xd78] sm:$0xff] }
 0x48b   :  { %7713 = vmatpush2.bf16.msra.mxu0 %v17547_v6  ;;  %7667 = vmatprep.subr.bf16.mxu1 %v17436_v9  ;;  %v17636_v14 = vcombine.high %v4425_v32, %v4429_v4  ;;  %v4397_v49 = vld [vmem:[#allocation6 + $0xc78] sm:$0xff] }
 0x48c   :  { %7714 = vmatprep.subr.bf16.mxu0 %v17540_v11  ;;  %v17643_v11 = vcombine.low %v4433_v20, %v4437_v3  ;;  %v4385_v56 = vld [vmem:[#allocation6 + $0xc18] sm:$0xff] }
 0x48d   :  { %v4389_v7 = vld [vmem:[#allocation6 + $0xc38] sm:$0xff] }
 0x48e   :  { %7668 = vmatpush2.bf16.msra.mxu1 %v17435_v25  ;;  %v4417_v25 = vld [vmem:[#allocation6 + $0xd18] sm:$0xff]  ;;  %v17595_v20 = vcombine.low %v4385_v56, %v4389_v7 }
 0x48f   :  { %7715 = vmatpush2.bf16.msra.mxu0 %v17539_v24  ;;  %7669 = vmatprep.subr.bf16.mxu1 %v17428_v21  ;;  %v4421_v24 = vld [vmem:[#allocation6 + $0xd38] sm:$0xff] }
 0x490   :  { %7716 = vmatprep.subr.bf16.mxu0 %v17532_v28  ;;  %v17628_v19 = vcombine.high %v4417_v25, %v4421_v24 }
 0x492   :  { %7670 = vmatpush2.bf16.msra.mxu1 %v17427_v26  ;;  %v4413_v26 = vld [vmem:[#allocation6 + $0xcf8] sm:$0xff] }
 0x493   :  { %7717 = vmatpush2.bf16.msra.mxu0 %v17531_v27  ;;  %7671 = vmatprep.subr.bf16.mxu1 %v17420_v36  ;;  %v17627_v27 = vcombine.low %v4417_v25, %v4421_v24  ;;  %v18996_v36 = vld [vmem:[#allocation9 + $0x8] sm:$0xff]   ;;  %v19024_v24 = vld [vmem:[#allocation9 + $0x118] sm:$0xff]  }
 0x494   :  { %18878 = vmatprep.subr.bf16.mxu0 %v18983_v34  ;;  %v17620_v34 = vcombine.high %v4409_v1, %v4413_v26 }
 0x496   :  { %v19740_v50 = vpop.f32.mrf.mxu0  ;;  %7672 = vmatpush2.bf16.msra.mxu1 %v17419_v38  ;;  %7719 = vmatmul.mubr.bf16.vlgmr.msra.gmra.mxu0 %v19650_v13  ;;  %v17619_v38 = vcombine.low %v4409_v1, %v4413_v26  ;;  %v4473_v1 = vld [vmem:[#allocation6 + $0xed8] sm:$0xff] }
 0x497   :  { %18879 = vmatpush3.bf16.msra.mxu0 %v18984_v40  ;;  %8335 = vmatprep.mubr.bf16.mxu0 %v7777_v54  ;;  %v18998_v40 = vld [vmem:[#allocation9] sm:$0xff]   ;;  %v19015_v54 = vld [vmem:[#allocation9 + $0x178] sm:$0xff]   ;;  %v4477_v26 = vld [vmem:[#allocation6 + $0xef8] sm:$0xff] }
 0x498   :  { %v19743_v60 = vpop.f32.mrf.mxu0  ;;  %7673 = vmatprep.subr.bf16.mxu1 %v17412_v8  ;;  %18880 = vmatprep.subr.bf16.mxu0 %v18985_v41  ;;  %v17612_v8 = vcombine.high %v4401_v37, %v4405_v51  ;;  %v7768_v41 = vmax.f32 %v19714_v42, 0.0  ;;  %v17596_v42 = vcombine.high %v4385_v56, %v4389_v7 }
 0x49a   :  { %v7478_v57 = vpop.f32.mrf.mxu0  ;;  %7674 = vmatpush2.bf16.msra.mxu1 %v17411_v39  ;;  %v17611_v39 = vcombine.low %v4401_v37, %v4405_v51  ;;  %v4465_v37 = vld [vmem:[#allocation6 + $0xe98] sm:$0xff] }
 0x49b   :  { %18881 = vmatpush3.bf16.msra.mxu0 %v18986_v29  ;;  %7675 = vmatprep.subr.bf16.mxu1 %v17404_v52  ;;  %v17604_v29 = vcombine.high %v4393_v44, %v4397_v49  ;;  %v19016_v52 = vld [vmem:[#allocation9 + $0x138] sm:$0xff]   ;;  %v19017_v57 = vld [vmem:[#allocation9 + $0x170] sm:$0xff]  }
 0x49c   :  { %v7479_v13 = vpop.f32.mrf.mxu0  ;;  %18882 = vmatprep.subr.bf16.mxu0 %v18987_v55  ;;  %v7776_v55 = vpack.c.bf16 %v7768_v41, %v7768_v41  ;;  %v4469_v51 = vld [vmem:[#allocation6 + $0xeb8] sm:$0xff]  ;;  %v19030_v41 = vld [vmem:[#allocation9 + $0x100] sm:$0xff]  }
 0x49d   :  { %v4509_v13 = vld [vmem:[#allocation6 + $0xff8] sm:$0xff] }
 0x49e   :  { %7676 = vmatpush2.bf16.msra.mxu1 %v17403_v63  ;;  %v17603_v63 = vcombine.low %v4393_v44, %v4397_v49  ;;  %v4457_v44 = vld [vmem:[#allocation6 + $0xe58] sm:$0xff] }
 0x49f   :  { %18883 = vmatpush3.bf16.msra.mxu0 %v18988_v16  ;;  %7727 = vmatprep.subr.bf16.mxu1 %v17652_v31  ;;  %v19018_v16 = vld [vmem:[#allocation9 + $0x130] sm:$0xff]  }
 0x4a0   :  { %18884 = vmatprep.subr.bf16.mxu0 %v18989_v46  ;;  %v4505_v31 = vld [vmem:[#allocation6 + $0xfd8] sm:$0xff]  ;;  %v19019_v46 = vld [vmem:[#allocation9 + $0x168] sm:$0xff]  }
 0x4a1   :  { %v7433_v6 = vpop.f32.mrf.mxu1  ;;  %7678 = vmatmul.mubr.bf16.vlgmr.msra.gmra.mxu1 %v19627_v18  ;;  %v17635_v18 = vcombine.low %v4425_v32, %v4429_v4  ;;  %v17716_v3 = vcombine.high %v4505_v31, %v4509_v13  ;;  %v17715_v32 = vcombine.low %v4505_v31, %v4509_v13  ;;  %v4461_v49 = vld [vmem:[#allocation6 + $0xe78] sm:$0xff]  ;;  %v18999_v31 = vld [vmem:[#allocation9 + $0xf8] sm:$0xff]   ;;  %v4531_v13 = vrot.slane %v19724_v2, %v19596_v17 }
 0x4a2   :  { %v19747_v9 = vadd.f32 %v7433_v6, %v19735_v45  ;;  %7728 = vmatpush1.bf16.msra.mxu1 %v17651_v22  ;;  %7759 = vmatprep.mubr.bf16.mxu1 %v19676_v30  ;;  %v18994_v45 = vld [vmem:[#allocation9 + $0x10] sm:$0xff]   ;;  %v18995_v30 = vld [vmem:[#allocation9 + $0x48] sm:$0xff]   ;;  %v19022_v6 = vld [vmem:[#allocation9 + $0x120] sm:$0xff]   ;;  %v17667_v56 = vcombine.low %v4457_v44, %v4461_v49 }
 0x4a3   :  { %v19750_v61 = vpop.f32.mrf.mxu1  ;;  %18885 = vmatpush3.bf16.msra.mxu0 %v18990_v23  ;;  %7729 = vmatprep.subr.bf16.mxu1 %v17644_v0  ;;  %v19020_v22 = vld [vmem:[#allocation9 + $0x128] sm:$0xff]   ;;  %v4497_v23 = vld [vmem:[#allocation6 + $0xf98] sm:$0xff] }
 0x4a4   :  { %18886 = vmatprep.subr.bf16.mxu0 %v18991_v62  ;;  %v4501_v0 = vld [vmem:[#allocation6 + $0xfb8] sm:$0xff]  ;;  %v19021_v62 = vld [vmem:[#allocation9 + $0x160] sm:$0xff]  }
 0x4a5   :  { %v7437_v21 = vpop.f32.mrf.mxu1  ;;  %v17708_v4 = vcombine.high %v4497_v23, %v4501_v0 }
 0x4a6   :  { %7730 = vmatpush1.bf16.msra.mxu1 %v17643_v11  ;;  %v4489_v11 = vld [vmem:[#allocation6 + $0xf58] sm:$0xff] }
 0x4a7   :  { %v7438_v28 = vpop.f32.mrf.mxu1  ;;  %18887 = vmatpush3.bf16.msra.mxu0 %v18992_v12  ;;  %7731 = vmatprep.subr.bf16.mxu1 %v17636_v14  ;;  %v4493_v12 = vld [vmem:[#allocation6 + $0xf78] sm:$0xff]  ;;  %v19023_v14 = vld [vmem:[#allocation9 + $0x158] sm:$0xff]  }
 0x4a8   :  { %18888 = vmatprep.subr.bf16.mxu0 %v18993_v15  ;;  %v17707_v15 = vcombine.low %v4497_v23, %v4501_v0  ;;  %v17700_v25 = vcombine.high %v4489_v11, %v4493_v12  ;;  %v4481_v21 = vld [vmem:[#allocation6 + $0xf18] sm:$0xff] }
 0x4a9   :  { %v19025_v28 = vld [vmem:[#allocation9 + $0x150] sm:$0xff]  }
 0x4aa   :  { %7732 = vmatpush1.bf16.msra.mxu1 %v17635_v18  ;;  %v4485_v18 = vld [vmem:[#allocation6 + $0xf38] sm:$0xff] }
 0x4ab   :  { %18889 = vmatpush3.bf16.msra.mxu0 %v18994_v45  ;;  %7733 = vmatprep.subr.bf16.mxu1 %v17628_v19  ;;  %v17699_v45 = vcombine.low %v4489_v11, %v4493_v12  ;;  %v17692_v19 = vcombine.high %v4481_v21, %v4485_v18  ;;  %v19001_v23 = vld [vmem:[#allocation9 + $0xf0] sm:$0xff]   ;;  %v19003_v11 = vld [vmem:[#allocation9 + $0xe8] sm:$0xff]  }
 0x4ac   :  { %18890 = vmatprep.subr.bf16.mxu0 %v18995_v30  ;;  %v19026_v30 = vld [vmem:[#allocation9 + $0x110] sm:$0xff]  }
 0x4ae   :  { %7734 = vmatpush1.bf16.msra.mxu1 %v17627_v27  ;;  %v19027_v27 = vld [vmem:[#allocation9 + $0x148] sm:$0xff]  }
 0x4af   :  { %18891 = vmatpush3.bf16.msra.mxu0 %v18996_v36  ;;  %7735 = vmatprep.subr.bf16.mxu1 %v17620_v34  ;;  %v17691_v36 = vcombine.low %v4481_v21, %v4485_v18  ;;  %v17684_v34 = vcombine.high %v4473_v1, %v4477_v26  ;;  %v19005_v21 = vld [vmem:[#allocation9 + $0xe0] sm:$0xff]   ;;  %v19008_v18 = vld [vmem:[#allocation9 + $0x98] sm:$0xff]  }
 0x4b0   :  { %18892 = vmatprep.subr.bf16.mxu0 %v18997_v35  ;;  %v19028_v35 = vld [vmem:[#allocation9 + $0x108] sm:$0xff]  }
 0x4b2   :  { %7736 = vmatpush1.bf16.msra.mxu1 %v17619_v38  ;;  %v19029_v38 = vld [vmem:[#allocation9 + $0x140] sm:$0xff]  }
 0x4b3   :  { %18893 = vmatpush3.bf16.msra.mxu0 %v18998_v40  ;;  %7737 = vmatprep.subr.bf16.mxu1 %v17612_v8  ;;  %v17683_v40 = vcombine.low %v4473_v1, %v4477_v26  ;;  %v17676_v8 = vcombine.high %v4465_v37, %v4469_v51  ;;  %v19013_v1 = vld [vmem:[#allocation9 + $0xc0] sm:$0xff]  }
 0x4b4   :  { %18922 = vmatprep.subr.bf16.mxu0 %v19015_v54  ;;  %v17675_v54 = vcombine.low %v4465_v37, %v4469_v51  ;;  %v19014_v26 = vld [vmem:[#allocation9 + $0x80] sm:$0xff]   ;;  %v19033_v37 = vld [vmem:[#allocation9 + $0x1f0] sm:$0xff]  }
 0x4b5   :  { %v19034_v51 = vld [vmem:[#allocation9 + $0x1b0] sm:$0xff]  }
 0x4b6   :  { %7738 = vmatpush1.bf16.msra.mxu1 %v17611_v39  ;;  %8336 = vmatmul.mubr.bf16.vlgmr.msra.gmra.mxu0 %v7776_v55  ;;  %v17668_v39 = vcombine.high %v4457_v44, %v4461_v49  ;;  %v19040_v44 = vld [vmem:[#allocation9 + $0x198] sm:$0xff]   ;;  %v19041_v49 = vld [vmem:[#allocation9 + $0x1d0] sm:$0xff]  }
 0x4b7   :  { %7739 = vmatprep.subr.bf16.mxu1 %v17604_v29  ;;  %18923 = vmatpush3.bf16.msra.mxu0 %v19016_v52  ;;  %v4449_v29 = vld [vmem:[#allocation6 + $0xe18] sm:$0xff] }
 0x4b8   :  { %18924 = vmatprep.subr.bf16.mxu0 %v19017_v57  ;;  %v4453_v52 = vld [vmem:[#allocation6 + $0xe38] sm:$0xff]  ;;  %v7436_v57 = vadd.f32 %v19750_v61, %v19737_v59  ;;  %v7475_v59 = vadd.f32 %v19740_v50, %v4531_v13 }
 0x4b9   :  { %v17660_v7 = vcombine.high %v4449_v29, %v4453_v52 }
 0x4ba   :  { %7740 = vmatpush1.bf16.msra.mxu1 %v17603_v63 }
 0x4bb   :  { %7741 = vmatprep.subr.bf16.mxu1 %v17596_v42  ;;  %18925 = vmatpush3.bf16.msra.mxu0 %v19018_v16  ;;  %v17659_v16 = vcombine.low %v4449_v29, %v4453_v52 }
 0x4bc   :  { %18926 = vmatprep.subr.bf16.mxu0 %v19019_v46  ;;  %v7771_v46 = vmax.f32 %v7436_v57, 0.0  ;;  %v19043_v57 = vld [vmem:[#allocation9 + $0x1c8] sm:$0xff]  }
 0x4be   :  { %7742 = vmatpush1.bf16.msra.mxu1 %v17595_v20  ;;  %v7779_v61 = vpack.c.bf16 %v7771_v46, %v7771_v46 }
 0x4bf   :  { %7743 = vmatprep.subr.bf16.mxu1 %v17716_v3  ;;  %18927 = vmatpush3.bf16.msra.mxu0 %v19020_v22  ;;  %v4535_v3 = vrot.slane %v19724_v2, %v19618_v53  ;;  %v19000_v22 = vld [vmem:[#allocation9 + $0xb8] sm:$0xff]  }
 0x4c0   :  { %18928 = vmatprep.subr.bf16.mxu0 %v19021_v62 }
 0x4c1   :  { %v7477_v62 = vadd.f32 %v19743_v60, %v4535_v3  ;;  %v19007_v60 = vld [vmem:[#allocation9 + $0xd8] sm:$0xff]  }
 0x4c2   :  { %7744 = vmatpush2.bf16.msra.mxu1 %v17715_v32 }
 0x4c3   :  { %7745 = vmatprep.subr.bf16.mxu1 %v17708_v4  ;;  %18929 = vmatpush3.bf16.msra.mxu0 %v19022_v6  ;;  %v19002_v4 = vld [vmem:[#allocation9 + $0xb0] sm:$0xff]  }
 0x4c4   :  { %18930 = vmatprep.subr.bf16.mxu0 %v19023_v14 }
 0x4c6   :  { %7746 = vmatpush2.bf16.msra.mxu1 %v17707_v15 }
 0x4c7   :  { %7747 = vmatprep.subr.bf16.mxu1 %v17700_v25  ;;  %18931 = vmatpush3.bf16.msra.mxu0 %v19024_v24  ;;  %v19004_v25 = vld [vmem:[#allocation9 + $0xa8] sm:$0xff]  }
 0x4c8   :  { %18932 = vmatprep.subr.bf16.mxu0 %v19025_v28  ;;  %v19009_v28 = vld [vmem:[#allocation9 + $0xd0] sm:$0xff]  }
 0x4ca   :  { %7748 = vmatpush2.bf16.msra.mxu1 %v17699_v45  ;;  %v19010_v45 = vld [vmem:[#allocation9 + $0x90] sm:$0xff]  }
 0x4cb   :  { %7749 = vmatprep.subr.bf16.mxu1 %v17692_v19  ;;  %18933 = vmatpush3.bf16.msra.mxu0 %v19026_v30  ;;  %v19011_v19 = vld [vmem:[#allocation9 + $0xc8] sm:$0xff]  }
 0x4cc   :  { %18934 = vmatprep.subr.bf16.mxu0 %v19027_v27  ;;  %v19012_v30 = vld [vmem:[#allocation9 + $0x88] sm:$0xff]   ;;  %v7770_v27 = vmax.f32 %v19747_v9, 0.0  ;;  %v19039_v9 = vld [vmem:[#allocation9 + $0x1d8] sm:$0xff]  }
 0x4ce   :  { %7750 = vmatpush2.bf16.msra.mxu1 %v17691_v36  ;;  %v19031_v36 = vld [vmem:[#allocation9 + $0x1f8] sm:$0xff]  }
 0x4cf   :  { %7751 = vmatprep.subr.bf16.mxu1 %v17684_v34  ;;  %18935 = vmatpush3.bf16.msra.mxu0 %v19028_v35  ;;  %v19032_v34 = vld [vmem:[#allocation9 + $0x1b8] sm:$0xff]   ;;  %v7778_v35 = vpack.c.bf16 %v7770_v27, %v7770_v27  ;;  %v8516_v27 = vld [vmem:[#allocation12 + $0x1a0] sm:$0xff] }
 0x4d0   :  { %18936 = vmatprep.subr.bf16.mxu0 %v19029_v38  ;;  %v19035_v38 = vld [vmem:[#allocation9 + $0x1e8] sm:$0xff]  }
 0x4d2   :  { %7752 = vmatpush2.bf16.msra.mxu1 %v17683_v40  ;;  %v19036_v40 = vld [vmem:[#allocation9 + $0x1a8] sm:$0xff]  }
 0x4d3   :  { %7753 = vmatprep.subr.bf16.mxu1 %v17676_v8  ;;  %18937 = vmatpush3.bf16.msra.mxu0 %v19030_v41  ;;  %v19037_v8 = vld [vmem:[#allocation9 + $0x1e0] sm:$0xff]  }
 0x4d4   :  { %v19038_v41 = vld [vmem:[#allocation9 + $0x1a0] sm:$0xff]  }
 0x4d6   :  { %v7556_v55 = vpop.f32.mrf.mxu0  ;;  %7754 = vmatpush2.bf16.msra.mxu1 %v17675_v54  ;;  %v19042_v54 = vld [vmem:[#allocation9 + $0x190] sm:$0xff]  }
 0x4d7   :  { %7755 = vmatprep.subr.bf16.mxu1 %v17668_v39 }
 0x4d8   :  { %v7558_v63 = vpop.f32.mrf.mxu0 }
 0x4da   :  { %v7560_v42 = vpop.f32.mrf.mxu0  ;;  %7756 = vmatpush2.bf16.msra.mxu1 %v17667_v56 }
 0x4db   :  { %7757 = vmatprep.subr.bf16.mxu1 %v17660_v7  ;;  %v19044_v42 = vld [vmem:[#allocation9 + $0x188] sm:$0xff]  }
 0x4dc   :  { %v7561_v20 = vpop.f32.mrf.mxu0 }
 0x4dd   :  { %v19045_v20 = vld [vmem:[#allocation9 + $0x1c0] sm:$0xff]  }
 0x4de   :  { %7758 = vmatpush2.bf16.msra.mxu1 %v17659_v16 }
 0x4df   :  { %18900 = vmatprep.subr.bf16.mxu1 %v18999_v31 }
 0x4e1   :  { %v7515_v0 = vpop.f32.mrf.mxu1  ;;  %7760 = vmatmul.mubr.bf16.vlgmr.msra.gmra.mxu1 %v19678_v33  ;;  %v19006_v33 = vld [vmem:[#allocation9 + $0xa0] sm:$0xff]  }
 0x4e2   :  { %v7516_v32 = vadd.f32 %v7515_v0, %v7475_v59  ;;  %18901 = vmatpush3.bf16.msra.mxu1 %v19000_v22  ;;  %8375 = vmatprep.mubr.bf16.mxu1 %v7779_v61  ;;  %v19046_v22 = vld [vmem:[#allocation9 + $0x180] sm:$0xff]  }
 0x4e3   :  { %v7517_v6 = vpop.f32.mrf.mxu1  ;;  %18902 = vmatprep.subr.bf16.mxu1 %v19001_v23 }
 0x4e4   :  { %v7518_v12 = vadd.f32 %v7517_v6, %v7477_v62  ;;  %v7557_v14 = vadd.f32 %v7556_v55, %v7516_v32  ;;  %v4539_v32 = vrot.slane %v19724_v2, %v19663_v58  ;;  %v4543_v6 = vrot.slane %v19724_v2, %v19666_v47 }
 0x4e5   :  { %v7519_v15 = vpop.f32.mrf.mxu1 }
 0x4e6   :  { %18903 = vmatpush3.bf16.msra.mxu1 %v19002_v4  ;;  %v7559_v24 = vadd.f32 %v7558_v63, %v7518_v12 }
 0x4e7   :  { %v7520_v50 = vpop.f32.mrf.mxu1  ;;  %18904 = vmatprep.subr.bf16.mxu1 %v19003_v11 }
 0x4ea   :  { %18905 = vmatpush3.bf16.msra.mxu1 %v19004_v25 }
 0x4eb   :  { %18906 = vmatprep.subr.bf16.mxu1 %v19005_v21 }
 0x4ee   :  { %18907 = vmatpush3.bf16.msra.mxu1 %v19006_v33 }
 0x4ef   :  { %18908 = vmatprep.subr.bf16.mxu1 %v19007_v60 }
 0x4f2   :  { %18909 = vmatpush3.bf16.msra.mxu1 %v19008_v18  ;;  %v8520_v18 = vld [vmem:[#allocation12 + $0x1c0] sm:$0xff] }
 0x4f3   :  { %18910 = vmatprep.subr.bf16.mxu1 %v19009_v28  ;;  %v8524_v28 = vld [vmem:[#allocation12 + $0x1e0] sm:$0xff] }
 0x4f6   :  { %18911 = vmatpush3.bf16.msra.mxu1 %v19010_v45  ;;  %v8521_v45 = vld [vmem:[#allocation12 + $0x1c8] sm:$0xff] }
 0x4f7   :  { %18912 = vmatprep.subr.bf16.mxu1 %v19011_v19  ;;  %v17838_v19 = vcombine.low %v8520_v18, %v8524_v28 }
 0x4fa   :  { %18913 = vmatpush3.bf16.msra.mxu1 %v19012_v30  ;;  %v17839_v30 = vcombine.high %v8520_v18, %v8524_v28 }
 0x4fb   :  { %18914 = vmatprep.subr.bf16.mxu1 %v19013_v1  ;;  %v8525_v1 = vld [vmem:[#allocation12 + $0x1e8] sm:$0xff] }
 0x4fc   :  { %8890 = vmatprep.subr.bf16.mxu0 %v17839_v30 }
 0x4fe   :  { %18915 = vmatpush3.bf16.msra.mxu1 %v19014_v26  ;;  %v8512_v26 = vld [vmem:[#allocation12 + $0x180] sm:$0xff] }
 0x4ff   :  { %18944 = vmatprep.subr.bf16.mxu1 %v19031_v36  ;;  %v17841_v36 = vcombine.high %v8521_v45, %v8525_v1  ;;  %v17831_v2 = vcombine.high %v8512_v26, %v8516_v27 }
 0x501   :  { %8376 = vmatmul.mubr.bf16.vlgmr.msra.gmra.mxu1 %v7778_v35  ;;  %v8508_v35 = vld [vmem:[#allocation12 + $0x160] sm:$0xff] }
 0x502   :  { %18945 = vmatpush3.bf16.msra.mxu1 %v19032_v34  ;;  %v8504_v34 = vld [vmem:[#allocation12 + $0x140] sm:$0xff] }
 0x503   :  { %18946 = vmatprep.subr.bf16.mxu1 %v19033_v37  ;;  %v17830_v37 = vcombine.low %v8512_v26, %v8516_v27  ;;  %v17717_v27 = vld [vmem:[#allocation10] ss:$0 sm:$0xff] }
 0x506   :  { %18947 = vmatpush3.bf16.msra.mxu1 %v19034_v51 }
 0x507   :  { %18948 = vmatprep.subr.bf16.mxu1 %v19035_v38  ;;  %v17823_v38 = vcombine.high %v8504_v34, %v8508_v35 }
 0x50a   :  { %18949 = vmatpush3.bf16.msra.mxu1 %v19036_v40  ;;  %v8496_v40 = vld [vmem:[#allocation12 + $0x100] sm:$0xff] }
 0x50b   :  { %18950 = vmatprep.subr.bf16.mxu1 %v19037_v8  ;;  %v8500_v8 = vld [vmem:[#allocation12 + $0x120] sm:$0xff] }
 0x50e   :  { %18951 = vmatpush3.bf16.msra.mxu1 %v19038_v41 }
 0x50f   :  { %18952 = vmatprep.subr.bf16.mxu1 %v19039_v9 }
 0x512   :  { %18953 = vmatpush3.bf16.msra.mxu1 %v19040_v44  ;;  %v17822_v44 = vcombine.low %v8504_v34, %v8508_v35 }
 0x513   :  { %18954 = vmatprep.subr.bf16.mxu1 %v19041_v49 }
 0x516   :  { %v7638_v39 = vpop.f32.mrf.mxu0  ;;  %18955 = vmatpush3.bf16.msra.mxu1 %v19042_v54  ;;  %v17815_v54 = vcombine.high %v8496_v40, %v8500_v8 }
 0x517   :  { %18956 = vmatprep.subr.bf16.mxu1 %v19043_v57  ;;  %v7639_v11 = vadd.f32 %v7638_v39, %v4539_v32  ;;  %v8488_v39 = vld [vmem:[#allocation12 + $0xc0] sm:$0xff]  ;;  %v17840_v32 = vcombine.low %v8521_v45, %v8525_v1  ;;  %v8481_v45 = vld [vmem:[#allocation12 + $0x88] sm:$0xff] }
 0x518   :  { %v7640_v29 = vpop.f32.mrf.mxu0  ;;  %v8484_v57 = vld [vmem:[#allocation12 + $0xa0] sm:$0xff] }
 0x51a   :  { %v7642_v52 = vpop.f32.mrf.mxu0  ;;  %18957 = vmatpush3.bf16.msra.mxu1 %v19044_v42 }
 0x51b   :  { %18958 = vmatprep.subr.bf16.mxu1 %v19045_v20 }
 0x51c   :  { %v7643_v55 = vpop.f32.mrf.mxu0 }
 0x51d   :  { %v17814_v55 = vcombine.low %v8496_v40, %v8500_v8  ;;  %v8472_v40 = vld [vmem:[#allocation12 + $0x40] sm:$0xff] }
 0x51e   :  { %18959 = vmatpush3.bf16.msra.mxu1 %v19046_v22  ;;  %v8476_v8 = vld [vmem:[#allocation12 + $0x60] sm:$0xff] }
 0x51f   :  { %8931 = vmatprep.subr.bf16.mxu1 %v17841_v36 }
 0x521   :  { %v7597_v56 = vpop.f32.mrf.mxu1 }
 0x522   :  { %v7598_v7 = vadd.f32 %v7597_v56, %v7557_v14  ;;  %v7641_v14 = vadd.f32 %v7640_v29, %v4543_v6  ;;  %v8492_v29 = vld [vmem:[#allocation12 + $0xe0] sm:$0xff] }
 0x523   :  { %v7599_v63 = vpop.f32.mrf.mxu1  ;;  %v17807_v56 = vcombine.high %v8488_v39, %v8492_v29 }
 0x524   :  { %v7600_v16 = vadd.f32 %v7599_v63, %v7559_v24  ;;  %v7772_v31 = vmax.f32 %v7598_v7, 0.0  ;;  %v8480_v7 = vld [vmem:[#allocation12 + $0x80] sm:$0xff]  ;;  %v17806_v63 = vcombine.low %v8488_v39, %v8492_v29  ;;  %v17790_v39 = vcombine.low %v8472_v40, %v8476_v8 }
 0x525   :  { %v7601_v13 = vpop.f32.mrf.mxu1  ;;  %v17799_v42 = vcombine.high %v8480_v7, %v8484_v57 }
 0x526   :  { %v7773_v46 = vmax.f32 %v7600_v16, 0.0  ;;  %v7780_v59 = vpack.c.bf16 %v7772_v31, %v7772_v31  ;;  %v17798_v16 = vcombine.low %v8480_v7, %v8484_v57  ;;  %v8468_v7 = vld [vmem:[#allocation12 + $0x20] sm:$0xff] }
 0x527   :  { %v7602_v3 = vpop.f32.mrf.mxu1 }
 0x528   :  { %v7781_v23 = vpack.c.bf16 %v7773_v46, %v7773_v46 }
 0x52a   :  { %8415 = vmatprep.mubr.bf16.mxu0 %v7781_v23 }
 0x52b   :  { %8416 = vmatmul.mubr.bf16.vlgmr.msra.gmra.mxu0 %v7780_v59  ;;  %v8513_v59 = vld [vmem:[#allocation12 + $0x188] sm:$0xff] }
 0x52c   :  { %8891 = vmatpush1.bf16.msra.mxu0 %v17838_v19  ;;  %v8485_v19 = vld [vmem:[#allocation12 + $0xa8] sm:$0xff] }
 0x52d   :  { %8892 = vmatprep.subr.bf16.mxu0 %v17831_v2  ;;  %v17801_v1 = vcombine.high %v8481_v45, %v8485_v19  ;;  %v17800_v26 = vcombine.low %v8481_v45, %v8485_v19  ;;  %v8506_v19 = vld [vmem:[#allocation12 + $0x150] sm:$0xff] }
 0x530   :  { %8893 = vmatpush1.bf16.msra.mxu0 %v17830_v37 }
 0x531   :  { %8894 = vmatprep.subr.bf16.mxu0 %v17823_v38 }
 0x534   :  { %8895 = vmatpush1.bf16.msra.mxu0 %v17822_v44  ;;  %v17791_v44 = vcombine.high %v8472_v40, %v8476_v8 }
 0x535   :  { %8896 = vmatprep.subr.bf16.mxu0 %v17815_v54 }
 0x538   :  { %8897 = vmatpush1.bf16.msra.mxu0 %v17814_v55 }
 0x539   :  { %8898 = vmatprep.subr.bf16.mxu0 %v17807_v56  ;;  %v8464_v56 = vld [vmem:[#allocation12] sm:$0xff] }
 0x53c   :  { %8899 = vmatpush1.bf16.msra.mxu0 %v17806_v63  ;;  %v17783_v63 = vcombine.high %v8464_v56, %v8468_v7 }
 0x53d   :  { %8900 = vmatprep.subr.bf16.mxu0 %v17799_v42  ;;  %v8469_v42 = vld [vmem:[#allocation12 + $0x28] sm:$0xff] }
 0x540   :  { %8901 = vmatpush1.bf16.msra.mxu0 %v17798_v16 }
 0x541   :  { %8902 = vmatprep.subr.bf16.mxu0 %v17791_v44 }
 0x544   :  { %8903 = vmatpush1.bf16.msra.mxu0 %v17790_v39  ;;  %v8491_v39 = vld [vmem:[#allocation12 + $0xd8] sm:$0xff] }
 0x545   :  { %8904 = vmatprep.subr.bf16.mxu0 %v17783_v63  ;;  %v8483_v63 = vld [vmem:[#allocation12 + $0x98] sm:$0xff] }
 0x556   :  { %v7720_v61 = vpop.f32.mrf.mxu0 }
 0x558   :  { %v7722_v0 = vpop.f32.mrf.mxu0 }
 0x55a   :  { %v7724_v62 = vpop.f32.mrf.mxu0 }
 0x55c   :  { %v7725_v4 = vpop.f32.mrf.mxu0 }
 0x561   :  { %v7679_v12 = vpop.f32.mrf.mxu1 }
 0x562   :  { %v7680_v15 = vadd.f32 %v7679_v12, %v7639_v11  ;;  %v8505_v11 = vld [vmem:[#allocation12 + $0x148] sm:$0xff] }
 0x563   :  { %v7681_v25 = vpop.f32.mrf.mxu1  ;;  %v8509_v12 = vld [vmem:[#allocation12 + $0x168] sm:$0xff] }
 0x564   :  { %v7682_v24 = vadd.f32 %v7681_v25, %v7641_v14  ;;  %v7721_v50 = vadd.f32 %v7720_v61, %v7680_v15  ;;  %v8517_v61 = vld [vmem:[#allocation12 + $0x1a8] sm:$0xff]  ;;  %v17825_v15 = vcombine.high %v8505_v11, %v8509_v12 }
 0x565   :  { %v7683_v21 = vpop.f32.mrf.mxu1  ;;  %v17833_v6 = vcombine.high %v8513_v59, %v8517_v61  ;;  %v17832_v14 = vcombine.low %v8513_v59, %v8517_v61  ;;  %v8497_v25 = vld [vmem:[#allocation12 + $0x108] sm:$0xff]  ;;  %v8523_v59 = vld [vmem:[#allocation12 + $0x1d8] sm:$0xff] }
 0x566   :  { %v7723_v33 = vadd.f32 %v7722_v0, %v7682_v24  ;;  %v8501_v24 = vld [vmem:[#allocation12 + $0x128] sm:$0xff] }
 0x567   :  { %v7684_v60 = vpop.f32.mrf.mxu1  ;;  %v17817_v21 = vcombine.high %v8497_v25, %v8501_v24  ;;  %v17816_v18 = vcombine.low %v8497_v25, %v8501_v24  ;;  %v8518_v24 = vld [vmem:[#allocation12 + $0x1b0] sm:$0xff] }
 0x568   :  { %v8493_v60 = vld [vmem:[#allocation12 + $0xe8] sm:$0xff] }
 0x576   :  { %v18894_v51 = vpop.f32.mrf.mxu0 }
 0x578   :  { %v18895_v41 = vpop.f32.mrf.mxu0 }
 0x579   :  { %v19767_v9 = vadd.f32 %v18895_v41, %v18894_v51  ;;  %v8473_v41 = vld [vmem:[#allocation12 + $0x48] sm:$0xff] }
 0x57a   :  { %v18897_v49 = vpop.f32.mrf.mxu0 }
 0x57b   :  { %v8338_v34 = vadd.f32 %v19767_v9, %v17717_v27  ;;  %v8477_v49 = vld [vmem:[#allocation12 + $0x68] sm:$0xff] }
 0x57c   :  { %v18898_v52 = vpop.f32.mrf.mxu0  ;;  %v17792_v29 = vcombine.low %v8473_v41, %v8477_v49  ;;  %v8465_v9 = vld [vmem:[#allocation12 + $0x8] sm:$0xff] }
 0x57d   :  { %v17793_v52 = vcombine.high %v8473_v41, %v8477_v49  ;;  %v8490_v49 = vld [vmem:[#allocation12 + $0xd0] sm:$0xff] }
 0x5a1   :  { %v7761_v31 = vpop.f32.mrf.mxu1 }
 0x5a2   :  { %v7762_v13 = vadd.f32 %v7761_v31, %v7721_v50  ;;  %v17824_v50 = vcombine.low %v8505_v11, %v8509_v12  ;;  %v17782_v31 = vcombine.low %v8464_v56, %v8468_v7 }
 0x5a3   :  { %v7763_v46 = vpop.f32.mrf.mxu1 }
 0x5a4   :  { %v7764_v20 = vadd.f32 %v7763_v46, %v7723_v33  ;;  %v7774_v3 = vmax.f32 %v7762_v13, 0.0  ;;  %v8489_v33 = vld [vmem:[#allocation12 + $0xc8] sm:$0xff]  ;;  %v17784_v13 = vcombine.low %v8465_v9, %v8469_v42  ;;  %v17785_v46 = vcombine.high %v8465_v9, %v8469_v42  ;;  %8905 = vmatpush1.bf16.msra.mxu0 %v17782_v31  ;;  %v8482_v9 = vld [vmem:[#allocation12 + $0x90] sm:$0xff]  ;;  %v8487_v42 = vld [vmem:[#allocation12 + $0xb8] sm:$0xff] }
 0x5a5   :  { %v7765_v22 = vpop.f32.mrf.mxu1  ;;  %v17809_v28 = vcombine.high %v8489_v33, %v8493_v60  ;;  %v17808_v30 = vcombine.low %v8489_v33, %v8493_v60 }
 0x5a6   :  { %v7775_v23 = vmax.f32 %v7764_v20, 0.0  ;;  %v7782_v4 = vpack.c.bf16 %v7774_v3, %v7774_v3  ;;  %v8522_v22 = vld [vmem:[#allocation12 + $0x1d0] sm:$0xff] }
 0x5a7   :  { %v7766_v0 = vpop.f32.mrf.mxu1 }
 0x5a8   :  { %v7783_v62 = vpack.c.bf16 %v7775_v23, %v7775_v23  ;;  %v8526_v23 = vld [vmem:[#allocation12 + $0x1f0] sm:$0xff] }
 0x5a9   :  { %v17842_v61 = vcombine.low %v8522_v22, %v8526_v23  ;;  %v17843_v0 = vcombine.high %v8522_v22, %v8526_v23  ;;  %v8475_v22 = vld [vmem:[#allocation12 + $0x58] sm:$0xff] }
 0x5aa   :  { %8455 = vmatprep.mubr.bf16.mxu1 %v7783_v62  ;;  %v8527_v62 = vld [vmem:[#allocation12 + $0x1f8] sm:$0xff] }
 0x5ab   :  { %8456 = vmatmul.mubr.bf16.vlgmr.msra.gmra.mxu1 %v7782_v4  ;;  %v17844_v4 = vcombine.low %v8523_v59, %v8527_v62  ;;  %8972 = vmatprep.subr.bf16.mxu0 %v17843_v0  ;;  %v8479_v23 = vld [vmem:[#allocation12 + $0x78] sm:$0xff] }
 0x5ac   :  { %8932 = vmatpush1.bf16.msra.mxu1 %v17840_v32  ;;  %v19355_v32 = vmov 0  }
 0x5ad   :  { %8933 = vmatprep.subr.bf16.mxu1 %v17833_v6  ;;  %8922 = vmatprep.mubr.bf16.mxu0 %v19355_v32  ;;  %v17845_v6 = vcombine.high %v8523_v59, %v8527_v62  ;;  %v17797_v62 = vcombine.high %v8475_v22, %v8479_v23 }
 0x5ae   :  { %8963 = vmatprep.mubr.bf16.mxu1 %v19355_v32 }
 0x5b0   :  { %8934 = vmatpush1.bf16.msra.mxu1 %v17832_v14 }
 0x5b1   :  { %8935 = vmatprep.subr.bf16.mxu1 %v17825_v15  ;;  %v8514_v15 = vld [vmem:[#allocation12 + $0x190] sm:$0xff] }
 0x5b2   :  { %v17834_v27 = vcombine.low %v8514_v15, %v8518_v24 }
 0x5b4   :  { %8936 = vmatpush1.bf16.msra.mxu1 %v17824_v50  ;;  %v8515_v50 = vld [vmem:[#allocation12 + $0x198] sm:$0xff] }
 0x5b5   :  { %8937 = vmatprep.subr.bf16.mxu1 %v17817_v21  ;;  %v8519_v21 = vld [vmem:[#allocation12 + $0x1b8] sm:$0xff] }
 0x5b6   :  { %v17837_v45 = vcombine.high %v8515_v50, %v8519_v21 }
 0x5b8   :  { %8938 = vmatpush1.bf16.msra.mxu1 %v17816_v18 }
 0x5b9   :  { %8939 = vmatprep.subr.bf16.mxu1 %v17809_v28  ;;  %v17835_v28 = vcombine.high %v8514_v15, %v8518_v24  ;;  %v9126_v24 = vld [vmem:[#allocation15 + $0x1c0] sm:$0xff] }
 0x5bc   :  { %8940 = vmatpush1.bf16.msra.mxu1 %v17808_v30  ;;  %v8510_v30 = vld [vmem:[#allocation12 + $0x170] sm:$0xff] }
 0x5bd   :  { %8941 = vmatprep.subr.bf16.mxu1 %v17801_v1  ;;  %v8507_v1 = vld [vmem:[#allocation12 + $0x158] sm:$0xff]  ;;  %v17826_v40 = vcombine.low %v8506_v19, %v8510_v30 }
 0x5c0   :  { %8942 = vmatpush1.bf16.msra.mxu1 %v17800_v26  ;;  %v8511_v26 = vld [vmem:[#allocation12 + $0x178] sm:$0xff] }
 0x5c1   :  { %v18916_v36 = vpop.f32.mrf.mxu1  ;;  %8943 = vmatprep.subr.bf16.mxu1 %v17793_v52  ;;  %v17828_v8 = vcombine.low %v8507_v1, %v8511_v26 }
 0x5c3   :  { %v18917_v2 = vpop.f32.mrf.mxu1 }
 0x5c4   :  { %v18918_v35 = vadd.f32 %v18917_v2, %v18916_v36  ;;  %8944 = vmatpush1.bf16.msra.mxu1 %v17792_v29  ;;  %v17836_v36 = vcombine.low %v8515_v50, %v8519_v21  ;;  %v17827_v2 = vcombine.high %v8506_v19, %v8510_v30  ;;  %v8495_v29 = vld [vmem:[#allocation12 + $0xf8] sm:$0xff]  ;;  %v9130_v50 = vld [vmem:[#allocation15 + $0x1e0] sm:$0xff] }
 0x5c5   :  { %v18919_v37 = vpop.f32.mrf.mxu1  ;;  %8945 = vmatprep.subr.bf16.mxu1 %v17785_v46  ;;  %v17813_v7 = vcombine.high %v8491_v39, %v8495_v29  ;;  %v17812_v31 = vcombine.low %v8491_v39, %v8495_v29  ;;  %v17805_v46 = vcombine.high %v8483_v63, %v8487_v42  ;;  %v9254_v21 = vld [vmem:[#allocation15 + $0x5c0] sm:$0xff] }
 0x5c6   :  { %v8378_v51 = vadd.f32 %v18918_v35, %v8338_v34  ;;  %v17829_v34 = vcombine.high %v8507_v1, %v8511_v26  ;;  %v8498_v35 = vld [vmem:[#allocation12 + $0x110] sm:$0xff]  ;;  %v9118_v30 = vld [vmem:[#allocation15 + $0x180] sm:$0xff] }
 0x5c7   :  { %v18920_v38 = vpop.f32.mrf.mxu1  ;;  %v8502_v37 = vld [vmem:[#allocation12 + $0x130] sm:$0xff]  ;;  %v9122_v1 = vld [vmem:[#allocation15 + $0x1a0] sm:$0xff] }
 0x5c8   :  { %8946 = vmatpush1.bf16.msra.mxu1 %v17784_v13  ;;  %v8503_v38 = vld [vmem:[#allocation12 + $0x138] sm:$0xff]  ;;  %v17819_v41 = vcombine.high %v8498_v35, %v8502_v37  ;;  %v17818_v52 = vcombine.low %v8498_v35, %v8502_v37  ;;  %v9246_v26 = vld [vmem:[#allocation15 + $0x580] sm:$0xff] }
 0x5c9   :  { %9013 = vmatprep.subr.bf16.mxu1 %v17845_v6  ;;  %v8467_v6 = vld [vmem:[#allocation12 + $0x18] sm:$0xff]  ;;  %v9110_v37 = vld [vmem:[#allocation15 + $0x140] sm:$0xff] }
 0x5ca   :  { %v9106_v39 = vld [vmem:[#allocation15 + $0x120] sm:$0xff] }
 0x5cb   :  { %v9230_v29 = vld [vmem:[#allocation15 + $0x500] sm:$0xff] }
 0x5eb   :  { %v18938_v54 = vpop.f32.mrf.mxu0 }
 0x5ed   :  { %v18939_v55 = vpop.f32.mrf.mxu0 }
 0x5ee   :  { %v18940_v57 = vadd.f32 %v18939_v55, %v18938_v54  ;;  %v8494_v54 = vld [vmem:[#allocation12 + $0xf0] sm:$0xff] }
 0x5ef   :  { %v18941_v16 = vpop.f32.mrf.mxu0  ;;  %v17811_v56 = vcombine.high %v8490_v49, %v8494_v54 }
 0x5f0   :  { %v8418_v20 = vadd.f32 %v18940_v57, %v8378_v51  ;;  %v8499_v51 = vld [vmem:[#allocation12 + $0x118] sm:$0xff]  ;;  %v8486_v57 = vld [vmem:[#allocation12 + $0xb0] sm:$0xff]  ;;  %v17810_v16 = vcombine.low %v8490_v49, %v8494_v54  ;;  %v9102_v54 = vld [vmem:[#allocation15 + $0x100] sm:$0xff] }
 0x5f1   :  { %v18942_v3 = vpop.f32.mrf.mxu0  ;;  %v17821_v44 = vcombine.high %v8499_v51, %v8503_v38  ;;  %v17820_v55 = vcombine.low %v8499_v51, %v8503_v38  ;;  %v17803_v13 = vcombine.high %v8482_v9, %v8486_v57  ;;  %v17802_v59 = vcombine.low %v8482_v9, %v8486_v57  ;;  %v9114_v51 = vld [vmem:[#allocation15 + $0x160] sm:$0xff] }
 0x5f2   :  { %v8478_v3 = vld [vmem:[#allocation12 + $0x70] sm:$0xff]  ;;  %v9238_v38 = vld [vmem:[#allocation15 + $0x540] sm:$0xff] }
 0x5f3   :  { %v9094_v9 = vld [vmem:[#allocation15 + $0xc0] sm:$0xff] }
 0x5f4   :  { %v9098_v57 = vld [vmem:[#allocation15 + $0xe0] sm:$0xff] }
 0x66b   :  { %v18960_v11 = vpop.f32.mrf.mxu1 }
 0x66d   :  { %v18961_v12 = vpop.f32.mrf.mxu1 }
 0x66e   :  { %v18962_v14 = vadd.f32 %v18961_v12, %v18960_v11  ;;  %v8471_v11 = vld [vmem:[#allocation12 + $0x38] sm:$0xff] }
 0x66f   :  { %v18963_v25 = vpop.f32.mrf.mxu1 }
 0x670   :  { %v8458_v33 = vadd.f32 %v18962_v14, %v8418_v20  ;;  %v8474_v20 = vld [vmem:[#allocation12 + $0x50] sm:$0xff]  ;;  %v17796_v14 = vcombine.low %v8475_v22, %v8479_v23  ;;  %v17789_v25 = vcombine.high %v8467_v6, %v8471_v11  ;;  %v9214_v22 = vld [vmem:[#allocation15 + $0x480] sm:$0xff] }
 0x671   :  { %v18964_v60 = vpop.f32.mrf.mxu1  ;;  %v17795_v0 = vcombine.high %v8474_v20, %v8478_v3  ;;  %v17794_v12 = vcombine.low %v8474_v20, %v8478_v3  ;;  %v9086_v20 = vld [vmem:[#allocation15 + $0x80] sm:$0xff] }
 0x672   :  { %v19770_v18 = vpack.c.bf16 %v8458_v33, %v8458_v33  ;;  %v9258_v33 = vld [vmem:[#allocation15 + $0x5e0] sm:$0xff] }
 0x673   :  { %v18031_v19 = vcombine.high %v9254_v21, %v9258_v33  ;;  %v9090_v3 = vld [vmem:[#allocation15 + $0xa0] sm:$0xff] }
 0x674   :  { %8923 = vmatmul.mubr.bf16.vlgmr.msra.gmra.mxu0 %v19770_v18  ;;  %8964 = vmatmul.mubr.bf16.vlgmr.msra.gmra.mxu1 %v19770_v18  ;;  %v9218_v23 = vld [vmem:[#allocation15 + $0x4a0] sm:$0xff] }
 0x675   :  { %8973 = vmatpush1.bf16.msra.mxu0 %v17842_v61  ;;  %9014 = vmatpush1.bf16.msra.mxu1 %v17844_v4  ;;  %v17804_v61 = vcombine.low %v8483_v63, %v8487_v42  ;;  %v8470_v4 = vld [vmem:[#allocation12 + $0x30] sm:$0xff]  ;;  %v9222_v63 = vld [vmem:[#allocation15 + $0x4c0] sm:$0xff] }
 0x676   :  { %8974 = vmatprep.subr.bf16.mxu0 %v17835_v28  ;;  %9015 = vmatprep.subr.bf16.mxu1 %v17837_v45  ;;  %v17788_v28 = vcombine.low %v8467_v6, %v8471_v11  ;;  %v17903_v45 = vcombine.high %v9126_v24, %v9130_v50  ;;  %v9226_v42 = vld [vmem:[#allocation15 + $0x4e0] sm:$0xff] }
 0x677   :  { %9004 = vmatprep.mubr.bf16.mxu0 %v19355_v32  ;;  %9045 = vmatprep.mubr.bf16.mxu1 %v19355_v32  ;;  %v8466_v32 = vld [vmem:[#allocation12 + $0x10] sm:$0xff]  ;;  %v9206_v6 = vld [vmem:[#allocation15 + $0x440] sm:$0xff] }
 0x678   :  { %v17787_v15 = vcombine.high %v8466_v32, %v8470_v4  ;;  %v17786_v60 = vcombine.low %v8466_v32, %v8470_v4  ;;  %v9078_v32 = vld [vmem:[#allocation15 + $0x40] sm:$0xff] }
 0x679   :  { %8975 = vmatpush1.bf16.msra.mxu0 %v17834_v27  ;;  %9016 = vmatpush1.bf16.msra.mxu1 %v17836_v36  ;;  %v9250_v27 = vld [vmem:[#allocation15 + $0x5a0] sm:$0xff]  ;;  %v17902_v36 = vcombine.low %v9126_v24, %v9130_v50 }
 0x67a   :  { %8976 = vmatprep.subr.bf16.mxu0 %v17827_v2  ;;  %9017 = vmatprep.subr.bf16.mxu1 %v17829_v34  ;;  %v18030_v2 = vcombine.low %v9254_v21, %v9258_v33  ;;  %v17895_v34 = vcombine.high %v9118_v30, %v9122_v1  ;;  %v18023_v35 = vcombine.high %v9246_v26, %v9250_v27  ;;  %v9082_v4 = vld [vmem:[#allocation15 + $0x60] sm:$0xff] }
 0x67b   :  { %v9210_v11 = vld [vmem:[#allocation15 + $0x460] sm:$0xff] }
 0x67c   :  { %v9070_v24 = vld [vmem:[#allocation15] sm:$0xff] }
 0x67d   :  { %8977 = vmatpush1.bf16.msra.mxu0 %v17826_v40  ;;  %9018 = vmatpush1.bf16.msra.mxu1 %v17828_v8  ;;  %v9242_v40 = vld [vmem:[#allocation15 + $0x560] sm:$0xff]  ;;  %v17894_v8 = vcombine.low %v9118_v30, %v9122_v1 }
 0x67e   :  { %8978 = vmatprep.subr.bf16.mxu0 %v17819_v41  ;;  %9019 = vmatprep.subr.bf16.mxu1 %v17821_v44  ;;  %v18022_v41 = vcombine.low %v9246_v26, %v9250_v27  ;;  %v17887_v44 = vcombine.high %v9110_v37, %v9114_v51  ;;  %v18015_v49 = vcombine.high %v9238_v38, %v9242_v40  ;;  %v9074_v50 = vld [vmem:[#allocation15 + $0x20] sm:$0xff] }
 0x67f   :  { %v9198_v21 = vld [vmem:[#allocation15 + $0x400] sm:$0xff] }
 0x680   :  { %v9202_v33 = vld [vmem:[#allocation15 + $0x420] sm:$0xff] }
 0x681   :  { %8979 = vmatpush1.bf16.msra.mxu0 %v17818_v52  ;;  %9020 = vmatpush1.bf16.msra.mxu1 %v17820_v55  ;;  %v9234_v52 = vld [vmem:[#allocation15 + $0x520] sm:$0xff]  ;;  %v17886_v55 = vcombine.low %v9110_v37, %v9114_v51 }
 0x682   :  { %8980 = vmatprep.subr.bf16.mxu0 %v17811_v56  ;;  %9021 = vmatprep.subr.bf16.mxu1 %v17813_v7  ;;  %v18014_v56 = vcombine.low %v9238_v38, %v9242_v40  ;;  %v17879_v7 = vcombine.high %v9102_v54, %v9106_v39  ;;  %v9190_v30 = vld [vmem:[#allocation15 + $0x3c0] sm:$0xff] }
 0x683   :  { %v9194_v1 = vld [vmem:[#allocation15 + $0x3e0] sm:$0xff] }
 0x684   :  { %v9318_v26 = vld [vmem:[#allocation15 + $0x7c0] sm:$0xff] }
 0x685   :  { %8981 = vmatpush1.bf16.msra.mxu0 %v17810_v16  ;;  %9022 = vmatpush1.bf16.msra.mxu1 %v17812_v31  ;;  %v17878_v16 = vcombine.low %v9102_v54, %v9106_v39  ;;  %v18006_v31 = vcombine.low %v9230_v29, %v9234_v52  ;;  %v9322_v27 = vld [vmem:[#allocation15 + $0x7e0] sm:$0xff] }
 0x686   :  { %8982 = vmatprep.subr.bf16.mxu0 %v17803_v13  ;;  %9023 = vmatprep.subr.bf16.mxu1 %v17805_v46  ;;  %v17871_v13 = vcombine.high %v9094_v9, %v9098_v57  ;;  %v17999_v46 = vcombine.high %v9222_v63, %v9226_v42  ;;  %v9182_v37 = vld [vmem:[#allocation15 + $0x380] sm:$0xff] }
 0x687   :  { %v9186_v51 = vld [vmem:[#allocation15 + $0x3a0] sm:$0xff] }
 0x688   :  { %v9310_v38 = vld [vmem:[#allocation15 + $0x780] sm:$0xff] }
 0x689   :  { %8983 = vmatpush1.bf16.msra.mxu0 %v17802_v59  ;;  %9024 = vmatpush1.bf16.msra.mxu1 %v17804_v61  ;;  %v17870_v59 = vcombine.low %v9094_v9, %v9098_v57  ;;  %v17998_v61 = vcombine.low %v9222_v63, %v9226_v42  ;;  %v9314_v40 = vld [vmem:[#allocation15 + $0x7a0] sm:$0xff] }
 0x68a   :  { %8984 = vmatprep.subr.bf16.mxu0 %v17795_v0  ;;  %9025 = vmatprep.subr.bf16.mxu1 %v17797_v62  ;;  %v17863_v0 = vcombine.high %v9086_v20, %v9090_v3  ;;  %v17991_v62 = vcombine.high %v9214_v22, %v9218_v23  ;;  %v9174_v54 = vld [vmem:[#allocation15 + $0x340] sm:$0xff] }
 0x68b   :  { %v9178_v39 = vld [vmem:[#allocation15 + $0x360] sm:$0xff] }
 0x68c   :  { %v9166_v9 = vld [vmem:[#allocation15 + $0x300] sm:$0xff] }
 0x68d   :  { %8985 = vmatpush1.bf16.msra.mxu0 %v17794_v12  ;;  %9026 = vmatpush1.bf16.msra.mxu1 %v17796_v14  ;;  %v17862_v12 = vcombine.low %v9086_v20, %v9090_v3  ;;  %v17990_v14 = vcombine.low %v9214_v22, %v9218_v23  ;;  %v9170_v57 = vld [vmem:[#allocation15 + $0x320] sm:$0xff] }
 0x68e   :  { %8986 = vmatprep.subr.bf16.mxu0 %v17787_v15  ;;  %9027 = vmatprep.subr.bf16.mxu1 %v17789_v25  ;;  %v17855_v15 = vcombine.high %v9078_v32, %v9082_v4  ;;  %v17983_v25 = vcombine.high %v9206_v6, %v9210_v11  ;;  %v9294_v63 = vld [vmem:[#allocation15 + $0x700] sm:$0xff] }
 0x68f   :  { %v9298_v42 = vld [vmem:[#allocation15 + $0x720] sm:$0xff] }
 0x690   :  { %v18071_v20 = vcombine.high %v9294_v63, %v9298_v42  ;;  %v9162_v3 = vld [vmem:[#allocation15 + $0x2e0] sm:$0xff] }
 0x691   :  { %8987 = vmatpush1.bf16.msra.mxu0 %v17786_v60  ;;  %9028 = vmatpush1.bf16.msra.mxu1 %v17788_v28  ;;  %v17854_v60 = vcombine.low %v9078_v32, %v9082_v4  ;;  %v17982_v28 = vcombine.low %v9206_v6, %v9210_v11  ;;  %v9286_v22 = vld [vmem:[#allocation15 + $0x6c0] sm:$0xff]  ;;  %v18070_v4 = vcombine.low %v9294_v63, %v9298_v42 }
 0x692   :  { %12184 = vmatprep.subr.bf16.mxu0 %v17903_v45  ;;  %12225 = vmatprep.subr.bf16.mxu1 %v18031_v19  ;;  %v17847_v45 = vcombine.high %v9070_v24, %v9074_v50  ;;  %v17975_v19 = vcombine.high %v9198_v21, %v9202_v33  ;;  %v9290_v23 = vld [vmem:[#allocation15 + $0x6e0] sm:$0xff] }
 0x693   :  { %v19782_v32 = vld [vmem:[#allocation15 + $0xde0] sm:$0xff] }
 0x694   :  { %9005 = vmatmul.mubr.bf16.vlgmr.msra.gmra.mxu0 %v19770_v18  ;;  %9046 = vmatmul.mubr.bf16.vlgmr.msra.gmra.mxu1 %v19770_v18  ;;  %v18007_v18 = vcombine.high %v9230_v29, %v9234_v52  ;;  %v9302_v29 = vld [vmem:[#allocation15 + $0x740] sm:$0xff] }
 0x695   :  { %12185 = vmatpush1.bf16.msra.mxu0 %v17902_v36  ;;  %12226 = vmatpush1.bf16.msra.mxu1 %v18030_v2  ;;  %v17846_v36 = vcombine.low %v9070_v24, %v9074_v50  ;;  %v17974_v2 = vcombine.low %v9198_v21, %v9202_v33  ;;  %v9306_v52 = vld [vmem:[#allocation15 + $0x760] sm:$0xff]  ;;  %v18062_v33 = vcombine.low %v9286_v22, %v9290_v23 }
 0x696   :  { %12186 = vmatprep.subr.bf16.mxu0 %v17895_v34  ;;  %12227 = vmatprep.subr.bf16.mxu1 %v18023_v35  ;;  %v17967_v34 = vcombine.high %v9190_v30, %v9194_v1  ;;  %v18095_v35 = vcombine.high %v9318_v26, %v9322_v27  ;;  %v9278_v24 = vld [vmem:[#allocation15 + $0x680] sm:$0xff] }
 0x697   :  { %v9282_v50 = vld [vmem:[#allocation15 + $0x6a0] sm:$0xff] }
 0x699   :  { %12187 = vmatpush1.bf16.msra.mxu0 %v17894_v8  ;;  %12228 = vmatpush1.bf16.msra.mxu1 %v18022_v41  ;;  %v17966_v8 = vcombine.low %v9190_v30, %v9194_v1  ;;  %v18094_v41 = vcombine.low %v9318_v26, %v9322_v27  ;;  %v9270_v30 = vld [vmem:[#allocation15 + $0x640] sm:$0xff]  ;;  %v18054_v27 = vcombine.low %v9278_v24, %v9282_v50 }
 0x69a   :  { %12188 = vmatprep.subr.bf16.mxu0 %v17887_v44  ;;  %12229 = vmatprep.subr.bf16.mxu1 %v18015_v49  ;;  %v17959_v44 = vcombine.high %v9182_v37, %v9186_v51  ;;  %v18087_v49 = vcombine.high %v9310_v38, %v9314_v40  ;;  %v9274_v1 = vld [vmem:[#allocation15 + $0x660] sm:$0xff] }
 0x69d   :  { %12189 = vmatpush1.bf16.msra.mxu0 %v17886_v55  ;;  %12230 = vmatpush1.bf16.msra.mxu1 %v18014_v56  ;;  %v17958_v55 = vcombine.low %v9182_v37, %v9186_v51  ;;  %v18086_v56 = vcombine.low %v9310_v38, %v9314_v40  ;;  %v9262_v37 = vld [vmem:[#allocation15 + $0x600] sm:$0xff]  ;;  %v18046_v40 = vcombine.low %v9270_v30, %v9274_v1 }
 0x69e   :  { %12190 = vmatprep.subr.bf16.mxu0 %v17879_v7  ;;  %12231 = vmatprep.subr.bf16.mxu1 %v18007_v18  ;;  %v17951_v7 = vcombine.high %v9174_v54, %v9178_v39  ;;  %v18079_v18 = vcombine.high %v9302_v29, %v9306_v52  ;;  %v9266_v51 = vld [vmem:[#allocation15 + $0x620] sm:$0xff] }
 0x6a1   :  { %12191 = vmatpush1.bf16.msra.mxu0 %v17878_v16  ;;  %12232 = vmatpush1.bf16.msra.mxu1 %v18006_v31  ;;  %v17950_v16 = vcombine.low %v9174_v54, %v9178_v39  ;;  %v18078_v31 = vcombine.low %v9302_v29, %v9306_v52  ;;  %v19792_v29 = vld [vmem:[#allocation13] sm:$0xff] }
 0x6a2   :  { %12192 = vmatprep.subr.bf16.mxu0 %v17871_v13  ;;  %12233 = vmatprep.subr.bf16.mxu1 %v17999_v46  ;;  %v9158_v13 = vld [vmem:[#allocation15 + $0x2c0] sm:$0xff]  ;;  %v17943_v46 = vcombine.high %v9166_v9, %v9170_v57  ;;  %v8533_v52 = vrot.slane %v19792_v29, %v19534_v5 }
 0x6a3   :  { %v17934_v21 = vcombine.low %v9158_v13, %v9162_v3 }
 0x6a5   :  { %12193 = vmatpush1.bf16.msra.mxu0 %v17870_v59  ;;  %12234 = vmatpush1.bf16.msra.mxu1 %v17998_v61  ;;  %v19776_v59 = vld [vmem:[#allocation15 + $0x9c0] sm:$0xff] }
 0x6a6   :  { %12194 = vmatprep.subr.bf16.mxu0 %v17863_v0  ;;  %12235 = vmatprep.subr.bf16.mxu1 %v17991_v62  ;;  %v19778_v61 = vld [vmem:[#allocation15 + $0x9e0] sm:$0xff]  ;;  %v17942_v62 = vcombine.low %v9166_v9, %v9170_v57 }
 0x6a7   :  { %v19780_v0 = vld [vmem:[#allocation15 + $0xdc0] sm:$0xff]  ;;  %v18158_v6 = vcombine.low %v19776_v59, %v19778_v61  ;;  %v18159_v54 = vcombine.high %v19776_v59, %v19778_v61 }
 0x6a8   :  { %v18286_v11 = vcombine.low %v19780_v0, %v19782_v32  ;;  %v18287_v39 = vcombine.high %v19780_v0, %v19782_v32  ;;  %v9350_v0 = vld [vmem:[#allocation15 + $0x8c0] sm:$0xff] }
 0x6a9   :  { %12195 = vmatpush1.bf16.msra.mxu0 %v17862_v12  ;;  %12236 = vmatpush1.bf16.msra.mxu1 %v17990_v14  ;;  %v17935_v12 = vcombine.high %v9158_v13, %v9162_v3  ;;  %v18063_v14 = vcombine.high %v9286_v22, %v9290_v23  ;;  %v9374_v23 = vld [vmem:[#allocation15 + $0x980] sm:$0xff] }
 0x6aa   :  { %12196 = vmatprep.subr.bf16.mxu0 %v17855_v15  ;;  %12237 = vmatprep.subr.bf16.mxu1 %v17983_v25  ;;  %v9150_v15 = vld [vmem:[#allocation15 + $0x280] sm:$0xff] }
 0x6ab   :  { %v9154_v25 = vld [vmem:[#allocation15 + $0x2a0] sm:$0xff] }
 0x6ac   :  { %v17926_v26 = vcombine.low %v9150_v15, %v9154_v25  ;;  %v9354_v32 = vld [vmem:[#allocation15 + $0x8e0] sm:$0xff] }
 0x6ad   :  { %12197 = vmatpush1.bf16.msra.mxu0 %v17854_v60  ;;  %12238 = vmatpush1.bf16.msra.mxu1 %v17982_v28  ;;  %v17927_v60 = vcombine.high %v9150_v15, %v9154_v25  ;;  %v18055_v28 = vcombine.high %v9278_v24, %v9282_v50  ;;  %v9506_v15 = vld [vmem:[#allocation15 + $0xda0] sm:$0xff] }
 0x6ae   :  { %12198 = vmatprep.subr.bf16.mxu0 %v17847_v45  ;;  %12239 = vmatprep.subr.bf16.mxu1 %v17975_v19  ;;  %v9142_v45 = vld [vmem:[#allocation15 + $0x240] sm:$0xff] }
 0x6af   :  { %v9146_v19 = vld [vmem:[#allocation15 + $0x260] sm:$0xff] }
 0x6b0   :  { %v17918_v38 = vcombine.low %v9142_v45, %v9146_v19 }
 0x6b1   :  { %12199 = vmatpush1.bf16.msra.mxu0 %v17846_v36  ;;  %12240 = vmatpush1.bf16.msra.mxu1 %v17974_v2  ;;  %v17919_v36 = vcombine.high %v9142_v45, %v9146_v19  ;;  %v18047_v2 = vcombine.high %v9270_v30, %v9274_v1  ;;  %v9366_v19 = vld [vmem:[#allocation15 + $0x940] sm:$0xff] }
 0x6b2   :  { %12200 = vmatprep.subr.bf16.mxu0 %v17967_v34  ;;  %12241 = vmatprep.subr.bf16.mxu1 %v18095_v35  ;;  %v9134_v34 = vld [vmem:[#allocation15 + $0x200] sm:$0xff] }
 0x6b3   :  { %v9138_v35 = vld [vmem:[#allocation15 + $0x220] sm:$0xff] }
 0x6b4   :  { %v9370_v30 = vld [vmem:[#allocation15 + $0x960] sm:$0xff] }
 0x6b5   :  { %12201 = vmatpush2.bf16.msra.mxu0 %v17966_v8  ;;  %12242 = vmatpush2.bf16.msra.mxu1 %v18094_v41  ;;  %v17911_v8 = vcombine.high %v9134_v34, %v9138_v35  ;;  %v18039_v41 = vcombine.high %v9262_v37, %v9266_v51  ;;  %v9494_v1 = vld [vmem:[#allocation15 + $0xd40] sm:$0xff] }
 0x6b6   :  { %12202 = vmatprep.subr.bf16.mxu0 %v17959_v44  ;;  %12243 = vmatprep.subr.bf16.mxu1 %v18087_v49  ;;  %v17910_v44 = vcombine.low %v9134_v34, %v9138_v35  ;;  %v18038_v49 = vcombine.low %v9262_v37, %v9266_v51  ;;  %v9358_v35 = vld [vmem:[#allocation15 + $0x900] sm:$0xff] }
 0x6b7   :  { %v9362_v37 = vld [vmem:[#allocation15 + $0x920] sm:$0xff] }
 0x6b8   :  { %v9486_v51 = vld [vmem:[#allocation15 + $0xd00] sm:$0xff]  ;;  %v18135_v59 = vcombine.high %v9358_v35, %v9362_v37 }
 0x6b9   :  { %12203 = vmatpush2.bf16.msra.mxu0 %v17958_v55  ;;  %12244 = vmatpush2.bf16.msra.mxu1 %v18086_v56  ;;  %v8541_v55 = vrot.slane %v19792_v29, %v19564_v43  ;;  %v8537_v56 = vrot.slane %v19792_v29, %v19539_v10 }
 0x6ba   :  { %12204 = vmatprep.subr.bf16.mxu0 %v17951_v7  ;;  %12245 = vmatprep.subr.bf16.mxu1 %v18079_v18  ;;  %v8545_v7 = vrot.slane %v19792_v29, %v19567_v48 }
 0x6bd   :  { %12205 = vmatpush2.bf16.msra.mxu0 %v17950_v16  ;;  %12246 = vmatpush2.bf16.msra.mxu1 %v18078_v31 }
 0x6be   :  { %12206 = vmatprep.subr.bf16.mxu0 %v17943_v46  ;;  %12247 = vmatprep.subr.bf16.mxu1 %v18071_v20 }
 0x6c1   :  { %12207 = vmatpush2.bf16.msra.mxu0 %v17942_v62  ;;  %12248 = vmatpush2.bf16.msra.mxu1 %v18070_v4 }
 0x6c2   :  { %12208 = vmatprep.subr.bf16.mxu0 %v17935_v12  ;;  %12249 = vmatprep.subr.bf16.mxu1 %v18063_v14  ;;  %v9378_v12 = vld [vmem:[#allocation15 + $0x9a0] sm:$0xff] }
 0x6c3   :  { %v9502_v14 = vld [vmem:[#allocation15 + $0xd80] sm:$0xff] }
 0x6c4   :  { %v18279_v45 = vcombine.high %v9502_v14, %v9506_v15 }
 0x6c5   :  { %12209 = vmatpush2.bf16.msra.mxu0 %v17934_v21  ;;  %12250 = vmatpush2.bf16.msra.mxu1 %v18062_v33 }
 0x6c6   :  { %12210 = vmatprep.subr.bf16.mxu0 %v17927_v60  ;;  %12251 = vmatprep.subr.bf16.mxu1 %v18055_v28  ;;  %v18151_v28 = vcombine.high %v9374_v23, %v9378_v12 }
 0x6c9   :  { %12211 = vmatpush2.bf16.msra.mxu0 %v17926_v26  ;;  %12252 = vmatpush2.bf16.msra.mxu1 %v18054_v27  ;;  %v9498_v26 = vld [vmem:[#allocation15 + $0xd60] sm:$0xff]  ;;  %v18150_v27 = vcombine.low %v9374_v23, %v9378_v12  ;;  %v8553_v12 = vrot.slane %v19792_v29, %v19618_v53 }
 0x6ca   :  { %12212 = vmatprep.subr.bf16.mxu0 %v17919_v36  ;;  %12253 = vmatprep.subr.bf16.mxu1 %v18047_v2  ;;  %v18278_v36 = vcombine.low %v9502_v14, %v9506_v15  ;;  %v18143_v2 = vcombine.high %v9366_v19, %v9370_v30  ;;  %v18271_v34 = vcombine.high %v9494_v1, %v9498_v26  ;;  %v9330_v23 = vld [vmem:[#allocation15 + $0x820] sm:$0xff] }
 0x6cb   :  { %v8561_v14 = vrot.slane %v19792_v29, %v19666_v47 }
 0x6cd   :  { %12213 = vmatpush2.bf16.msra.mxu0 %v17918_v38  ;;  %12254 = vmatpush2.bf16.msra.mxu1 %v18046_v40  ;;  %v9490_v38 = vld [vmem:[#allocation15 + $0xd20] sm:$0xff]  ;;  %v18142_v40 = vcombine.low %v9366_v19, %v9370_v30 }
 0x6ce   :  { %12214 = vmatprep.subr.bf16.mxu0 %v17911_v8  ;;  %12255 = vmatprep.subr.bf16.mxu1 %v18039_v41  ;;  %v18270_v8 = vcombine.low %v9494_v1, %v9498_v26  ;;  %v18263_v61 = vcombine.high %v9486_v51, %v9490_v38  ;;  %v18134_v41 = vcombine.low %v9358_v35, %v9362_v37  ;;  %v9446_v30 = vld [vmem:[#allocation15 + $0xbc0] sm:$0xff] }
 0x6cf   :  { %v9450_v1 = vld [vmem:[#allocation15 + $0xbe0] sm:$0xff] }
 0x6d0   :  { %v9574_v26 = vld [vmem:[#allocation15 + $0xfc0] sm:$0xff] }
 0x6d1   :  { %12215 = vmatpush2.bf16.msra.mxu0 %v17910_v44  ;;  %12256 = vmatpush2.bf16.msra.mxu1 %v18038_v49  ;;  %v18262_v44 = vcombine.low %v9486_v51, %v9490_v38  ;;  %v18127_v49 = vcombine.high %v9350_v0, %v9354_v32 }
 0x6d2   :  { %12266 = vmatprep.subr.bf16.mxu0 %v18159_v54  ;;  %12307 = vmatprep.subr.bf16.mxu1 %v18287_v39  ;;  %v9342_v39 = vld [vmem:[#allocation15 + $0x880] sm:$0xff] }
 0x734   :  { %v8924_v18 = vpop.f32.mrf.mxu0  ;;  %v8965_v9 = vpop.f32.mrf.mxu1 }
 0x735   :  { %v8925_v57 = vadd.f32 %v8924_v18, %v8533_v52  ;;  %v8966_v63 = vadd.f32 %v8965_v9, %v8541_v55  ;;  %v9346_v52 = vld [vmem:[#allocation15 + $0x8a0] sm:$0xff] }
 0x736   :  { %v8926_v42 = vpop.f32.mrf.mxu0  ;;  %v8967_v16 = vpop.f32.mrf.mxu1  ;;  %v9470_v55 = vld [vmem:[#allocation15 + $0xc80] sm:$0xff]  ;;  %v18119_v9 = vcombine.high %v9342_v39, %v9346_v52 }
 0x737   :  { %v8927_v31 = vadd.f32 %v8926_v42, %v8537_v56  ;;  %v8968_v13 = vadd.f32 %v8967_v16, %v8545_v7  ;;  %v9054_v46 = vmax.f32 %v8925_v57, 0.0  ;;  %v9056_v20 = vmax.f32 %v8966_v63, 0.0  ;;  %v9474_v56 = vld [vmem:[#allocation15 + $0xca0] sm:$0xff] }
 0x738   :  { %v8928_v3 = vpop.f32.mrf.mxu0  ;;  %v8969_v22 = vpop.f32.mrf.mxu1  ;;  %v18126_v7 = vcombine.low %v9350_v0, %v9354_v32  ;;  %v18247_v57 = vcombine.high %v9470_v55, %v9474_v56  ;;  %v9334_v63 = vld [vmem:[#allocation15 + $0x840] sm:$0xff] }
 0x739   :  { %v9055_v62 = vmax.f32 %v8927_v31, 0.0  ;;  %v9057_v4 = vmax.f32 %v8968_v13, 0.0  ;;  %v19806_v33 = vpack.c.bf16 %v9054_v46, %v9054_v46  ;;  %v19808_v60 = vpack.c.bf16 %v9056_v20, %v9056_v20  ;;  %v9338_v42 = vld [vmem:[#allocation15 + $0x860] sm:$0xff] }
 0x73a   :  { %v8929_v25 = vpop.f32.mrf.mxu0  ;;  %v8970_v24 = vpop.f32.mrf.mxu1  ;;  %v9462_v16 = vld [vmem:[#allocation15 + $0xc40] sm:$0xff]  ;;  %v18118_v13 = vcombine.low %v9342_v39, %v9346_v52  ;;  %v18246_v46 = vcombine.low %v9470_v55, %v9474_v56  ;;  %v18111_v20 = vcombine.high %v9334_v63, %v9338_v42  ;;  %v18110_v15 = vcombine.low %v9334_v63, %v9338_v42 }
 0x73b   :  { %v19802_v50 = vpack.c.bf16 %v9055_v62, %v9055_v62  ;;  %v19804_v21 = vpack.c.bf16 %v9057_v4, %v9057_v4  ;;  %v9466_v31 = vld [vmem:[#allocation15 + $0xc60] sm:$0xff] }
 0x73c   :  { %v18239_v3 = vcombine.high %v9462_v16, %v9466_v31  ;;  %v9326_v22 = vld [vmem:[#allocation15 + $0x800] sm:$0xff]  ;;  %v18238_v25 = vcombine.low %v9462_v16, %v9466_v31 }
 0x73d   :  { %12216 = vmatprep.mubr.bf16.mxu0 %v19802_v50  ;;  %12257 = vmatprep.mubr.bf16.mxu1 %v19804_v21  ;;  %v9454_v62 = vld [vmem:[#allocation15 + $0xc00] sm:$0xff] }
 0x73e   :  { %12217 = vmatmul.mubr.bf16.vlgmr.msra.gmra.mxu0 %v19806_v33  ;;  %12258 = vmatmul.mubr.bf16.vlgmr.msra.gmra.mxu1 %v19808_v60  ;;  %v9458_v4 = vld [vmem:[#allocation15 + $0xc20] sm:$0xff] }
 0x73f   :  { %12267 = vmatpush1.bf16.msra.mxu0 %v18158_v6  ;;  %12308 = vmatpush1.bf16.msra.mxu1 %v18286_v11  ;;  %v9478_v6 = vld [vmem:[#allocation15 + $0xcc0] sm:$0xff]  ;;  %v18231_v19 = vcombine.high %v9454_v62, %v9458_v4  ;;  %v18230_v51 = vcombine.low %v9454_v62, %v9458_v4 }
 0x740   :  { %12268 = vmatprep.subr.bf16.mxu0 %v18151_v28  ;;  %12309 = vmatprep.subr.bf16.mxu1 %v18279_v45  ;;  %v9482_v11 = vld [vmem:[#allocation15 + $0xce0] sm:$0xff]  ;;  %v18103_v45 = vcombine.high %v9326_v22, %v9330_v23 }
 0x741   :  { %v18255_v54 = vcombine.high %v9478_v6, %v9482_v11  ;;  %v18254_v18 = vcombine.low %v9478_v6, %v9482_v11  ;;  %v9442_v6 = vld [vmem:[#allocation15 + $0xba0] sm:$0xff] }
 0x742   :  { %v9566_v11 = vld [vmem:[#allocation15 + $0xf80] sm:$0xff] }
 0x743   :  { %12269 = vmatpush1.bf16.msra.mxu0 %v18150_v27  ;;  %12310 = vmatpush1.bf16.msra.mxu1 %v18278_v36  ;;  %v9578_v27 = vld [vmem:[#allocation15 + $0xfe0] sm:$0xff] }
 0x744   :  { %12270 = vmatprep.subr.bf16.mxu0 %v18143_v2  ;;  %12311 = vmatprep.subr.bf16.mxu1 %v18271_v34  ;;  %v18102_v34 = vcombine.low %v9326_v22, %v9330_v23  ;;  %v18350_v55 = vcombine.low %v9574_v26, %v9578_v27  ;;  %v9562_v63 = vld [vmem:[#allocation15 + $0xf60] sm:$0xff] }
 0x745   :  { %v9554_v22 = vld [vmem:[#allocation15 + $0xf20] sm:$0xff] }
 0x747   :  { %12271 = vmatpush1.bf16.msra.mxu0 %v18142_v40  ;;  %12312 = vmatpush1.bf16.msra.mxu1 %v18270_v8  ;;  %v18223_v8 = vcombine.high %v9446_v30, %v9450_v1 }
 0x748   :  { %12272 = vmatprep.subr.bf16.mxu0 %v18135_v59  ;;  %12313 = vmatprep.subr.bf16.mxu1 %v18263_v61  ;;  %v18351_v59 = vcombine.high %v9574_v26, %v9578_v27  ;;  %v9438_v61 = vld [vmem:[#allocation15 + $0xb80] sm:$0xff] }
 0x749   :  { %v18215_v56 = vcombine.high %v9438_v61, %v9442_v6  ;;  %v18214_v42 = vcombine.low %v9438_v61, %v9442_v6  ;;  %v9406_v27 = vld [vmem:[#allocation15 + $0xa80] sm:$0xff] }
 0x74a   :  { %v9530_v61 = vld [vmem:[#allocation15 + $0xe60] sm:$0xff] }
 0x74b   :  { %12273 = vmatpush1.bf16.msra.mxu0 %v18134_v41  ;;  %12314 = vmatpush1.bf16.msra.mxu1 %v18262_v44  ;;  %v9570_v41 = vld [vmem:[#allocation15 + $0xfa0] sm:$0xff] }
 0x74c   :  { %12274 = vmatprep.subr.bf16.mxu0 %v18127_v49  ;;  %12315 = vmatprep.subr.bf16.mxu1 %v18255_v54  ;;  %v18222_v54 = vcombine.low %v9446_v30, %v9450_v1  ;;  %v18342_v16 = vcombine.low %v9566_v11, %v9570_v41 }
 0x74f   :  { %12275 = vmatpush1.bf16.msra.mxu0 %v18126_v7  ;;  %12316 = vmatpush1.bf16.msra.mxu1 %v18254_v18  ;;  %v18343_v7 = vcombine.high %v9566_v11, %v9570_v41  ;;  %v9430_v18 = vld [vmem:[#allocation15 + $0xb40] sm:$0xff]  ;;  %v8557_v11 = vrot.slane %v19792_v29, %v19663_v58 }
 0x750   :  { %12276 = vmatprep.subr.bf16.mxu0 %v18119_v9  ;;  %12317 = vmatprep.subr.bf16.mxu1 %v18247_v57  ;;  %v9434_v9 = vld [vmem:[#allocation15 + $0xb60] sm:$0xff] }
 0x751   :  { %v9558_v57 = vld [vmem:[#allocation15 + $0xf40] sm:$0xff]  ;;  %v18207_v31 = vcombine.high %v9430_v18, %v9434_v9  ;;  %v18206_v23 = vcombine.low %v9430_v18, %v9434_v9 }
 0x752   :  { %v18334_v62 = vcombine.low %v9558_v57, %v9562_v63 }
 0x753   :  { %12277 = vmatpush1.bf16.msra.mxu0 %v18118_v13  ;;  %12318 = vmatpush1.bf16.msra.mxu1 %v18246_v46  ;;  %v18335_v13 = vcombine.high %v9558_v57, %v9562_v63  ;;  %v9422_v46 = vld [vmem:[#allocation15 + $0xb00] sm:$0xff] }
 0x754   :  { %v19824_v24 = vpop.f32.mrf.mxu0  ;;  %v19826_v28 = vpop.f32.mrf.mxu1  ;;  %12278 = vmatprep.subr.bf16.mxu0 %v18111_v20  ;;  %12319 = vmatprep.subr.bf16.mxu1 %v18239_v3  ;;  %v9426_v20 = vld [vmem:[#allocation15 + $0xb20] sm:$0xff] }
 0x755   :  { %v9550_v3 = vld [vmem:[#allocation15 + $0xf00] sm:$0xff]  ;;  %v18199_v4 = vcombine.high %v9422_v46, %v9426_v20  ;;  %v9048_v63 = vadd.f32 %v19826_v28, %v8557_v11  ;;  %v9247_v28 = vld [vmem:[#allocation15 + $0x588] sm:$0xff] }
 0x756   :  { %v9008_v36 = vpop.f32.mrf.mxu0  ;;  %v9049_v2 = vpop.f32.mrf.mxu1  ;;  %v18326_v30 = vcombine.low %v9550_v3, %v9554_v22  ;;  %v9099_v11 = vld [vmem:[#allocation15 + $0xe8] sm:$0xff] }
 0x757   :  { %v9009_v35 = vadd.f32 %v9008_v36, %v8553_v12  ;;  %v9050_v37 = vadd.f32 %v9049_v2, %v8561_v14  ;;  %12279 = vmatpush1.bf16.msra.mxu0 %v18110_v15  ;;  %12320 = vmatpush1.bf16.msra.mxu1 %v18238_v25  ;;  %v18327_v12 = vcombine.high %v9550_v3, %v9554_v22  ;;  %v9414_v14 = vld [vmem:[#allocation15 + $0xac0] sm:$0xff]  ;;  %v9060_v22 = vmax.f32 %v9048_v63, 0.0 }
 0x758   :  { %v9010_v38 = vpop.f32.mrf.mxu0  ;;  %v9051_v40 = vpop.f32.mrf.mxu1  ;;  %12280 = vmatprep.subr.bf16.mxu0 %v18103_v45  ;;  %12321 = vmatprep.subr.bf16.mxu1 %v18231_v19  ;;  %v9418_v15 = vld [vmem:[#allocation15 + $0xae0] sm:$0xff]  ;;  %v18198_v19 = vcombine.low %v9422_v46, %v9426_v20 }
 0x759   :  { %v9059_v0 = vmax.f32 %v9009_v35, 0.0  ;;  %v9061_v32 = vmax.f32 %v9050_v37, 0.0  ;;  %v9542_v25 = vld [vmem:[#allocation15 + $0xec0] sm:$0xff]  ;;  %v18191_v1 = vcombine.high %v9414_v14, %v9418_v15  ;;  %v18190_v35 = vcombine.low %v9414_v14, %v9418_v15 }
 0x75a   :  { %v9011_v44 = vpop.f32.mrf.mxu0  ;;  %v9052_v49 = vpop.f32.mrf.mxu1  ;;  %v9546_v45 = vld [vmem:[#allocation15 + $0xee0] sm:$0xff] }
 0x75b   :  { %v19828_v39 = vpack.c.bf16 %v9059_v0, %v9059_v0  ;;  %v19830_v52 = vpack.c.bf16 %v9061_v32, %v9061_v32  ;;  %12281 = vmatpush1.bf16.msra.mxu0 %v18102_v34  ;;  %12322 = vmatpush1.bf16.msra.mxu1 %v18230_v51  ;;  %v18319_v26 = vcombine.high %v9542_v25, %v9546_v45  ;;  %v9410_v36 = vld [vmem:[#allocation15 + $0xaa0] sm:$0xff] }
 0x75c   :  { %12282 = vmatprep.subr.bf16.mxu0 %v18223_v8  ;;  %12323 = vmatprep.subr.bf16.mxu1 %v18351_v59  ;;  %v9534_v2 = vld [vmem:[#allocation15 + $0xe80] sm:$0xff]  ;;  %v18318_v37 = vcombine.low %v9542_v25, %v9546_v45  ;;  %v18183_v51 = vcombine.high %v9406_v27, %v9410_v36  ;;  %v8549_v0 = vrot.slane %v19792_v29, %v19596_v17 }
 0x75d   :  { %12298 = vmatprep.mubr.bf16.mxu0 %v19828_v39  ;;  %12339 = vmatprep.mubr.bf16.mxu1 %v19830_v52  ;;  %v9538_v34 = vld [vmem:[#allocation15 + $0xea0] sm:$0xff]  ;;  %v18182_v32 = vcombine.low %v9406_v27, %v9410_v36  ;;  %v19842_v25 = vpack.c.bf16 %v9060_v22, %v9060_v22  ;;  %v9239_v27 = vld [vmem:[#allocation15 + $0x548] sm:$0xff] }
 0x75e   :  { %v18311_v38 = vcombine.high %v9534_v2, %v9538_v34  ;;  %v9398_v40 = vld [vmem:[#allocation15 + $0xa40] sm:$0xff]  ;;  %v18310_v6 = vcombine.low %v9534_v2, %v9538_v34  ;;  %v9007_v57 = vadd.f32 %v19824_v24, %v8549_v0  ;;  %v9119_v24 = vld [vmem:[#allocation15 + $0x188] sm:$0xff] }
 0x75f   :  { %12283 = vmatpush2.bf16.msra.mxu0 %v18222_v54  ;;  %12324 = vmatpush2.bf16.msra.mxu1 %v18350_v55  ;;  %v9402_v8 = vld [vmem:[#allocation15 + $0xa60] sm:$0xff]  ;;  %v9243_v36 = vld [vmem:[#allocation15 + $0x568] sm:$0xff] }
 0x760   :  { %12284 = vmatprep.subr.bf16.mxu0 %v18215_v56  ;;  %12325 = vmatprep.subr.bf16.mxu1 %v18343_v7  ;;  %v9526_v59 = vld [vmem:[#allocation15 + $0xe40] sm:$0xff]  ;;  %v18175_v41 = vcombine.high %v9398_v40, %v9402_v8  ;;  %v18174_v7 = vcombine.low %v9398_v40, %v9402_v8  ;;  %v9058_v3 = vmax.f32 %v9007_v57, 0.0  ;;  %v9231_v40 = vld [vmem:[#allocation15 + $0x508] sm:$0xff] }
 0x761   :  { %v18303_v44 = vcombine.high %v9526_v59, %v9530_v61  ;;  %v9390_v49 = vld [vmem:[#allocation15 + $0xa00] sm:$0xff]  ;;  %v18302_v18 = vcombine.low %v9526_v59, %v9530_v61  ;;  %v9235_v8 = vld [vmem:[#allocation15 + $0x528] sm:$0xff]  ;;  %v18016_v61 = vcombine.low %v9239_v27, %v9243_v36 }
 0x762   :  { %v9394_v54 = vld [vmem:[#allocation15 + $0xa20] sm:$0xff]  ;;  %v19840_v15 = vpack.c.bf16 %v9058_v3, %v9058_v3  ;;  %v9219_v57 = vld [vmem:[#allocation15 + $0x4a8] sm:$0xff] }
 0x763   :  { %12285 = vmatpush2.bf16.msra.mxu0 %v18214_v42  ;;  %12326 = vmatpush2.bf16.msra.mxu1 %v18342_v16  ;;  %v9518_v55 = vld [vmem:[#allocation15 + $0xe00] sm:$0xff]  ;;  %v18167_v9 = vcombine.high %v9390_v49, %v9394_v54  ;;  %v9127_v42 = vld [vmem:[#allocation15 + $0x1c8] sm:$0xff]  ;;  %v18166_v46 = vcombine.low %v9390_v49, %v9394_v54  ;;  %v18008_v54 = vcombine.low %v9231_v40, %v9235_v8 }
 0x764   :  { %12286 = vmatprep.subr.bf16.mxu0 %v18207_v31  ;;  %12327 = vmatprep.subr.bf16.mxu1 %v18335_v13  ;;  %v9522_v56 = vld [vmem:[#allocation15 + $0xe20] sm:$0xff]  ;;  %v9131_v16 = vld [vmem:[#allocation15 + $0x1e8] sm:$0xff] }
 0x765   :  { %v18295_v29 = vcombine.high %v9518_v55, %v9522_v56  ;;  %v9255_v31 = vld [vmem:[#allocation15 + $0x5c8] sm:$0xff]  ;;  %v18294_v20 = vcombine.low %v9518_v55, %v9522_v56  ;;  %v17904_v14 = vcombine.low %v9127_v42, %v9131_v16 }
 0x766   :  { %v9259_v13 = vld [vmem:[#allocation15 + $0x5e8] sm:$0xff] }
 0x767   :  { %12287 = vmatpush2.bf16.msra.mxu0 %v18206_v23  ;;  %12328 = vmatpush2.bf16.msra.mxu1 %v18334_v62  ;;  %v17905_v23 = vcombine.high %v9127_v42, %v9131_v16  ;;  %v18033_v62 = vcombine.high %v9255_v31, %v9259_v13  ;;  %v18032_v45 = vcombine.low %v9255_v31, %v9259_v13  ;;  %v9079_v31 = vld [vmem:[#allocation15 + $0x48] sm:$0xff] }
 0x768   :  { %12288 = vmatprep.subr.bf16.mxu0 %v18199_v4  ;;  %12329 = vmatprep.subr.bf16.mxu1 %v18327_v12  ;;  %v9123_v4 = vld [vmem:[#allocation15 + $0x1a8] sm:$0xff] }
 0x769   :  { %v9251_v12 = vld [vmem:[#allocation15 + $0x5a8] sm:$0xff]  ;;  %v17896_v2 = vcombine.low %v9119_v24, %v9123_v4 }
 0x76a   :  { %v18024_v34 = vcombine.low %v9247_v28, %v9251_v12  ;;  %v9083_v13 = vld [vmem:[#allocation15 + $0x68] sm:$0xff] }
 0x76b   :  { %12289 = vmatpush2.bf16.msra.mxu0 %v18198_v19  ;;  %12330 = vmatpush2.bf16.msra.mxu1 %v18326_v30  ;;  %v17897_v19 = vcombine.high %v9119_v24, %v9123_v4  ;;  %v18025_v30 = vcombine.high %v9247_v28, %v9251_v12  ;;  %v9071_v24 = vld [vmem:[#allocation15 + $0x8] sm:$0xff] }
 0x76c   :  { %12290 = vmatprep.subr.bf16.mxu0 %v18191_v1  ;;  %12331 = vmatprep.subr.bf16.mxu1 %v18319_v26  ;;  %v9111_v1 = vld [vmem:[#allocation15 + $0x148] sm:$0xff] }
 0x76d   :  { %v9115_v26 = vld [vmem:[#allocation15 + $0x168] sm:$0xff] }
 0x76e   :  { %v17888_v59 = vcombine.low %v9111_v1, %v9115_v26  ;;  %v9075_v4 = vld [vmem:[#allocation15 + $0x28] sm:$0xff] }
 0x76f   :  { %12291 = vmatpush2.bf16.msra.mxu0 %v18190_v35  ;;  %12332 = vmatpush2.bf16.msra.mxu1 %v18318_v37  ;;  %v17889_v35 = vcombine.high %v9111_v1, %v9115_v26  ;;  %v18017_v37 = vcombine.high %v9239_v27, %v9243_v36  ;;  %v9199_v28 = vld [vmem:[#allocation15 + $0x408] sm:$0xff] }
 0x770   :  { %12292 = vmatprep.subr.bf16.mxu0 %v18183_v51  ;;  %12333 = vmatprep.subr.bf16.mxu1 %v18311_v38  ;;  %v9103_v51 = vld [vmem:[#allocation15 + $0x108] sm:$0xff] }
 0x771   :  { %v9107_v38 = vld [vmem:[#allocation15 + $0x128] sm:$0xff] }
 0x772   :  { %v17881_v0 = vcombine.high %v9103_v51, %v9107_v38  ;;  %v17880_v49 = vcombine.low %v9103_v51, %v9107_v38  ;;  %v9203_v12 = vld [vmem:[#allocation15 + $0x428] sm:$0xff] }
 0x773   :  { %12293 = vmatpush2.bf16.msra.mxu0 %v18182_v32  ;;  %12334 = vmatpush2.bf16.msra.mxu1 %v18310_v6  ;;  %v18009_v32 = vcombine.high %v9231_v40, %v9235_v8  ;;  %v9095_v6 = vld [vmem:[#allocation15 + $0xc8] sm:$0xff] }
 0x774   :  { %12294 = vmatprep.subr.bf16.mxu0 %v18175_v41  ;;  %12335 = vmatprep.subr.bf16.mxu1 %v18303_v44  ;;  %v9223_v41 = vld [vmem:[#allocation15 + $0x4c8] sm:$0xff]  ;;  %v17873_v55 = vcombine.high %v9095_v6, %v9099_v11  ;;  %v17872_v63 = vcombine.low %v9095_v6, %v9099_v11 }
 0x775   :  { %v9227_v44 = vld [vmem:[#allocation15 + $0x4e8] sm:$0xff] }
 0x776   :  { %v18001_v56 = vcombine.high %v9223_v41, %v9227_v44  ;;  %v9191_v1 = vld [vmem:[#allocation15 + $0x3c8] sm:$0xff] }
 0x777   :  { %12295 = vmatpush2.bf16.msra.mxu0 %v18174_v7  ;;  %12336 = vmatpush2.bf16.msra.mxu1 %v18302_v18  ;;  %v9087_v7 = vld [vmem:[#allocation15 + $0x88] sm:$0xff] }
 0x778   :  { %12296 = vmatprep.subr.bf16.mxu0 %v18167_v9  ;;  %12337 = vmatprep.subr.bf16.mxu1 %v18295_v29  ;;  %v9091_v18 = vld [vmem:[#allocation15 + $0xa8] sm:$0xff]  ;;  %v18000_v29 = vcombine.low %v9223_v41, %v9227_v44 }
 0x779   :  { %v9215_v9 = vld [vmem:[#allocation15 + $0x488] sm:$0xff]  ;;  %v17865_v42 = vcombine.high %v9087_v7, %v9091_v18  ;;  %v17864_v3 = vcombine.low %v9087_v7, %v9091_v18 }
 0x77a   :  { %v17993_v16 = vcombine.high %v9215_v9, %v9219_v57  ;;  %v17992_v22 = vcombine.low %v9215_v9, %v9219_v57  ;;  %v9195_v26 = vld [vmem:[#allocation15 + $0x3e8] sm:$0xff] }
 0x77b   :  { %12297 = vmatpush2.bf16.msra.mxu0 %v18166_v46  ;;  %12338 = vmatpush2.bf16.msra.mxu1 %v18294_v20  ;;  %v9207_v46 = vld [vmem:[#allocation15 + $0x448] sm:$0xff] }
 0x77c   :  { %12348 = vmatprep.subr.bf16.mxu0 %v17905_v23  ;;  %12389 = vmatprep.subr.bf16.mxu1 %v18033_v62  ;;  %v9211_v20 = vld [vmem:[#allocation15 + $0x468] sm:$0xff]  ;;  %v17857_v23 = vcombine.high %v9079_v31, %v9083_v13 }
 0x77d   :  { %v17985_v62 = vcombine.high %v9207_v46, %v9211_v20  ;;  %v9319_v27 = vld [vmem:[#allocation15 + $0x7c8] sm:$0xff] }
 0x77e   :  { %12299 = vmatmul.mubr.bf16.vlgmr.msra.gmra.mxu0 %v19840_v15  ;;  %12340 = vmatmul.mubr.bf16.vlgmr.msra.gmra.mxu1 %v19842_v25  ;;  %v9323_v36 = vld [vmem:[#allocation15 + $0x7e8] sm:$0xff] }
 0x77f   :  { %12349 = vmatpush1.bf16.msra.mxu0 %v17904_v14  ;;  %12380 = vmatprep.mubr.bf16.mxu0 %v19802_v50  ;;  %v17856_v14 = vcombine.low %v9079_v31, %v9083_v13  ;;  %v9183_v51 = vld [vmem:[#allocation15 + $0x388] sm:$0xff] }
 0x780   :  { %12390 = vmatpush1.bf16.msra.mxu1 %v18032_v45  ;;  %12421 = vmatprep.mubr.bf16.mxu1 %v19804_v21  ;;  %v17984_v45 = vcombine.low %v9207_v46, %v9211_v20  ;;  %v9187_v38 = vld [vmem:[#allocation15 + $0x3a8] sm:$0xff] }
 0x781   :  { %12350 = vmatprep.subr.bf16.mxu0 %v17897_v19  ;;  %12391 = vmatprep.subr.bf16.mxu1 %v18025_v30  ;;  %v17849_v19 = vcombine.high %v9071_v24, %v9075_v4  ;;  %v17977_v30 = vcombine.high %v9199_v28, %v9203_v12  ;;  %v9311_v40 = vld [vmem:[#allocation15 + $0x788] sm:$0xff] }
 0x782   :  { %v9315_v8 = vld [vmem:[#allocation15 + $0x7a8] sm:$0xff] }
 0x783   :  { %12351 = vmatpush1.bf16.msra.mxu0 %v17896_v2  ;;  %v17848_v2 = vcombine.low %v9071_v24, %v9075_v4  ;;  %v9175_v6 = vld [vmem:[#allocation15 + $0x348] sm:$0xff] }
 0x784   :  { %12392 = vmatpush1.bf16.msra.mxu1 %v18024_v34  ;;  %12352 = vmatprep.subr.bf16.mxu0 %v17889_v35  ;;  %v17976_v34 = vcombine.low %v9199_v28, %v9203_v12  ;;  %v17969_v35 = vcombine.high %v9191_v1, %v9195_v26  ;;  %v9179_v11 = vld [vmem:[#allocation15 + $0x368] sm:$0xff] }
 0x785   :  { %12393 = vmatprep.subr.bf16.mxu1 %v18017_v37  ;;  %v18097_v37 = vcombine.high %v9319_v27, %v9323_v36  ;;  %v9303_v41 = vld [vmem:[#allocation15 + $0x748] sm:$0xff] }
 0x786   :  { %v9307_v44 = vld [vmem:[#allocation15 + $0x768] sm:$0xff] }
 0x787   :  { %12353 = vmatpush1.bf16.msra.mxu0 %v17888_v59  ;;  %v17968_v59 = vcombine.low %v9191_v1, %v9195_v26  ;;  %v9167_v7 = vld [vmem:[#allocation15 + $0x308] sm:$0xff] }
 0x788   :  { %12394 = vmatpush1.bf16.msra.mxu1 %v18016_v61  ;;  %12354 = vmatprep.subr.bf16.mxu0 %v17881_v0  ;;  %v18096_v61 = vcombine.low %v9319_v27, %v9323_v36  ;;  %v17961_v0 = vcombine.high %v9183_v51, %v9187_v38  ;;  %v9171_v18 = vld [vmem:[#allocation15 + $0x328] sm:$0xff] }
 0x789   :  { %12395 = vmatprep.subr.bf16.mxu1 %v18009_v32  ;;  %v18089_v32 = vcombine.high %v9311_v40, %v9315_v8  ;;  %v9295_v9 = vld [vmem:[#allocation15 + $0x708] sm:$0xff] }
 0x78a   :  { %v9299_v57 = vld [vmem:[#allocation15 + $0x728] sm:$0xff] }
 0x78b   :  { %12355 = vmatpush1.bf16.msra.mxu0 %v17880_v49  ;;  %v17960_v49 = vcombine.low %v9183_v51, %v9187_v38  ;;  %v9159_v31 = vld [vmem:[#allocation15 + $0x2c8] sm:$0xff] }
 0x78c   :  { %12396 = vmatpush1.bf16.msra.mxu1 %v18008_v54  ;;  %12356 = vmatprep.subr.bf16.mxu0 %v17873_v55  ;;  %v18088_v54 = vcombine.low %v9311_v40, %v9315_v8  ;;  %v17953_v55 = vcombine.high %v9175_v6, %v9179_v11  ;;  %v9163_v13 = vld [vmem:[#allocation15 + $0x2e8] sm:$0xff] }
 0x78d   :  { %12397 = vmatprep.subr.bf16.mxu1 %v18001_v56  ;;  %v18081_v56 = vcombine.high %v9303_v41, %v9307_v44  ;;  %v9287_v46 = vld [vmem:[#allocation15 + $0x6c8] sm:$0xff] }
 0x78e   :  { %v9291_v20 = vld [vmem:[#allocation15 + $0x6e8] sm:$0xff] }
 0x78f   :  { %12357 = vmatpush1.bf16.msra.mxu0 %v17872_v63  ;;  %v17952_v63 = vcombine.low %v9175_v6, %v9179_v11  ;;  %v9151_v24 = vld [vmem:[#allocation15 + $0x288] sm:$0xff] }
 0x790   :  { %12398 = vmatpush1.bf16.msra.mxu1 %v18000_v29  ;;  %12358 = vmatprep.subr.bf16.mxu0 %v17865_v42  ;;  %v18080_v29 = vcombine.low %v9303_v41, %v9307_v44  ;;  %v17945_v42 = vcombine.high %v9167_v7, %v9171_v18  ;;  %v9155_v4 = vld [vmem:[#allocation15 + $0x2a8] sm:$0xff] }
 0x791   :  { %12399 = vmatprep.subr.bf16.mxu1 %v17993_v16  ;;  %v18073_v16 = vcombine.high %v9295_v9, %v9299_v57  ;;  %v9279_v28 = vld [vmem:[#allocation15 + $0x688] sm:$0xff] }
 0x792   :  { %v9283_v12 = vld [vmem:[#allocation15 + $0x6a8] sm:$0xff] }
 0x793   :  { %12359 = vmatpush1.bf16.msra.mxu0 %v17864_v3  ;;  %v17944_v3 = vcombine.low %v9167_v7, %v9171_v18  ;;  %v9143_v1 = vld [vmem:[#allocation15 + $0x248] sm:$0xff] }
 0x794   :  { %12400 = vmatpush1.bf16.msra.mxu1 %v17992_v22  ;;  %12360 = vmatprep.subr.bf16.mxu0 %v17857_v23  ;;  %v18072_v22 = vcombine.low %v9295_v9, %v9299_v57  ;;  %v17937_v23 = vcombine.high %v9159_v31, %v9163_v13  ;;  %v9147_v26 = vld [vmem:[#allocation15 + $0x268] sm:$0xff] }
 0x795   :  { %12401 = vmatprep.subr.bf16.mxu1 %v17985_v62  ;;  %v18065_v62 = vcombine.high %v9287_v46, %v9291_v20  ;;  %v9271_v27 = vld [vmem:[#allocation15 + $0x648] sm:$0xff] }
 0x796   :  { %v9275_v36 = vld [vmem:[#allocation15 + $0x668] sm:$0xff] }
 0x797   :  { %12361 = vmatpush1.bf16.msra.mxu0 %v17856_v14  ;;  %v17936_v14 = vcombine.low %v9159_v31, %v9163_v13  ;;  %v9135_v51 = vld [vmem:[#allocation15 + $0x208] sm:$0xff] }
 0x798   :  { %12402 = vmatpush1.bf16.msra.mxu1 %v17984_v45  ;;  %12362 = vmatprep.subr.bf16.mxu0 %v17849_v19  ;;  %v18064_v45 = vcombine.low %v9287_v46, %v9291_v20  ;;  %v17929_v19 = vcombine.high %v9151_v24, %v9155_v4  ;;  %v9139_v38 = vld [vmem:[#allocation15 + $0x228] sm:$0xff] }
 0x799   :  { %12403 = vmatprep.subr.bf16.mxu1 %v17977_v30  ;;  %v18057_v30 = vcombine.high %v9279_v28, %v9283_v12  ;;  %v9263_v40 = vld [vmem:[#allocation15 + $0x608] sm:$0xff] }
 0x79a   :  { %v9267_v8 = vld [vmem:[#allocation15 + $0x628] sm:$0xff] }
 0x79b   :  { %12363 = vmatpush1.bf16.msra.mxu0 %v17848_v2  ;;  %v17928_v2 = vcombine.low %v9151_v24, %v9155_v4  ;;  %v9383_v6 = vld [vmem:[#allocation15 + $0x9c8] sm:$0xff] }
 0x79c   :  { %12404 = vmatpush1.bf16.msra.mxu1 %v17976_v34  ;;  %12364 = vmatprep.subr.bf16.mxu0 %v17969_v35  ;;  %v18056_v34 = vcombine.low %v9279_v28, %v9283_v12  ;;  %v17921_v35 = vcombine.high %v9143_v1, %v9147_v26  ;;  %v9387_v11 = vld [vmem:[#allocation15 + $0x9e8] sm:$0xff] }
 0x79d   :  { %12405 = vmatprep.subr.bf16.mxu1 %v18097_v37  ;;  %v18049_v37 = vcombine.high %v9271_v27, %v9275_v36  ;;  %v9511_v41 = vld [vmem:[#allocation15 + $0xdc8] sm:$0xff]  ;;  %v18160_v9 = vcombine.low %v9383_v6, %v9387_v11 }
 0x79e   :  { %v9515_v44 = vld [vmem:[#allocation15 + $0xde8] sm:$0xff] }
 0x79f   :  { %12365 = vmatpush2.bf16.msra.mxu0 %v17968_v59  ;;  %v17920_v59 = vcombine.low %v9143_v1, %v9147_v26  ;;  %v9375_v7 = vld [vmem:[#allocation15 + $0x988] sm:$0xff] }
 0x7a0   :  { %12406 = vmatpush2.bf16.msra.mxu1 %v18096_v61  ;;  %12366 = vmatprep.subr.bf16.mxu0 %v17961_v0  ;;  %v18048_v61 = vcombine.low %v9271_v27, %v9275_v36  ;;  %v17913_v0 = vcombine.high %v9135_v51, %v9139_v38  ;;  %v9379_v18 = vld [vmem:[#allocation15 + $0x9a8] sm:$0xff] }
 0x7a1   :  { %12407 = vmatprep.subr.bf16.mxu1 %v18089_v32  ;;  %v18041_v32 = vcombine.high %v9263_v40, %v9267_v8  ;;  %v9503_v57 = vld [vmem:[#allocation15 + $0xd88] sm:$0xff] }
 0x7a2   :  { %v9371_v31 = vld [vmem:[#allocation15 + $0x968] sm:$0xff] }
 0x7a3   :  { %12367 = vmatpush2.bf16.msra.mxu0 %v17960_v49  ;;  %v17912_v49 = vcombine.low %v9135_v51, %v9139_v38  ;;  %v9495_v46 = vld [vmem:[#allocation15 + $0xd48] sm:$0xff] }
 0x7a4   :  { %12408 = vmatpush2.bf16.msra.mxu1 %v18088_v54  ;;  %12368 = vmatprep.subr.bf16.mxu0 %v17953_v55  ;;  %v18040_v54 = vcombine.low %v9263_v40, %v9267_v8  ;;  %v18161_v55 = vcombine.high %v9383_v6, %v9387_v11  ;;  %v9499_v20 = vld [vmem:[#allocation15 + $0xd68] sm:$0xff] }
 0x7a5   :  { %12409 = vmatprep.subr.bf16.mxu1 %v18081_v56  ;;  %v18289_v56 = vcombine.high %v9511_v41, %v9515_v44  ;;  %v9359_v24 = vld [vmem:[#allocation15 + $0x908] sm:$0xff] }
 0x7a6   :  { %v9363_v4 = vld [vmem:[#allocation15 + $0x928] sm:$0xff] }
 0x7a7   :  { %12369 = vmatpush2.bf16.msra.mxu0 %v17952_v63  ;;  %v9507_v63 = vld [vmem:[#allocation15 + $0xda8] sm:$0xff] }
 0x7a8   :  { %12410 = vmatpush2.bf16.msra.mxu1 %v18080_v29  ;;  %12370 = vmatprep.subr.bf16.mxu0 %v17945_v42  ;;  %v18288_v29 = vcombine.low %v9511_v41, %v9515_v44  ;;  %v18153_v42 = vcombine.high %v9375_v7, %v9379_v18  ;;  %v18281_v13 = vcombine.high %v9503_v57, %v9507_v63  ;;  %v9487_v28 = vld [vmem:[#allocation15 + $0xd08] sm:$0xff] }
 0x7a9   :  { %12411 = vmatprep.subr.bf16.mxu1 %v18073_v16  ;;  %v9367_v16 = vld [vmem:[#allocation15 + $0x948] sm:$0xff] }
 0x7aa   :  { %v9491_v12 = vld [vmem:[#allocation15 + $0xd28] sm:$0xff] }
 0x7ab   :  { %12371 = vmatpush2.bf16.msra.mxu0 %v17944_v3  ;;  %v18152_v3 = vcombine.low %v9375_v7, %v9379_v18  ;;  %v9351_v1 = vld [vmem:[#allocation15 + $0x8c8] sm:$0xff] }
 0x7ac   :  { %12412 = vmatpush2.bf16.msra.mxu1 %v18072_v22  ;;  %12372 = vmatprep.subr.bf16.mxu0 %v17937_v23  ;;  %v18280_v22 = vcombine.low %v9503_v57, %v9507_v63  ;;  %v18145_v23 = vcombine.high %v9367_v16, %v9371_v31  ;;  %v9355_v26 = vld [vmem:[#allocation15 + $0x8e8] sm:$0xff] }
 0x7ad   :  { %12413 = vmatprep.subr.bf16.mxu1 %v18065_v62  ;;  %v18273_v62 = vcombine.high %v9495_v46, %v9499_v20  ;;  %v9479_v27 = vld [vmem:[#allocation15 + $0xcc8] sm:$0xff] }
 0x7ae   :  { %v9483_v36 = vld [vmem:[#allocation15 + $0xce8] sm:$0xff] }
 0x7af   :  { %12373 = vmatpush2.bf16.msra.mxu0 %v17936_v14  ;;  %v18144_v14 = vcombine.low %v9367_v16, %v9371_v31  ;;  %v9343_v51 = vld [vmem:[#allocation15 + $0x888] sm:$0xff] }
 0x7b0   :  { %12414 = vmatpush2.bf16.msra.mxu1 %v18064_v45  ;;  %12374 = vmatprep.subr.bf16.mxu0 %v17929_v19  ;;  %v18272_v45 = vcombine.low %v9495_v46, %v9499_v20  ;;  %v18137_v19 = vcombine.high %v9359_v24, %v9363_v4  ;;  %v9347_v38 = vld [vmem:[#allocation15 + $0x8a8] sm:$0xff] }
 0x7b1   :  { %12415 = vmatprep.subr.bf16.mxu1 %v18057_v30  ;;  %v18265_v30 = vcombine.high %v9487_v28, %v9491_v12  ;;  %v9471_v40 = vld [vmem:[#allocation15 + $0xc88] sm:$0xff] }
 0x7b2   :  { %v9475_v8 = vld [vmem:[#allocation15 + $0xca8] sm:$0xff] }
 0x7b3   :  { %12375 = vmatpush2.bf16.msra.mxu0 %v17928_v2  ;;  %v18136_v2 = vcombine.low %v9359_v24, %v9363_v4  ;;  %v9335_v6 = vld [vmem:[#allocation15 + $0x848] sm:$0xff] }
 0x7b4   :  { %12416 = vmatpush2.bf16.msra.mxu1 %v18056_v34  ;;  %12376 = vmatprep.subr.bf16.mxu0 %v17921_v35  ;;  %v18264_v34 = vcombine.low %v9487_v28, %v9491_v12  ;;  %v18129_v35 = vcombine.high %v9351_v1, %v9355_v26  ;;  %v9339_v11 = vld [vmem:[#allocation15 + $0x868] sm:$0xff] }
 0x7b5   :  { %12417 = vmatprep.subr.bf16.mxu1 %v18049_v37  ;;  %v18257_v37 = vcombine.high %v9479_v27, %v9483_v36  ;;  %v9463_v41 = vld [vmem:[#allocation15 + $0xc48] sm:$0xff]  ;;  %v18112_v63 = vcombine.low %v9335_v6, %v9339_v11 }
 0x7b6   :  { %v9467_v44 = vld [vmem:[#allocation15 + $0xc68] sm:$0xff] }
 0x7b7   :  { %12377 = vmatpush2.bf16.msra.mxu0 %v17920_v59  ;;  %v18128_v59 = vcombine.low %v9351_v1, %v9355_v26  ;;  %v9327_v7 = vld [vmem:[#allocation15 + $0x808] sm:$0xff] }
 0x7b8   :  { %12418 = vmatpush2.bf16.msra.mxu1 %v18048_v61  ;;  %12378 = vmatprep.subr.bf16.mxu0 %v17913_v0  ;;  %v18256_v61 = vcombine.low %v9479_v27, %v9483_v36  ;;  %v18121_v0 = vcombine.high %v9343_v51, %v9347_v38  ;;  %v9331_v18 = vld [vmem:[#allocation15 + $0x828] sm:$0xff] }
 0x7b9   :  { %12419 = vmatprep.subr.bf16.mxu1 %v18041_v32  ;;  %v18249_v32 = vcombine.high %v9471_v40, %v9475_v8  ;;  %v9459_v57 = vld [vmem:[#allocation15 + $0xc28] sm:$0xff] }
 0x7ba   :  { %v9447_v31 = vld [vmem:[#allocation15 + $0xbc8] sm:$0xff] }
 0x7bb   :  { %12379 = vmatpush2.bf16.msra.mxu0 %v17912_v49  ;;  %v18120_v49 = vcombine.low %v9343_v51, %v9347_v38  ;;  %v9575_v46 = vld [vmem:[#allocation15 + $0xfc8] sm:$0xff] }
 0x7bc   :  { %12420 = vmatpush2.bf16.msra.mxu1 %v18040_v54  ;;  %12430 = vmatprep.subr.bf16.mxu0 %v18161_v55  ;;  %v18248_v54 = vcombine.low %v9471_v40, %v9475_v8  ;;  %v18113_v55 = vcombine.high %v9335_v6, %v9339_v11  ;;  %v9579_v20 = vld [vmem:[#allocation15 + $0xfe8] sm:$0xff] }
 0x7bd   :  { %12471 = vmatprep.subr.bf16.mxu1 %v18289_v56  ;;  %v18241_v56 = vcombine.high %v9463_v41, %v9467_v44  ;;  %v9439_v24 = vld [vmem:[#allocation15 + $0xb88] sm:$0xff] }
 0x7be   :  { %12381 = vmatmul.mubr.bf16.vlgmr.msra.gmra.mxu0 %v19806_v33  ;;  %v9443_v4 = vld [vmem:[#allocation15 + $0xba8] sm:$0xff] }
 0x7bf   :  { %12422 = vmatmul.mubr.bf16.vlgmr.msra.gmra.mxu1 %v19808_v60  ;;  %12431 = vmatpush1.bf16.msra.mxu0 %v18160_v9  ;;  %v9455_v9 = vld [vmem:[#allocation15 + $0xc08] sm:$0xff] }
 0x7c0   :  { %12462 = vmatprep.mubr.bf16.mxu0 %v19828_v39  ;;  %12472 = vmatpush1.bf16.msra.mxu1 %v18288_v29  ;;  %v18240_v29 = vcombine.low %v9463_v41, %v9467_v44  ;;  %v18233_v16 = vcombine.high %v9455_v9, %v9459_v57  ;;  %v9567_v28 = vld [vmem:[#allocation15 + $0xf88] sm:$0xff] }
 0x7c1   :  { %12503 = vmatprep.mubr.bf16.mxu1 %v19830_v52  ;;  %12432 = vmatprep.subr.bf16.mxu0 %v18153_v42  ;;  %v18105_v42 = vcombine.high %v9327_v7, %v9331_v18  ;;  %v9571_v12 = vld [vmem:[#allocation15 + $0xfa8] sm:$0xff] }
 0x7c2   :  { %12473 = vmatprep.subr.bf16.mxu1 %v18281_v13  ;;  %v9451_v13 = vld [vmem:[#allocation15 + $0xbe8] sm:$0xff] }
 0x7c3   :  { %12433 = vmatpush1.bf16.msra.mxu0 %v18152_v3  ;;  %v18104_v3 = vcombine.low %v9327_v7, %v9331_v18  ;;  %v9431_v1 = vld [vmem:[#allocation15 + $0xb48] sm:$0xff] }
 0x7c4   :  { %12474 = vmatpush1.bf16.msra.mxu1 %v18280_v22  ;;  %12434 = vmatprep.subr.bf16.mxu0 %v18145_v23  ;;  %v18232_v22 = vcombine.low %v9455_v9, %v9459_v57  ;;  %v18225_v23 = vcombine.high %v9447_v31, %v9451_v13  ;;  %v9435_v26 = vld [vmem:[#allocation15 + $0xb68] sm:$0xff] }
 0x7c5   :  { %12475 = vmatprep.subr.bf16.mxu1 %v18273_v62  ;;  %v18353_v62 = vcombine.high %v9575_v46, %v9579_v20  ;;  %v9559_v27 = vld [vmem:[#allocation15 + $0xf48] sm:$0xff] }
 0x7c6   :  { %v9563_v36 = vld [vmem:[#allocation15 + $0xf68] sm:$0xff] }
 0x7c7   :  { %12435 = vmatpush1.bf16.msra.mxu0 %v18144_v14  ;;  %v18224_v14 = vcombine.low %v9447_v31, %v9451_v13  ;;  %v9423_v51 = vld [vmem:[#allocation15 + $0xb08] sm:$0xff] }
 0x7c8   :  { %12476 = vmatpush1.bf16.msra.mxu1 %v18272_v45  ;;  %12436 = vmatprep.subr.bf16.mxu0 %v18137_v19  ;;  %v18352_v45 = vcombine.low %v9575_v46, %v9579_v20  ;;  %v18217_v19 = vcombine.high %v9439_v24, %v9443_v4  ;;  %v9427_v38 = vld [vmem:[#allocation15 + $0xb28] sm:$0xff] }
 0x7c9   :  { %12477 = vmatprep.subr.bf16.mxu1 %v18265_v30  ;;  %v18345_v30 = vcombine.high %v9567_v28, %v9571_v12  ;;  %v9551_v40 = vld [vmem:[#allocation15 + $0xf08] sm:$0xff] }
 0x7ca   :  { %v9555_v8 = vld [vmem:[#allocation15 + $0xf28] sm:$0xff] }
 0x7cb   :  { %12437 = vmatpush1.bf16.msra.mxu0 %v18136_v2  ;;  %v18216_v2 = vcombine.low %v9439_v24, %v9443_v4  ;;  %v9415_v6 = vld [vmem:[#allocation15 + $0xac8] sm:$0xff] }
 0x7cc   :  { %12478 = vmatpush1.bf16.msra.mxu1 %v18264_v34  ;;  %12438 = vmatprep.subr.bf16.mxu0 %v18129_v35  ;;  %v18344_v34 = vcombine.low %v9567_v28, %v9571_v12  ;;  %v18209_v35 = vcombine.high %v9431_v1, %v9435_v26  ;;  %v9419_v11 = vld [vmem:[#allocation15 + $0xae8] sm:$0xff] }
 0x7cd   :  { %12479 = vmatprep.subr.bf16.mxu1 %v18257_v37  ;;  %v18337_v37 = vcombine.high %v9559_v27, %v9563_v36  ;;  %v9543_v41 = vld [vmem:[#allocation15 + $0xec8] sm:$0xff] }
 0x7ce   :  { %v9547_v44 = vld [vmem:[#allocation15 + $0xee8] sm:$0xff] }
 0x7cf   :  { %12439 = vmatpush1.bf16.msra.mxu0 %v18128_v59  ;;  %v18208_v59 = vcombine.low %v9431_v1, %v9435_v26  ;;  %v9407_v7 = vld [vmem:[#allocation15 + $0xa88] sm:$0xff]  ;;  %v9128_v1 = vld [vmem:[#allocation15 + $0x1d0] sm:$0xff] }
 0x7d0   :  { %12480 = vmatpush1.bf16.msra.mxu1 %v18256_v61  ;;  %12440 = vmatprep.subr.bf16.mxu0 %v18121_v0  ;;  %v18336_v61 = vcombine.low %v9559_v27, %v9563_v36  ;;  %v18201_v0 = vcombine.high %v9423_v51, %v9427_v38  ;;  %v9411_v18 = vld [vmem:[#allocation15 + $0xaa8] sm:$0xff]  ;;  %v9132_v26 = vld [vmem:[#allocation15 + $0x1f0] sm:$0xff] }
 0x7d1   :  { %12481 = vmatprep.subr.bf16.mxu1 %v18249_v32  ;;  %v18329_v32 = vcombine.high %v9551_v40, %v9555_v8  ;;  %v9535_v9 = vld [vmem:[#allocation15 + $0xe88] sm:$0xff]  ;;  %v9256_v27 = vld [vmem:[#allocation15 + $0x5d0] sm:$0xff] }
 0x7d2   :  { %v9539_v57 = vld [vmem:[#allocation15 + $0xea8] sm:$0xff]  ;;  %v9260_v36 = vld [vmem:[#allocation15 + $0x5f0] sm:$0xff] }
 0x7d3   :  { %12441 = vmatpush1.bf16.msra.mxu0 %v18120_v49  ;;  %v18200_v49 = vcombine.low %v9423_v51, %v9427_v38  ;;  %v9399_v31 = vld [vmem:[#allocation15 + $0xa48] sm:$0xff]  ;;  %v18035_v51 = vcombine.high %v9256_v27, %v9260_v36  ;;  %v9120_v38 = vld [vmem:[#allocation15 + $0x190] sm:$0xff] }
 0x7d4   :  { %12482 = vmatpush1.bf16.msra.mxu1 %v18248_v54  ;;  %12442 = vmatprep.subr.bf16.mxu0 %v18113_v55  ;;  %v18328_v54 = vcombine.low %v9551_v40, %v9555_v8  ;;  %v18193_v55 = vcombine.high %v9415_v6, %v9419_v11  ;;  %v9403_v13 = vld [vmem:[#allocation15 + $0xa68] sm:$0xff]  ;;  %v9124_v40 = vld [vmem:[#allocation15 + $0x1b0] sm:$0xff]  ;;  %v17906_v8 = vcombine.low %v9128_v1, %v9132_v26 }
 0x7d5   :  { %12483 = vmatprep.subr.bf16.mxu1 %v18241_v56  ;;  %v18321_v56 = vcombine.high %v9543_v41, %v9547_v44  ;;  %v9527_v46 = vld [vmem:[#allocation15 + $0xe48] sm:$0xff] }
 0x7d6   :  { %v9531_v20 = vld [vmem:[#allocation15 + $0xe68] sm:$0xff] }
 0x7d7   :  { %12443 = vmatpush1.bf16.msra.mxu0 %v18112_v63  ;;  %v18192_v63 = vcombine.low %v9415_v6, %v9419_v11  ;;  %v9391_v24 = vld [vmem:[#allocation15 + $0xa08] sm:$0xff]  ;;  %v17899_v11 = vcombine.high %v9120_v38, %v9124_v40 }
 0x7d8   :  { %12484 = vmatpush1.bf16.msra.mxu1 %v18240_v29  ;;  %12444 = vmatprep.subr.bf16.mxu0 %v18105_v42  ;;  %v18320_v29 = vcombine.low %v9543_v41, %v9547_v44  ;;  %v18185_v42 = vcombine.high %v9407_v7, %v9411_v18  ;;  %v9395_v4 = vld [vmem:[#allocation15 + $0xa28] sm:$0xff]  ;;  %v9112_v41 = vld [vmem:[#allocation15 + $0x150] sm:$0xff] }
 0x7d9   :  { %12485 = vmatprep.subr.bf16.mxu1 %v18233_v16  ;;  %v18313_v16 = vcombine.high %v9535_v9, %v9539_v57  ;;  %v9519_v28 = vld [vmem:[#allocation15 + $0xe08] sm:$0xff]  ;;  %v9116_v44 = vld [vmem:[#allocation15 + $0x170] sm:$0xff] }
 0x7da   :  { %v9523_v12 = vld [vmem:[#allocation15 + $0xe28] sm:$0xff] }
 0x7db   :  { %12445 = vmatpush1.bf16.msra.mxu0 %v18104_v3  ;;  %v18184_v3 = vcombine.low %v9407_v7, %v9411_v18  ;;  %v9244_v7 = vld [vmem:[#allocation15 + $0x570] sm:$0xff] }
 0x7dc   :  { %12486 = vmatpush1.bf16.msra.mxu1 %v18232_v22  ;;  %12446 = vmatprep.subr.bf16.mxu0 %v18225_v23  ;;  %v18312_v22 = vcombine.low %v9535_v9, %v9539_v57  ;;  %v18177_v23 = vcombine.high %v9399_v31, %v9403_v13  ;;  %v17898_v9 = vcombine.low %v9120_v38, %v9124_v40  ;;  %v9092_v38 = vld [vmem:[#allocation15 + $0xb0] sm:$0xff] }
 0x7dd   :  { %12487 = vmatprep.subr.bf16.mxu1 %v18353_v62  ;;  %v18305_v62 = vcombine.high %v9527_v46, %v9531_v20  ;;  %v9216_v40 = vld [vmem:[#allocation15 + $0x490] sm:$0xff] }
 0x7df   :  { %12447 = vmatpush2.bf16.msra.mxu0 %v18224_v14  ;;  %v18176_v14 = vcombine.low %v9399_v31, %v9403_v13 }
 0x7e0   :  { %12488 = vmatpush2.bf16.msra.mxu1 %v18352_v45  ;;  %12448 = vmatprep.subr.bf16.mxu0 %v18217_v19  ;;  %v18304_v45 = vcombine.low %v9527_v46, %v9531_v20  ;;  %v18169_v19 = vcombine.high %v9391_v24, %v9395_v4  ;;  %v9104_v46 = vld [vmem:[#allocation15 + $0x110] sm:$0xff] }
 0x7e1   :  { %12489 = vmatprep.subr.bf16.mxu1 %v18345_v30  ;;  %v18297_v30 = vcombine.high %v9519_v28, %v9523_v12  ;;  %v9108_v20 = vld [vmem:[#allocation15 + $0x130] sm:$0xff] }
 0x7e3   :  { %12449 = vmatpush2.bf16.msra.mxu0 %v18216_v2  ;;  %v18168_v2 = vcombine.low %v9391_v24, %v9395_v4  ;;  %v17890_v4 = vcombine.low %v9112_v41, %v9116_v44 }
 0x7e4   :  { %12490 = vmatpush2.bf16.msra.mxu1 %v18344_v34  ;;  %12450 = vmatprep.subr.bf16.mxu0 %v18209_v35  ;;  %v18296_v34 = vcombine.low %v9519_v28, %v9523_v12  ;;  %v17907_v35 = vcombine.high %v9128_v1, %v9132_v26  ;;  %v9100_v1 = vld [vmem:[#allocation15 + $0xf0] sm:$0xff] }
 0x7e5   :  { %12491 = vmatprep.subr.bf16.mxu1 %v18337_v37  ;;  %v19852_v37 = vld [vmem:[#allocation16] sm:$0xff]  ;;  %v9224_v26 = vld [vmem:[#allocation15 + $0x4d0] sm:$0xff] }
 0x7e6   :  { %v9591_v6 = vrot.slane %v19852_v37, %v19539_v10 }
 0x7e7   :  { %12451 = vmatpush2.bf16.msra.mxu0 %v18208_v59  ;;  %v9587_v59 = vrot.slane %v19852_v37, %v19534_v5 }
 0x7e8   :  { %12492 = vmatpush2.bf16.msra.mxu1 %v18336_v61  ;;  %12452 = vmatprep.subr.bf16.mxu0 %v18201_v0  ;;  %v9248_v61 = vld [vmem:[#allocation15 + $0x590] sm:$0xff] }
 0x7e9   :  { %12493 = vmatprep.subr.bf16.mxu1 %v18329_v32  ;;  %v9252_v0 = vld [vmem:[#allocation15 + $0x5b0] sm:$0xff]  ;;  %v18034_v32 = vcombine.low %v9256_v27, %v9260_v36  ;;  %v17882_v36 = vcombine.low %v9104_v46, %v9108_v20 }
 0x7ea   :  { %v9228_v27 = vld [vmem:[#allocation15 + $0x4f0] sm:$0xff] }
 0x7eb   :  { %12453 = vmatpush2.bf16.msra.mxu0 %v18200_v49 }
 0x7ec   :  { %12494 = vmatpush2.bf16.msra.mxu1 %v18328_v54  ;;  %12454 = vmatprep.subr.bf16.mxu0 %v18193_v55  ;;  %v18027_v55 = vcombine.high %v9248_v61, %v9252_v0 }
 0x7ed   :  { %12495 = vmatprep.subr.bf16.mxu1 %v18321_v56  ;;  %v9240_v56 = vld [vmem:[#allocation15 + $0x550] sm:$0xff] }
 0x7ee   :  { %v18019_v13 = vcombine.high %v9240_v56, %v9244_v7 }
 0x7ef   :  { %12455 = vmatpush2.bf16.msra.mxu0 %v18192_v63 }
 0x7f0   :  { %12496 = vmatpush2.bf16.msra.mxu1 %v18320_v29  ;;  %12456 = vmatprep.subr.bf16.mxu0 %v18185_v42  ;;  %v18026_v29 = vcombine.low %v9248_v61, %v9252_v0  ;;  %v17891_v42 = vcombine.high %v9112_v41, %v9116_v44  ;;  %v18002_v61 = vcombine.low %v9224_v26, %v9228_v27  ;;  %v9208_v41 = vld [vmem:[#allocation15 + $0x450] sm:$0xff] }
 0x7f1   :  { %12497 = vmatprep.subr.bf16.mxu1 %v18313_v16  ;;  %v9212_v44 = vld [vmem:[#allocation15 + $0x470] sm:$0xff] }
 0x7f3   :  { %12457 = vmatpush2.bf16.msra.mxu0 %v18184_v3 }
 0x7f4   :  { %12498 = vmatpush2.bf16.msra.mxu1 %v18312_v22  ;;  %12458 = vmatprep.subr.bf16.mxu0 %v18177_v23  ;;  %v9232_v23 = vld [vmem:[#allocation15 + $0x510] sm:$0xff] }
 0x7f5   :  { %12499 = vmatprep.subr.bf16.mxu1 %v18305_v62  ;;  %v9236_v62 = vld [vmem:[#allocation15 + $0x530] sm:$0xff] }
 0x7f7   :  { %12459 = vmatpush2.bf16.msra.mxu0 %v18176_v14  ;;  %v18018_v14 = vcombine.low %v9240_v56, %v9244_v7  ;;  %v17987_v56 = vcombine.high %v9208_v41, %v9212_v44  ;;  %v9072_v7 = vld [vmem:[#allocation15 + $0x10] sm:$0xff] }
 0x7f8   :  { %12500 = vmatpush2.bf16.msra.mxu1 %v18304_v45  ;;  %12460 = vmatprep.subr.bf16.mxu0 %v18169_v19  ;;  %v17883_v45 = vcombine.high %v9104_v46, %v9108_v20  ;;  %v18011_v19 = vcombine.high %v9232_v23, %v9236_v62  ;;  %v9196_v46 = vld [vmem:[#allocation15 + $0x3f0] sm:$0xff] }
 0x7f9   :  { %12501 = vmatprep.subr.bf16.mxu1 %v18297_v30  ;;  %v9096_v30 = vld [vmem:[#allocation15 + $0xd0] sm:$0xff] }
 0x7fa   :  { %v9320_v20 = vld [vmem:[#allocation15 + $0x7d0] sm:$0xff] }
 0x7fb   :  { %12461 = vmatpush2.bf16.msra.mxu0 %v18168_v2  ;;  %v18010_v2 = vcombine.low %v9232_v23, %v9236_v62 }
 0x7fc   :  { %12502 = vmatpush2.bf16.msra.mxu1 %v18296_v34  ;;  %12512 = vmatprep.subr.bf16.mxu0 %v17907_v35  ;;  %v17875_v34 = vcombine.high %v9096_v30, %v9100_v1  ;;  %v18003_v35 = vcombine.high %v9224_v26, %v9228_v27  ;;  %v9176_v27 = vld [vmem:[#allocation15 + $0x350] sm:$0xff] }
 0x7fd   :  { %12553 = vmatprep.subr.bf16.mxu1 %v18035_v51  ;;  %v9088_v51 = vld [vmem:[#allocation15 + $0x90] sm:$0xff] }
 0x7fe   :  { %12463 = vmatmul.mubr.bf16.vlgmr.msra.gmra.mxu0 %v19840_v15  ;;  %v12218_v49 = vpop.f32.mrf.mxu0  ;;  %v12259_v54 = vpop.f32.mrf.mxu1  ;;  %v17867_v0 = vcombine.high %v9088_v51, %v9092_v38 }
 0x7ff   :  { %12504 = vmatmul.mubr.bf16.vlgmr.msra.gmra.mxu1 %v19842_v25  ;;  %v12219_v18 = vadd.f32 %v12218_v49, %v9587_v59  ;;  %12513 = vmatpush1.bf16.msra.mxu0 %v17906_v8  ;;  %v9220_v8 = vld [vmem:[#allocation15 + $0x4b0] sm:$0xff]  ;;  %v17874_v59 = vcombine.low %v9096_v30, %v9100_v1  ;;  %v17866_v49 = vcombine.low %v9088_v51, %v9092_v38 }
 0x800   :  { %12544 = vmatprep.mubr.bf16.mxu0 %v19802_v50  ;;  %12554 = vmatpush1.bf16.msra.mxu1 %v18034_v32  ;;  %v12220_v57 = vpop.f32.mrf.mxu0  ;;  %v12261_v63 = vpop.f32.mrf.mxu1  ;;  %v17995_v32 = vcombine.high %v9216_v40, %v9220_v8 }
 0x801   :  { %v19861_v16 = vadd.f32 %v12259_v54, %v12219_v18  ;;  %12585 = vmatprep.mubr.bf16.mxu1 %v19804_v21  ;;  %v12221_v31 = vadd.f32 %v12220_v57, %v9591_v6  ;;  %12514 = vmatprep.subr.bf16.mxu0 %v17899_v11  ;;  %v9080_v6 = vld [vmem:[#allocation15 + $0x50] sm:$0xff]  ;;  %v17994_v54 = vcombine.low %v9216_v40, %v9220_v8 }
 0x802   :  { %12555 = vmatprep.subr.bf16.mxu1 %v18027_v55  ;;  %v12222_v3 = vpop.f32.mrf.mxu0  ;;  %v12263_v22 = vpop.f32.mrf.mxu1  ;;  %v9084_v11 = vld [vmem:[#allocation15 + $0x70] sm:$0xff] }
 0x803   :  { %v19864_v24 = vadd.f32 %v12261_v63, %v12221_v31  ;;  %12515 = vmatpush1.bf16.msra.mxu0 %v17898_v9  ;;  %v17859_v55 = vcombine.high %v9080_v6, %v9084_v11  ;;  %v9076_v18 = vld [vmem:[#allocation15 + $0x30] sm:$0xff]  ;;  %v17858_v63 = vcombine.low %v9080_v6, %v9084_v11 }
 0x804   :  { %12556 = vmatpush1.bf16.msra.mxu1 %v18026_v29  ;;  %v12223_v28 = vpop.f32.mrf.mxu0  ;;  %v12264_v12 = vpop.f32.mrf.mxu1  ;;  %12516 = vmatprep.subr.bf16.mxu0 %v17891_v42  ;;  %v9200_v9 = vld [vmem:[#allocation15 + $0x410] sm:$0xff]  ;;  %v17986_v29 = vcombine.low %v9208_v41, %v9212_v44  ;;  %v17851_v42 = vcombine.high %v9072_v7, %v9076_v18  ;;  %v17850_v22 = vcombine.low %v9072_v7, %v9076_v18 }
 0x805   :  { %12557 = vmatprep.subr.bf16.mxu1 %v18019_v13  ;;  %v9204_v57 = vld [vmem:[#allocation15 + $0x430] sm:$0xff] }
 0x806   :  { %v17979_v31 = vcombine.high %v9200_v9, %v9204_v57  ;;  %v9192_v13 = vld [vmem:[#allocation15 + $0x3d0] sm:$0xff]  ;;  %v17978_v23 = vcombine.low %v9200_v9, %v9204_v57 }
 0x807   :  { %12517 = vmatpush1.bf16.msra.mxu0 %v17890_v4  ;;  %v9324_v3 = vld [vmem:[#allocation15 + $0x7f0] sm:$0xff]  ;;  %v17971_v62 = vcombine.high %v9192_v13, %v9196_v46 }
 0x808   :  { %12558 = vmatpush1.bf16.msra.mxu1 %v18018_v14  ;;  %12518 = vmatprep.subr.bf16.mxu0 %v17883_v45  ;;  %v18099_v4 = vcombine.high %v9320_v20, %v9324_v3  ;;  %v9184_v28 = vld [vmem:[#allocation15 + $0x390] sm:$0xff]  ;;  %v18098_v30 = vcombine.low %v9320_v20, %v9324_v3 }
 0x809   :  { %12559 = vmatprep.subr.bf16.mxu1 %v18011_v19  ;;  %v9188_v12 = vld [vmem:[#allocation15 + $0x3b0] sm:$0xff]  ;;  %v17970_v19 = vcombine.low %v9192_v13, %v9196_v46 }
 0x80a   :  { %v9312_v14 = vld [vmem:[#allocation15 + $0x790] sm:$0xff]  ;;  %v17963_v1 = vcombine.high %v9184_v28, %v9188_v12 }
 0x80b   :  { %12519 = vmatpush1.bf16.msra.mxu0 %v17882_v36  ;;  %v9316_v45 = vld [vmem:[#allocation15 + $0x7b0] sm:$0xff] }
 0x80c   :  { %12560 = vmatpush1.bf16.msra.mxu1 %v18010_v2  ;;  %12520 = vmatprep.subr.bf16.mxu0 %v17875_v34  ;;  %v18091_v26 = vcombine.high %v9312_v14, %v9316_v45  ;;  %v9180_v36 = vld [vmem:[#allocation15 + $0x370] sm:$0xff]  ;;  %v18090_v51 = vcombine.low %v9312_v14, %v9316_v45 }
 0x80d   :  { %12561 = vmatprep.subr.bf16.mxu1 %v18003_v35  ;;  %v9304_v2 = vld [vmem:[#allocation15 + $0x750] sm:$0xff]  ;;  %v17962_v35 = vcombine.low %v9184_v28, %v9188_v12  ;;  %v17955_v38 = vcombine.high %v9176_v27, %v9180_v36 }
 0x80e   :  { %v9308_v34 = vld [vmem:[#allocation15 + $0x770] sm:$0xff] }
 0x80f   :  { %12521 = vmatpush1.bf16.msra.mxu0 %v17874_v59  ;;  %v18083_v40 = vcombine.high %v9304_v2, %v9308_v34  ;;  %v9168_v8 = vld [vmem:[#allocation15 + $0x310] sm:$0xff]  ;;  %v18082_v6 = vcombine.low %v9304_v2, %v9308_v34 }
 0x810   :  { %12562 = vmatpush1.bf16.msra.mxu1 %v18002_v61  ;;  %12522 = vmatprep.subr.bf16.mxu0 %v17867_v0  ;;  %v9172_v59 = vld [vmem:[#allocation15 + $0x330] sm:$0xff] }
 0x811   :  { %12563 = vmatprep.subr.bf16.mxu1 %v17995_v32  ;;  %v9296_v61 = vld [vmem:[#allocation15 + $0x710] sm:$0xff]  ;;  %v17954_v32 = vcombine.low %v9176_v27, %v9180_v36  ;;  %v17947_v11 = vcombine.high %v9168_v8, %v9172_v59 }
 0x812   :  { %v9300_v0 = vld [vmem:[#allocation15 + $0x730] sm:$0xff] }
 0x813   :  { %12523 = vmatpush1.bf16.msra.mxu0 %v17866_v49  ;;  %v18075_v41 = vcombine.high %v9296_v61, %v9300_v0  ;;  %v9160_v44 = vld [vmem:[#allocation15 + $0x2d0] sm:$0xff]  ;;  %v18074_v7 = vcombine.low %v9296_v61, %v9300_v0 }
 0x814   :  { %12564 = vmatpush1.bf16.msra.mxu1 %v17994_v54  ;;  %12524 = vmatprep.subr.bf16.mxu0 %v17859_v55  ;;  %v9164_v49 = vld [vmem:[#allocation15 + $0x2f0] sm:$0xff] }
 0x815   :  { %12565 = vmatprep.subr.bf16.mxu1 %v17987_v56  ;;  %v9288_v54 = vld [vmem:[#allocation15 + $0x6d0] sm:$0xff]  ;;  %v17946_v56 = vcombine.low %v9168_v8, %v9172_v59  ;;  %v17939_v18 = vcombine.high %v9160_v44, %v9164_v49 }
 0x816   :  { %v9292_v55 = vld [vmem:[#allocation15 + $0x6f0] sm:$0xff] }
 0x817   :  { %12525 = vmatpush1.bf16.msra.mxu0 %v17858_v63  ;;  %v18067_v9 = vcombine.high %v9288_v54, %v9292_v55  ;;  %v9152_v57 = vld [vmem:[#allocation15 + $0x290] sm:$0xff]  ;;  %v18066_v13 = vcombine.low %v9288_v54, %v9292_v55 }
 0x818   :  { %12566 = vmatpush1.bf16.msra.mxu1 %v17986_v29  ;;  %12526 = vmatprep.subr.bf16.mxu0 %v17851_v42  ;;  %v9156_v63 = vld [vmem:[#allocation15 + $0x2b0] sm:$0xff] }
 0x819   :  { %12567 = vmatprep.subr.bf16.mxu1 %v17979_v31  ;;  %v9280_v29 = vld [vmem:[#allocation15 + $0x690] sm:$0xff]  ;;  %v17938_v31 = vcombine.low %v9160_v44, %v9164_v49  ;;  %v17931_v46 = vcombine.high %v9152_v57, %v9156_v63 }
 0x81a   :  { %v9284_v42 = vld [vmem:[#allocation15 + $0x6b0] sm:$0xff] }
 0x81b   :  { %12527 = vmatpush1.bf16.msra.mxu0 %v17850_v22  ;;  %v18059_v20 = vcombine.high %v9280_v29, %v9284_v42  ;;  %v9144_v3 = vld [vmem:[#allocation15 + $0x250] sm:$0xff]  ;;  %v18058_v28 = vcombine.low %v9280_v29, %v9284_v42 }
 0x81c   :  { %12568 = vmatpush1.bf16.msra.mxu1 %v17978_v23  ;;  %12528 = vmatprep.subr.bf16.mxu0 %v17971_v62  ;;  %v9148_v22 = vld [vmem:[#allocation15 + $0x270] sm:$0xff] }
 0x81d   :  { %12569 = vmatprep.subr.bf16.mxu1 %v18099_v4  ;;  %v9272_v23 = vld [vmem:[#allocation15 + $0x650] sm:$0xff]  ;;  %v17930_v4 = vcombine.low %v9152_v57, %v9156_v63  ;;  %v17923_v12 = vcombine.high %v9144_v3, %v9148_v22 }
 0x81e   :  { %v9276_v62 = vld [vmem:[#allocation15 + $0x670] sm:$0xff] }
 0x81f   :  { %12529 = vmatpush2.bf16.msra.mxu0 %v17970_v19  ;;  %v18051_v14 = vcombine.high %v9272_v23, %v9276_v62  ;;  %v9136_v45 = vld [vmem:[#allocation15 + $0x210] sm:$0xff]  ;;  %v18050_v27 = vcombine.low %v9272_v23, %v9276_v62 }
 0x820   :  { %12570 = vmatpush2.bf16.msra.mxu1 %v18098_v30  ;;  %12530 = vmatprep.subr.bf16.mxu0 %v17963_v1  ;;  %v9140_v19 = vld [vmem:[#allocation15 + $0x230] sm:$0xff] }
 0x821   :  { %12571 = vmatprep.subr.bf16.mxu1 %v18091_v26  ;;  %v9264_v30 = vld [vmem:[#allocation15 + $0x610] sm:$0xff]  ;;  %v17922_v26 = vcombine.low %v9144_v3, %v9148_v22  ;;  %v17915_v36 = vcombine.high %v9136_v45, %v9140_v19 }
 0x822   :  { %v9268_v1 = vld [vmem:[#allocation15 + $0x630] sm:$0xff] }
 0x823   :  { %12531 = vmatpush2.bf16.msra.mxu0 %v17962_v35  ;;  %v18043_v2 = vcombine.high %v9264_v30, %v9268_v1  ;;  %v9384_v34 = vld [vmem:[#allocation15 + $0x9d0] sm:$0xff]  ;;  %v18042_v8 = vcombine.low %v9264_v30, %v9268_v1 }
 0x824   :  { %12572 = vmatpush2.bf16.msra.mxu1 %v18090_v51  ;;  %12532 = vmatprep.subr.bf16.mxu0 %v17955_v38  ;;  %v9388_v35 = vld [vmem:[#allocation15 + $0x9f0] sm:$0xff] }
 0x825   :  { %12573 = vmatprep.subr.bf16.mxu1 %v18083_v40  ;;  %v9512_v51 = vld [vmem:[#allocation15 + $0xdd0] sm:$0xff]  ;;  %v17914_v40 = vcombine.low %v9136_v45, %v9140_v19  ;;  %v18163_v59 = vcombine.high %v9384_v34, %v9388_v35 }
 0x826   :  { %v9516_v38 = vld [vmem:[#allocation15 + $0xdf0] sm:$0xff] }
 0x827   :  { %12533 = vmatpush2.bf16.msra.mxu0 %v17954_v32  ;;  %v18291_v61 = vcombine.high %v9512_v51, %v9516_v38  ;;  %v9376_v0 = vld [vmem:[#allocation15 + $0x990] sm:$0xff]  ;;  %v18290_v44 = vcombine.low %v9512_v51, %v9516_v38 }
 0x828   :  { %12574 = vmatpush2.bf16.msra.mxu1 %v18082_v6  ;;  %12534 = vmatprep.subr.bf16.mxu0 %v17947_v11  ;;  %v9380_v32 = vld [vmem:[#allocation15 + $0x9b0] sm:$0xff]  ;;  %v18162_v6 = vcombine.low %v9384_v34, %v9388_v35 }
 0x829   :  { %12575 = vmatprep.subr.bf16.mxu1 %v18075_v41  ;;  %v9504_v11 = vld [vmem:[#allocation15 + $0xd90] sm:$0xff]  ;;  %v18155_v49 = vcombine.high %v9376_v0, %v9380_v32  ;;  %v18154_v29 = vcombine.low %v9376_v0, %v9380_v32 }
 0x82a   :  { %v9508_v41 = vld [vmem:[#allocation15 + $0xdb0] sm:$0xff] }
 0x82b   :  { %12535 = vmatpush2.bf16.msra.mxu0 %v17946_v56  ;;  %v9368_v54 = vld [vmem:[#allocation15 + $0x950] sm:$0xff] }
 0x82c   :  { %12576 = vmatpush2.bf16.msra.mxu1 %v18074_v7  ;;  %12536 = vmatprep.subr.bf16.mxu0 %v17939_v18  ;;  %v9372_v55 = vld [vmem:[#allocation15 + $0x970] sm:$0xff]  ;;  %v18283_v18 = vcombine.high %v9504_v11, %v9508_v41 }
 0x82d   :  { %12577 = vmatprep.subr.bf16.mxu1 %v18067_v9  ;;  %v9496_v9 = vld [vmem:[#allocation15 + $0xd50] sm:$0xff]  ;;  %v18146_v45 = vcombine.low %v9368_v54, %v9372_v55 }
 0x82e   :  { %v9500_v57 = vld [vmem:[#allocation15 + $0xd70] sm:$0xff] }
 0x82f   :  { %12537 = vmatpush2.bf16.msra.mxu0 %v17938_v31  ;;  %v18275_v22 = vcombine.high %v9496_v9, %v9500_v57  ;;  %v9364_v23 = vld [vmem:[#allocation15 + $0x930] sm:$0xff]  ;;  %v18274_v1 = vcombine.low %v9496_v9, %v9500_v57 }
 0x830   :  { %12578 = vmatpush2.bf16.msra.mxu1 %v18066_v13  ;;  %12538 = vmatprep.subr.bf16.mxu0 %v17931_v46  ;;  %v18282_v13 = vcombine.low %v9504_v11, %v9508_v41  ;;  %v18147_v46 = vcombine.high %v9368_v54, %v9372_v55  ;;  %v9484_v34 = vld [vmem:[#allocation15 + $0xcf0] sm:$0xff] }
 0x831   :  { %12579 = vmatprep.subr.bf16.mxu1 %v18059_v20  ;;  %v9476_v0 = vld [vmem:[#allocation15 + $0xcb0] sm:$0xff] }
 0x832   :  { %v9464_v54 = vld [vmem:[#allocation15 + $0xc50] sm:$0xff] }
 0x833   :  { %12539 = vmatpush2.bf16.msra.mxu0 %v17930_v4  ;;  %v9468_v55 = vld [vmem:[#allocation15 + $0xc70] sm:$0xff] }
 0x834   :  { %12580 = vmatpush2.bf16.msra.mxu1 %v18058_v28  ;;  %12540 = vmatprep.subr.bf16.mxu0 %v17923_v12  ;;  %v9488_v28 = vld [vmem:[#allocation15 + $0xd10] sm:$0xff]  ;;  %v18243_v9 = vcombine.high %v9464_v54, %v9468_v55 }
 0x835   :  { %12581 = vmatprep.subr.bf16.mxu1 %v18051_v14  ;;  %v9492_v12 = vld [vmem:[#allocation15 + $0xd30] sm:$0xff] }
 0x836   :  { %v18266_v51 = vcombine.low %v9488_v28, %v9492_v12  ;;  %v9328_v57 = vld [vmem:[#allocation15 + $0x810] sm:$0xff] }
 0x837   :  { %12541 = vmatpush2.bf16.msra.mxu0 %v17922_v26 }
 0x838   :  { %12582 = vmatpush2.bf16.msra.mxu1 %v18050_v27  ;;  %12542 = vmatprep.subr.bf16.mxu0 %v17915_v36  ;;  %v9352_v27 = vld [vmem:[#allocation15 + $0x8d0] sm:$0xff] }
 0x839   :  { %12583 = vmatprep.subr.bf16.mxu1 %v18043_v2  ;;  %v9356_v36 = vld [vmem:[#allocation15 + $0x8f0] sm:$0xff] }
 0x83a   :  { %v9480_v2 = vld [vmem:[#allocation15 + $0xcd0] sm:$0xff]  ;;  %v18131_v38 = vcombine.high %v9352_v27, %v9356_v36  ;;  %v18130_v32 = vcombine.low %v9352_v27, %v9356_v36 }
 0x83b   :  { %12543 = vmatpush2.bf16.msra.mxu0 %v17914_v40  ;;  %v18259_v40 = vcombine.high %v9480_v2, %v9484_v34 }
 0x83c   :  { %12584 = vmatpush2.bf16.msra.mxu1 %v18042_v8  ;;  %12594 = vmatprep.subr.bf16.mxu0 %v18163_v59  ;;  %v9344_v8 = vld [vmem:[#allocation15 + $0x890] sm:$0xff] }
 0x83d   :  { %12635 = vmatprep.subr.bf16.mxu1 %v18291_v61  ;;  %v9348_v59 = vld [vmem:[#allocation15 + $0x8b0] sm:$0xff] }
 0x83e   :  { %v12300_v56 = vpop.f32.mrf.mxu0  ;;  %v12341_v7 = vpop.f32.mrf.mxu1  ;;  %12545 = vmatmul.mubr.bf16.vlgmr.msra.gmra.mxu0 %v19806_v33  ;;  %v9472_v61 = vld [vmem:[#allocation15 + $0xc90] sm:$0xff]  ;;  %v18123_v11 = vcombine.high %v9344_v8, %v9348_v59 }
 0x83f   :  { %v12301_v63 = vadd.f32 %v12300_v56, %v19861_v16  ;;  %12586 = vmatmul.mubr.bf16.vlgmr.msra.gmra.mxu1 %v19808_v60  ;;  %12595 = vmatpush1.bf16.msra.mxu0 %v18162_v6  ;;  %v9360_v16 = vld [vmem:[#allocation15 + $0x910] sm:$0xff]  ;;  %v18258_v6 = vcombine.low %v9480_v2, %v9484_v34  ;;  %v18251_v41 = vcombine.high %v9472_v61, %v9476_v0 }
 0x840   :  { %12626 = vmatprep.mubr.bf16.mxu0 %v19828_v39  ;;  %12636 = vmatpush1.bf16.msra.mxu1 %v18290_v44  ;;  %v12302_v42 = vpop.f32.mrf.mxu0  ;;  %v12343_v31 = vpop.f32.mrf.mxu1  ;;  %v18139_v26 = vcombine.high %v9360_v16, %v9364_v23  ;;  %v18138_v35 = vcombine.low %v9360_v16, %v9364_v23  ;;  %v9336_v44 = vld [vmem:[#allocation15 + $0x850] sm:$0xff]  ;;  %v18122_v56 = vcombine.low %v9344_v8, %v9348_v59 }
 0x841   :  { %v19870_v20 = vadd.f32 %v12341_v7, %v12301_v63  ;;  %12667 = vmatprep.mubr.bf16.mxu1 %v19830_v52  ;;  %v12303_v3 = vadd.f32 %v12302_v42, %v19864_v24  ;;  %12596 = vmatprep.subr.bf16.mxu0 %v18155_v49  ;;  %v18267_v24 = vcombine.high %v9488_v28, %v9492_v12  ;;  %v9340_v49 = vld [vmem:[#allocation15 + $0x870] sm:$0xff] }
 0x842   :  { %v12304_v62 = vpop.f32.mrf.mxu0  ;;  %v12345_v4 = vpop.f32.mrf.mxu1  ;;  %12637 = vmatprep.subr.bf16.mxu1 %v18283_v18  ;;  %v18250_v7 = vcombine.low %v9472_v61, %v9476_v0  ;;  %v18115_v18 = vcombine.high %v9336_v44, %v9340_v49  ;;  %v9332_v63 = vld [vmem:[#allocation15 + $0x830] sm:$0xff] }
 0x843   :  { %v19874_v14 = vadd.f32 %v12343_v31, %v12303_v3  ;;  %12597 = vmatpush1.bf16.msra.mxu0 %v18154_v29  ;;  %v9456_v29 = vld [vmem:[#allocation15 + $0xc10] sm:$0xff]  ;;  %v18114_v31 = vcombine.low %v9336_v44, %v9340_v49  ;;  %v18106_v4 = vcombine.low %v9328_v57, %v9332_v63 }
 0x844   :  { %12638 = vmatpush1.bf16.msra.mxu1 %v18282_v13  ;;  %v12305_v19 = vpop.f32.mrf.mxu0  ;;  %v12346_v30 = vpop.f32.mrf.mxu1  ;;  %12598 = vmatprep.subr.bf16.mxu0 %v18147_v46  ;;  %v9460_v42 = vld [vmem:[#allocation15 + $0xc30] sm:$0xff]  ;;  %v18242_v13 = vcombine.low %v9464_v54, %v9468_v55  ;;  %v18107_v46 = vcombine.high %v9328_v57, %v9332_v63 }
 0x845   :  { %12639 = vmatprep.subr.bf16.mxu1 %v18275_v22  ;;  %v18235_v3 = vcombine.high %v9456_v29, %v9460_v42  ;;  %v9448_v22 = vld [vmem:[#allocation15 + $0xbd0] sm:$0xff]  ;;  %v18234_v28 = vcombine.low %v9456_v29, %v9460_v42 }
 0x846   :  { %v9452_v16 = vld [vmem:[#allocation15 + $0xbf0] sm:$0xff] }
 0x847   :  { %12599 = vmatpush1.bf16.msra.mxu0 %v18146_v45  ;;  %v9576_v23 = vld [vmem:[#allocation15 + $0xfd0] sm:$0xff]  ;;  %v18227_v12 = vcombine.high %v9448_v22, %v9452_v16 }
 0x848   :  { %12640 = vmatpush1.bf16.msra.mxu1 %v18274_v1  ;;  %12600 = vmatprep.subr.bf16.mxu0 %v18139_v26  ;;  %v9580_v62 = vld [vmem:[#allocation15 + $0xff0] sm:$0xff] }
 0x849   :  { %12641 = vmatprep.subr.bf16.mxu1 %v18267_v24  ;;  %v18355_v45 = vcombine.high %v9576_v23, %v9580_v62  ;;  %v9440_v19 = vld [vmem:[#allocation15 + $0xb90] sm:$0xff]  ;;  %v18226_v24 = vcombine.low %v9448_v22, %v9452_v16  ;;  %v18354_v27 = vcombine.low %v9576_v23, %v9580_v62 }
 0x84a   :  { %v9444_v30 = vld [vmem:[#allocation15 + $0xbb0] sm:$0xff] }
 0x84b   :  { %12601 = vmatpush1.bf16.msra.mxu0 %v18138_v35  ;;  %v9568_v1 = vld [vmem:[#allocation15 + $0xf90] sm:$0xff]  ;;  %v18219_v36 = vcombine.high %v9440_v19, %v9444_v30 }
 0x84c   :  { %12642 = vmatpush1.bf16.msra.mxu1 %v18266_v51  ;;  %12602 = vmatprep.subr.bf16.mxu0 %v18131_v38  ;;  %v9572_v26 = vld [vmem:[#allocation15 + $0xfb0] sm:$0xff] }
 0x84d   :  { %12643 = vmatprep.subr.bf16.mxu1 %v18259_v40  ;;  %v18347_v2 = vcombine.high %v9568_v1, %v9572_v26  ;;  %v9432_v34 = vld [vmem:[#allocation15 + $0xb50] sm:$0xff]  ;;  %v18218_v40 = vcombine.low %v9440_v19, %v9444_v30  ;;  %v18346_v8 = vcombine.low %v9568_v1, %v9572_v26 }
 0x84e   :  { %v9436_v35 = vld [vmem:[#allocation15 + $0xb70] sm:$0xff] }
 0x84f   :  { %12603 = vmatpush1.bf16.msra.mxu0 %v18130_v32  ;;  %v9560_v51 = vld [vmem:[#allocation15 + $0xf50] sm:$0xff]  ;;  %v18211_v59 = vcombine.high %v9432_v34, %v9436_v35 }
 0x850   :  { %12644 = vmatpush1.bf16.msra.mxu1 %v18258_v6  ;;  %12604 = vmatprep.subr.bf16.mxu0 %v18123_v11  ;;  %v9564_v38 = vld [vmem:[#allocation15 + $0xf70] sm:$0xff] }
 0x851   :  { %12645 = vmatprep.subr.bf16.mxu1 %v18251_v41  ;;  %v18339_v61 = vcombine.high %v9560_v51, %v9564_v38  ;;  %v9424_v0 = vld [vmem:[#allocation15 + $0xb10] sm:$0xff]  ;;  %v18210_v41 = vcombine.low %v9432_v34, %v9436_v35  ;;  %v18338_v44 = vcombine.low %v9560_v51, %v9564_v38  ;;  %v9129_v38 = vld [vmem:[#allocation15 + $0x1d8] sm:$0xff] }
 0x852   :  { %v9428_v32 = vld [vmem:[#allocation15 + $0xb30] sm:$0xff] }
 0x853   :  { %12605 = vmatpush1.bf16.msra.mxu0 %v18122_v56  ;;  %v9552_v6 = vld [vmem:[#allocation15 + $0xf10] sm:$0xff]  ;;  %v18203_v49 = vcombine.high %v9424_v0, %v9428_v32 }
 0x854   :  { %12646 = vmatpush1.bf16.msra.mxu1 %v18250_v7  ;;  %12606 = vmatprep.subr.bf16.mxu0 %v18115_v18  ;;  %v9556_v11 = vld [vmem:[#allocation15 + $0xf30] sm:$0xff] }
 0x855   :  { %12647 = vmatprep.subr.bf16.mxu1 %v18243_v9  ;;  %v18331_v54 = vcombine.high %v9552_v6, %v9556_v11  ;;  %v9416_v55 = vld [vmem:[#allocation15 + $0xad0] sm:$0xff]  ;;  %v18202_v9 = vcombine.low %v9424_v0, %v9428_v32  ;;  %v18330_v57 = vcombine.low %v9552_v6, %v9556_v11  ;;  %v9121_v11 = vld [vmem:[#allocation15 + $0x198] sm:$0xff] }
 0x856   :  { %v9420_v56 = vld [vmem:[#allocation15 + $0xaf0] sm:$0xff] }
 0x857   :  { %12607 = vmatpush1.bf16.msra.mxu0 %v18114_v31  ;;  %v9544_v7 = vld [vmem:[#allocation15 + $0xed0] sm:$0xff]  ;;  %v18195_v63 = vcombine.high %v9416_v55, %v9420_v56 }
 0x858   :  { %12648 = vmatpush1.bf16.msra.mxu1 %v18242_v13  ;;  %12608 = vmatprep.subr.bf16.mxu0 %v18107_v46  ;;  %v9548_v18 = vld [vmem:[#allocation15 + $0xef0] sm:$0xff] }
 0x859   :  { %12649 = vmatprep.subr.bf16.mxu1 %v18235_v3  ;;  %v18323_v29 = vcombine.high %v9544_v7, %v9548_v18  ;;  %v9408_v42 = vld [vmem:[#allocation15 + $0xa90] sm:$0xff]  ;;  %v18194_v3 = vcombine.low %v9416_v55, %v9420_v56  ;;  %v18322_v22 = vcombine.low %v9544_v7, %v9548_v18  ;;  %v9253_v55 = vld [vmem:[#allocation15 + $0x5b8] sm:$0xff]  ;;  %v9599_v7 = vrot.slane %v19852_v37, %v19567_v48 }
 0x85a   :  { %v9412_v31 = vld [vmem:[#allocation15 + $0xab0] sm:$0xff] }
 0x85b   :  { %12609 = vmatpush1.bf16.msra.mxu0 %v18106_v4  ;;  %v9536_v13 = vld [vmem:[#allocation15 + $0xe90] sm:$0xff]  ;;  %v18187_v16 = vcombine.high %v9408_v42, %v9412_v31 }
 0x85c   :  { %12650 = vmatpush1.bf16.msra.mxu1 %v18234_v28  ;;  %12610 = vmatprep.subr.bf16.mxu0 %v18227_v12  ;;  %v9540_v46 = vld [vmem:[#allocation15 + $0xeb0] sm:$0xff] }
 0x85d   :  { %12651 = vmatprep.subr.bf16.mxu1 %v18355_v45  ;;  %v18315_v23 = vcombine.high %v9536_v13, %v9540_v46  ;;  %v9400_v62 = vld [vmem:[#allocation15 + $0xa50] sm:$0xff]  ;;  %v18186_v45 = vcombine.low %v9408_v42, %v9412_v31  ;;  %v18314_v19 = vcombine.low %v9536_v13, %v9540_v46  ;;  %v9241_v42 = vld [vmem:[#allocation15 + $0x558] sm:$0xff] }
 0x85e   :  { %v9404_v4 = vld [vmem:[#allocation15 + $0xa70] sm:$0xff]  ;;  %v9245_v31 = vld [vmem:[#allocation15 + $0x578] sm:$0xff] }
 0x85f   :  { %12611 = vmatpush2.bf16.msra.mxu0 %v18226_v24  ;;  %v9528_v28 = vld [vmem:[#allocation15 + $0xe50] sm:$0xff]  ;;  %v18179_v30 = vcombine.high %v9400_v62, %v9404_v4 }
 0x860   :  { %12652 = vmatpush2.bf16.msra.mxu1 %v18354_v27  ;;  %12612 = vmatprep.subr.bf16.mxu0 %v18219_v36  ;;  %v9532_v12 = vld [vmem:[#allocation15 + $0xe70] sm:$0xff] }
 0x861   :  { %12653 = vmatprep.subr.bf16.mxu1 %v18347_v2  ;;  %v18307_v1 = vcombine.high %v9528_v28, %v9532_v12  ;;  %v9392_v26 = vld [vmem:[#allocation15 + $0xa10] sm:$0xff]  ;;  %v18178_v2 = vcombine.low %v9400_v62, %v9404_v4  ;;  %v18306_v34 = vcombine.low %v9528_v28, %v9532_v12  ;;  %v18021_v28 = vcombine.high %v9241_v42, %v9245_v31  ;;  %v9105_v12 = vld [vmem:[#allocation15 + $0x118] sm:$0xff] }
 0x862   :  { %v9396_v24 = vld [vmem:[#allocation15 + $0xa30] sm:$0xff] }
 0x863   :  { %12613 = vmatpush2.bf16.msra.mxu0 %v18218_v40  ;;  %v9520_v27 = vld [vmem:[#allocation15 + $0xe10] sm:$0xff]  ;;  %v18171_v35 = vcombine.high %v9392_v26, %v9396_v24  ;;  %v9133_v40 = vld [vmem:[#allocation15 + $0x1f8] sm:$0xff] }
 0x864   :  { %12654 = vmatpush2.bf16.msra.mxu1 %v18346_v8  ;;  %12614 = vmatprep.subr.bf16.mxu0 %v18211_v59  ;;  %v9524_v36 = vld [vmem:[#allocation15 + $0xe30] sm:$0xff]  ;;  %v9257_v8 = vld [vmem:[#allocation15 + $0x5d8] sm:$0xff]  ;;  %v17909_v32 = vcombine.high %v9129_v38, %v9133_v40 }
 0x865   :  { %12655 = vmatprep.subr.bf16.mxu1 %v18339_v61  ;;  %v18299_v51 = vcombine.high %v9520_v27, %v9524_v36  ;;  %v9261_v59 = vld [vmem:[#allocation15 + $0x5f8] sm:$0xff]  ;;  %v18170_v61 = vcombine.low %v9392_v26, %v9396_v24  ;;  %v18298_v0 = vcombine.low %v9520_v27, %v9524_v36  ;;  %v18020_v36 = vcombine.low %v9241_v42, %v9245_v31 }
 0x866   :  { %v18037_v6 = vcombine.high %v9257_v8, %v9261_v59  ;;  %v18036_v56 = vcombine.low %v9257_v8, %v9261_v59  ;;  %v9073_v31 = vld [vmem:[#allocation15 + $0x18] sm:$0xff] }
 0x867   :  { %12615 = vmatpush2.bf16.msra.mxu0 %v18210_v41  ;;  %v9125_v41 = vld [vmem:[#allocation15 + $0x1b8] sm:$0xff] }
 0x868   :  { %12656 = vmatpush2.bf16.msra.mxu1 %v18338_v44  ;;  %12616 = vmatprep.subr.bf16.mxu0 %v18203_v49  ;;  %v9595_v44 = vrot.slane %v19852_v37, %v19564_v43  ;;  %v17908_v49 = vcombine.low %v9129_v38, %v9133_v40  ;;  %v17901_v18 = vcombine.high %v9121_v11, %v9125_v41  ;;  %v9225_v38 = vld [vmem:[#allocation15 + $0x4d8] sm:$0xff] }
 0x869   :  { %12657 = vmatprep.subr.bf16.mxu1 %v18331_v54  ;;  %v9249_v54 = vld [vmem:[#allocation15 + $0x598] sm:$0xff] }
 0x86a   :  { %v18028_v37 = vcombine.low %v9249_v54, %v9253_v55  ;;  %v9229_v40 = vld [vmem:[#allocation15 + $0x4f8] sm:$0xff] }
 0x86b   :  { %12617 = vmatpush2.bf16.msra.mxu0 %v18202_v9  ;;  %v9113_v9 = vld [vmem:[#allocation15 + $0x158] sm:$0xff] }
 0x86c   :  { %12658 = vmatpush2.bf16.msra.mxu1 %v18330_v57  ;;  %12618 = vmatprep.subr.bf16.mxu0 %v18195_v63  ;;  %v9117_v57 = vld [vmem:[#allocation15 + $0x178] sm:$0xff] }
 0x86d   :  { %12659 = vmatprep.subr.bf16.mxu1 %v18323_v29  ;;  %v18029_v29 = vcombine.high %v9249_v54, %v9253_v55  ;;  %v17892_v24 = vcombine.low %v9113_v9, %v9117_v57 }
 0x86f   :  { %12619 = vmatpush2.bf16.msra.mxu0 %v18194_v3  ;;  %v17900_v3 = vcombine.low %v9121_v11, %v9125_v41  ;;  %v9217_v11 = vld [vmem:[#allocation15 + $0x498] sm:$0xff] }
 0x870   :  { %12660 = vmatpush2.bf16.msra.mxu1 %v18322_v22  ;;  %12620 = vmatprep.subr.bf16.mxu0 %v18187_v16  ;;  %v17893_v16 = vcombine.high %v9113_v9, %v9117_v57  ;;  %v9221_v41 = vld [vmem:[#allocation15 + $0x4b8] sm:$0xff] }
 0x871   :  { %12661 = vmatprep.subr.bf16.mxu1 %v18315_v23  ;;  %v17997_v55 = vcombine.high %v9217_v11, %v9221_v41  ;;  %v9213_v9 = vld [vmem:[#allocation15 + $0x478] sm:$0xff] }
 0x873   :  { %12621 = vmatpush2.bf16.msra.mxu0 %v18186_v45  ;;  %v9109_v45 = vld [vmem:[#allocation15 + $0x138] sm:$0xff] }
 0x874   :  { %12662 = vmatpush2.bf16.msra.mxu1 %v18314_v19  ;;  %12622 = vmatprep.subr.bf16.mxu0 %v18179_v30  ;;  %v9233_v30 = vld [vmem:[#allocation15 + $0x518] sm:$0xff]  ;;  %v17884_v8 = vcombine.low %v9105_v12, %v9109_v45 }
 0x875   :  { %12663 = vmatprep.subr.bf16.mxu1 %v18307_v1  ;;  %v9237_v1 = vld [vmem:[#allocation15 + $0x538] sm:$0xff] }
 0x876   :  { %v18012_v59 = vcombine.low %v9233_v30, %v9237_v1 }
 0x877   :  { %12623 = vmatpush2.bf16.msra.mxu0 %v18178_v2 }
 0x878   :  { %12664 = vmatpush2.bf16.msra.mxu1 %v18306_v34  ;;  %12624 = vmatprep.subr.bf16.mxu0 %v18171_v35  ;;  %v18013_v34 = vcombine.high %v9233_v30, %v9237_v1  ;;  %v9097_v35 = vld [vmem:[#allocation15 + $0xd8] sm:$0xff] }
 0x879   :  { %12665 = vmatprep.subr.bf16.mxu1 %v18299_v51  ;;  %v9101_v51 = vld [vmem:[#allocation15 + $0xf8] sm:$0xff] }
 0x87b   :  { %12625 = vmatpush2.bf16.msra.mxu0 %v18170_v61  ;;  %v17877_v61 = vcombine.high %v9097_v35, %v9101_v51 }
 0x87c   :  { %12666 = vmatpush2.bf16.msra.mxu1 %v18298_v0  ;;  %12676 = vmatprep.subr.bf16.mxu0 %v17909_v32  ;;  %v18005_v0 = vcombine.high %v9225_v38, %v9229_v40  ;;  %v9089_v32 = vld [vmem:[#allocation15 + $0x98] sm:$0xff] }
 0x87d   :  { %12717 = vmatprep.subr.bf16.mxu1 %v18037_v6  ;;  %v9093_v6 = vld [vmem:[#allocation15 + $0xb8] sm:$0xff] }
 0x87e   :  { %v12382_v63 = vpop.f32.mrf.mxu0  ;;  %12627 = vmatmul.mubr.bf16.vlgmr.msra.gmra.mxu0 %v19840_v15  ;;  %v17869_v54 = vcombine.high %v9089_v32, %v9093_v6  ;;  %v17868_v57 = vcombine.low %v9089_v32, %v9093_v6 }
 0x87f   :  { %v12383_v13 = vadd.f32 %v12382_v63, %v9595_v44  ;;  %v12423_v46 = vpop.f32.mrf.mxu1  ;;  %12668 = vmatmul.mubr.bf16.vlgmr.msra.gmra.mxu1 %v19842_v25  ;;  %12677 = vmatpush1.bf16.msra.mxu0 %v17908_v49  ;;  %v17876_v44 = vcombine.low %v9097_v35, %v9101_v51  ;;  %v18004_v49 = vcombine.low %v9225_v38, %v9229_v40  ;;  %v9177_v38 = vld [vmem:[#allocation15 + $0x358] sm:$0xff] }
 0x880   :  { %12708 = vmatprep.mubr.bf16.mxu0 %v19802_v50  ;;  %12718 = vmatpush1.bf16.msra.mxu1 %v18036_v56  ;;  %v12384_v22 = vpop.f32.mrf.mxu0  ;;  %v9081_v56 = vld [vmem:[#allocation15 + $0x58] sm:$0xff]  ;;  %v17996_v63 = vcombine.low %v9217_v11, %v9221_v41 }
 0x881   :  { %v19883_v23 = vadd.f32 %v12423_v46, %v12383_v13  ;;  %12749 = vmatprep.mubr.bf16.mxu1 %v19804_v21  ;;  %v12385_v62 = vadd.f32 %v12384_v22, %v9599_v7  ;;  %v12425_v4 = vpop.f32.mrf.mxu1  ;;  %12678 = vmatprep.subr.bf16.mxu0 %v17901_v18  ;;  %v17885_v21 = vcombine.high %v9105_v12, %v9109_v45  ;;  %v9085_v7 = vld [vmem:[#allocation15 + $0x78] sm:$0xff] }
 0x882   :  { %v12386_v19 = vpop.f32.mrf.mxu0  ;;  %12719 = vmatprep.subr.bf16.mxu1 %v18029_v29  ;;  %v9209_v18 = vld [vmem:[#allocation15 + $0x458] sm:$0xff]  ;;  %v17861_v29 = vcombine.high %v9081_v56, %v9085_v7  ;;  %v17860_v22 = vcombine.low %v9081_v56, %v9085_v7 }
 0x883   :  { %v19886_v26 = vadd.f32 %v12425_v4, %v12385_v62  ;;  %v12427_v50 = vpop.f32.mrf.mxu1  ;;  %12679 = vmatpush1.bf16.msra.mxu0 %v17900_v3  ;;  %v17989_v42 = vcombine.high %v9209_v18, %v9213_v9  ;;  %v9077_v13 = vld [vmem:[#allocation15 + $0x38] sm:$0xff] }
 0x884   :  { %12720 = vmatpush1.bf16.msra.mxu1 %v18028_v37  ;;  %v12387_v27 = vpop.f32.mrf.mxu0  ;;  %12680 = vmatprep.subr.bf16.mxu0 %v17893_v16  ;;  %v9201_v46 = vld [vmem:[#allocation15 + $0x418] sm:$0xff]  ;;  %v17988_v37 = vcombine.low %v9209_v18, %v9213_v9  ;;  %v17853_v16 = vcombine.high %v9073_v31, %v9077_v13  ;;  %v17852_v19 = vcombine.low %v9073_v31, %v9077_v13 }
 0x885   :  { %v12428_v2 = vpop.f32.mrf.mxu1  ;;  %12721 = vmatprep.subr.bf16.mxu1 %v18021_v28  ;;  %v9205_v3 = vld [vmem:[#allocation15 + $0x438] sm:$0xff] }
 0x886   :  { %v17981_v62 = vcombine.high %v9201_v46, %v9205_v3  ;;  %v9193_v4 = vld [vmem:[#allocation15 + $0x3d8] sm:$0xff]  ;;  %v17980_v30 = vcombine.low %v9201_v46, %v9205_v3 }
 0x887   :  { %12681 = vmatpush1.bf16.msra.mxu0 %v17892_v24  ;;  %v9197_v28 = vld [vmem:[#allocation15 + $0x3f8] sm:$0xff] }
 0x888   :  { %12722 = vmatpush1.bf16.msra.mxu1 %v18020_v36  ;;  %12682 = vmatprep.subr.bf16.mxu0 %v17885_v21  ;;  %v9321_v12 = vld [vmem:[#allocation15 + $0x7d8] sm:$0xff]  ;;  %v17973_v1 = vcombine.high %v9193_v4, %v9197_v28  ;;  %v17972_v2 = vcombine.low %v9193_v4, %v9197_v28 }
 0x889   :  { %12723 = vmatprep.subr.bf16.mxu1 %v18013_v34  ;;  %v9325_v45 = vld [vmem:[#allocation15 + $0x7f8] sm:$0xff] }
 0x88a   :  { %v18101_v50 = vcombine.high %v9321_v12, %v9325_v45  ;;  %v9185_v24 = vld [vmem:[#allocation15 + $0x398] sm:$0xff]  ;;  %v18100_v34 = vcombine.low %v9321_v12, %v9325_v45 }
 0x88b   :  { %12683 = vmatpush1.bf16.msra.mxu0 %v17884_v8  ;;  %v9189_v27 = vld [vmem:[#allocation15 + $0x3b8] sm:$0xff] }
 0x88c   :  { %12724 = vmatpush1.bf16.msra.mxu1 %v18012_v59  ;;  %12684 = vmatprep.subr.bf16.mxu0 %v17877_v61  ;;  %v9313_v36 = vld [vmem:[#allocation15 + $0x798] sm:$0xff]  ;;  %v17965_v35 = vcombine.high %v9185_v24, %v9189_v27  ;;  %v17964_v61 = vcombine.low %v9185_v24, %v9189_v27 }
 0x88d   :  { %12725 = vmatprep.subr.bf16.mxu1 %v18005_v0  ;;  %v9317_v21 = vld [vmem:[#allocation15 + $0x7b8] sm:$0xff] }
 0x88e   :  { %v18093_v51 = vcombine.high %v9313_v36, %v9317_v21  ;;  %v9181_v40 = vld [vmem:[#allocation15 + $0x378] sm:$0xff]  ;;  %v18092_v0 = vcombine.low %v9313_v36, %v9317_v21 }
 0x88f   :  { %12685 = vmatpush1.bf16.msra.mxu0 %v17876_v44  ;;  %v9305_v8 = vld [vmem:[#allocation15 + $0x758] sm:$0xff]  ;;  %v17957_v32 = vcombine.high %v9177_v38, %v9181_v40 }
 0x890   :  { %12726 = vmatpush1.bf16.msra.mxu1 %v18004_v49  ;;  %12686 = vmatprep.subr.bf16.mxu0 %v17869_v54  ;;  %v9309_v59 = vld [vmem:[#allocation15 + $0x778] sm:$0xff]  ;;  %v17956_v54 = vcombine.low %v9177_v38, %v9181_v40 }
 0x891   :  { %12727 = vmatprep.subr.bf16.mxu1 %v17997_v55  ;;  %v18085_v6 = vcombine.high %v9305_v8, %v9309_v59  ;;  %v9169_v11 = vld [vmem:[#allocation15 + $0x318] sm:$0xff]  ;;  %v18084_v55 = vcombine.low %v9305_v8, %v9309_v59 }
 0x892   :  { %v9173_v41 = vld [vmem:[#allocation15 + $0x338] sm:$0xff] }
 0x893   :  { %12687 = vmatpush1.bf16.msra.mxu0 %v17868_v57  ;;  %v9297_v44 = vld [vmem:[#allocation15 + $0x718] sm:$0xff]  ;;  %v17949_v56 = vcombine.high %v9169_v11, %v9173_v41 }
 0x894   :  { %12728 = vmatpush1.bf16.msra.mxu1 %v17996_v63  ;;  %12688 = vmatprep.subr.bf16.mxu0 %v17861_v29  ;;  %v9301_v49 = vld [vmem:[#allocation15 + $0x738] sm:$0xff]  ;;  %v17948_v29 = vcombine.low %v9169_v11, %v9173_v41 }
 0x895   :  { %12729 = vmatprep.subr.bf16.mxu1 %v17989_v42  ;;  %v18077_v7 = vcombine.high %v9297_v44, %v9301_v49  ;;  %v9161_v18 = vld [vmem:[#allocation15 + $0x2d8] sm:$0xff]  ;;  %v18076_v42 = vcombine.low %v9297_v44, %v9301_v49 }
 0x896   :  { %v9165_v9 = vld [vmem:[#allocation15 + $0x2f8] sm:$0xff] }
 0x897   :  { %12689 = vmatpush1.bf16.msra.mxu0 %v17860_v22  ;;  %v9289_v57 = vld [vmem:[#allocation15 + $0x6d8] sm:$0xff]  ;;  %v17941_v31 = vcombine.high %v9161_v18, %v9165_v9 }
 0x898   :  { %12730 = vmatpush1.bf16.msra.mxu1 %v17988_v37  ;;  %12690 = vmatprep.subr.bf16.mxu0 %v17853_v16  ;;  %v9293_v63 = vld [vmem:[#allocation15 + $0x6f8] sm:$0xff]  ;;  %v17940_v16 = vcombine.low %v9161_v18, %v9165_v9 }
 0x899   :  { %12731 = vmatprep.subr.bf16.mxu1 %v17981_v62  ;;  %v18069_v13 = vcombine.high %v9289_v57, %v9293_v63  ;;  %v9153_v46 = vld [vmem:[#allocation15 + $0x298] sm:$0xff]  ;;  %v18068_v62 = vcombine.low %v9289_v57, %v9293_v63 }
 0x89a   :  { %v9157_v3 = vld [vmem:[#allocation15 + $0x2b8] sm:$0xff] }
 0x89b   :  { %12691 = vmatpush1.bf16.msra.mxu0 %v17852_v19  ;;  %v9281_v22 = vld [vmem:[#allocation15 + $0x698] sm:$0xff]  ;;  %v17933_v4 = vcombine.high %v9153_v46, %v9157_v3 }
 0x89c   :  { %12732 = vmatpush1.bf16.msra.mxu1 %v17980_v30  ;;  %12692 = vmatprep.subr.bf16.mxu0 %v17973_v1  ;;  %v9285_v37 = vld [vmem:[#allocation15 + $0x6b8] sm:$0xff]  ;;  %v17932_v1 = vcombine.low %v9153_v46, %v9157_v3 }
 0x89d   :  { %12733 = vmatprep.subr.bf16.mxu1 %v18101_v50  ;;  %v18061_v28 = vcombine.high %v9281_v22, %v9285_v37  ;;  %v9145_v12 = vld [vmem:[#allocation15 + $0x258] sm:$0xff]  ;;  %v18060_v50 = vcombine.low %v9281_v22, %v9285_v37 }
 0x89e   :  { %v9149_v45 = vld [vmem:[#allocation15 + $0x278] sm:$0xff] }
 0x89f   :  { %12693 = vmatpush2.bf16.msra.mxu0 %v17972_v2  ;;  %v9273_v19 = vld [vmem:[#allocation15 + $0x658] sm:$0xff]  ;;  %v17925_v24 = vcombine.high %v9145_v12, %v9149_v45 }
 0x8a0   :  { %12734 = vmatpush2.bf16.msra.mxu1 %v18100_v34  ;;  %12694 = vmatprep.subr.bf16.mxu0 %v17965_v35  ;;  %v9277_v30 = vld [vmem:[#allocation15 + $0x678] sm:$0xff]  ;;  %v17924_v35 = vcombine.low %v9145_v12, %v9149_v45 }
 0x8a1   :  { %12735 = vmatprep.subr.bf16.mxu1 %v18093_v51  ;;  %v18053_v27 = vcombine.high %v9273_v19, %v9277_v30  ;;  %v9137_v36 = vld [vmem:[#allocation15 + $0x218] sm:$0xff]  ;;  %v18052_v51 = vcombine.low %v9273_v19, %v9277_v30 }
 0x8a2   :  { %v9141_v21 = vld [vmem:[#allocation15 + $0x238] sm:$0xff] }
 0x8a3   :  { %12695 = vmatpush2.bf16.msra.mxu0 %v17964_v61  ;;  %v9265_v2 = vld [vmem:[#allocation15 + $0x618] sm:$0xff]  ;;  %v17917_v38 = vcombine.high %v9137_v36, %v9141_v21 }
 0x8a4   :  { %12736 = vmatpush2.bf16.msra.mxu1 %v18092_v0  ;;  %12696 = vmatprep.subr.bf16.mxu0 %v17957_v32  ;;  %v9269_v34 = vld [vmem:[#allocation15 + $0x638] sm:$0xff]  ;;  %v17916_v32 = vcombine.low %v9137_v36, %v9141_v21 }
 0x8a5   :  { %12737 = vmatprep.subr.bf16.mxu1 %v18085_v6  ;;  %v18045_v40 = vcombine.high %v9265_v2, %v9269_v34  ;;  %v9385_v8 = vld [vmem:[#allocation15 + $0x9d8] sm:$0xff]  ;;  %v18044_v6 = vcombine.low %v9265_v2, %v9269_v34 }
 0x8a6   :  { %v9389_v59 = vld [vmem:[#allocation15 + $0x9f8] sm:$0xff] }
 0x8a7   :  { %12697 = vmatpush2.bf16.msra.mxu0 %v17956_v54  ;;  %v9513_v61 = vld [vmem:[#allocation15 + $0xdd8] sm:$0xff]  ;;  %v18165_v11 = vcombine.high %v9385_v8, %v9389_v59  ;;  %v18164_v54 = vcombine.low %v9385_v8, %v9389_v59 }
 0x8a8   :  { %12738 = vmatpush2.bf16.msra.mxu1 %v18084_v55  ;;  %12698 = vmatprep.subr.bf16.mxu0 %v17949_v56  ;;  %v9517_v0 = vld [vmem:[#allocation15 + $0xdf8] sm:$0xff] }
 0x8a9   :  { %12739 = vmatprep.subr.bf16.mxu1 %v18077_v7  ;;  %v18293_v41 = vcombine.high %v9513_v61, %v9517_v0  ;;  %v9377_v44 = vld [vmem:[#allocation15 + $0x998] sm:$0xff]  ;;  %v18292_v7 = vcombine.low %v9513_v61, %v9517_v0 }
 0x8aa   :  { %v9381_v49 = vld [vmem:[#allocation15 + $0x9b8] sm:$0xff] }
 0x8ab   :  { %12699 = vmatpush2.bf16.msra.mxu0 %v17948_v29  ;;  %v9505_v55 = vld [vmem:[#allocation15 + $0xd98] sm:$0xff]  ;;  %v18157_v18 = vcombine.high %v9377_v44, %v9381_v49  ;;  %v18156_v3 = vcombine.low %v9377_v44, %v9381_v49 }
 0x8ac   :  { %12740 = vmatpush2.bf16.msra.mxu1 %v18076_v42  ;;  %12700 = vmatprep.subr.bf16.mxu0 %v17941_v31  ;;  %v9509_v56 = vld [vmem:[#allocation15 + $0xdb8] sm:$0xff] }
 0x8ad   :  { %12741 = vmatprep.subr.bf16.mxu1 %v18069_v13  ;;  %v9369_v9 = vld [vmem:[#allocation15 + $0x958] sm:$0xff]  ;;  %v18285_v29 = vcombine.high %v9505_v55, %v9509_v56  ;;  %v18284_v37 = vcombine.low %v9505_v55, %v9509_v56 }
 0x8ae   :  { %v9373_v57 = vld [vmem:[#allocation15 + $0x978] sm:$0xff] }
 0x8af   :  { %12701 = vmatpush2.bf16.msra.mxu0 %v17940_v16  ;;  %v9497_v42 = vld [vmem:[#allocation15 + $0xd58] sm:$0xff]  ;;  %v18149_v16 = vcombine.high %v9369_v9, %v9373_v57  ;;  %v18148_v19 = vcombine.low %v9369_v9, %v9373_v57 }
 0x8b0   :  { %12742 = vmatpush2.bf16.msra.mxu1 %v18068_v62  ;;  %12702 = vmatprep.subr.bf16.mxu0 %v17933_v4  ;;  %v9501_v31 = vld [vmem:[#allocation15 + $0xd78] sm:$0xff] }
 0x8b1   :  { %12743 = vmatprep.subr.bf16.mxu1 %v18061_v28  ;;  %v9361_v4 = vld [vmem:[#allocation15 + $0x918] sm:$0xff] }
 0x8b2   :  { %v9365_v28 = vld [vmem:[#allocation15 + $0x938] sm:$0xff] }
 0x8b3   :  { %12703 = vmatpush2.bf16.msra.mxu0 %v17932_v1  ;;  %v9489_v12 = vld [vmem:[#allocation15 + $0xd18] sm:$0xff]  ;;  %v18276_v1 = vcombine.low %v9497_v42, %v9501_v31  ;;  %v18140_v34 = vcombine.low %v9361_v4, %v9365_v28 }
 0x8b4   :  { %12744 = vmatpush2.bf16.msra.mxu1 %v18060_v50  ;;  %12704 = vmatprep.subr.bf16.mxu0 %v17925_v24  ;;  %v9493_v45 = vld [vmem:[#allocation15 + $0xd38] sm:$0xff]  ;;  %v18141_v50 = vcombine.high %v9361_v4, %v9365_v28 }
 0x8b5   :  { %12745 = vmatprep.subr.bf16.mxu1 %v18053_v27  ;;  %v9353_v27 = vld [vmem:[#allocation15 + $0x8d8] sm:$0xff] }
 0x8b6   :  { %v9357_v36 = vld [vmem:[#allocation15 + $0x8f8] sm:$0xff] }
 0x8b7   :  { %12705 = vmatpush2.bf16.msra.mxu0 %v17924_v35  ;;  %v9481_v21 = vld [vmem:[#allocation15 + $0xcd8] sm:$0xff]  ;;  %v18268_v35 = vcombine.low %v9489_v12, %v9493_v45  ;;  %v18132_v0 = vcombine.low %v9353_v27, %v9357_v36 }
 0x8b8   :  { %12746 = vmatpush2.bf16.msra.mxu1 %v18052_v51  ;;  %12706 = vmatprep.subr.bf16.mxu0 %v17917_v38  ;;  %v9485_v2 = vld [vmem:[#allocation15 + $0xcf8] sm:$0xff]  ;;  %v18133_v51 = vcombine.high %v9353_v27, %v9357_v36 }
 0x8b9   :  { %12747 = vmatprep.subr.bf16.mxu1 %v18045_v40  ;;  %v18261_v38 = vcombine.high %v9481_v21, %v9485_v2  ;;  %v9345_v40 = vld [vmem:[#allocation15 + $0x898] sm:$0xff] }
 0x8ba   :  { %v9349_v8 = vld [vmem:[#allocation15 + $0x8b8] sm:$0xff] }
 0x8bb   :  { %12707 = vmatpush2.bf16.msra.mxu0 %v17916_v32  ;;  %v9473_v59 = vld [vmem:[#allocation15 + $0xc98] sm:$0xff]  ;;  %v18260_v32 = vcombine.low %v9481_v21, %v9485_v2  ;;  %v18124_v55 = vcombine.low %v9345_v40, %v9349_v8 }
 0x8bc   :  { %12748 = vmatpush2.bf16.msra.mxu1 %v18044_v6  ;;  %12758 = vmatprep.subr.bf16.mxu0 %v18165_v11  ;;  %v9477_v61 = vld [vmem:[#allocation15 + $0xcb8] sm:$0xff]  ;;  %v18125_v6 = vcombine.high %v9345_v40, %v9349_v8 }
 0x8bd   :  { %12799 = vmatprep.subr.bf16.mxu1 %v18293_v41  ;;  %v18253_v11 = vcombine.high %v9473_v59, %v9477_v61  ;;  %v9337_v41 = vld [vmem:[#allocation15 + $0x858] sm:$0xff]  ;;  %v18252_v56 = vcombine.low %v9473_v59, %v9477_v61 }
 0x8be   :  { %v12464_v63 = vpop.f32.mrf.mxu0  ;;  %12709 = vmatmul.mubr.bf16.vlgmr.msra.gmra.mxu0 %v19806_v33  ;;  %v9341_v44 = vld [vmem:[#allocation15 + $0x878] sm:$0xff] }
 0x8bf   :  { %v12465_v13 = vadd.f32 %v12464_v63, %v19883_v23  ;;  %v12505_v46 = vpop.f32.mrf.mxu1  ;;  %12750 = vmatmul.mubr.bf16.vlgmr.msra.gmra.mxu1 %v19808_v60  ;;  %12759 = vmatpush1.bf16.msra.mxu0 %v18164_v54  ;;  %v18277_v23 = vcombine.high %v9497_v42, %v9501_v31  ;;  %v9465_v49 = vld [vmem:[#allocation15 + $0xc58] sm:$0xff]  ;;  %v18116_v42 = vcombine.low %v9337_v41, %v9341_v44 }
 0x8c0   :  { %12790 = vmatprep.mubr.bf16.mxu0 %v19828_v39  ;;  %12800 = vmatpush1.bf16.msra.mxu1 %v18292_v7  ;;  %v19892_v22 = vpop.f32.mrf.mxu0  ;;  %v9469_v54 = vld [vmem:[#allocation15 + $0xc78] sm:$0xff]  ;;  %v18117_v7 = vcombine.high %v9337_v41, %v9341_v44 }
 0x8c1   :  { %v19894_v62 = vadd.f32 %v12505_v46, %v12465_v13  ;;  %12831 = vmatprep.mubr.bf16.mxu1 %v19830_v52  ;;  %v19897_v33 = vpop.f32.mrf.mxu1  ;;  %12760 = vmatprep.subr.bf16.mxu0 %v18157_v18  ;;  %v18269_v52 = vcombine.high %v9489_v12, %v9493_v45  ;;  %v18245_v18 = vcombine.high %v9465_v49, %v9469_v54  ;;  %v9329_v9 = vld [vmem:[#allocation15 + $0x818] sm:$0xff] }
 0x8c2   :  { %v12468_v60 = vpop.f32.mrf.mxu0  ;;  %12801 = vmatprep.subr.bf16.mxu1 %v18285_v29  ;;  %v9333_v57 = vld [vmem:[#allocation15 + $0x838] sm:$0xff]  ;;  %v18244_v31 = vcombine.low %v9465_v49, %v9469_v54 }
 0x8c3   :  { %v12509_v39 = vpop.f32.mrf.mxu1  ;;  %12761 = vmatpush1.bf16.msra.mxu0 %v18156_v3  ;;  %v9457_v63 = vld [vmem:[#allocation15 + $0xc18] sm:$0xff]  ;;  %v18109_v13 = vcombine.high %v9329_v9, %v9333_v57  ;;  %v18108_v4 = vcombine.low %v9329_v9, %v9333_v57 }
 0x8c4   :  { %12802 = vmatpush1.bf16.msra.mxu1 %v18284_v37  ;;  %v12469_v30 = vpop.f32.mrf.mxu0  ;;  %12762 = vmatprep.subr.bf16.mxu0 %v18149_v16  ;;  %v9461_v29 = vld [vmem:[#allocation15 + $0xc38] sm:$0xff] }
 0x8c5   :  { %v12510_v24 = vpop.f32.mrf.mxu1  ;;  %12803 = vmatprep.subr.bf16.mxu1 %v18277_v23  ;;  %v18237_v46 = vcombine.high %v9457_v63, %v9461_v29  ;;  %v9449_v3 = vld [vmem:[#allocation15 + $0xbd8] sm:$0xff]  ;;  %v18236_v28 = vcombine.low %v9457_v63, %v9461_v29 }
 0x8c6   :  { %v9453_v37 = vld [vmem:[#allocation15 + $0xbf8] sm:$0xff] }
 0x8c7   :  { %12763 = vmatpush1.bf16.msra.mxu0 %v18148_v19  ;;  %v9577_v16 = vld [vmem:[#allocation15 + $0xfd8] sm:$0xff]  ;;  %v18229_v60 = vcombine.high %v9449_v3, %v9453_v37 }
 0x8c8   :  { %12804 = vmatpush1.bf16.msra.mxu1 %v18276_v1  ;;  %12764 = vmatprep.subr.bf16.mxu0 %v18141_v50  ;;  %v9581_v23 = vld [vmem:[#allocation15 + $0xff8] sm:$0xff]  ;;  %v18228_v1 = vcombine.low %v9449_v3, %v9453_v37 }
 0x8c9   :  { %12805 = vmatprep.subr.bf16.mxu1 %v18269_v52  ;;  %v18357_v12 = vcombine.high %v9577_v16, %v9581_v23  ;;  %v9441_v45 = vld [vmem:[#allocation15 + $0xb98] sm:$0xff]  ;;  %v18356_v50 = vcombine.low %v9577_v16, %v9581_v23 }
 0x8ca   :  { %v9445_v39 = vld [vmem:[#allocation15 + $0xbb8] sm:$0xff] }
 0x8cb   :  { %12765 = vmatpush1.bf16.msra.mxu0 %v18140_v34  ;;  %v9569_v19 = vld [vmem:[#allocation15 + $0xf98] sm:$0xff]  ;;  %v18221_v24 = vcombine.high %v9441_v45, %v9445_v39  ;;  %v18220_v34 = vcombine.low %v9441_v45, %v9445_v39 }
 0x8cc   :  { %12806 = vmatpush1.bf16.msra.mxu1 %v18268_v35  ;;  %12766 = vmatprep.subr.bf16.mxu0 %v18133_v51  ;;  %v9573_v30 = vld [vmem:[#allocation15 + $0xfb8] sm:$0xff] }
 0x8cd   :  { %12807 = vmatprep.subr.bf16.mxu1 %v18261_v38  ;;  %v18349_v52 = vcombine.high %v9569_v19, %v9573_v30  ;;  %v9433_v27 = vld [vmem:[#allocation15 + $0xb58] sm:$0xff]  ;;  %v18348_v35 = vcombine.low %v9569_v19, %v9573_v30 }
 0x8ce   :  { %v9437_v36 = vld [vmem:[#allocation15 + $0xb78] sm:$0xff] }
 0x8cf   :  { %12767 = vmatpush1.bf16.msra.mxu0 %v18132_v0  ;;  %v9561_v21 = vld [vmem:[#allocation15 + $0xf58] sm:$0xff]  ;;  %v18213_v51 = vcombine.high %v9433_v27, %v9437_v36  ;;  %v18212_v0 = vcombine.low %v9433_v27, %v9437_v36  ;;  %v12912_v36 = vld [vmem:[#allocation18 + $0x1c0] sm:$0xff] }
 0x8d0   :  { %12808 = vmatpush1.bf16.msra.mxu1 %v18260_v32  ;;  %12768 = vmatprep.subr.bf16.mxu0 %v18125_v6  ;;  %v9565_v2 = vld [vmem:[#allocation15 + $0xf78] sm:$0xff] }
 0x8d1   :  { %12809 = vmatprep.subr.bf16.mxu1 %v18253_v11  ;;  %v18341_v38 = vcombine.high %v9561_v21, %v9565_v2  ;;  %v9425_v40 = vld [vmem:[#allocation15 + $0xb18] sm:$0xff]  ;;  %v18340_v32 = vcombine.low %v9561_v21, %v9565_v2  ;;  %v12916_v21 = vld [vmem:[#allocation18 + $0x1e0] sm:$0xff] }
 0x8d2   :  { %v9429_v8 = vld [vmem:[#allocation15 + $0xb38] sm:$0xff]  ;;  %v13040_v2 = vld [vmem:[#allocation18 + $0x5c0] sm:$0xff] }
 0x8d3   :  { %12769 = vmatpush1.bf16.msra.mxu0 %v18124_v55  ;;  %v9553_v59 = vld [vmem:[#allocation15 + $0xf18] sm:$0xff]  ;;  %v18205_v6 = vcombine.high %v9425_v40, %v9429_v8  ;;  %v18204_v55 = vcombine.low %v9425_v40, %v9429_v8  ;;  %v12841_v40 = vmax.f32 %v19874_v14, 0.0  ;;  %v12904_v8 = vld [vmem:[#allocation18 + $0x180] sm:$0xff] }
 0x8d4   :  { %12810 = vmatpush1.bf16.msra.mxu1 %v18252_v56  ;;  %12770 = vmatprep.subr.bf16.mxu0 %v18117_v7  ;;  %v9557_v61 = vld [vmem:[#allocation15 + $0xf38] sm:$0xff] }
 0x8d5   :  { %12811 = vmatprep.subr.bf16.mxu1 %v18245_v18  ;;  %v18333_v11 = vcombine.high %v9553_v59, %v9557_v61  ;;  %v9417_v41 = vld [vmem:[#allocation15 + $0xad8] sm:$0xff]  ;;  %v18332_v56 = vcombine.low %v9553_v59, %v9557_v61  ;;  %v12908_v59 = vld [vmem:[#allocation18 + $0x1a0] sm:$0xff]  ;;  %v19907_v14 = vpack.c.bf16 %v12841_v40, %v12841_v40 }
 0x8d6   :  { %v9421_v44 = vld [vmem:[#allocation15 + $0xaf8] sm:$0xff] }
 0x8d7   :  { %12771 = vmatpush1.bf16.msra.mxu0 %v18116_v42  ;;  %v9545_v49 = vld [vmem:[#allocation15 + $0xed8] sm:$0xff]  ;;  %v18197_v7 = vcombine.high %v9417_v41, %v9421_v44  ;;  %v18196_v42 = vcombine.low %v9417_v41, %v9421_v44  ;;  %v18407_v44 = vcombine.high %v12904_v8, %v12908_v59 }
 0x8d8   :  { %12812 = vmatpush1.bf16.msra.mxu1 %v18244_v31  ;;  %12772 = vmatprep.subr.bf16.mxu0 %v18109_v13  ;;  %v9549_v54 = vld [vmem:[#allocation15 + $0xef8] sm:$0xff] }
 0x8d9   :  { %12813 = vmatprep.subr.bf16.mxu1 %v18237_v46  ;;  %v18325_v18 = vcombine.high %v9545_v49, %v9549_v54  ;;  %v9409_v9 = vld [vmem:[#allocation15 + $0xa98] sm:$0xff]  ;;  %v18324_v31 = vcombine.low %v9545_v49, %v9549_v54  ;;  %v12896_v49 = vld [vmem:[#allocation18 + $0x140] sm:$0xff] }
 0x8da   :  { %v9413_v57 = vld [vmem:[#allocation15 + $0xab8] sm:$0xff]  ;;  %v12900_v54 = vld [vmem:[#allocation18 + $0x160] sm:$0xff] }
 0x8db   :  { %12773 = vmatpush1.bf16.msra.mxu0 %v18108_v4  ;;  %v9537_v63 = vld [vmem:[#allocation15 + $0xe98] sm:$0xff]  ;;  %v18189_v13 = vcombine.high %v9409_v9, %v9413_v57  ;;  %v18188_v4 = vcombine.low %v9409_v9, %v9413_v57 }
 0x8dc   :  { %12814 = vmatpush1.bf16.msra.mxu1 %v18236_v28  ;;  %12774 = vmatprep.subr.bf16.mxu0 %v18229_v60  ;;  %v9541_v29 = vld [vmem:[#allocation15 + $0xeb8] sm:$0xff] }
 0x8dd   :  { %12815 = vmatprep.subr.bf16.mxu1 %v18357_v12  ;;  %v18317_v46 = vcombine.high %v9537_v63, %v9541_v29  ;;  %v9401_v3 = vld [vmem:[#allocation15 + $0xa58] sm:$0xff]  ;;  %v18316_v28 = vcombine.low %v9537_v63, %v9541_v29  ;;  %v18406_v29 = vcombine.low %v12904_v8, %v12908_v59  ;;  %v12864_v59 = vld [vmem:[#allocation18 + $0x40] sm:$0xff] }
 0x8de   :  { %v9405_v37 = vld [vmem:[#allocation15 + $0xa78] sm:$0xff] }
 0x8df   :  { %12775 = vmatpush2.bf16.msra.mxu0 %v18228_v1  ;;  %v9529_v16 = vld [vmem:[#allocation15 + $0xe58] sm:$0xff]  ;;  %v18181_v60 = vcombine.high %v9401_v3, %v9405_v37  ;;  %v12467_v1 = vadd.f32 %v19892_v22, %v19886_v26  ;;  %v18415_v26 = vcombine.high %v12912_v36, %v12916_v21 }
 0x8e0   :  { %12816 = vmatpush2.bf16.msra.mxu1 %v18356_v50  ;;  %12776 = vmatprep.subr.bf16.mxu0 %v18221_v24  ;;  %v9533_v23 = vld [vmem:[#allocation15 + $0xe78] sm:$0xff]  ;;  %v18180_v50 = vcombine.low %v9401_v3, %v9405_v37  ;;  %v12888_v37 = vld [vmem:[#allocation18 + $0x100] sm:$0xff] }
 0x8e1   :  { %12817 = vmatprep.subr.bf16.mxu1 %v18349_v52  ;;  %v18309_v12 = vcombine.high %v9529_v16, %v9533_v23  ;;  %v9393_v45 = vld [vmem:[#allocation15 + $0xa18] sm:$0xff]  ;;  %v18308_v24 = vcombine.low %v9529_v16, %v9533_v23  ;;  %v12892_v16 = vld [vmem:[#allocation18 + $0x120] sm:$0xff] }
 0x8e2   :  { %v9397_v39 = vld [vmem:[#allocation15 + $0xa38] sm:$0xff]  ;;  %v13016_v23 = vld [vmem:[#allocation18 + $0x500] sm:$0xff] }
 0x8e3   :  { %12777 = vmatpush2.bf16.msra.mxu0 %v18220_v34  ;;  %v9521_v19 = vld [vmem:[#allocation15 + $0xe18] sm:$0xff]  ;;  %v18173_v52 = vcombine.high %v9393_v45, %v9397_v39  ;;  %v13044_v34 = vld [vmem:[#allocation18 + $0x5e0] sm:$0xff] }
 0x8e4   :  { %12818 = vmatpush2.bf16.msra.mxu1 %v18348_v35  ;;  %12778 = vmatprep.subr.bf16.mxu0 %v18213_v51  ;;  %v9525_v30 = vld [vmem:[#allocation15 + $0xe38] sm:$0xff]  ;;  %v12508_v35 = vadd.f32 %v19897_v33, %v12467_v1  ;;  %v18172_v51 = vcombine.low %v9393_v45, %v9397_v39  ;;  %v18543_v22 = vcombine.high %v13040_v2, %v13044_v34  ;;  %v12880_v1 = vld [vmem:[#allocation18 + $0xc0] sm:$0xff] }
 0x8e5   :  { %12819 = vmatprep.subr.bf16.mxu1 %v18341_v38  ;;  %v18301_v27 = vcombine.high %v9521_v19, %v9525_v30  ;;  %v18300_v38 = vcombine.low %v9521_v19, %v9525_v30  ;;  %v18414_v33 = vcombine.low %v12912_v36, %v12916_v21  ;;  %v18542_v41 = vcombine.low %v13040_v2, %v13044_v34  ;;  %v12872_v34 = vld [vmem:[#allocation18 + $0x80] sm:$0xff] }
 0x8e6   :  { %v12843_v61 = vmax.f32 %v12508_v35, 0.0  ;;  %v18391_v39 = vcombine.high %v12888_v37, %v12892_v16  ;;  %v12876_v35 = vld [vmem:[#allocation18 + $0xa0] sm:$0xff] }
 0x8e7   :  { %12779 = vmatpush2.bf16.msra.mxu0 %v18212_v0  ;;  %v19903_v0 = vld [vmem:[#allocation16] sm:$0xff]  ;;  %v18375_v40 = vcombine.high %v12872_v34, %v12876_v35 }
 0x8e8   :  { %12820 = vmatpush2.bf16.msra.mxu1 %v18340_v32  ;;  %12780 = vmatprep.subr.bf16.mxu0 %v18205_v6  ;;  %v9603_v32 = vrot.slane %v19903_v0, %v19596_v17  ;;  %v13032_v6 = vld [vmem:[#allocation18 + $0x580] sm:$0xff]  ;;  %v19910_v9 = vpack.c.bf16 %v12843_v61, %v12843_v61 }
 0x8e9   :  { %12821 = vmatprep.subr.bf16.mxu1 %v18333_v11  ;;  %v13036_v11 = vld [vmem:[#allocation18 + $0x5a0] sm:$0xff] }
 0x8ea   :  { %v12868_v61 = vld [vmem:[#allocation18 + $0x60] sm:$0xff] }
 0x8eb   :  { %12781 = vmatpush2.bf16.msra.mxu0 %v18204_v55 }
 0x8ec   :  { %12822 = vmatpush2.bf16.msra.mxu1 %v18332_v56  ;;  %12782 = vmatprep.subr.bf16.mxu0 %v18197_v7  ;;  %v18535_v56 = vcombine.high %v13032_v6, %v13036_v11  ;;  %v13024_v7 = vld [vmem:[#allocation18 + $0x540] sm:$0xff] }
 0x8ed   :  { %12823 = vmatprep.subr.bf16.mxu1 %v18325_v18  ;;  %v13028_v18 = vld [vmem:[#allocation18 + $0x560] sm:$0xff] }
 0x8ee   :  { %v18527_v3 = vcombine.high %v13024_v7, %v13028_v18  ;;  %v18526_v45 = vcombine.low %v13024_v7, %v13028_v18  ;;  %v18366_v7 = vcombine.low %v12864_v59, %v12868_v61 }
 0x8ef   :  { %12783 = vmatpush2.bf16.msra.mxu0 %v18196_v42 }
 0x8f0   :  { %12824 = vmatpush2.bf16.msra.mxu1 %v18324_v31  ;;  %12784 = vmatprep.subr.bf16.mxu0 %v18189_v13  ;;  %v18534_v31 = vcombine.low %v13032_v6, %v13036_v11  ;;  %v18399_v13 = vcombine.high %v12896_v49, %v12900_v54  ;;  %v18374_v6 = vcombine.low %v12872_v34, %v12876_v35  ;;  %v12952_v34 = vld [vmem:[#allocation18 + $0x300] sm:$0xff] }
 0x8f1   :  { %12825 = vmatprep.subr.bf16.mxu1 %v18317_v46  ;;  %v12956_v35 = vld [vmem:[#allocation18 + $0x320] sm:$0xff] }
 0x8f3   :  { %12785 = vmatpush2.bf16.msra.mxu0 %v18188_v4  ;;  %v13020_v4 = vld [vmem:[#allocation18 + $0x520] sm:$0xff] }
 0x8f4   :  { %12826 = vmatpush2.bf16.msra.mxu1 %v18316_v28  ;;  %12786 = vmatprep.subr.bf16.mxu0 %v18181_v60  ;;  %v18398_v60 = vcombine.low %v12896_v49, %v12900_v54  ;;  %v18519_v30 = vcombine.high %v13016_v23, %v13020_v4  ;;  %v18518_v36 = vcombine.low %v13016_v23, %v13020_v4  ;;  %v12856_v49 = vld [vmem:[#allocation18] sm:$0xff] }
 0x8f5   :  { %12827 = vmatprep.subr.bf16.mxu1 %v18309_v12  ;;  %v12860_v54 = vld [vmem:[#allocation18 + $0x20] sm:$0xff] }
 0x8f6   :  { %v12968_v4 = vld [vmem:[#allocation18 + $0x380] sm:$0xff] }
 0x8f7   :  { %12787 = vmatpush2.bf16.msra.mxu0 %v18180_v50  ;;  %v12884_v50 = vld [vmem:[#allocation18 + $0xe0] sm:$0xff] }
 0x8f8   :  { %12828 = vmatpush2.bf16.msra.mxu1 %v18308_v24  ;;  %12788 = vmatprep.subr.bf16.mxu0 %v18173_v52  ;;  %v13008_v24 = vld [vmem:[#allocation18 + $0x4c0] sm:$0xff]  ;;  %v18383_v21 = vcombine.high %v12880_v1, %v12884_v50 }
 0x8f9   :  { %12829 = vmatprep.subr.bf16.mxu1 %v18301_v27  ;;  %v13012_v52 = vld [vmem:[#allocation18 + $0x4e0] sm:$0xff]  ;;  %v18390_v27 = vcombine.low %v12888_v37, %v12892_v16  ;;  %v18358_v37 = vcombine.low %v12856_v49, %v12860_v54 }
 0x8fa   :  { %v18511_v2 = vcombine.high %v13008_v24, %v13012_v52 }
 0x8fb   :  { %12789 = vmatpush2.bf16.msra.mxu0 %v18172_v51  ;;  %v13000_v51 = vld [vmem:[#allocation18 + $0x480] sm:$0xff] }
 0x8fc   :  { %12830 = vmatpush2.bf16.msra.mxu1 %v18300_v38  ;;  %15970 = vmatprep.subr.bf16.mxu0 %v18415_v26  ;;  %v13004_v38 = vld [vmem:[#allocation18 + $0x4a0] sm:$0xff]  ;;  %v18382_v26 = vcombine.low %v12880_v1, %v12884_v50 }
 0x8fd   :  { %16011 = vmatprep.subr.bf16.mxu1 %v18543_v22  ;;  %v18510_v22 = vcombine.low %v13008_v24, %v13012_v52  ;;  %v18503_v8 = vcombine.high %v13000_v51, %v13004_v38  ;;  %v18502_v11 = vcombine.low %v13000_v51, %v13004_v38  ;;  %v12960_v1 = vld [vmem:[#allocation18 + $0x340] sm:$0xff] }
 0x8fe   :  { %v12546_v55 = vpop.f32.mrf.mxu0  ;;  %12791 = vmatmul.mubr.bf16.vlgmr.msra.gmra.mxu0 %v19840_v15  ;;  %v12964_v50 = vld [vmem:[#allocation18 + $0x360] sm:$0xff] }
 0x8ff   :  { %v12547_v57 = vadd.f32 %v12546_v55, %v9603_v32  ;;  %v12587_v63 = vpop.f32.mrf.mxu1  ;;  %12832 = vmatmul.mubr.bf16.vlgmr.msra.gmra.mxu1 %v19842_v25  ;;  %15971 = vmatpush1.bf16.msra.mxu0 %v18414_v33  ;;  %v12992_v32 = vld [vmem:[#allocation18 + $0x440] sm:$0xff] }
 0x900   :  { %16002 = vmatprep.mubr.bf16.mxu0 %v19907_v14  ;;  %16012 = vmatpush1.bf16.msra.mxu1 %v18542_v41  ;;  %v19914_v42 = vpop.f32.mrf.mxu0  ;;  %v12996_v33 = vld [vmem:[#allocation18 + $0x460] sm:$0xff]  ;;  %v18367_v41 = vcombine.high %v12864_v59, %v12868_v61 }
 0x901   :  { %v19916_v46 = vadd.f32 %v12587_v63, %v12547_v57  ;;  %16043 = vmatprep.mubr.bf16.mxu1 %v19910_v9  ;;  %v19919_v15 = vpop.f32.mrf.mxu1  ;;  %15972 = vmatprep.subr.bf16.mxu0 %v18407_v44  ;;  %v18495_v44 = vcombine.high %v12992_v32, %v12996_v33  ;;  %v12984_v55 = vld [vmem:[#allocation18 + $0x400] sm:$0xff]  ;;  %v18494_v18 = vcombine.low %v12992_v32, %v12996_v33 }
 0x902   :  { %v12550_v25 = vpop.f32.mrf.mxu0  ;;  %16013 = vmatprep.subr.bf16.mxu1 %v18535_v56  ;;  %v12988_v56 = vld [vmem:[#allocation18 + $0x420] sm:$0xff]  ;;  %v18359_v57 = vcombine.high %v12856_v49, %v12860_v54 }
 0x903   :  { %v12591_v28 = vpop.f32.mrf.mxu1  ;;  %15973 = vmatpush1.bf16.msra.mxu0 %v18406_v29  ;;  %v18487_v63 = vcombine.high %v12984_v55, %v12988_v56  ;;  %v12976_v29 = vld [vmem:[#allocation18 + $0x3c0] sm:$0xff]  ;;  %v18486_v16 = vcombine.low %v12984_v55, %v12988_v56 }
 0x904   :  { %16014 = vmatpush1.bf16.msra.mxu1 %v18534_v31  ;;  %v12551_v12 = vpop.f32.mrf.mxu0  ;;  %15974 = vmatprep.subr.bf16.mxu0 %v18399_v13  ;;  %v12980_v31 = vld [vmem:[#allocation18 + $0x3e0] sm:$0xff] }
 0x905   :  { %v12592_v19 = vpop.f32.mrf.mxu1  ;;  %16015 = vmatprep.subr.bf16.mxu1 %v18527_v3  ;;  %v13104_v13 = vld [vmem:[#allocation18 + $0x7c0] sm:$0xff]  ;;  %v18479_v25 = vcombine.high %v12976_v29, %v12980_v31 }
 0x906   :  { %v13108_v3 = vld [vmem:[#allocation18 + $0x7e0] sm:$0xff] }
 0x907   :  { %15975 = vmatpush1.bf16.msra.mxu0 %v18398_v60  ;;  %v18607_v23 = vcombine.high %v13104_v13, %v13108_v3  ;;  %v12972_v28 = vld [vmem:[#allocation18 + $0x3a0] sm:$0xff] }
 0x908   :  { %16016 = vmatpush1.bf16.msra.mxu1 %v18526_v45  ;;  %15976 = vmatprep.subr.bf16.mxu0 %v18391_v39  ;;  %v13096_v60 = vld [vmem:[#allocation18 + $0x780] sm:$0xff]  ;;  %v18478_v45 = vcombine.low %v12976_v29, %v12980_v31  ;;  %v18606_v39 = vcombine.low %v13104_v13, %v13108_v3  ;;  %v18471_v19 = vcombine.high %v12968_v4, %v12972_v28 }
 0x909   :  { %16017 = vmatprep.subr.bf16.mxu1 %v18519_v30  ;;  %v13100_v12 = vld [vmem:[#allocation18 + $0x7a0] sm:$0xff] }
 0x90a   :  { %v18599_v30 = vcombine.high %v13096_v60, %v13100_v12  ;;  %v13088_v24 = vld [vmem:[#allocation18 + $0x740] sm:$0xff] }
 0x90b   :  { %15977 = vmatpush1.bf16.msra.mxu0 %v18390_v27  ;;  %v13092_v52 = vld [vmem:[#allocation18 + $0x760] sm:$0xff]  ;;  %v18470_v27 = vcombine.low %v12968_v4, %v12972_v28 }
 0x90c   :  { %16018 = vmatpush1.bf16.msra.mxu1 %v18518_v36  ;;  %15978 = vmatprep.subr.bf16.mxu0 %v18383_v21  ;;  %v18598_v36 = vcombine.low %v13096_v60, %v13100_v12  ;;  %v18463_v21 = vcombine.high %v12960_v1, %v12964_v50  ;;  %v13080_v51 = vld [vmem:[#allocation18 + $0x700] sm:$0xff] }
 0x90d   :  { %16019 = vmatprep.subr.bf16.mxu1 %v18511_v2  ;;  %v18591_v2 = vcombine.high %v13088_v24, %v13092_v52  ;;  %v13084_v38 = vld [vmem:[#allocation18 + $0x720] sm:$0xff] }
 0x90e   :  { %v12944_v59 = vld [vmem:[#allocation18 + $0x2c0] sm:$0xff] }
 0x90f   :  { %15979 = vmatpush1.bf16.msra.mxu0 %v18382_v26  ;;  %v18462_v26 = vcombine.low %v12960_v1, %v12964_v50  ;;  %v12948_v61 = vld [vmem:[#allocation18 + $0x2e0] sm:$0xff] }
 0x910   :  { %16020 = vmatpush1.bf16.msra.mxu1 %v18510_v22  ;;  %15980 = vmatprep.subr.bf16.mxu0 %v18375_v40  ;;  %v18590_v22 = vcombine.low %v13088_v24, %v13092_v52  ;;  %v18455_v40 = vcombine.high %v12952_v34, %v12956_v35  ;;  %v13072_v32 = vld [vmem:[#allocation18 + $0x6c0] sm:$0xff] }
 0x911   :  { %16021 = vmatprep.subr.bf16.mxu1 %v18503_v8  ;;  %v18583_v8 = vcombine.high %v13080_v51, %v13084_v38  ;;  %v13076_v33 = vld [vmem:[#allocation18 + $0x6e0] sm:$0xff] }
 0x912   :  { %v12936_v49 = vld [vmem:[#allocation18 + $0x280] sm:$0xff] }
 0x913   :  { %15981 = vmatpush1.bf16.msra.mxu0 %v18374_v6  ;;  %v18454_v6 = vcombine.low %v12952_v34, %v12956_v35  ;;  %v12940_v54 = vld [vmem:[#allocation18 + $0x2a0] sm:$0xff]  ;;  %v12842_v35 = vmax.f32 %v19894_v62, 0.0 }
 0x914   :  { %16022 = vmatpush1.bf16.msra.mxu1 %v18502_v11  ;;  %15982 = vmatprep.subr.bf16.mxu0 %v18367_v41  ;;  %v18582_v11 = vcombine.low %v13080_v51, %v13084_v38  ;;  %v18447_v41 = vcombine.high %v12944_v59, %v12948_v61  ;;  %v13064_v55 = vld [vmem:[#allocation18 + $0x680] sm:$0xff] }
 0x915   :  { %16023 = vmatprep.subr.bf16.mxu1 %v18495_v44  ;;  %v18575_v44 = vcombine.high %v13072_v32, %v13076_v33  ;;  %v13068_v56 = vld [vmem:[#allocation18 + $0x6a0] sm:$0xff] }
 0x916   :  { %v12928_v29 = vld [vmem:[#allocation18 + $0x240] sm:$0xff] }
 0x917   :  { %15983 = vmatpush1.bf16.msra.mxu0 %v18366_v7  ;;  %v18446_v7 = vcombine.low %v12944_v59, %v12948_v61  ;;  %v12932_v31 = vld [vmem:[#allocation18 + $0x260] sm:$0xff] }
 0x918   :  { %16024 = vmatpush1.bf16.msra.mxu1 %v18494_v18  ;;  %15984 = vmatprep.subr.bf16.mxu0 %v18359_v57  ;;  %v18574_v18 = vcombine.low %v13072_v32, %v13076_v33  ;;  %v18439_v57 = vcombine.high %v12936_v49, %v12940_v54  ;;  %v13056_v13 = vld [vmem:[#allocation18 + $0x640] sm:$0xff]  ;;  %v19928_v32 = vpack.c.bf16 %v12842_v35, %v12842_v35 }
 0x919   :  { %16025 = vmatprep.subr.bf16.mxu1 %v18487_v63  ;;  %v18567_v63 = vcombine.high %v13064_v55, %v13068_v56  ;;  %v13060_v3 = vld [vmem:[#allocation18 + $0x660] sm:$0xff] }
 0x91a   :  { %v12920_v4 = vld [vmem:[#allocation18 + $0x200] sm:$0xff] }
 0x91b   :  { %15985 = vmatpush1.bf16.msra.mxu0 %v18358_v37  ;;  %v18438_v37 = vcombine.low %v12936_v49, %v12940_v54  ;;  %v12924_v28 = vld [vmem:[#allocation18 + $0x220] sm:$0xff] }
 0x91c   :  { %16026 = vmatpush1.bf16.msra.mxu1 %v18486_v16  ;;  %15986 = vmatprep.subr.bf16.mxu0 %v18479_v25  ;;  %v18566_v16 = vcombine.low %v13064_v55, %v13068_v56  ;;  %v18431_v25 = vcombine.high %v12928_v29, %v12932_v31  ;;  %v13048_v60 = vld [vmem:[#allocation18 + $0x600] sm:$0xff] }
 0x91d   :  { %16027 = vmatprep.subr.bf16.mxu1 %v18607_v23  ;;  %v18559_v23 = vcombine.high %v13056_v13, %v13060_v3  ;;  %v13052_v12 = vld [vmem:[#allocation18 + $0x620] sm:$0xff] }
 0x91e   :  { %v13168_v1 = vld [vmem:[#allocation18 + $0x9c0] sm:$0xff] }
 0x91f   :  { %15987 = vmatpush2.bf16.msra.mxu0 %v18478_v45  ;;  %v18430_v45 = vcombine.low %v12928_v29, %v12932_v31  ;;  %v13172_v50 = vld [vmem:[#allocation18 + $0x9e0] sm:$0xff] }
 0x920   :  { %16028 = vmatpush2.bf16.msra.mxu1 %v18606_v39  ;;  %15988 = vmatprep.subr.bf16.mxu0 %v18471_v19  ;;  %v18558_v39 = vcombine.low %v13056_v13, %v13060_v3  ;;  %v18423_v19 = vcombine.high %v12920_v4, %v12924_v28  ;;  %v13296_v24 = vld [vmem:[#allocation18 + $0xdc0] sm:$0xff]  ;;  %v18671_v34 = vcombine.high %v13168_v1, %v13172_v50 }
 0x921   :  { %16029 = vmatprep.subr.bf16.mxu1 %v18599_v30  ;;  %v18551_v30 = vcombine.high %v13048_v60, %v13052_v12  ;;  %v13300_v52 = vld [vmem:[#allocation18 + $0xde0] sm:$0xff] }
 0x922   :  { %v13160_v51 = vld [vmem:[#allocation18 + $0x980] sm:$0xff]  ;;  %v18798_v61 = vcombine.low %v13296_v24, %v13300_v52 }
 0x923   :  { %15989 = vmatpush2.bf16.msra.mxu0 %v18470_v27  ;;  %v9607_v27 = vrot.slane %v19903_v0, %v19618_v53  ;;  %v13164_v38 = vld [vmem:[#allocation18 + $0x9a0] sm:$0xff]  ;;  %v18670_v0 = vcombine.low %v13168_v1, %v13172_v50 }
 0x924   :  { %16030 = vmatpush2.bf16.msra.mxu1 %v18598_v36  ;;  %15990 = vmatprep.subr.bf16.mxu0 %v18463_v21  ;;  %v18422_v36 = vcombine.low %v12920_v4, %v12924_v28  ;;  %v12840_v21 = vmax.f32 %v19870_v20, 0.0  ;;  %v18663_v20 = vcombine.high %v13160_v51, %v13164_v38  ;;  %v13152_v33 = vld [vmem:[#allocation18 + $0x940] sm:$0xff]  ;;  %v18662_v54 = vcombine.low %v13160_v51, %v13164_v38 }
 0x925   :  { %16031 = vmatprep.subr.bf16.mxu1 %v18591_v2  ;;  %v18550_v2 = vcombine.low %v13048_v60, %v13052_v12  ;;  %v13156_v62 = vld [vmem:[#allocation18 + $0x960] sm:$0xff] }
 0x926   :  { %v19926_v59 = vpack.c.bf16 %v12840_v21, %v12840_v21  ;;  %v18655_v56 = vcombine.high %v13152_v33, %v13156_v62  ;;  %v13148_v29 = vld [vmem:[#allocation18 + $0x920] sm:$0xff]  ;;  %v19941_v21 = vld [vmem:[#allocation18 + $0x5e8] sm:$0xff] }
 0x927   :  { %15991 = vmatpush2.bf16.msra.mxu0 %v18462_v26  ;;  %v18799_v26 = vcombine.high %v13296_v24, %v13300_v52  ;;  %v13272_v3 = vld [vmem:[#allocation18 + $0xd00] sm:$0xff] }
 0x928   :  { %16032 = vmatpush2.bf16.msra.mxu1 %v18590_v22  ;;  %15992 = vmatprep.subr.bf16.mxu0 %v18455_v40  ;;  %v13288_v22 = vld [vmem:[#allocation18 + $0xd80] sm:$0xff] }
 0x929   :  { %16033 = vmatprep.subr.bf16.mxu1 %v18583_v8  ;;  %v13292_v40 = vld [vmem:[#allocation18 + $0xda0] sm:$0xff]  ;;  %v12549_v8 = vadd.f32 %v19914_v42, %v9607_v27 }
 0x92a   :  { %v13284_v42 = vld [vmem:[#allocation18 + $0xd60] sm:$0xff] }
 0x92b   :  { %15993 = vmatpush2.bf16.msra.mxu0 %v18454_v6  ;;  %v18791_v6 = vcombine.high %v13288_v22, %v13292_v40  ;;  %v13268_v1 = vld [vmem:[#allocation18 + $0xce0] sm:$0xff] }
 0x92c   :  { %16034 = vmatpush2.bf16.msra.mxu1 %v18582_v11  ;;  %15994 = vmatprep.subr.bf16.mxu0 %v18447_v41  ;;  %v13280_v41 = vld [vmem:[#allocation18 + $0xd40] sm:$0xff] }
 0x92d   :  { %16035 = vmatprep.subr.bf16.mxu1 %v18575_v44  ;;  %v12590_v44 = vadd.f32 %v19919_v15, %v12549_v8  ;;  %v18783_v31 = vcombine.high %v13280_v41, %v13284_v42  ;;  %v13276_v15 = vld [vmem:[#allocation18 + $0xd20] sm:$0xff]  ;;  %v18782_v28 = vcombine.low %v13280_v41, %v13284_v42 }
 0x92e   :  { %v18774_v27 = vcombine.low %v13272_v3, %v13276_v15  ;;  %v13256_v38 = vld [vmem:[#allocation18 + $0xc80] sm:$0xff] }
 0x92f   :  { %15995 = vmatpush2.bf16.msra.mxu0 %v18446_v7  ;;  %v18790_v7 = vcombine.low %v13288_v22, %v13292_v40 }
 0x930   :  { %16036 = vmatpush2.bf16.msra.mxu1 %v18574_v18  ;;  %15996 = vmatprep.subr.bf16.mxu0 %v18439_v57 }
 0x931   :  { %16037 = vmatprep.subr.bf16.mxu1 %v18567_v63  ;;  %v13144_v63 = vld [vmem:[#allocation18 + $0x900] sm:$0xff] }
 0x932   :  { %v18647_v4 = vcombine.high %v13144_v63, %v13148_v29  ;;  %v18646_v24 = vcombine.low %v13144_v63, %v13148_v29  ;;  %v13232_v29 = vld [vmem:[#allocation18 + $0xbc0] sm:$0xff] }
 0x933   :  { %15997 = vmatpush2.bf16.msra.mxu0 %v18438_v37 }
 0x934   :  { %16038 = vmatpush2.bf16.msra.mxu1 %v18566_v16  ;;  %15998 = vmatprep.subr.bf16.mxu0 %v18431_v25  ;;  %v18654_v25 = vcombine.low %v13152_v33, %v13156_v62  ;;  %v13248_v33 = vld [vmem:[#allocation18 + $0xc40] sm:$0xff] }
 0x935   :  { %16039 = vmatprep.subr.bf16.mxu1 %v18559_v23  ;;  %v13252_v62 = vld [vmem:[#allocation18 + $0xc60] sm:$0xff] }
 0x936   :  { %v18750_v63 = vcombine.low %v13248_v33, %v13252_v62 }
 0x937   :  { %15999 = vmatpush2.bf16.msra.mxu0 %v18430_v45  ;;  %v13136_v45 = vld [vmem:[#allocation18 + $0x8c0] sm:$0xff] }
 0x938   :  { %16040 = vmatpush2.bf16.msra.mxu1 %v18558_v39  ;;  %16000 = vmatprep.subr.bf16.mxu0 %v18423_v19  ;;  %v13140_v39 = vld [vmem:[#allocation18 + $0x8e0] sm:$0xff]  ;;  %v18775_v19 = vcombine.high %v13272_v3, %v13276_v15 }
 0x939   :  { %16041 = vmatprep.subr.bf16.mxu1 %v18551_v30  ;;  %v13264_v30 = vld [vmem:[#allocation18 + $0xcc0] sm:$0xff]  ;;  %v18639_v52 = vcombine.high %v13136_v45, %v13140_v39  ;;  %v18638_v22 = vcombine.low %v13136_v45, %v13140_v39 }
 0x93a   :  { %v18767_v35 = vcombine.high %v13264_v30, %v13268_v1  ;;  %v18766_v8 = vcombine.low %v13264_v30, %v13268_v1  ;;  %v13360_v3 = vld [vmem:[#allocation18 + $0xfc0] sm:$0xff] }
 0x93b   :  { %16001 = vmatpush2.bf16.msra.mxu0 %v18422_v36  ;;  %v19939_v36 = vld [vmem:[#allocation18 + $0x5c8] sm:$0xff]  ;;  %v13364_v15 = vld [vmem:[#allocation18 + $0xfe0] sm:$0xff] }
 0x93c   :  { %16042 = vmatpush2.bf16.msra.mxu1 %v18550_v2  ;;  %16052 = vmatprep.subr.bf16.mxu0 %v18671_v34  ;;  %v13128_v2 = vld [vmem:[#allocation18 + $0x880] sm:$0xff]  ;;  %v18544_v51 = vcombine.low %v19939_v36, %v19941_v21 }
 0x93d   :  { %16093 = vmatprep.subr.bf16.mxu1 %v18799_v26  ;;  %v13132_v34 = vld [vmem:[#allocation18 + $0x8a0] sm:$0xff] }
 0x93e   :  { %v19930_v11 = vpop.f32.mrf.mxu0  ;;  %16003 = vmatmul.mubr.bf16.vlgmr.msra.gmra.mxu0 %v19926_v59  ;;  %v13260_v26 = vld [vmem:[#allocation18 + $0xca0] sm:$0xff]  ;;  %v18631_v40 = vcombine.high %v13128_v2, %v13132_v34 }
 0x93f   :  { %v19934_v49 = vpop.f32.mrf.mxu1  ;;  %16044 = vmatmul.mubr.bf16.vlgmr.msra.gmra.mxu1 %v19928_v32  ;;  %16053 = vmatpush1.bf16.msra.mxu0 %v18670_v0  ;;  %v13120_v0 = vld [vmem:[#allocation18 + $0x840] sm:$0xff]  ;;  %v18758_v42 = vcombine.low %v13256_v38, %v13260_v26 }
 0x940   :  { %v12630_v55 = vpop.f32.mrf.mxu0  ;;  %16054 = vmatprep.subr.bf16.mxu0 %v18663_v20  ;;  %16094 = vmatpush1.bf16.msra.mxu1 %v18798_v61  ;;  %v13124_v20 = vld [vmem:[#allocation18 + $0x860] sm:$0xff]  ;;  %v18759_v61 = vcombine.high %v13256_v38, %v13260_v26 }
 0x941   :  { %v12631_v18 = vadd.f32 %v12630_v55, %v12590_v44  ;;  %v12671_v57 = vpop.f32.mrf.mxu1  ;;  %16095 = vmatprep.subr.bf16.mxu1 %v18791_v6  ;;  %v18630_v6 = vcombine.low %v13128_v2, %v13132_v34  ;;  %v18623_v41 = vcombine.high %v13120_v0, %v13124_v20  ;;  %v13112_v44 = vld [vmem:[#allocation18 + $0x800] sm:$0xff]  ;;  %v18751_v55 = vcombine.high %v13248_v33, %v13252_v62 }
 0x942   :  { %v12632_v13 = vpop.f32.mrf.mxu0  ;;  %v13216_v30 = vld [vmem:[#allocation18 + $0xb40] sm:$0xff] }
 0x943   :  { %v12672_v37 = vadd.f32 %v12671_v57, %v12631_v18  ;;  %v12673_v16 = vpop.f32.mrf.mxu1  ;;  %16055 = vmatpush1.bf16.msra.mxu0 %v18662_v54  ;;  %v13116_v54 = vld [vmem:[#allocation18 + $0x820] sm:$0xff]  ;;  %v18622_v18 = vcombine.low %v13120_v0, %v13124_v20 }
 0x944   :  { %v12633_v23 = vpop.f32.mrf.mxu0  ;;  %16056 = vmatprep.subr.bf16.mxu0 %v18655_v56  ;;  %16096 = vmatpush1.bf16.msra.mxu1 %v18790_v7  ;;  %v13240_v56 = vld [vmem:[#allocation18 + $0xc00] sm:$0xff]  ;;  %v18615_v57 = vcombine.high %v13112_v44, %v13116_v54 }
 0x945   :  { %v12845_v60 = vmax.f32 %v12672_v37, 0.0  ;;  %v12674_v12 = vpop.f32.mrf.mxu1  ;;  %16097 = vmatprep.subr.bf16.mxu1 %v18783_v31  ;;  %v13244_v7 = vld [vmem:[#allocation18 + $0xc20] sm:$0xff]  ;;  %v18614_v37 = vcombine.low %v13112_v44, %v13116_v54 }
 0x946   :  { %v13236_v31 = vld [vmem:[#allocation18 + $0xbe0] sm:$0xff]  ;;  %v18743_v13 = vcombine.high %v13240_v56, %v13244_v7 }
 0x947   :  { %v19937_v50 = vpack.c.bf16 %v12845_v60, %v12845_v60  ;;  %16057 = vmatpush1.bf16.msra.mxu0 %v18654_v25  ;;  %v18735_v16 = vcombine.high %v13232_v29, %v13236_v31  ;;  %v18742_v25 = vcombine.low %v13240_v56, %v13244_v7  ;;  %v13224_v23 = vld [vmem:[#allocation18 + $0xb80] sm:$0xff]  ;;  %v18734_v45 = vcombine.low %v13232_v29, %v13236_v31 }
 0x948   :  { %16058 = vmatprep.subr.bf16.mxu0 %v18647_v4  ;;  %16098 = vmatpush1.bf16.msra.mxu1 %v18782_v28  ;;  %v13228_v4 = vld [vmem:[#allocation18 + $0xba0] sm:$0xff]  ;;  %v18863_v28 = vcombine.high %v13360_v3, %v13364_v15 }
 0x949   :  { %16084 = vmatprep.mubr.bf16.mxu0 %v19937_v50  ;;  %16099 = vmatprep.subr.bf16.mxu1 %v18775_v19  ;;  %v13352_v60 = vld [vmem:[#allocation18 + $0xf80] sm:$0xff]  ;;  %v18727_v39 = vcombine.high %v13224_v23, %v13228_v4  ;;  %v18862_v19 = vcombine.low %v13360_v3, %v13364_v15  ;;  %v18726_v2 = vcombine.low %v13224_v23, %v13228_v4 }
 0x94a   :  { %v13356_v12 = vld [vmem:[#allocation18 + $0xfa0] sm:$0xff]  ;;  %v12629_v4 = vadd.f32 %v19930_v11, %v19916_v46  ;;  %v12917_v46 = vld [vmem:[#allocation18 + $0x1e8] sm:$0xff] }
 0x94b   :  { %16059 = vmatpush1.bf16.msra.mxu0 %v18646_v24  ;;  %v13220_v1 = vld [vmem:[#allocation18 + $0xb60] sm:$0xff]  ;;  %v18855_v24 = vcombine.high %v13352_v60, %v13356_v12 }
 0x94c   :  { %16060 = vmatprep.subr.bf16.mxu0 %v18639_v52  ;;  %16100 = vmatpush1.bf16.msra.mxu1 %v18774_v27  ;;  %v13344_v52 = vld [vmem:[#allocation18 + $0xf40] sm:$0xff]  ;;  %v18719_v34 = vcombine.high %v13216_v30, %v13220_v1  ;;  %v18718_v0 = vcombine.low %v13216_v30, %v13220_v1 }
 0x94d   :  { %16101 = vmatprep.subr.bf16.mxu1 %v18767_v35  ;;  %v13348_v27 = vld [vmem:[#allocation18 + $0xf60] sm:$0xff]  ;;  %v18854_v35 = vcombine.low %v13352_v60, %v13356_v12 }
 0x94e   :  { %v13208_v38 = vld [vmem:[#allocation18 + $0xb00] sm:$0xff] }
 0x94f   :  { %16061 = vmatpush1.bf16.msra.mxu0 %v18638_v22  ;;  %v13212_v26 = vld [vmem:[#allocation18 + $0xb20] sm:$0xff]  ;;  %v18847_v22 = vcombine.high %v13344_v52, %v13348_v27 }
 0x950   :  { %16062 = vmatprep.subr.bf16.mxu0 %v18631_v40  ;;  %16102 = vmatpush1.bf16.msra.mxu1 %v18766_v8  ;;  %v13336_v40 = vld [vmem:[#allocation18 + $0xf00] sm:$0xff]  ;;  %v18711_v20 = vcombine.high %v13208_v38, %v13212_v26  ;;  %v18710_v44 = vcombine.low %v13208_v38, %v13212_v26 }
 0x951   :  { %16103 = vmatprep.subr.bf16.mxu1 %v18759_v61  ;;  %v13340_v8 = vld [vmem:[#allocation18 + $0xf20] sm:$0xff]  ;;  %v18846_v61 = vcombine.low %v13344_v52, %v13348_v27 }
 0x952   :  { %v13200_v33 = vld [vmem:[#allocation18 + $0xac0] sm:$0xff] }
 0x953   :  { %16063 = vmatpush1.bf16.msra.mxu0 %v18630_v6  ;;  %v13204_v62 = vld [vmem:[#allocation18 + $0xae0] sm:$0xff]  ;;  %v18839_v6 = vcombine.high %v13336_v40, %v13340_v8 }
 0x954   :  { %16064 = vmatprep.subr.bf16.mxu0 %v18623_v41  ;;  %16104 = vmatpush1.bf16.msra.mxu1 %v18758_v42  ;;  %v13328_v41 = vld [vmem:[#allocation18 + $0xec0] sm:$0xff]  ;;  %v18703_v54 = vcombine.high %v13200_v33, %v13204_v62  ;;  %v18702_v29 = vcombine.low %v13200_v33, %v13204_v62  ;;  %v12901_v33 = vld [vmem:[#allocation18 + $0x168] sm:$0xff] }
 0x955   :  { %16105 = vmatprep.subr.bf16.mxu1 %v18751_v55  ;;  %v13332_v42 = vld [vmem:[#allocation18 + $0xee0] sm:$0xff]  ;;  %v18838_v55 = vcombine.low %v13336_v40, %v13340_v8  ;;  %v12909_v40 = vld [vmem:[#allocation18 + $0x1a8] sm:$0xff] }
 0x956   :  { %v13192_v56 = vld [vmem:[#allocation18 + $0xa80] sm:$0xff] }
 0x957   :  { %16065 = vmatpush1.bf16.msra.mxu0 %v18622_v18  ;;  %v13196_v7 = vld [vmem:[#allocation18 + $0xaa0] sm:$0xff]  ;;  %v18831_v18 = vcombine.high %v13328_v41, %v13332_v42 }
 0x958   :  { %16066 = vmatprep.subr.bf16.mxu0 %v18615_v57  ;;  %16106 = vmatpush1.bf16.msra.mxu1 %v18750_v63  ;;  %v13320_v57 = vld [vmem:[#allocation18 + $0xe80] sm:$0xff]  ;;  %v18695_v31 = vcombine.high %v13192_v56, %v13196_v7  ;;  %v18694_v23 = vcombine.low %v13192_v56, %v13196_v7  ;;  %v12893_v56 = vld [vmem:[#allocation18 + $0x128] sm:$0xff] }
 0x959   :  { %16107 = vmatprep.subr.bf16.mxu1 %v18743_v13  ;;  %v13324_v63 = vld [vmem:[#allocation18 + $0xea0] sm:$0xff]  ;;  %v18830_v13 = vcombine.low %v13328_v41, %v13332_v42 }
 0x95a   :  { %v13184_v3 = vld [vmem:[#allocation18 + $0xa40] sm:$0xff]  ;;  %v18822_v60 = vcombine.low %v13320_v57, %v13324_v63 }
 0x95b   :  { %16067 = vmatpush1.bf16.msra.mxu0 %v18614_v37  ;;  %v13188_v15 = vld [vmem:[#allocation18 + $0xa60] sm:$0xff]  ;;  %v18823_v37 = vcombine.high %v13320_v57, %v13324_v63 }
 0x95c   :  { %16068 = vmatprep.subr.bf16.mxu0 %v18735_v16  ;;  %16108 = vmatpush1.bf16.msra.mxu1 %v18742_v25  ;;  %v13312_v16 = vld [vmem:[#allocation18 + $0xe40] sm:$0xff]  ;;  %v18686_v1 = vcombine.low %v13184_v3, %v13188_v15 }
 0x95d   :  { %16109 = vmatprep.subr.bf16.mxu1 %v18863_v28  ;;  %v13316_v25 = vld [vmem:[#allocation18 + $0xe60] sm:$0xff]  ;;  %v18687_v28 = vcombine.high %v13184_v3, %v13188_v15  ;;  %v12885_v3 = vld [vmem:[#allocation18 + $0xe8] sm:$0xff] }
 0x95e   :  { %v13176_v12 = vld [vmem:[#allocation18 + $0xa00] sm:$0xff]  ;;  %v18814_v27 = vcombine.low %v13312_v16, %v13316_v25 }
 0x95f   :  { %16069 = vmatpush2.bf16.msra.mxu0 %v18734_v45  ;;  %v13180_v45 = vld [vmem:[#allocation18 + $0xa20] sm:$0xff] }
 0x960   :  { %16070 = vmatprep.subr.bf16.mxu0 %v18727_v39  ;;  %16110 = vmatpush2.bf16.msra.mxu1 %v18862_v19  ;;  %v18815_v39 = vcombine.high %v13312_v16, %v13316_v25  ;;  %v13304_v19 = vld [vmem:[#allocation18 + $0xe00] sm:$0xff]  ;;  %v18679_v52 = vcombine.high %v13176_v12, %v13180_v45  ;;  %v12873_v16 = vld [vmem:[#allocation18 + $0x88] sm:$0xff] }
 0x961   :  { %16111 = vmatprep.subr.bf16.mxu1 %v18855_v24  ;;  %v13308_v30 = vld [vmem:[#allocation18 + $0xe20] sm:$0xff]  ;;  %v12670_v24 = vadd.f32 %v19934_v49, %v12629_v4  ;;  %v18545_v49 = vcombine.high %v19939_v36, %v19941_v21  ;;  %v12877_v25 = vld [vmem:[#allocation18 + $0xa8] sm:$0xff] }
 0x962   :  { %v18807_v11 = vcombine.high %v13304_v19, %v13308_v30  ;;  %v18806_v26 = vcombine.low %v13304_v19, %v13308_v30  ;;  %v18377_v4 = vcombine.high %v12873_v16, %v12877_v25  ;;  %v12861_v19 = vld [vmem:[#allocation18 + $0x28] sm:$0xff] }
 0x963   :  { %16071 = vmatpush2.bf16.msra.mxu0 %v18726_v2  ;;  %v12913_v2 = vld [vmem:[#allocation18 + $0x1c8] sm:$0xff] }
 0x964   :  { %16072 = vmatprep.subr.bf16.mxu0 %v18719_v34  ;;  %16112 = vmatpush2.bf16.msra.mxu1 %v18854_v35  ;;  %v18678_v34 = vcombine.low %v13176_v12, %v13180_v45  ;;  %v12844_v35 = vmax.f32 %v12670_v24, 0.0  ;;  %v18417_v38 = vcombine.high %v12913_v2, %v12917_v46  ;;  %v18416_v8 = vcombine.low %v12913_v2, %v12917_v46  ;;  %v12977_v24 = vld [vmem:[#allocation18 + $0x3c8] sm:$0xff] }
 0x965   :  { %16113 = vmatprep.subr.bf16.mxu1 %v18847_v22  ;;  %v12905_v22 = vld [vmem:[#allocation18 + $0x188] sm:$0xff]  ;;  %v18376_v12 = vcombine.low %v12873_v16, %v12877_v25  ;;  %v19083_v25 = vld [vmem:[#allocation16] sm:$0xff] }
 0x966   :  { %v18408_v41 = vcombine.low %v12905_v22, %v12909_v40  ;;  %v12969_v46 = vld [vmem:[#allocation18 + $0x388] sm:$0xff] }
 0x967   :  { %16073 = vmatpush2.bf16.msra.mxu0 %v18718_v0  ;;  %v19951_v0 = vpack.c.bf16 %v12844_v35, %v12844_v35 }
 0x968   :  { %16074 = vmatprep.subr.bf16.mxu0 %v18711_v20  ;;  %16114 = vmatpush2.bf16.msra.mxu1 %v18846_v61  ;;  %v18409_v20 = vcombine.high %v12905_v22, %v12909_v40  ;;  %v12897_v61 = vld [vmem:[#allocation18 + $0x148] sm:$0xff] }
 0x969   :  { %16115 = vmatprep.subr.bf16.mxu1 %v18839_v6  ;;  %v18400_v57 = vcombine.low %v12897_v61, %v12901_v33 }
 0x96b   :  { %16075 = vmatpush2.bf16.msra.mxu0 %v18710_v44  ;;  %v18401_v44 = vcombine.high %v12897_v61, %v12901_v33  ;;  %v12945_v33 = vld [vmem:[#allocation18 + $0x2c8] sm:$0xff] }
 0x96c   :  { %16076 = vmatprep.subr.bf16.mxu0 %v18703_v54  ;;  %16116 = vmatpush2.bf16.msra.mxu1 %v18838_v55  ;;  %v12889_v55 = vld [vmem:[#allocation18 + $0x108] sm:$0xff] }
 0x96d   :  { %16117 = vmatprep.subr.bf16.mxu1 %v18831_v18  ;;  %v18392_v15 = vcombine.low %v12889_v55, %v12893_v56 }
 0x96f   :  { %16077 = vmatpush2.bf16.msra.mxu0 %v18702_v29  ;;  %v18393_v29 = vcombine.high %v12889_v55, %v12893_v56  ;;  %v12937_v56 = vld [vmem:[#allocation18 + $0x288] sm:$0xff] }
 0x970   :  { %16078 = vmatprep.subr.bf16.mxu0 %v18695_v31  ;;  %16118 = vmatpush2.bf16.msra.mxu1 %v18830_v13  ;;  %v12881_v13 = vld [vmem:[#allocation18 + $0xc8] sm:$0xff] }
 0x971   :  { %16119 = vmatprep.subr.bf16.mxu1 %v18823_v37  ;;  %v18385_v37 = vcombine.high %v12881_v13, %v12885_v3 }
 0x973   :  { %16079 = vmatpush2.bf16.msra.mxu0 %v18694_v23  ;;  %v18384_v23 = vcombine.low %v12881_v13, %v12885_v3  ;;  %v12921_v3 = vld [vmem:[#allocation18 + $0x208] sm:$0xff] }
 0x974   :  { %16080 = vmatprep.subr.bf16.mxu0 %v18687_v28  ;;  %16120 = vmatpush2.bf16.msra.mxu1 %v18822_v60  ;;  %v12865_v28 = vld [vmem:[#allocation18 + $0x48] sm:$0xff] }
 0x975   :  { %16121 = vmatprep.subr.bf16.mxu1 %v18815_v39  ;;  %v12869_v60 = vld [vmem:[#allocation18 + $0x68] sm:$0xff] }
 0x976   :  { %v18369_v45 = vcombine.high %v12865_v28, %v12869_v60  ;;  %v12857_v39 = vld [vmem:[#allocation18 + $0x8] sm:$0xff]  ;;  %v18368_v30 = vcombine.low %v12865_v28, %v12869_v60  ;;  %v9615_v60 = vrot.slane %v19083_v25, %v19666_v47 }
 0x977   :  { %16081 = vmatpush2.bf16.msra.mxu0 %v18686_v1  ;;  %v18361_v1 = vcombine.high %v12857_v39, %v12861_v19  ;;  %v13173_v28 = vld [vmem:[#allocation18 + $0x9e8] sm:$0xff] }
 0x978   :  { %16082 = vmatprep.subr.bf16.mxu0 %v18679_v52  ;;  %16122 = vmatpush2.bf16.msra.mxu1 %v18814_v27  ;;  %v12981_v52 = vld [vmem:[#allocation18 + $0x3e8] sm:$0xff]  ;;  %v18360_v27 = vcombine.low %v12857_v39, %v12861_v19 }
 0x979   :  { %16123 = vmatprep.subr.bf16.mxu1 %v18807_v11  ;;  %v18481_v2 = vcombine.high %v12977_v24, %v12981_v52  ;;  %v12973_v11 = vld [vmem:[#allocation18 + $0x3a8] sm:$0xff] }
 0x97a   :  { %v18473_v35 = vcombine.high %v12969_v46, %v12973_v11  ;;  %v18472_v22 = vcombine.low %v12969_v46, %v12973_v11  ;;  %v13161_v19 = vld [vmem:[#allocation18 + $0x988] sm:$0xff] }
 0x97b   :  { %16083 = vmatpush2.bf16.msra.mxu0 %v18678_v34  ;;  %v18480_v34 = vcombine.low %v12977_v24, %v12981_v52  ;;  %v13157_v46 = vld [vmem:[#allocation18 + $0x968] sm:$0xff] }
 0x97c   :  { %16134 = vmatprep.subr.bf16.mxu0 %v18417_v38  ;;  %16124 = vmatpush2.bf16.msra.mxu1 %v18806_v26  ;;  %v12961_v38 = vld [vmem:[#allocation18 + $0x348] sm:$0xff] }
 0x97d   :  { %16175 = vmatprep.subr.bf16.mxu1 %v18545_v49  ;;  %v12965_v26 = vld [vmem:[#allocation18 + $0x368] sm:$0xff] }
 0x97e   :  { %v19953_v62 = vpop.f32.mrf.mxu0  ;;  %16085 = vmatmul.mubr.bf16.vlgmr.msra.gmra.mxu0 %v19951_v0  ;;  %v18465_v40 = vcombine.high %v12961_v38, %v12965_v26  ;;  %v12953_v49 = vld [vmem:[#allocation18 + $0x308] sm:$0xff] }
 0x97f   :  { %v19956_v6 = vpop.f32.mrf.mxu1  ;;  %16135 = vmatpush1.bf16.msra.mxu0 %v18416_v8  ;;  %16166 = vmatprep.mubr.bf16.mxu0 %v19907_v14  ;;  %v12957_v8 = vld [vmem:[#allocation18 + $0x328] sm:$0xff] }
 0x980   :  { %v19959_v42 = vpop.f32.mrf.mxu0  ;;  %16136 = vmatprep.subr.bf16.mxu0 %v18409_v20  ;;  %v18464_v20 = vcombine.low %v12961_v38, %v12965_v26  ;;  %v18457_v61 = vcombine.high %v12953_v49, %v12957_v8 }
 0x981   :  { %v19961_v54 = vpop.f32.mrf.mxu1 }
 0x982   :  { %v12714_v7 = vpop.f32.mrf.mxu0 }
 0x983   :  { %v12755_v18 = vpop.f32.mrf.mxu1  ;;  %16137 = vmatpush1.bf16.msra.mxu0 %v18408_v41  ;;  %v12949_v41 = vld [vmem:[#allocation18 + $0x2e8] sm:$0xff] }
 0x984   :  { %v12715_v63 = vpop.f32.mrf.mxu0  ;;  %16138 = vmatprep.subr.bf16.mxu0 %v18401_v44  ;;  %v18456_v44 = vcombine.low %v12953_v49, %v12957_v8  ;;  %v18449_v55 = vcombine.high %v12945_v33, %v12949_v41  ;;  %v12941_v7 = vld [vmem:[#allocation18 + $0x2a8] sm:$0xff]  ;;  %v18448_v18 = vcombine.low %v12945_v33, %v12949_v41 }
 0x985   :  { %v12756_v31 = vpop.f32.mrf.mxu1  ;;  %v12929_v63 = vld [vmem:[#allocation18 + $0x248] sm:$0xff] }
 0x986   :  { %v18440_v31 = vcombine.low %v12937_v56, %v12941_v7  ;;  %v13149_v8 = vld [vmem:[#allocation18 + $0x928] sm:$0xff] }
 0x987   :  { %16139 = vmatpush1.bf16.msra.mxu0 %v18400_v57  ;;  %v18441_v57 = vcombine.high %v12937_v56, %v12941_v7 }
 0x988   :  { %16140 = vmatprep.subr.bf16.mxu0 %v18393_v29  ;;  %v12933_v29 = vld [vmem:[#allocation18 + $0x268] sm:$0xff] }
 0x989   :  { %v18433_v13 = vcombine.high %v12929_v63, %v12933_v29 }
 0x98b   :  { %16141 = vmatpush1.bf16.msra.mxu0 %v18392_v15  ;;  %v12925_v15 = vld [vmem:[#allocation18 + $0x228] sm:$0xff] }
 0x98c   :  { %16142 = vmatprep.subr.bf16.mxu0 %v18385_v37  ;;  %v18432_v37 = vcombine.low %v12929_v63, %v12933_v29  ;;  %v18425_v16 = vcombine.high %v12921_v3, %v12925_v15  ;;  %v13137_v63 = vld [vmem:[#allocation18 + $0x8c8] sm:$0xff] }
 0x98d   :  { %v13141_v29 = vld [vmem:[#allocation18 + $0x8e8] sm:$0xff] }
 0x98f   :  { %16143 = vmatpush1.bf16.msra.mxu0 %v18384_v23  ;;  %v9611_v23 = vrot.slane %v19083_v25, %v19663_v58  ;;  %v13029_v25 = vld [vmem:[#allocation18 + $0x568] sm:$0xff] }
 0x990   :  { %16144 = vmatprep.subr.bf16.mxu0 %v18377_v4  ;;  %v13169_v4 = vld [vmem:[#allocation18 + $0x9c8] sm:$0xff] }
 0x991   :  { %v12711_v39 = vadd.f32 %v19953_v62, %v9611_v23  ;;  %v18672_v24 = vcombine.low %v13169_v4, %v13173_v28  ;;  %v13129_v23 = vld [vmem:[#allocation18 + $0x888] sm:$0xff] }
 0x993   :  { %16145 = vmatpush1.bf16.msra.mxu0 %v18376_v12  ;;  %v18424_v12 = vcombine.low %v12921_v3, %v12925_v15 }
 0x994   :  { %16146 = vmatprep.subr.bf16.mxu0 %v18369_v45  ;;  %v18673_v45 = vcombine.high %v13169_v4, %v13173_v28  ;;  %v13133_v4 = vld [vmem:[#allocation18 + $0x8a8] sm:$0xff] }
 0x997   :  { %16147 = vmatpush1.bf16.msra.mxu0 %v18368_v30  ;;  %v13165_v30 = vld [vmem:[#allocation18 + $0x9a8] sm:$0xff] }
 0x998   :  { %16148 = vmatprep.subr.bf16.mxu0 %v18361_v1  ;;  %v12713_v1 = vadd.f32 %v19959_v42, %v9615_v60  ;;  %v18665_v52 = vcombine.high %v13161_v19, %v13165_v30  ;;  %v18664_v62 = vcombine.low %v13161_v19, %v13165_v30  ;;  %v18640_v60 = vcombine.low %v13137_v63, %v13141_v29  ;;  %v13021_v19 = vld [vmem:[#allocation18 + $0x528] sm:$0xff] }
 0x999   :  { %v13121_v30 = vld [vmem:[#allocation18 + $0x848] sm:$0xff] }
 0x99b   :  { %16149 = vmatpush1.bf16.msra.mxu0 %v18360_v27  ;;  %v12752_v27 = vadd.f32 %v19956_v6, %v12711_v39  ;;  %v13145_v6 = vld [vmem:[#allocation18 + $0x908] sm:$0xff] }
 0x99c   :  { %16150 = vmatprep.subr.bf16.mxu0 %v18481_v2  ;;  %v13153_v2 = vld [vmem:[#allocation18 + $0x948] sm:$0xff]  ;;  %v18648_v3 = vcombine.low %v13145_v6, %v13149_v8 }
 0x99d   :  { %v18657_v26 = vcombine.high %v13153_v2, %v13157_v46  ;;  %v18656_v41 = vcombine.low %v13153_v2, %v13157_v46  ;;  %v13017_v39 = vld [vmem:[#allocation18 + $0x508] sm:$0xff] }
 0x99e   :  { %v18521_v36 = vcombine.high %v13017_v39, %v13021_v19  ;;  %v13113_v2 = vld [vmem:[#allocation18 + $0x808] sm:$0xff] }
 0x99f   :  { %16151 = vmatpush2.bf16.msra.mxu0 %v18480_v34  ;;  %v12754_v34 = vadd.f32 %v19961_v54, %v12713_v1  ;;  %v13125_v1 = vld [vmem:[#allocation18 + $0x868] sm:$0xff] }
 0x9a0   :  { %16152 = vmatprep.subr.bf16.mxu0 %v18473_v35  ;;  %v18625_v21 = vcombine.high %v13121_v30, %v13125_v1  ;;  %v13117_v46 = vld [vmem:[#allocation18 + $0x828] sm:$0xff] }
 0x9a3   :  { %16153 = vmatpush2.bf16.msra.mxu0 %v18472_v22 }
 0x9a4   :  { %16154 = vmatprep.subr.bf16.mxu0 %v18465_v40 }
 0x9a7   :  { %16155 = vmatpush2.bf16.msra.mxu0 %v18464_v20 }
 0x9a8   :  { %16156 = vmatprep.subr.bf16.mxu0 %v18457_v61 }
 0x9ab   :  { %16157 = vmatpush2.bf16.msra.mxu0 %v18456_v44 }
 0x9ac   :  { %16158 = vmatprep.subr.bf16.mxu0 %v18449_v55  ;;  %v18649_v55 = vcombine.high %v13145_v6, %v13149_v8 }
 0x9af   :  { %16159 = vmatpush2.bf16.msra.mxu0 %v18448_v18  ;;  %v13033_v18 = vld [vmem:[#allocation18 + $0x588] sm:$0xff] }
 0x9b0   :  { %16160 = vmatprep.subr.bf16.mxu0 %v18441_v57  ;;  %v13037_v57 = vld [vmem:[#allocation18 + $0x5a8] sm:$0xff] }
 0x9b1   :  { %v18537_v15 = vcombine.high %v13033_v18, %v13037_v57  ;;  %v18536_v28 = vcombine.low %v13033_v18, %v13037_v57  ;;  %v12989_v18 = vld [vmem:[#allocation18 + $0x428] sm:$0xff] }
 0x9b2   :  { %v13217_v57 = vld [vmem:[#allocation18 + $0xb48] sm:$0xff] }
 0x9b3   :  { %16161 = vmatpush2.bf16.msra.mxu0 %v18440_v31 }
 0x9b4   :  { %16162 = vmatprep.subr.bf16.mxu0 %v18433_v13 }
 0x9b7   :  { %16163 = vmatpush2.bf16.msra.mxu0 %v18432_v37  ;;  %v18641_v37 = vcombine.high %v13137_v63, %v13141_v29  ;;  %v13221_v63 = vld [vmem:[#allocation18 + $0xb68] sm:$0xff] }
 0x9b8   :  { %16164 = vmatprep.subr.bf16.mxu0 %v18425_v16  ;;  %v13025_v16 = vld [vmem:[#allocation18 + $0x548] sm:$0xff] }
 0x9bb   :  { %16165 = vmatpush2.bf16.msra.mxu0 %v18424_v12  ;;  %v18529_v12 = vcombine.high %v13025_v16, %v13029_v25 }
 0x9bc   :  { %16216 = vmatprep.subr.bf16.mxu0 %v18673_v45  ;;  %v18633_v45 = vcombine.high %v13129_v23, %v13133_v4 }
 0x9be   :  { %v12792_v11 = vpop.f32.mrf.mxu0  ;;  %16167 = vmatmul.mubr.bf16.vlgmr.msra.gmra.mxu0 %v19926_v59 }
 0x9bf   :  { %v12793_v35 = vadd.f32 %v12792_v11, %v12752_v27  ;;  %v12833_v38 = vpop.f32.mrf.mxu1  ;;  %16217 = vmatpush1.bf16.msra.mxu0 %v18672_v24  ;;  %16248 = vmatprep.mubr.bf16.mxu0 %v19937_v50  ;;  %v18528_v24 = vcombine.low %v13025_v16, %v13029_v25  ;;  %v13013_v27 = vld [vmem:[#allocation18 + $0x4e8] sm:$0xff]  ;;  %v18520_v11 = vcombine.low %v13017_v39, %v13021_v19 }
 0x9c0   :  { %v12794_v42 = vpop.f32.mrf.mxu0  ;;  %16218 = vmatprep.subr.bf16.mxu0 %v18665_v52  ;;  %v18632_v52 = vcombine.low %v13129_v23, %v13133_v4  ;;  %v13105_v16 = vld [vmem:[#allocation18 + $0x7c8] sm:$0xff] }
 0x9c1   :  { %v12834_v22 = vadd.f32 %v12833_v38, %v12793_v35  ;;  %v12795_v40 = vadd.f32 %v12794_v42, %v12754_v34  ;;  %v12835_v49 = vpop.f32.mrf.mxu1  ;;  %v18624_v34 = vcombine.low %v13121_v30, %v13125_v1  ;;  %v18617_v38 = vcombine.high %v13113_v2, %v13117_v46  ;;  %v13005_v42 = vld [vmem:[#allocation18 + $0x4a8] sm:$0xff] }
 0x9c2   :  { %v12796_v20 = vpop.f32.mrf.mxu0  ;;  %v13109_v25 = vld [vmem:[#allocation18 + $0x7e8] sm:$0xff] }
 0x9c3   :  { %v12836_v61 = vadd.f32 %v12835_v49, %v12795_v40  ;;  %v12837_v33 = vpop.f32.mrf.mxu1  ;;  %16219 = vmatpush1.bf16.msra.mxu0 %v18664_v62  ;;  %v12846_v54 = vmax.f32 %v12834_v22, 0.0  ;;  %v13001_v62 = vld [vmem:[#allocation18 + $0x488] sm:$0xff]  ;;  %v18616_v49 = vcombine.low %v13113_v2, %v13117_v46 }
 0x9c4   :  { %v12797_v44 = vpop.f32.mrf.mxu0  ;;  %16220 = vmatprep.subr.bf16.mxu0 %v18657_v26  ;;  %v13233_v26 = vld [vmem:[#allocation18 + $0xbc8] sm:$0xff]  ;;  %v18505_v6 = vcombine.high %v13001_v62, %v13005_v42 }
 0x9c5   :  { %v12847_v56 = vmax.f32 %v12836_v61, 0.0  ;;  %v12838_v7 = vpop.f32.mrf.mxu1  ;;  %v19973_v13 = vpack.c.bf16 %v12846_v54, %v12846_v54  ;;  %v13237_v22 = vld [vmem:[#allocation18 + $0xbe8] sm:$0xff]  ;;  %v18504_v54 = vcombine.low %v13001_v62, %v13005_v42 }
 0x9c6   :  { %v18737_v8 = vcombine.high %v13233_v26, %v13237_v22  ;;  %v12993_v20 = vld [vmem:[#allocation18 + $0x448] sm:$0xff]  ;;  %v18736_v44 = vcombine.low %v13233_v26, %v13237_v22 }
 0x9c7   :  { %v19971_v31 = vpack.c.bf16 %v12847_v56, %v12847_v56  ;;  %16221 = vmatpush1.bf16.msra.mxu0 %v18656_v41  ;;  %v12997_v61 = vld [vmem:[#allocation18 + $0x468] sm:$0xff] }
 0x9c8   :  { %16222 = vmatprep.subr.bf16.mxu0 %v18649_v55  ;;  %v13225_v33 = vld [vmem:[#allocation18 + $0xb88] sm:$0xff]  ;;  %v18497_v55 = vcombine.high %v12993_v20, %v12997_v61  ;;  %v18496_v29 = vcombine.low %v12993_v20, %v12997_v61 }
 0x9c9   :  { %16125 = vmatprep.mubr.bf16.mxu1 %v19971_v31  ;;  %v13229_v41 = vld [vmem:[#allocation18 + $0xba8] sm:$0xff] }
 0x9ca   :  { %16126 = vmatmul.mubr.bf16.vlgmr.msra.gmra.mxu1 %v19973_v13  ;;  %v18729_v56 = vcombine.high %v13225_v33, %v13229_v41  ;;  %v12985_v7 = vld [vmem:[#allocation18 + $0x408] sm:$0xff] }
 0x9cb   :  { %16176 = vmatpush1.bf16.msra.mxu1 %v18544_v51  ;;  %16207 = vmatprep.mubr.bf16.mxu1 %v19910_v9  ;;  %v13009_v51 = vld [vmem:[#allocation18 + $0x4c8] sm:$0xff] }
 0x9cc   :  { %16223 = vmatpush1.bf16.msra.mxu0 %v18648_v3  ;;  %16177 = vmatprep.subr.bf16.mxu1 %v18537_v15  ;;  %v18513_v35 = vcombine.high %v13009_v51, %v13013_v27  ;;  %v18512_v40 = vcombine.low %v13009_v51, %v13013_v27  ;;  %v18728_v3 = vcombine.low %v13225_v33, %v13229_v41  ;;  %v13209_v23 = vld [vmem:[#allocation18 + $0xb08] sm:$0xff] }
 0x9cd   :  { %16224 = vmatprep.subr.bf16.mxu0 %v18641_v37  ;;  %v18489_v15 = vcombine.high %v12985_v7, %v12989_v18  ;;  %v18721_v37 = vcombine.high %v13217_v57, %v13221_v63  ;;  %v13213_v4 = vld [vmem:[#allocation18 + $0xb28] sm:$0xff] }
 0x9ce   :  { %v13097_v39 = vld [vmem:[#allocation18 + $0x788] sm:$0xff] }
 0x9cf   :  { %16178 = vmatpush1.bf16.msra.mxu1 %v18536_v28  ;;  %v18488_v28 = vcombine.low %v12985_v7, %v12989_v18  ;;  %v13101_v19 = vld [vmem:[#allocation18 + $0x7a8] sm:$0xff] }
 0x9d0   :  { %16225 = vmatpush1.bf16.msra.mxu0 %v18640_v60  ;;  %16179 = vmatprep.subr.bf16.mxu1 %v18529_v12  ;;  %v18720_v60 = vcombine.low %v13217_v57, %v13221_v63  ;;  %v18609_v12 = vcombine.high %v13105_v16, %v13109_v25  ;;  %v13201_v30 = vld [vmem:[#allocation18 + $0xac8] sm:$0xff]  ;;  %v12914_v57 = vld [vmem:[#allocation18 + $0x1d0] sm:$0xff] }
 0x9d1   :  { %16226 = vmatprep.subr.bf16.mxu0 %v18633_v45  ;;  %v18713_v45 = vcombine.high %v13209_v23, %v13213_v4  ;;  %v13205_v1 = vld [vmem:[#allocation18 + $0xae8] sm:$0xff]  ;;  %v12918_v63 = vld [vmem:[#allocation18 + $0x1f0] sm:$0xff] }
 0x9d2   :  { %v13089_v51 = vld [vmem:[#allocation18 + $0x748] sm:$0xff] }
 0x9d3   :  { %16180 = vmatpush1.bf16.msra.mxu1 %v18528_v24  ;;  %v18608_v24 = vcombine.low %v13105_v16, %v13109_v25  ;;  %v13093_v27 = vld [vmem:[#allocation18 + $0x768] sm:$0xff]  ;;  %v18419_v16 = vcombine.high %v12914_v57, %v12918_v63 }
 0x9d4   :  { %16227 = vmatpush1.bf16.msra.mxu0 %v18632_v52  ;;  %16181 = vmatprep.subr.bf16.mxu1 %v18521_v36  ;;  %v18712_v52 = vcombine.low %v13209_v23, %v13213_v4  ;;  %v18601_v36 = vcombine.high %v13097_v39, %v13101_v19  ;;  %v13193_v2 = vld [vmem:[#allocation18 + $0xa88] sm:$0xff]  ;;  %v12906_v4 = vld [vmem:[#allocation18 + $0x190] sm:$0xff] }
 0x9d5   :  { %16228 = vmatprep.subr.bf16.mxu0 %v18625_v21  ;;  %v18705_v21 = vcombine.high %v13201_v30, %v13205_v1  ;;  %v13197_v46 = vld [vmem:[#allocation18 + $0xaa8] sm:$0xff] }
 0x9d6   :  { %v13081_v62 = vld [vmem:[#allocation18 + $0x708] sm:$0xff] }
 0x9d7   :  { %16182 = vmatpush1.bf16.msra.mxu1 %v18520_v11  ;;  %v18600_v11 = vcombine.low %v13097_v39, %v13101_v19  ;;  %v13085_v42 = vld [vmem:[#allocation18 + $0x728] sm:$0xff] }
 0x9d8   :  { %16229 = vmatpush1.bf16.msra.mxu0 %v18624_v34  ;;  %16183 = vmatprep.subr.bf16.mxu1 %v18513_v35  ;;  %v18704_v34 = vcombine.low %v13201_v30, %v13205_v1  ;;  %v18593_v35 = vcombine.high %v13089_v51, %v13093_v27  ;;  %v13185_v26 = vld [vmem:[#allocation18 + $0xa48] sm:$0xff] }
 0x9d9   :  { %16230 = vmatprep.subr.bf16.mxu0 %v18617_v38  ;;  %v18697_v38 = vcombine.high %v13193_v2, %v13197_v46  ;;  %v13189_v22 = vld [vmem:[#allocation18 + $0xa68] sm:$0xff] }
 0x9da   :  { %v13073_v20 = vld [vmem:[#allocation18 + $0x6c8] sm:$0xff] }
 0x9db   :  { %16184 = vmatpush1.bf16.msra.mxu1 %v18512_v40  ;;  %v18592_v40 = vcombine.low %v13089_v51, %v13093_v27  ;;  %v13077_v61 = vld [vmem:[#allocation18 + $0x6e8] sm:$0xff] }
 0x9dc   :  { %16231 = vmatpush1.bf16.msra.mxu0 %v18616_v49  ;;  %16185 = vmatprep.subr.bf16.mxu1 %v18505_v6  ;;  %v18696_v49 = vcombine.low %v13193_v2, %v13197_v46  ;;  %v18585_v6 = vcombine.high %v13081_v62, %v13085_v42  ;;  %v13177_v33 = vld [vmem:[#allocation18 + $0xa08] sm:$0xff] }
 0x9dd   :  { %16232 = vmatprep.subr.bf16.mxu0 %v18737_v8  ;;  %v18689_v8 = vcombine.high %v13185_v26, %v13189_v22  ;;  %v13181_v41 = vld [vmem:[#allocation18 + $0xa28] sm:$0xff] }
 0x9de   :  { %v13065_v7 = vld [vmem:[#allocation18 + $0x688] sm:$0xff] }
 0x9df   :  { %16186 = vmatpush1.bf16.msra.mxu1 %v18504_v54  ;;  %v18584_v54 = vcombine.low %v13081_v62, %v13085_v42  ;;  %v13069_v18 = vld [vmem:[#allocation18 + $0x6a8] sm:$0xff] }
 0x9e0   :  { %16233 = vmatpush2.bf16.msra.mxu0 %v18736_v44  ;;  %16187 = vmatprep.subr.bf16.mxu1 %v18497_v55  ;;  %v18688_v44 = vcombine.low %v13185_v26, %v13189_v22  ;;  %v18577_v55 = vcombine.high %v13073_v20, %v13077_v61  ;;  %v13057_v25 = vld [vmem:[#allocation18 + $0x648] sm:$0xff]  ;;  %v12890_v22 = vld [vmem:[#allocation18 + $0x110] sm:$0xff] }
 0x9e1   :  { %16234 = vmatprep.subr.bf16.mxu0 %v18729_v56  ;;  %v18681_v56 = vcombine.high %v13177_v33, %v13181_v41  ;;  %v13061_v23 = vld [vmem:[#allocation18 + $0x668] sm:$0xff] }
 0x9e2   :  { %v18561_v19 = vcombine.high %v13057_v25, %v13061_v23  ;;  %v13049_v1 = vld [vmem:[#allocation18 + $0x608] sm:$0xff]  ;;  %v18560_v2 = vcombine.low %v13057_v25, %v13061_v23 }
 0x9e3   :  { %16188 = vmatpush1.bf16.msra.mxu1 %v18496_v29  ;;  %v18576_v29 = vcombine.low %v13073_v20, %v13077_v61  ;;  %v13297_v62 = vld [vmem:[#allocation18 + $0xdc8] sm:$0xff] }
 0x9e4   :  { %16235 = vmatpush2.bf16.msra.mxu0 %v18728_v3  ;;  %16189 = vmatprep.subr.bf16.mxu1 %v18489_v15  ;;  %v18680_v3 = vcombine.low %v13177_v33, %v13181_v41  ;;  %v18569_v15 = vcombine.high %v13065_v7, %v13069_v18  ;;  %v13301_v42 = vld [vmem:[#allocation18 + $0xde8] sm:$0xff] }
 0x9e5   :  { %16236 = vmatprep.subr.bf16.mxu0 %v18721_v37  ;;  %v13368_v37 = vld [vmem:[#allocation19] sm:$0xff]  ;;  %v18801_v33 = vcombine.high %v13297_v62, %v13301_v42 }
 0x9e6   :  { %v13377_v39 = vrot.slane %v13368_v37, %v19539_v10 }
 0x9e7   :  { %16190 = vmatpush1.bf16.msra.mxu1 %v18488_v28  ;;  %v12910_v28 = vld [vmem:[#allocation18 + $0x1b0] sm:$0xff] }
 0x9e8   :  { %16237 = vmatpush2.bf16.msra.mxu0 %v18720_v60  ;;  %16191 = vmatprep.subr.bf16.mxu1 %v18609_v12  ;;  %v18568_v60 = vcombine.low %v13065_v7, %v13069_v18  ;;  %v13373_v12 = vrot.slane %v13368_v37, %v19534_v5  ;;  %v18411_v30 = vcombine.high %v12906_v4, %v12910_v28  ;;  %v12886_v7 = vld [vmem:[#allocation18 + $0xf0] sm:$0xff] }
 0x9e9   :  { %16238 = vmatprep.subr.bf16.mxu0 %v18713_v45  ;;  %v18418_v45 = vcombine.low %v12914_v57, %v12918_v63  ;;  %v18410_v46 = vcombine.low %v12906_v4, %v12910_v28  ;;  %v18800_v18 = vcombine.low %v13297_v62, %v13301_v42  ;;  %v12874_v37 = vld [vmem:[#allocation18 + $0x90] sm:$0xff] }
 0x9eb   :  { %16192 = vmatpush2.bf16.msra.mxu1 %v18608_v24  ;;  %v13053_v24 = vld [vmem:[#allocation18 + $0x628] sm:$0xff] }
 0x9ec   :  { %16239 = vmatpush2.bf16.msra.mxu0 %v18712_v52  ;;  %16193 = vmatprep.subr.bf16.mxu1 %v18601_v36  ;;  %v12898_v36 = vld [vmem:[#allocation18 + $0x150] sm:$0xff] }
 0x9ed   :  { %16240 = vmatprep.subr.bf16.mxu0 %v18705_v21  ;;  %v12902_v21 = vld [vmem:[#allocation18 + $0x170] sm:$0xff] }
 0x9ee   :  { %v18402_v61 = vcombine.low %v12898_v36, %v12902_v21 }
 0x9ef   :  { %16194 = vmatpush2.bf16.msra.mxu1 %v18600_v11  ;;  %v18553_v11 = vcombine.high %v13049_v1, %v13053_v24 }
 0x9f0   :  { %16241 = vmatpush2.bf16.msra.mxu0 %v18704_v34  ;;  %16195 = vmatprep.subr.bf16.mxu1 %v18593_v35 }
 0x9f1   :  { %16242 = vmatprep.subr.bf16.mxu0 %v18697_v38  ;;  %v18403_v38 = vcombine.high %v12898_v36, %v12902_v21  ;;  %v13269_v36 = vld [vmem:[#allocation18 + $0xce8] sm:$0xff]  ;;  %v12858_v21 = vld [vmem:[#allocation18 + $0x10] sm:$0xff] }
 0x9f3   :  { %16196 = vmatpush2.bf16.msra.mxu1 %v18592_v40  ;;  %v12894_v40 = vld [vmem:[#allocation18 + $0x130] sm:$0xff] }
 0x9f4   :  { %16243 = vmatpush2.bf16.msra.mxu0 %v18696_v49  ;;  %16197 = vmatprep.subr.bf16.mxu1 %v18585_v6  ;;  %v18394_v57 = vcombine.low %v12890_v22, %v12894_v40 }
 0x9f5   :  { %16244 = vmatprep.subr.bf16.mxu0 %v18689_v8  ;;  %v18552_v8 = vcombine.low %v13049_v1, %v13053_v24 }
 0x9f7   :  { %16198 = vmatpush2.bf16.msra.mxu1 %v18584_v54  ;;  %v18395_v54 = vcombine.high %v12890_v22, %v12894_v40  ;;  %v13249_v40 = vld [vmem:[#allocation18 + $0xc48] sm:$0xff] }
 0x9f8   :  { %16245 = vmatpush2.bf16.msra.mxu0 %v18688_v44  ;;  %16199 = vmatprep.subr.bf16.mxu1 %v18577_v55  ;;  %v13289_v44 = vld [vmem:[#allocation18 + $0xd88] sm:$0xff] }
 0x9f9   :  { %16246 = vmatprep.subr.bf16.mxu0 %v18681_v56  ;;  %v13293_v55 = vld [vmem:[#allocation18 + $0xda8] sm:$0xff]  ;;  %v12882_v56 = vld [vmem:[#allocation18 + $0xd0] sm:$0xff] }
 0x9fa   :  { %v18793_v63 = vcombine.high %v13289_v44, %v13293_v55  ;;  %v18792_v25 = vcombine.low %v13289_v44, %v13293_v55  ;;  %v18386_v23 = vcombine.low %v12882_v56, %v12886_v7  ;;  %v13241_v44 = vld [vmem:[#allocation18 + $0xc08] sm:$0xff] }
 0x9fb   :  { %16200 = vmatpush2.bf16.msra.mxu1 %v18576_v29  ;;  %v18387_v29 = vcombine.high %v12882_v56, %v12886_v7  ;;  %v13245_v55 = vld [vmem:[#allocation18 + $0xc28] sm:$0xff]  ;;  %v12962_v56 = vld [vmem:[#allocation18 + $0x350] sm:$0xff] }
 0x9fc   :  { %16247 = vmatpush2.bf16.msra.mxu0 %v18680_v3  ;;  %16201 = vmatprep.subr.bf16.mxu1 %v18569_v15  ;;  %v13281_v3 = vld [vmem:[#allocation18 + $0xd48] sm:$0xff]  ;;  %v12966_v7 = vld [vmem:[#allocation18 + $0x370] sm:$0xff] }
 0x9fd   :  { %16298 = vmatprep.subr.bf16.mxu0 %v18419_v16  ;;  %v13285_v15 = vld [vmem:[#allocation18 + $0xd68] sm:$0xff]  ;;  %v12878_v16 = vld [vmem:[#allocation18 + $0xb0] sm:$0xff] }
 0x9fe   :  { %v16004_v52 = vpop.f32.mrf.mxu0  ;;  %v18785_v4 = vcombine.high %v13281_v3, %v13285_v15  ;;  %v18379_v28 = vcombine.high %v12874_v37, %v12878_v16 }
 0x9ff   :  { %v16005_v51 = vadd.f32 %v16004_v52, %v13373_v12  ;;  %v16045_v27 = vpop.f32.mrf.mxu1  ;;  %16202 = vmatpush2.bf16.msra.mxu1 %v18568_v60  ;;  %16249 = vmatmul.mubr.bf16.vlgmr.msra.gmra.mxu0 %v19951_v0  ;;  %v13273_v60 = vld [vmem:[#allocation18 + $0xd08] sm:$0xff] }
 0xa00   :  { %16299 = vmatpush1.bf16.msra.mxu0 %v18418_v45  ;;  %16330 = vmatprep.mubr.bf16.mxu0 %v19907_v14  ;;  %v16006_v5 = vpop.f32.mrf.mxu0  ;;  %v13277_v12 = vld [vmem:[#allocation18 + $0xd28] sm:$0xff]  ;;  %v12866_v45 = vld [vmem:[#allocation18 + $0x50] sm:$0xff] }
 0xa01   :  { %v19985_v10 = vadd.f32 %v16045_v27, %v16005_v51  ;;  %v16007_v34 = vadd.f32 %v16006_v5, %v13377_v39  ;;  %v16047_v35 = vpop.f32.mrf.mxu1  ;;  %16203 = vmatprep.subr.bf16.mxu1 %v18561_v19  ;;  %16300 = vmatprep.subr.bf16.mxu0 %v18411_v30  ;;  %v12870_v39 = vld [vmem:[#allocation18 + $0x70] sm:$0xff]  ;;  %v18784_v19 = vcombine.low %v13281_v3, %v13285_v15  ;;  %v13265_v52 = vld [vmem:[#allocation18 + $0xcc8] sm:$0xff] }
 0xa02   :  { %v16008_v26 = vpop.f32.mrf.mxu0  ;;  %v18378_v30 = vcombine.low %v12874_v37, %v12878_v16  ;;  %v18777_v1 = vcombine.high %v13273_v60, %v13277_v12  ;;  %v18371_v24 = vcombine.high %v12866_v45, %v12870_v39  ;;  %v12862_v51 = vld [vmem:[#allocation18 + $0x30] sm:$0xff]  ;;  %v18776_v27 = vcombine.low %v13273_v60, %v13277_v12  ;;  %v13361_v3 = vld [vmem:[#allocation18 + $0xfc8] sm:$0xff] }
 0xa03   :  { %v19987_v49 = vadd.f32 %v16047_v35, %v16007_v34  ;;  %v16049_v6 = vpop.f32.mrf.mxu1  ;;  %16204 = vmatpush2.bf16.msra.mxu1 %v18560_v2  ;;  %v18370_v2 = vcombine.low %v12866_v45, %v12870_v39  ;;  %v18769_v5 = vcombine.high %v13265_v52, %v13269_v36  ;;  %v13261_v34 = vld [vmem:[#allocation18 + $0xca8] sm:$0xff]  ;;  %v12978_v35 = vld [vmem:[#allocation18 + $0x3d0] sm:$0xff]  ;;  %v18768_v62 = vcombine.low %v13265_v52, %v13269_v36 }
 0xa04   :  { %16301 = vmatpush1.bf16.msra.mxu0 %v18410_v46  ;;  %v16009_v20 = vpop.f32.mrf.mxu0  ;;  %16205 = vmatprep.subr.bf16.mxu1 %v18553_v11  ;;  %v18363_v46 = vcombine.high %v12858_v21, %v12862_v51  ;;  %v13257_v11 = vld [vmem:[#allocation18 + $0xc88] sm:$0xff]  ;;  %v18362_v42 = vcombine.low %v12858_v21, %v12862_v51  ;;  %v12954_v37 = vld [vmem:[#allocation18 + $0x310] sm:$0xff] }
 0xa05   :  { %v16050_v41 = vpop.f32.mrf.mxu1  ;;  %16302 = vmatprep.subr.bf16.mxu0 %v18403_v38  ;;  %v12982_v38 = vld [vmem:[#allocation18 + $0x3f0] sm:$0xff]  ;;  %v18761_v26 = vcombine.high %v13257_v11, %v13261_v34  ;;  %v13253_v6 = vld [vmem:[#allocation18 + $0xc68] sm:$0xff] }
 0xa06   :  { %v18483_v22 = vcombine.high %v12978_v35, %v12982_v38  ;;  %v12974_v20 = vld [vmem:[#allocation18 + $0x3b0] sm:$0xff]  ;;  %v18753_v41 = vcombine.high %v13249_v40, %v13253_v6  ;;  %v13365_v15 = vld [vmem:[#allocation18 + $0xfe8] sm:$0xff] }
 0xa07   :  { %16206 = vmatpush2.bf16.msra.mxu1 %v18552_v8  ;;  %v12970_v8 = vld [vmem:[#allocation18 + $0x390] sm:$0xff]  ;;  %v13353_v60 = vld [vmem:[#allocation18 + $0xf88] sm:$0xff] }
 0xa08   :  { %16303 = vmatpush1.bf16.msra.mxu0 %v18402_v61  ;;  %16257 = vmatprep.subr.bf16.mxu1 %v18801_v33  ;;  %v18760_v61 = vcombine.low %v13257_v11, %v13261_v34  ;;  %v18482_v33 = vcombine.low %v12978_v35, %v12982_v38  ;;  %v12958_v16 = vld [vmem:[#allocation18 + $0x330] sm:$0xff]  ;;  %v13357_v12 = vld [vmem:[#allocation18 + $0xfa8] sm:$0xff] }
 0xa09   :  { %16304 = vmatprep.subr.bf16.mxu0 %v18395_v54  ;;  %v18475_v54 = vcombine.high %v12970_v8, %v12974_v20  ;;  %v12946_v45 = vld [vmem:[#allocation18 + $0x2d0] sm:$0xff]  ;;  %v13345_v52 = vld [vmem:[#allocation18 + $0xf48] sm:$0xff] }
 0xa0a   :  { %16208 = vmatmul.mubr.bf16.vlgmr.msra.gmra.mxu1 %v19928_v32  ;;  %v12950_v39 = vld [vmem:[#allocation18 + $0x2f0] sm:$0xff]  ;;  %v13349_v36 = vld [vmem:[#allocation18 + $0xf68] sm:$0xff] }
 0xa0b   :  { %16258 = vmatpush1.bf16.msra.mxu1 %v18800_v18  ;;  %16289 = vmatprep.mubr.bf16.mxu1 %v19971_v31  ;;  %v18752_v18 = vcombine.low %v13249_v40, %v13253_v6  ;;  %v12938_v21 = vld [vmem:[#allocation18 + $0x290] sm:$0xff]  ;;  %v13337_v11 = vld [vmem:[#allocation18 + $0xf08] sm:$0xff] }
 0xa0c   :  { %16305 = vmatpush1.bf16.msra.mxu0 %v18394_v57  ;;  %16259 = vmatprep.subr.bf16.mxu1 %v18793_v63  ;;  %v18474_v57 = vcombine.low %v12970_v8, %v12974_v20  ;;  %v18745_v63 = vcombine.high %v13241_v44, %v13245_v55  ;;  %v12942_v51 = vld [vmem:[#allocation18 + $0x2b0] sm:$0xff]  ;;  %v13341_v34 = vld [vmem:[#allocation18 + $0xf28] sm:$0xff] }
 0xa0d   :  { %16306 = vmatprep.subr.bf16.mxu0 %v18387_v29  ;;  %v18467_v29 = vcombine.high %v12962_v56, %v12966_v7  ;;  %v12930_v35 = vld [vmem:[#allocation18 + $0x250] sm:$0xff]  ;;  %v13329_v40 = vld [vmem:[#allocation18 + $0xec8] sm:$0xff] }
 0xa0e   :  { %v12934_v38 = vld [vmem:[#allocation18 + $0x270] sm:$0xff]  ;;  %v13333_v6 = vld [vmem:[#allocation18 + $0xee8] sm:$0xff] }
 0xa0f   :  { %16260 = vmatpush1.bf16.msra.mxu1 %v18792_v25  ;;  %v18744_v25 = vcombine.low %v13241_v44, %v13245_v55  ;;  %v12922_v8 = vld [vmem:[#allocation18 + $0x210] sm:$0xff]  ;;  %v13321_v44 = vld [vmem:[#allocation18 + $0xe88] sm:$0xff] }
 0xa10   :  { %16307 = vmatpush1.bf16.msra.mxu0 %v18386_v23  ;;  %16261 = vmatprep.subr.bf16.mxu1 %v18785_v4  ;;  %v18466_v23 = vcombine.low %v12962_v56, %v12966_v7  ;;  %v18865_v4 = vcombine.high %v13361_v3, %v13365_v15  ;;  %v12926_v20 = vld [vmem:[#allocation18 + $0x230] sm:$0xff]  ;;  %v13325_v55 = vld [vmem:[#allocation18 + $0xea8] sm:$0xff] }
 0xa11   :  { %16308 = vmatprep.subr.bf16.mxu0 %v18379_v28  ;;  %v18459_v28 = vcombine.high %v12954_v37, %v12958_v16  ;;  %v13170_v56 = vld [vmem:[#allocation18 + $0x9d0] sm:$0xff] }
 0xa12   :  { %v13174_v7 = vld [vmem:[#allocation18 + $0x9f0] sm:$0xff] }
 0xa13   :  { %16262 = vmatpush1.bf16.msra.mxu1 %v18784_v19  ;;  %v18864_v19 = vcombine.low %v13361_v3, %v13365_v15  ;;  %v13313_v3 = vld [vmem:[#allocation18 + $0xe48] sm:$0xff] }
 0xa14   :  { %16309 = vmatpush1.bf16.msra.mxu0 %v18378_v30  ;;  %16263 = vmatprep.subr.bf16.mxu1 %v18777_v1  ;;  %v18458_v30 = vcombine.low %v12954_v37, %v12958_v16  ;;  %v18857_v1 = vcombine.high %v13353_v60, %v13357_v12  ;;  %v13317_v15 = vld [vmem:[#allocation18 + $0xe68] sm:$0xff]  ;;  %v13162_v37 = vld [vmem:[#allocation18 + $0x990] sm:$0xff] }
 0xa15   :  { %16310 = vmatprep.subr.bf16.mxu0 %v18371_v24  ;;  %v18451_v24 = vcombine.high %v12946_v45, %v12950_v39  ;;  %v13166_v16 = vld [vmem:[#allocation18 + $0x9b0] sm:$0xff] }
 0xa17   :  { %16264 = vmatpush1.bf16.msra.mxu1 %v18776_v27  ;;  %v18856_v27 = vcombine.low %v13353_v60, %v13357_v12  ;;  %v13305_v60 = vld [vmem:[#allocation18 + $0xe08] sm:$0xff] }
 0xa18   :  { %16311 = vmatpush1.bf16.msra.mxu0 %v18370_v2  ;;  %16265 = vmatprep.subr.bf16.mxu1 %v18769_v5  ;;  %v18450_v2 = vcombine.low %v12946_v45, %v12950_v39  ;;  %v18849_v5 = vcombine.high %v13345_v52, %v13349_v36  ;;  %v13309_v12 = vld [vmem:[#allocation18 + $0xe28] sm:$0xff]  ;;  %v13154_v39 = vld [vmem:[#allocation18 + $0x950] sm:$0xff] }
 0xa19   :  { %16312 = vmatprep.subr.bf16.mxu0 %v18363_v46  ;;  %v18443_v46 = vcombine.high %v12938_v21, %v12942_v51 }
 0xa1b   :  { %16266 = vmatpush1.bf16.msra.mxu1 %v18768_v62  ;;  %v18848_v62 = vcombine.low %v13345_v52, %v13349_v36  ;;  %v18666_v52 = vcombine.low %v13162_v37, %v13166_v16  ;;  %v18809_v36 = vcombine.high %v13305_v60, %v13309_v12 }
 0xa1c   :  { %16313 = vmatpush1.bf16.msra.mxu0 %v18362_v42  ;;  %16267 = vmatprep.subr.bf16.mxu1 %v18761_v26  ;;  %v18442_v42 = vcombine.low %v12938_v21, %v12942_v51  ;;  %v18841_v26 = vcombine.high %v13337_v11, %v13341_v34 }
 0xa1d   :  { %16314 = vmatprep.subr.bf16.mxu0 %v18483_v22  ;;  %v18435_v22 = vcombine.high %v12930_v35, %v12934_v38 }
 0xa1f   :  { %16268 = vmatpush1.bf16.msra.mxu1 %v18760_v61  ;;  %v18840_v61 = vcombine.low %v13337_v11, %v13341_v34  ;;  %v18808_v11 = vcombine.low %v13305_v60, %v13309_v12 }
 0xa20   :  { %16315 = vmatpush2.bf16.msra.mxu0 %v18482_v33  ;;  %16269 = vmatprep.subr.bf16.mxu1 %v18753_v41  ;;  %v18434_v33 = vcombine.low %v12930_v35, %v12934_v38  ;;  %v18833_v41 = vcombine.high %v13329_v40, %v13333_v6 }
 0xa21   :  { %16316 = vmatprep.subr.bf16.mxu0 %v18475_v54  ;;  %v18427_v54 = vcombine.high %v12922_v8, %v12926_v20 }
 0xa23   :  { %16270 = vmatpush1.bf16.msra.mxu1 %v18752_v18  ;;  %v18832_v18 = vcombine.low %v13329_v40, %v13333_v6 }
 0xa24   :  { %16317 = vmatpush2.bf16.msra.mxu0 %v18474_v57  ;;  %16271 = vmatprep.subr.bf16.mxu1 %v18745_v63  ;;  %v18426_v57 = vcombine.low %v12922_v8, %v12926_v20  ;;  %v18825_v63 = vcombine.high %v13321_v44, %v13325_v55 }
 0xa25   :  { %16318 = vmatprep.subr.bf16.mxu0 %v18467_v29  ;;  %v18675_v29 = vcombine.high %v13170_v56, %v13174_v7 }
 0xa27   :  { %16272 = vmatpush1.bf16.msra.mxu1 %v18744_v25  ;;  %v18824_v25 = vcombine.low %v13321_v44, %v13325_v55 }
 0xa28   :  { %16319 = vmatpush2.bf16.msra.mxu0 %v18466_v23  ;;  %16273 = vmatprep.subr.bf16.mxu1 %v18865_v4  ;;  %v18674_v23 = vcombine.low %v13170_v56, %v13174_v7  ;;  %v18817_v4 = vcombine.high %v13313_v3, %v13317_v15 }
 0xa29   :  { %16320 = vmatprep.subr.bf16.mxu0 %v18459_v28  ;;  %v18667_v28 = vcombine.high %v13162_v37, %v13166_v16 }
 0xa2b   :  { %16274 = vmatpush2.bf16.msra.mxu1 %v18864_v19  ;;  %v13158_v19 = vld [vmem:[#allocation18 + $0x970] sm:$0xff] }
 0xa2c   :  { %16321 = vmatpush2.bf16.msra.mxu0 %v18458_v30  ;;  %16275 = vmatprep.subr.bf16.mxu1 %v18857_v1  ;;  %v18816_v1 = vcombine.low %v13313_v3, %v13317_v15  ;;  %v18659_v51 = vcombine.high %v13154_v39, %v13158_v19  ;;  %v18658_v35 = vcombine.low %v13154_v39, %v13158_v19  ;;  %v13002_v19 = vld [vmem:[#allocation18 + $0x490] sm:$0xff] }
 0xa2d   :  { %16322 = vmatprep.subr.bf16.mxu0 %v18451_v24 }
 0xa2f   :  { %16276 = vmatpush2.bf16.msra.mxu1 %v18856_v27  ;;  %v13042_v27 = vld [vmem:[#allocation18 + $0x5d0] sm:$0xff] }
 0xa30   :  { %16323 = vmatpush2.bf16.msra.mxu0 %v18450_v2  ;;  %16277 = vmatprep.subr.bf16.mxu1 %v18849_v5  ;;  %v13046_v2 = vld [vmem:[#allocation18 + $0x5f0] sm:$0xff] }
 0xa31   :  { %16324 = vmatprep.subr.bf16.mxu0 %v18443_v46  ;;  %v13146_v5 = vld [vmem:[#allocation18 + $0x910] sm:$0xff]  ;;  %v18547_v38 = vcombine.high %v13042_v27, %v13046_v2  ;;  %v18546_v40 = vcombine.low %v13042_v27, %v13046_v2 }
 0xa32   :  { %v13150_v46 = vld [vmem:[#allocation18 + $0x930] sm:$0xff] }
 0xa33   :  { %16278 = vmatpush2.bf16.msra.mxu1 %v18848_v62  ;;  %v18651_v62 = vcombine.high %v13146_v5, %v13150_v46  ;;  %v18650_v6 = vcombine.low %v13146_v5, %v13150_v46  ;;  %v12998_v5 = vld [vmem:[#allocation18 + $0x470] sm:$0xff] }
 0xa34   :  { %16325 = vmatpush2.bf16.msra.mxu0 %v18442_v42  ;;  %16279 = vmatprep.subr.bf16.mxu1 %v18841_v26  ;;  %v13034_v42 = vld [vmem:[#allocation18 + $0x590] sm:$0xff] }
 0xa35   :  { %16326 = vmatprep.subr.bf16.mxu0 %v18435_v22  ;;  %v13138_v26 = vld [vmem:[#allocation18 + $0x8d0] sm:$0xff] }
 0xa36   :  { %v13142_v22 = vld [vmem:[#allocation18 + $0x8f0] sm:$0xff] }
 0xa37   :  { %16280 = vmatpush2.bf16.msra.mxu1 %v18840_v61  ;;  %v18643_v20 = vcombine.high %v13138_v26, %v13142_v22  ;;  %v13026_v61 = vld [vmem:[#allocation18 + $0x550] sm:$0xff]  ;;  %v18642_v55 = vcombine.low %v13138_v26, %v13142_v22 }
 0xa38   :  { %16327 = vmatpush2.bf16.msra.mxu0 %v18434_v33  ;;  %16281 = vmatprep.subr.bf16.mxu1 %v18833_v41  ;;  %v13030_v33 = vld [vmem:[#allocation18 + $0x570] sm:$0xff] }
 0xa39   :  { %16328 = vmatprep.subr.bf16.mxu0 %v18427_v54  ;;  %v13130_v41 = vld [vmem:[#allocation18 + $0x890] sm:$0xff]  ;;  %v18531_v56 = vcombine.high %v13026_v61, %v13030_v33  ;;  %v18530_v3 = vcombine.low %v13026_v61, %v13030_v33 }
 0xa3a   :  { %v13134_v54 = vld [vmem:[#allocation18 + $0x8b0] sm:$0xff] }
 0xa3b   :  { %16282 = vmatpush2.bf16.msra.mxu1 %v18832_v18  ;;  %v18635_v7 = vcombine.high %v13130_v41, %v13134_v54  ;;  %v13018_v18 = vld [vmem:[#allocation18 + $0x510] sm:$0xff]  ;;  %v18634_v15 = vcombine.low %v13130_v41, %v13134_v54 }
 0xa3c   :  { %16329 = vmatpush2.bf16.msra.mxu0 %v18426_v57  ;;  %16283 = vmatprep.subr.bf16.mxu1 %v18825_v63  ;;  %v13022_v57 = vld [vmem:[#allocation18 + $0x530] sm:$0xff] }
 0xa3d   :  { %16380 = vmatprep.subr.bf16.mxu0 %v18675_v29  ;;  %v13122_v63 = vld [vmem:[#allocation18 + $0x850] sm:$0xff]  ;;  %v18523_v37 = vcombine.high %v13018_v18, %v13022_v57  ;;  %v18522_v60 = vcombine.low %v13018_v18, %v13022_v57 }
 0xa3e   :  { %v16086_v45 = vpop.f32.mrf.mxu0  ;;  %v13126_v29 = vld [vmem:[#allocation18 + $0x870] sm:$0xff] }
 0xa3f   :  { %v19992_v30 = vadd.f32 %v16086_v45, %v19985_v10  ;;  %16284 = vmatpush2.bf16.msra.mxu1 %v18824_v25  ;;  %16331 = vmatmul.mubr.bf16.vlgmr.msra.gmra.mxu0 %v19926_v59  ;;  %v18627_v16 = vcombine.high %v13122_v63, %v13126_v29  ;;  %v13010_v25 = vld [vmem:[#allocation18 + $0x4d0] sm:$0xff]  ;;  %v18626_v12 = vcombine.low %v13122_v63, %v13126_v29 }
 0xa40   :  { %16381 = vmatpush1.bf16.msra.mxu0 %v18674_v23  ;;  %16412 = vmatprep.mubr.bf16.mxu0 %v19937_v50  ;;  %v16088_v24 = vpop.f32.mrf.mxu0  ;;  %v13014_v23 = vld [vmem:[#allocation18 + $0x4f0] sm:$0xff] }
 0xa41   :  { %v19997_v21 = vadd.f32 %v16088_v24, %v19987_v49  ;;  %16285 = vmatprep.subr.bf16.mxu1 %v18817_v4  ;;  %16382 = vmatprep.subr.bf16.mxu0 %v18667_v28  ;;  %v13038_v49 = vld [vmem:[#allocation18 + $0x5b0] sm:$0xff]  ;;  %v18515_v45 = vcombine.high %v13010_v25, %v13014_v23 }
 0xa42   :  { %v16090_v10 = vpop.f32.mrf.mxu0  ;;  %v18539_v8 = vcombine.high %v13034_v42, %v13038_v49  ;;  %v18538_v44 = vcombine.low %v13034_v42, %v13038_v49  ;;  %v13114_v4 = vld [vmem:[#allocation18 + $0x810] sm:$0xff] }
 0xa43   :  { %16286 = vmatpush2.bf16.msra.mxu1 %v18816_v1  ;;  %v13118_v28 = vld [vmem:[#allocation18 + $0x830] sm:$0xff] }
 0xa44   :  { %16383 = vmatpush1.bf16.msra.mxu0 %v18666_v52  ;;  %v16091_v34 = vpop.f32.mrf.mxu0  ;;  %16287 = vmatprep.subr.bf16.mxu1 %v18809_v36  ;;  %v18619_v39 = vcombine.high %v13114_v4, %v13118_v28  ;;  %v13006_v1 = vld [vmem:[#allocation18 + $0x4b0] sm:$0xff]  ;;  %v18514_v36 = vcombine.low %v13010_v25, %v13014_v23 }
 0xa45   :  { %16384 = vmatprep.subr.bf16.mxu0 %v18659_v51  ;;  %v13234_v24 = vld [vmem:[#allocation18 + $0xbd0] sm:$0xff]  ;;  %v18618_v51 = vcombine.low %v13114_v4, %v13118_v28  ;;  %v18507_v27 = vcombine.high %v13002_v19, %v13006_v1  ;;  %v18506_v34 = vcombine.low %v13002_v19, %v13006_v1 }
 0xa46   :  { %v13238_v52 = vld [vmem:[#allocation18 + $0xbf0] sm:$0xff] }
 0xa47   :  { %16288 = vmatpush2.bf16.msra.mxu1 %v18808_v11  ;;  %v18739_v2 = vcombine.high %v13234_v24, %v13238_v52  ;;  %v12994_v10 = vld [vmem:[#allocation18 + $0x450] sm:$0xff] }
 0xa48   :  { %16385 = vmatpush1.bf16.msra.mxu0 %v18658_v35  ;;  %16339 = vmatprep.subr.bf16.mxu1 %v18547_v38  ;;  %v13226_v46 = vld [vmem:[#allocation18 + $0xb90] sm:$0xff]  ;;  %v18738_v35 = vcombine.low %v13234_v24, %v13238_v52  ;;  %v18499_v38 = vcombine.high %v12994_v10, %v12998_v5 }
 0xa49   :  { %16386 = vmatprep.subr.bf16.mxu0 %v18651_v62  ;;  %v13230_v11 = vld [vmem:[#allocation18 + $0xbb0] sm:$0xff] }
 0xa4a   :  { %16290 = vmatmul.mubr.bf16.vlgmr.msra.gmra.mxu1 %v19973_v13  ;;  %v18731_v62 = vcombine.high %v13226_v46, %v13230_v11  ;;  %v12986_v42 = vld [vmem:[#allocation18 + $0x410] sm:$0xff] }
 0xa4b   :  { %16340 = vmatpush1.bf16.msra.mxu1 %v18546_v40  ;;  %16371 = vmatprep.mubr.bf16.mxu1 %v19910_v9  ;;  %v12990_v49 = vld [vmem:[#allocation18 + $0x430] sm:$0xff]  ;;  %v18498_v40 = vcombine.low %v12994_v10, %v12998_v5 }
 0xa4c   :  { %16387 = vmatpush1.bf16.msra.mxu0 %v18650_v6  ;;  %16341 = vmatprep.subr.bf16.mxu1 %v18539_v8  ;;  %v13218_v26 = vld [vmem:[#allocation18 + $0xb50] sm:$0xff]  ;;  %v18730_v6 = vcombine.low %v13226_v46, %v13230_v11  ;;  %v18491_v8 = vcombine.high %v12986_v42, %v12990_v49 }
 0xa4d   :  { %16388 = vmatprep.subr.bf16.mxu0 %v18643_v20  ;;  %v13222_v22 = vld [vmem:[#allocation18 + $0xb70] sm:$0xff] }
 0xa4e   :  { %v18723_v20 = vcombine.high %v13218_v26, %v13222_v22  ;;  %v13106_v61 = vld [vmem:[#allocation18 + $0x7d0] sm:$0xff] }
 0xa4f   :  { %16342 = vmatpush1.bf16.msra.mxu1 %v18538_v44  ;;  %v13110_v33 = vld [vmem:[#allocation18 + $0x7f0] sm:$0xff]  ;;  %v18490_v44 = vcombine.low %v12986_v42, %v12990_v49 }
 0xa50   :  { %16389 = vmatpush1.bf16.msra.mxu0 %v18642_v55  ;;  %16343 = vmatprep.subr.bf16.mxu1 %v18531_v56  ;;  %v13210_v41 = vld [vmem:[#allocation18 + $0xb10] sm:$0xff]  ;;  %v18722_v55 = vcombine.low %v13218_v26, %v13222_v22  ;;  %v18611_v56 = vcombine.high %v13106_v61, %v13110_v33  ;;  %v12915_v26 = vld [vmem:[#allocation18 + $0x1d8] sm:$0xff] }
 0xa51   :  { %16390 = vmatprep.subr.bf16.mxu0 %v18635_v7  ;;  %v13214_v54 = vld [vmem:[#allocation18 + $0xb30] sm:$0xff]  ;;  %v12919_v22 = vld [vmem:[#allocation18 + $0x1f8] sm:$0xff] }
 0xa52   :  { %v18715_v7 = vcombine.high %v13210_v41, %v13214_v54  ;;  %v13098_v18 = vld [vmem:[#allocation18 + $0x790] sm:$0xff] }
 0xa53   :  { %16344 = vmatpush1.bf16.msra.mxu1 %v18530_v3  ;;  %v13102_v57 = vld [vmem:[#allocation18 + $0x7b0] sm:$0xff]  ;;  %v18610_v3 = vcombine.low %v13106_v61, %v13110_v33 }
 0xa54   :  { %16391 = vmatpush1.bf16.msra.mxu0 %v18634_v15  ;;  %16345 = vmatprep.subr.bf16.mxu1 %v18523_v37  ;;  %v13202_v63 = vld [vmem:[#allocation18 + $0xad0] sm:$0xff]  ;;  %v18714_v15 = vcombine.low %v13210_v41, %v13214_v54  ;;  %v18603_v37 = vcombine.high %v13098_v18, %v13102_v57  ;;  %v12907_v41 = vld [vmem:[#allocation18 + $0x198] sm:$0xff] }
 0xa55   :  { %16392 = vmatprep.subr.bf16.mxu0 %v18627_v16  ;;  %v13206_v29 = vld [vmem:[#allocation18 + $0xaf0] sm:$0xff]  ;;  %v12911_v54 = vld [vmem:[#allocation18 + $0x1b8] sm:$0xff] }
 0xa56   :  { %v18707_v16 = vcombine.high %v13202_v63, %v13206_v29  ;;  %v13090_v25 = vld [vmem:[#allocation18 + $0x750] sm:$0xff] }
 0xa57   :  { %16346 = vmatpush1.bf16.msra.mxu1 %v18522_v60  ;;  %v13094_v23 = vld [vmem:[#allocation18 + $0x770] sm:$0xff]  ;;  %v18602_v60 = vcombine.low %v13098_v18, %v13102_v57 }
 0xa58   :  { %16393 = vmatpush1.bf16.msra.mxu0 %v18626_v12  ;;  %16347 = vmatprep.subr.bf16.mxu1 %v18515_v45  ;;  %v13194_v4 = vld [vmem:[#allocation18 + $0xa90] sm:$0xff]  ;;  %v18706_v12 = vcombine.low %v13202_v63, %v13206_v29  ;;  %v18595_v45 = vcombine.high %v13090_v25, %v13094_v23  ;;  %v12899_v29 = vld [vmem:[#allocation18 + $0x158] sm:$0xff] }
 0xa59   :  { %16394 = vmatprep.subr.bf16.mxu0 %v18619_v39  ;;  %v13198_v28 = vld [vmem:[#allocation18 + $0xab0] sm:$0xff] }
 0xa5a   :  { %v18699_v39 = vcombine.high %v13194_v4, %v13198_v28  ;;  %v13082_v19 = vld [vmem:[#allocation18 + $0x710] sm:$0xff] }
 0xa5b   :  { %16348 = vmatpush1.bf16.msra.mxu1 %v18514_v36  ;;  %v13086_v1 = vld [vmem:[#allocation18 + $0x730] sm:$0xff]  ;;  %v18594_v36 = vcombine.low %v13090_v25, %v13094_v23 }
 0xa5c   :  { %16395 = vmatpush1.bf16.msra.mxu0 %v18618_v51  ;;  %16349 = vmatprep.subr.bf16.mxu1 %v18507_v27  ;;  %v13186_v24 = vld [vmem:[#allocation18 + $0xa50] sm:$0xff]  ;;  %v18698_v51 = vcombine.low %v13194_v4, %v13198_v28  ;;  %v18587_v27 = vcombine.high %v13082_v19, %v13086_v1 }
 0xa5d   :  { %16396 = vmatprep.subr.bf16.mxu0 %v18739_v2  ;;  %v13190_v52 = vld [vmem:[#allocation18 + $0xa70] sm:$0xff] }
 0xa5e   :  { %v18691_v2 = vcombine.high %v13186_v24, %v13190_v52  ;;  %v13074_v10 = vld [vmem:[#allocation18 + $0x6d0] sm:$0xff] }
 0xa5f   :  { %16350 = vmatpush1.bf16.msra.mxu1 %v18506_v34  ;;  %v13078_v5 = vld [vmem:[#allocation18 + $0x6f0] sm:$0xff]  ;;  %v18586_v34 = vcombine.low %v13082_v19, %v13086_v1 }
 0xa60   :  { %16397 = vmatpush2.bf16.msra.mxu0 %v18738_v35  ;;  %16351 = vmatprep.subr.bf16.mxu1 %v18499_v38  ;;  %v13178_v46 = vld [vmem:[#allocation18 + $0xa10] sm:$0xff]  ;;  %v18690_v35 = vcombine.low %v13186_v24, %v13190_v52  ;;  %v18579_v38 = vcombine.high %v13074_v10, %v13078_v5 }
 0xa61   :  { %16398 = vmatprep.subr.bf16.mxu0 %v18731_v62  ;;  %v13182_v11 = vld [vmem:[#allocation18 + $0xa30] sm:$0xff] }
 0xa62   :  { %v18683_v62 = vcombine.high %v13178_v46, %v13182_v11  ;;  %v13066_v42 = vld [vmem:[#allocation18 + $0x690] sm:$0xff] }
 0xa63   :  { %16352 = vmatpush1.bf16.msra.mxu1 %v18498_v40  ;;  %v13070_v49 = vld [vmem:[#allocation18 + $0x6b0] sm:$0xff]  ;;  %v18578_v40 = vcombine.low %v13074_v10, %v13078_v5 }
 0xa64   :  { %16399 = vmatpush2.bf16.msra.mxu0 %v18730_v6  ;;  %16353 = vmatprep.subr.bf16.mxu1 %v18491_v8  ;;  %v18682_v6 = vcombine.low %v13178_v46, %v13182_v11  ;;  %v18571_v8 = vcombine.high %v13066_v42, %v13070_v49  ;;  %v13058_v61 = vld [vmem:[#allocation18 + $0x650] sm:$0xff] }
 0xa65   :  { %16400 = vmatprep.subr.bf16.mxu0 %v18723_v20  ;;  %v18421_v20 = vcombine.high %v12915_v26, %v12919_v22  ;;  %v13062_v33 = vld [vmem:[#allocation18 + $0x670] sm:$0xff] }
 0xa66   :  { %v13050_v18 = vld [vmem:[#allocation18 + $0x610] sm:$0xff] }
 0xa67   :  { %16354 = vmatpush1.bf16.msra.mxu1 %v18490_v44  ;;  %v18570_v44 = vcombine.low %v13066_v42, %v13070_v49  ;;  %v13054_v57 = vld [vmem:[#allocation18 + $0x630] sm:$0xff] }
 0xa68   :  { %16401 = vmatpush2.bf16.msra.mxu0 %v18722_v55  ;;  %16355 = vmatprep.subr.bf16.mxu1 %v18611_v56  ;;  %v18420_v55 = vcombine.low %v12915_v26, %v12919_v22  ;;  %v18563_v56 = vcombine.high %v13058_v61, %v13062_v33  ;;  %v18555_v25 = vcombine.high %v13050_v18, %v13054_v57  ;;  %v13298_v4 = vld [vmem:[#allocation18 + $0xdd0] sm:$0xff] }
 0xa69   :  { %16402 = vmatprep.subr.bf16.mxu0 %v18715_v7  ;;  %v18413_v7 = vcombine.high %v12907_v41, %v12911_v54  ;;  %v13302_v28 = vld [vmem:[#allocation18 + $0xdf0] sm:$0xff] }
 0xa6a   :  { %v18803_v24 = vcombine.high %v13298_v4, %v13302_v28  ;;  %v13290_v52 = vld [vmem:[#allocation18 + $0xd90] sm:$0xff] }
 0xa6b   :  { %16356 = vmatpush2.bf16.msra.mxu1 %v18610_v3  ;;  %v12903_v3 = vld [vmem:[#allocation18 + $0x178] sm:$0xff]  ;;  %v13282_v11 = vld [vmem:[#allocation18 + $0xd50] sm:$0xff] }
 0xa6c   :  { %16403 = vmatpush2.bf16.msra.mxu0 %v18714_v15  ;;  %16357 = vmatprep.subr.bf16.mxu1 %v18603_v37  ;;  %v18562_v15 = vcombine.low %v13058_v61, %v13062_v33  ;;  %v18405_v23 = vcombine.high %v12899_v29, %v12903_v3  ;;  %v18404_v1 = vcombine.low %v12899_v29, %v12903_v3  ;;  %v13274_v61 = vld [vmem:[#allocation18 + $0xd10] sm:$0xff]  ;;  %v12859_v3 = vld [vmem:[#allocation18 + $0x18] sm:$0xff] }
 0xa6d   :  { %16404 = vmatprep.subr.bf16.mxu0 %v18707_v16  ;;  %v18412_v16 = vcombine.low %v12907_v41, %v12911_v54  ;;  %v13278_v33 = vld [vmem:[#allocation18 + $0xd30] sm:$0xff]  ;;  %v12867_v54 = vld [vmem:[#allocation18 + $0x58] sm:$0xff] }
 0xa6e   :  { %v13270_v29 = vld [vmem:[#allocation18 + $0xcf0] sm:$0xff] }
 0xa6f   :  { %16358 = vmatpush2.bf16.msra.mxu1 %v18602_v60 }
 0xa70   :  { %16405 = vmatpush2.bf16.msra.mxu0 %v18706_v12  ;;  %16359 = vmatprep.subr.bf16.mxu1 %v18595_v45  ;;  %v12891_v12 = vld [vmem:[#allocation18 + $0x118] sm:$0xff] }
 0xa71   :  { %16406 = vmatprep.subr.bf16.mxu0 %v18699_v39  ;;  %v12895_v45 = vld [vmem:[#allocation18 + $0x138] sm:$0xff]  ;;  %v18554_v39 = vcombine.low %v13050_v18, %v13054_v57  ;;  %v18779_v18 = vcombine.high %v13274_v61, %v13278_v33 }
 0xa72   :  { %v18396_v10 = vcombine.low %v12891_v12, %v12895_v45 }
 0xa73   :  { %16360 = vmatpush2.bf16.msra.mxu1 %v18594_v36  ;;  %v13294_v36 = vld [vmem:[#allocation18 + $0xdb0] sm:$0xff] }
 0xa74   :  { %16407 = vmatpush2.bf16.msra.mxu0 %v18698_v51  ;;  %16361 = vmatprep.subr.bf16.mxu1 %v18587_v27  ;;  %v12883_v51 = vld [vmem:[#allocation18 + $0xd8] sm:$0xff]  ;;  %v18795_v5 = vcombine.high %v13290_v52, %v13294_v36  ;;  %v18794_v49 = vcombine.low %v13290_v52, %v13294_v36  ;;  %v13254_v52 = vld [vmem:[#allocation18 + $0xc70] sm:$0xff] }
 0xa75   :  { %16408 = vmatprep.subr.bf16.mxu0 %v18691_v2  ;;  %v12887_v27 = vld [vmem:[#allocation18 + $0xf8] sm:$0xff]  ;;  %v18802_v2 = vcombine.low %v13298_v4, %v13302_v28  ;;  %v13258_v28 = vld [vmem:[#allocation18 + $0xc90] sm:$0xff] }
 0xa76   :  { %v18389_v46 = vcombine.high %v12883_v51, %v12887_v27  ;;  %v18388_v22 = vcombine.low %v12883_v51, %v12887_v27  ;;  %v12971_v36 = vld [vmem:[#allocation18 + $0x398] sm:$0xff] }
 0xa77   :  { %16362 = vmatpush2.bf16.msra.mxu1 %v18586_v34  ;;  %v13286_v34 = vld [vmem:[#allocation18 + $0xd70] sm:$0xff]  ;;  %v12975_v51 = vld [vmem:[#allocation18 + $0x3b8] sm:$0xff] }
 0xa78   :  { %16409 = vmatpush2.bf16.msra.mxu0 %v18690_v35  ;;  %16363 = vmatprep.subr.bf16.mxu1 %v18579_v38  ;;  %v12875_v38 = vld [vmem:[#allocation18 + $0x98] sm:$0xff] }
 0xa79   :  { %16410 = vmatprep.subr.bf16.mxu0 %v18683_v62  ;;  %v12879_v62 = vld [vmem:[#allocation18 + $0xb8] sm:$0xff] }
 0xa7b   :  { %16364 = vmatpush2.bf16.msra.mxu1 %v18578_v40  ;;  %v18787_v40 = vcombine.high %v13282_v11, %v13286_v34 }
 0xa7c   :  { %16411 = vmatpush2.bf16.msra.mxu0 %v18682_v6  ;;  %16365 = vmatprep.subr.bf16.mxu1 %v18571_v8 }
 0xa7d   :  { %16462 = vmatprep.subr.bf16.mxu0 %v18421_v20  ;;  %v18381_v20 = vcombine.high %v12875_v38, %v12879_v62 }
 0xa7e   :  { %v20001_v63 = vpop.f32.mrf.mxu0 }
 0xa7f   :  { %16366 = vmatpush2.bf16.msra.mxu1 %v18570_v44  ;;  %16413 = vmatmul.mubr.bf16.vlgmr.msra.gmra.mxu0 %v19951_v0  ;;  %v12871_v44 = vld [vmem:[#allocation18 + $0x78] sm:$0xff] }
 0xa80   :  { %16463 = vmatpush1.bf16.msra.mxu0 %v18420_v55  ;;  %16494 = vmatprep.mubr.bf16.mxu0 %v19907_v14  ;;  %v20005_v37 = vpop.f32.mrf.mxu0  ;;  %v18397_v14 = vcombine.high %v12891_v12, %v12895_v45  ;;  %v18786_v55 = vcombine.low %v13282_v11, %v13286_v34  ;;  %v18373_v57 = vcombine.high %v12867_v54, %v12871_v44  ;;  %v12979_v12 = vld [vmem:[#allocation18 + $0x3d8] sm:$0xff]  ;;  %v13242_v34 = vld [vmem:[#allocation18 + $0xc10] sm:$0xff] }
 0xa81   :  { %16367 = vmatprep.subr.bf16.mxu1 %v18563_v56  ;;  %16464 = vmatprep.subr.bf16.mxu0 %v18413_v7  ;;  %v18380_v7 = vcombine.low %v12875_v38, %v12879_v62  ;;  %v12983_v45 = vld [vmem:[#allocation18 + $0x3f8] sm:$0xff]  ;;  %v18477_v11 = vcombine.high %v12971_v36, %v12975_v51 }
 0xa82   :  { %v16172_v60 = vpop.f32.mrf.mxu0  ;;  %v12963_v62 = vld [vmem:[#allocation18 + $0x358] sm:$0xff] }
 0xa83   :  { %16368 = vmatpush2.bf16.msra.mxu1 %v18562_v15  ;;  %v12863_v15 = vld [vmem:[#allocation18 + $0x38] sm:$0xff]  ;;  %v13262_v60 = vld [vmem:[#allocation18 + $0xcb0] sm:$0xff] }
 0xa84   :  { %16465 = vmatpush1.bf16.msra.mxu0 %v18412_v16  ;;  %v16173_v19 = vpop.f32.mrf.mxu0  ;;  %16369 = vmatprep.subr.bf16.mxu1 %v18555_v25  ;;  %v18778_v16 = vcombine.low %v13274_v61, %v13278_v33  ;;  %v18372_v25 = vcombine.low %v12867_v54, %v12871_v44  ;;  %v18365_v4 = vcombine.high %v12859_v3, %v12863_v15  ;;  %v12955_v61 = vld [vmem:[#allocation18 + $0x318] sm:$0xff] }
 0xa85   :  { %16466 = vmatprep.subr.bf16.mxu0 %v18405_v23  ;;  %v18364_v19 = vcombine.low %v12859_v3, %v12863_v15  ;;  %v18762_v27 = vcombine.low %v13258_v28, %v13262_v60  ;;  %v12959_v33 = vld [vmem:[#allocation18 + $0x338] sm:$0xff]  ;;  %v13346_v15 = vld [vmem:[#allocation18 + $0xf50] sm:$0xff] }
 0xa87   :  { %16370 = vmatpush2.bf16.msra.mxu1 %v18554_v39 }
 0xa88   :  { %16467 = vmatpush1.bf16.msra.mxu0 %v18404_v1  ;;  %16421 = vmatprep.subr.bf16.mxu1 %v18803_v24  ;;  %v18763_v1 = vcombine.high %v13258_v28, %v13262_v60  ;;  %v18485_v24 = vcombine.high %v12979_v12, %v12983_v45 }
 0xa89   :  { %16468 = vmatprep.subr.bf16.mxu0 %v18397_v14  ;;  %v13250_v14 = vld [vmem:[#allocation18 + $0xc50] sm:$0xff] }
 0xa8a   :  { %16372 = vmatmul.mubr.bf16.vlgmr.msra.gmra.mxu1 %v19928_v32  ;;  %v16127_v35 = vpop.f32.mrf.mxu1 }
 0xa8b   :  { %v16128_v42 = vadd.f32 %v16127_v35, %v19992_v30  ;;  %16422 = vmatpush1.bf16.msra.mxu1 %v18802_v2  ;;  %16453 = vmatprep.mubr.bf16.mxu1 %v19971_v31  ;;  %v13246_v35 = vld [vmem:[#allocation18 + $0xc30] sm:$0xff] }
 0xa8c   :  { %16469 = vmatpush1.bf16.msra.mxu0 %v18396_v10  ;;  %v16129_v26 = vpop.f32.mrf.mxu1  ;;  %16423 = vmatprep.subr.bf16.mxu1 %v18795_v5  ;;  %v18484_v10 = vcombine.low %v12979_v12, %v12983_v45  ;;  %v18755_v5 = vcombine.high %v13250_v14, %v13254_v52 }
 0xa8d   :  { %v18870_v6 = vmul.f32 -1.442695, %v16128_v42  ;;  %v16130_v8 = vadd.f32 %v16129_v26, %v19997_v21  ;;  %16470 = vmatprep.subr.bf16.mxu0 %v18389_v46  ;;  %v13266_v21 = vld [vmem:[#allocation18 + $0xcd0] sm:$0xff]  ;;  %v12967_v42 = vld [vmem:[#allocation18 + $0x378] sm:$0xff]  ;;  %v18754_v26 = vcombine.low %v13250_v14, %v13254_v52 }
 0xa8e   :  { %v16131_v41 = vpop.f32.mrf.mxu1  ;;  %v18771_v23 = vcombine.high %v13266_v21, %v13270_v29  ;;  %v18770_v39 = vcombine.low %v13266_v21, %v13270_v29  ;;  %v18468_v54 = vcombine.low %v12963_v62, %v12967_v42  ;;  %v18460_v21 = vcombine.low %v12955_v61, %v12959_v33  ;;  %v12935_v14 = vld [vmem:[#allocation18 + $0x278] sm:$0xff] }
 0xa8f   :  { %19047 = vpow2.f32 %v18870_v6  ;;  %v18871_v30 = vmul.f32 -1.442695, %v16130_v8  ;;  %16424 = vmatpush1.bf16.msra.mxu1 %v18794_v49  ;;  %v18469_v6 = vcombine.high %v12963_v62, %v12967_v42  ;;  %v13362_v8 = vld [vmem:[#allocation18 + $0xfd0] sm:$0xff]  ;;  %v18746_v41 = vcombine.low %v13242_v34, %v13246_v35 }
 0xa90   :  { %16471 = vmatpush1.bf16.msra.mxu0 %v18388_v22  ;;  %v16132_v56 = vpop.f32.mrf.mxu1  ;;  %16425 = vmatprep.subr.bf16.mxu1 %v18787_v40  ;;  %v18476_v22 = vcombine.low %v12971_v36, %v12975_v51  ;;  %v18747_v40 = vcombine.high %v13242_v34, %v13246_v35  ;;  %v13322_v62 = vld [vmem:[#allocation18 + $0xe90] sm:$0xff] }
 0xa91   :  { %19049 = vpow2.f32 %v18871_v30  ;;  %16472 = vmatprep.subr.bf16.mxu0 %v18381_v20  ;;  %v13366_v20 = vld [vmem:[#allocation18 + $0xff0] sm:$0xff]  ;;  %v18461_v30 = vcombine.high %v12955_v61, %v12959_v33  ;;  %v13163_v33 = vld [vmem:[#allocation18 + $0x998] sm:$0xff] }
 0xa92   :  { %v18867_v44 = vcombine.high %v13362_v8, %v13366_v20  ;;  %v13358_v56 = vld [vmem:[#allocation18 + $0xfb0] sm:$0xff] }
 0xa93   :  { %16426 = vmatpush1.bf16.msra.mxu1 %v18786_v55  ;;  %v13354_v55 = vld [vmem:[#allocation18 + $0xf90] sm:$0xff] }
 0xa94   :  { %16473 = vmatpush1.bf16.msra.mxu0 %v18380_v7  ;;  %16427 = vmatprep.subr.bf16.mxu1 %v18779_v18  ;;  %v12947_v7 = vld [vmem:[#allocation18 + $0x2d8] sm:$0xff]  ;;  %v18859_v29 = vcombine.high %v13354_v55, %v13358_v56  ;;  %v13326_v42 = vld [vmem:[#allocation18 + $0xeb0] sm:$0xff] }
 0xa95   :  { %16474 = vmatprep.subr.bf16.mxu0 %v18373_v57  ;;  %v12951_v18 = vld [vmem:[#allocation18 + $0x2f8] sm:$0xff]  ;;  %v18866_v57 = vcombine.low %v13362_v8, %v13366_v20  ;;  %v13314_v20 = vld [vmem:[#allocation18 + $0xe50] sm:$0xff] }
 0xa96   :  { %v18453_v3 = vcombine.high %v12947_v7, %v12951_v18  ;;  %v18452_v60 = vcombine.low %v12947_v7, %v12951_v18  ;;  %v13318_v61 = vld [vmem:[#allocation18 + $0xe70] sm:$0xff]  ;;  %v13155_v18 = vld [vmem:[#allocation18 + $0x958] sm:$0xff] }
 0xa97   :  { %16428 = vmatpush1.bf16.msra.mxu1 %v18778_v16  ;;  %v13350_v16 = vld [vmem:[#allocation18 + $0xf70] sm:$0xff] }
 0xa98   :  { %16475 = vmatpush1.bf16.msra.mxu0 %v18372_v25  ;;  %16429 = vmatprep.subr.bf16.mxu1 %v18771_v23  ;;  %v12939_v25 = vld [vmem:[#allocation18 + $0x298] sm:$0xff]  ;;  %v18851_v12 = vcombine.high %v13346_v15, %v13350_v16  ;;  %v18850_v52 = vcombine.low %v13346_v15, %v13350_v16  ;;  %v13310_v7 = vld [vmem:[#allocation18 + $0xe30] sm:$0xff] }
 0xa99   :  { %16476 = vmatprep.subr.bf16.mxu0 %v18365_v4  ;;  %v12943_v23 = vld [vmem:[#allocation18 + $0x2b8] sm:$0xff]  ;;  %v18858_v4 = vcombine.low %v13354_v55, %v13358_v56  ;;  %v13306_v56 = vld [vmem:[#allocation18 + $0xe10] sm:$0xff] }
 0xa9a   :  { %v18445_v45 = vcombine.high %v12939_v25, %v12943_v23  ;;  %v18444_v36 = vcombine.low %v12939_v25, %v12943_v23  ;;  %v18811_v15 = vcombine.high %v13306_v56, %v13310_v7  ;;  %v13043_v23 = vld [vmem:[#allocation18 + $0x5d8] sm:$0xff] }
 0xa9b   :  { %16430 = vmatpush1.bf16.msra.mxu1 %v18770_v39  ;;  %v13338_v39 = vld [vmem:[#allocation18 + $0xf10] sm:$0xff] }
 0xa9c   :  { %v19048_v2 = vpop.eup %19047  ;;  %16477 = vmatpush1.bf16.msra.mxu0 %v18364_v19  ;;  %16431 = vmatprep.subr.bf16.mxu1 %v18763_v1  ;;  %v13342_v19 = vld [vmem:[#allocation18 + $0xf30] sm:$0xff] }
 0xa9d   :  { %v16650_v46 = vadd.f32 1.0, %v19048_v2  ;;  %16478 = vmatprep.subr.bf16.mxu0 %v18485_v24  ;;  %v12931_v24 = vld [vmem:[#allocation18 + $0x258] sm:$0xff]  ;;  %v18843_v51 = vcombine.high %v13338_v39, %v13342_v19  ;;  %v13330_v2 = vld [vmem:[#allocation18 + $0xed0] sm:$0xff] }
 0xa9e   :  { %v19050_v38 = vpop.eup %19049  ;;  %v18436_v34 = vcombine.low %v12931_v24, %v12935_v14 }
 0xa9f   :  { %19051 = vrcp.f32 %v16650_v46  ;;  %v16651_v49 = vadd.f32 1.0, %v19050_v38  ;;  %16432 = vmatpush1.bf16.msra.mxu1 %v18762_v27  ;;  %v18437_v27 = vcombine.high %v12931_v24, %v12935_v14  ;;  %v12927_v46 = vld [vmem:[#allocation18 + $0x238] sm:$0xff] }
 0xaa0   :  { %16479 = vmatpush2.bf16.msra.mxu0 %v18484_v10  ;;  %16433 = vmatprep.subr.bf16.mxu1 %v18755_v5  ;;  %v13334_v10 = vld [vmem:[#allocation18 + $0xef0] sm:$0xff]  ;;  %v12923_v5 = vld [vmem:[#allocation18 + $0x218] sm:$0xff] }
 0xaa1   :  { %19053 = vrcp.f32 %v16651_v49  ;;  %16480 = vmatprep.subr.bf16.mxu0 %v18477_v11  ;;  %v18842_v11 = vcombine.low %v13338_v39, %v13342_v19  ;;  %v18835_v35 = vcombine.high %v13330_v2, %v13334_v10  ;;  %v18429_v38 = vcombine.high %v12923_v5, %v12927_v46  ;;  %v13171_v49 = vld [vmem:[#allocation18 + $0x9d8] sm:$0xff]  ;;  %v20021_v19 = vld [vmem:[#allocation19] sm:$0xff] }
 0xaa2   :  { %v13035_v14 = vld [vmem:[#allocation18 + $0x598] sm:$0xff] }
 0xaa3   :  { %16434 = vmatpush1.bf16.msra.mxu1 %v18754_v26  ;;  %v13175_v26 = vld [vmem:[#allocation18 + $0x9f8] sm:$0xff] }
 0xaa4   :  { %16481 = vmatpush2.bf16.msra.mxu0 %v18476_v22  ;;  %16435 = vmatprep.subr.bf16.mxu1 %v18747_v40  ;;  %v18834_v22 = vcombine.low %v13330_v2, %v13334_v10  ;;  %v18428_v40 = vcombine.low %v12923_v5, %v12927_v46  ;;  %v18677_v8 = vcombine.high %v13171_v49, %v13175_v26 }
 0xaa5   :  { %16482 = vmatprep.subr.bf16.mxu0 %v18469_v6  ;;  %v18827_v6 = vcombine.high %v13322_v62, %v13326_v42 }
 0xaa7   :  { %16436 = vmatpush1.bf16.msra.mxu1 %v18746_v41  ;;  %v13167_v41 = vld [vmem:[#allocation18 + $0x9b8] sm:$0xff] }
 0xaa8   :  { %16483 = vmatpush2.bf16.msra.mxu0 %v18468_v54  ;;  %16437 = vmatprep.subr.bf16.mxu1 %v18867_v44  ;;  %v18826_v54 = vcombine.low %v13322_v62, %v13326_v42  ;;  %v18676_v44 = vcombine.low %v13171_v49, %v13175_v26  ;;  %v18669_v55 = vcombine.high %v13163_v33, %v13167_v41  ;;  %v13135_v62 = vld [vmem:[#allocation18 + $0x8b8] sm:$0xff] }
 0xaa9   :  { %16484 = vmatprep.subr.bf16.mxu0 %v18461_v30  ;;  %v18819_v30 = vcombine.high %v13314_v20, %v13318_v61 }
 0xaab   :  { %16438 = vmatpush2.bf16.msra.mxu1 %v18866_v57  ;;  %v13159_v57 = vld [vmem:[#allocation18 + $0x978] sm:$0xff] }
 0xaac   :  { %v19052_v28 = vpop.eup %19051  ;;  %16485 = vmatpush2.bf16.msra.mxu0 %v18460_v21  ;;  %16439 = vmatprep.subr.bf16.mxu1 %v18859_v29  ;;  %v18818_v29 = vcombine.low %v13314_v20, %v13318_v61  ;;  %v18661_v25 = vcombine.high %v13155_v18, %v13159_v57  ;;  %v13023_v20 = vld [vmem:[#allocation18 + $0x538] sm:$0xff] }
 0xaad   :  { %16674 = vst [vmem:[%s20087_s13] sm:$0xff] %v19052_v28  ;;  %16486 = vmatprep.subr.bf16.mxu0 %v18453_v3  ;;  %v18668_v3 = vcombine.low %v13163_v33, %v13167_v41  ;;  %v13147_v28 = vld [vmem:[#allocation18 + $0x918] sm:$0xff] }
 0xaae   :  { %v19054_v1 = vpop.eup %19053  ;;  %v13127_v41 = vld [vmem:[#allocation18 + $0x878] sm:$0xff] }
 0xaaf   :  { %16675 = vst [vmem:[%s20087_s13 + $0x8] sm:$0xff] %v19054_v1  ;;  %16440 = vmatpush2.bf16.msra.mxu1 %v18858_v4  ;;  %v13047_v4 = vld [vmem:[#allocation18 + $0x5f8] sm:$0xff] }
 0xab0   :  { %16487 = vmatpush2.bf16.msra.mxu0 %v18452_v60  ;;  %16441 = vmatprep.subr.bf16.mxu1 %v18851_v12  ;;  %v13151_v60 = vld [vmem:[#allocation18 + $0x938] sm:$0xff]  ;;  %v18549_v39 = vcombine.high %v13043_v23, %v13047_v4  ;;  %v18548_v2 = vcombine.low %v13043_v23, %v13047_v4 }
 0xab1   :  { %16488 = vmatprep.subr.bf16.mxu0 %v18445_v45  ;;  %v18810_v45 = vcombine.low %v13306_v56, %v13310_v7  ;;  %v18653_v24 = vcombine.high %v13147_v28, %v13151_v60  ;;  %v18652_v10 = vcombine.low %v13147_v28, %v13151_v60  ;;  %v13011_v7 = vld [vmem:[#allocation18 + $0x4d8] sm:$0xff] }
 0xab2   :  { %v13007_v23 = vld [vmem:[#allocation18 + $0x4b8] sm:$0xff] }
 0xab3   :  { %16442 = vmatpush2.bf16.msra.mxu1 %v18850_v52  ;;  %v13039_v52 = vld [vmem:[#allocation18 + $0x5b8] sm:$0xff] }
 0xab4   :  { %16489 = vmatpush2.bf16.msra.mxu0 %v18444_v36  ;;  %16443 = vmatprep.subr.bf16.mxu1 %v18843_v51  ;;  %v13139_v36 = vld [vmem:[#allocation18 + $0x8d8] sm:$0xff]  ;;  %v18541_v5 = vcombine.high %v13035_v14, %v13039_v52  ;;  %v18540_v49 = vcombine.low %v13035_v14, %v13039_v52 }
 0xab5   :  { %16490 = vmatprep.subr.bf16.mxu0 %v18437_v27  ;;  %v13143_v51 = vld [vmem:[#allocation18 + $0x8f8] sm:$0xff]  ;;  %v13385_v27 = vrot.slane %v20021_v19, %v19567_v48 }
 0xab6   :  { %v13235_v4 = vld [vmem:[#allocation18 + $0xbd8] sm:$0xff] }
 0xab7   :  { %16444 = vmatpush2.bf16.msra.mxu1 %v18842_v11  ;;  %v13027_v11 = vld [vmem:[#allocation18 + $0x558] sm:$0xff]  ;;  %v16171_v42 = vadd.f32 %v20005_v37, %v13385_v27 }
 0xab8   :  { %16491 = vmatpush2.bf16.msra.mxu0 %v18436_v34  ;;  %16445 = vmatprep.subr.bf16.mxu1 %v18835_v35  ;;  %v13031_v34 = vld [vmem:[#allocation18 + $0x578] sm:$0xff] }
 0xab9   :  { %16492 = vmatprep.subr.bf16.mxu0 %v18429_v38  ;;  %v13131_v38 = vld [vmem:[#allocation18 + $0x898] sm:$0xff] }
 0xaba   :  { %v13123_v37 = vld [vmem:[#allocation18 + $0x858] sm:$0xff] }
 0xabb   :  { %16446 = vmatpush2.bf16.msra.mxu1 %v18834_v22  ;;  %v18533_v22 = vcombine.high %v13027_v11, %v13031_v34  ;;  %v18629_v56 = vcombine.high %v13123_v37, %v13127_v41  ;;  %v13239_v28 = vld [vmem:[#allocation18 + $0xbf8] sm:$0xff] }
 0xabc   :  { %16493 = vmatpush2.bf16.msra.mxu0 %v18428_v40  ;;  %16447 = vmatprep.subr.bf16.mxu1 %v18827_v6  ;;  %v18637_v6 = vcombine.high %v13131_v38, %v13135_v62  ;;  %v18740_v52 = vcombine.low %v13235_v4, %v13239_v28  ;;  %v12987_v27 = vld [vmem:[#allocation18 + $0x418] sm:$0xff] }
 0xabd   :  { %16544 = vmatprep.subr.bf16.mxu0 %v18677_v8  ;;  %v13019_v8 = vld [vmem:[#allocation18 + $0x518] sm:$0xff] }
 0xabf   :  { %v20017_v21 = vpop.f32.mrf.mxu0  ;;  %16448 = vmatpush2.bf16.msra.mxu1 %v18826_v54  ;;  %16495 = vmatmul.mubr.bf16.vlgmr.msra.gmra.mxu0 %v19926_v59  ;;  %v18660_v59 = vcombine.low %v13155_v18, %v13159_v57  ;;  %v18532_v54 = vcombine.low %v13027_v11, %v13031_v34  ;;  %v13015_v18 = vld [vmem:[#allocation18 + $0x4f8] sm:$0xff] }
 0xac0   :  { %16545 = vmatpush1.bf16.msra.mxu0 %v18676_v44  ;;  %16576 = vmatprep.mubr.bf16.mxu0 %v19937_v50  ;;  %v13381_v50 = vrot.slane %v20021_v19, %v19564_v43  ;;  %v18645_v43 = vcombine.high %v13139_v36, %v13143_v51  ;;  %v13115_v57 = vld [vmem:[#allocation18 + $0x818] sm:$0xff]  ;;  %v18516_v60 = vcombine.low %v13011_v7, %v13015_v18 }
 0xac1   :  { %v16252_v16 = vpop.f32.mrf.mxu0  ;;  %16449 = vmatprep.subr.bf16.mxu1 %v18819_v30  ;;  %16546 = vmatprep.subr.bf16.mxu0 %v18669_v55  ;;  %v18636_v30 = vcombine.low %v13131_v38, %v13135_v62  ;;  %v18525_v55 = vcombine.high %v13019_v8, %v13023_v20  ;;  %v13111_v38 = vld [vmem:[#allocation18 + $0x7f8] sm:$0xff] }
 0xac2   :  { %v16169_v46 = vadd.f32 %v20001_v63, %v13381_v50  ;;  %v18644_v63 = vcombine.low %v13139_v36, %v13143_v51  ;;  %v12999_v50 = vld [vmem:[#allocation18 + $0x478] sm:$0xff] }
 0xac3   :  { %v16254_v12 = vpop.f32.mrf.mxu0  ;;  %16450 = vmatpush2.bf16.msra.mxu1 %v18818_v29  ;;  %v13119_v29 = vld [vmem:[#allocation18 + $0x838] sm:$0xff] }
 0xac4   :  { %16547 = vmatpush1.bf16.msra.mxu0 %v18668_v3  ;;  %16451 = vmatprep.subr.bf16.mxu1 %v18811_v15  ;;  %v18628_v3 = vcombine.low %v13123_v37, %v13127_v41  ;;  %v18517_v15 = vcombine.high %v13011_v7, %v13015_v18  ;;  %v18620_v12 = vcombine.low %v13115_v57, %v13119_v29  ;;  %v13211_v62 = vld [vmem:[#allocation18 + $0xb18] sm:$0xff] }
 0xac5   :  { %v16255_v1 = vpop.f32.mrf.mxu0  ;;  %16548 = vmatprep.subr.bf16.mxu0 %v18661_v25  ;;  %v13003_v25 = vld [vmem:[#allocation18 + $0x498] sm:$0xff] }
 0xac6   :  { %v13227_v1 = vld [vmem:[#allocation18 + $0xb98] sm:$0xff]  ;;  %v18508_v14 = vcombine.low %v13003_v25, %v13007_v23 }
 0xac7   :  { %16452 = vmatpush2.bf16.msra.mxu1 %v18810_v45  ;;  %v18509_v45 = vcombine.high %v13003_v25, %v13007_v23 }
 0xac8   :  { %16549 = vmatpush1.bf16.msra.mxu0 %v18660_v59  ;;  %16503 = vmatprep.subr.bf16.mxu1 %v18549_v39  ;;  %v18741_v59 = vcombine.high %v13235_v4, %v13239_v28  ;;  %v12995_v39 = vld [vmem:[#allocation18 + $0x458] sm:$0xff] }
 0xac9   :  { %16550 = vmatprep.subr.bf16.mxu0 %v18653_v24  ;;  %v13231_v24 = vld [vmem:[#allocation18 + $0xbb8] sm:$0xff]  ;;  %v18501_v36 = vcombine.high %v12995_v39, %v12999_v50 }
 0xaca   :  { %v16209_v35 = vpop.f32.mrf.mxu1  ;;  %16454 = vmatmul.mubr.bf16.vlgmr.msra.gmra.mxu1 %v19973_v13  ;;  %v18733_v51 = vcombine.high %v13227_v1, %v13231_v24  ;;  %v13075_v28 = vld [vmem:[#allocation18 + $0x6d8] sm:$0xff] }
 0xacb   :  { %v16210_v48 = vadd.f32 %v16209_v35, %v16169_v46  ;;  %16504 = vmatpush1.bf16.msra.mxu1 %v18548_v2  ;;  %16535 = vmatprep.mubr.bf16.mxu1 %v19910_v9  ;;  %v12991_v2 = vld [vmem:[#allocation18 + $0x438] sm:$0xff]  ;;  %v18500_v46 = vcombine.low %v12995_v39, %v12999_v50 }
 0xacc   :  { %v16211_v26 = vpop.f32.mrf.mxu1  ;;  %16551 = vmatpush1.bf16.msra.mxu0 %v18652_v10  ;;  %16505 = vmatprep.subr.bf16.mxu1 %v18541_v5  ;;  %v13219_v10 = vld [vmem:[#allocation18 + $0xb58] sm:$0xff]  ;;  %v18493_v11 = vcombine.high %v12987_v27, %v12991_v2 }
 0xacd   :  { %v16212_v40 = vadd.f32 %v16211_v26, %v16171_v42  ;;  %16552 = vmatprep.subr.bf16.mxu0 %v18645_v43  ;;  %v20032_v61 = vadd.f32 %v20017_v21, %v16210_v48  ;;  %v18524_v21 = vcombine.low %v13019_v8, %v13023_v20  ;;  %v13223_v5 = vld [vmem:[#allocation18 + $0xb78] sm:$0xff]  ;;  %v18732_v43 = vcombine.low %v13227_v1, %v13231_v24 }
 0xace   :  { %v16213_v33 = vpop.f32.mrf.mxu1  ;;  %v18725_v34 = vcombine.high %v13219_v10, %v13223_v5  ;;  %v13107_v35 = vld [vmem:[#allocation18 + $0x7d8] sm:$0xff]  ;;  %v18492_v48 = vcombine.low %v12987_v27, %v12991_v2 }
 0xacf   :  { %16506 = vmatpush1.bf16.msra.mxu1 %v18540_v49  ;;  %v20034_v9 = vadd.f32 %v16252_v16, %v16212_v40  ;;  %v18621_v16 = vcombine.high %v13115_v57, %v13119_v29  ;;  %v13215_v42 = vld [vmem:[#allocation18 + $0xb38] sm:$0xff]  ;;  %v18724_v49 = vcombine.low %v13219_v10, %v13223_v5  ;;  %v18613_v26 = vcombine.high %v13107_v35, %v13111_v38 }
 0xad0   :  { %v16214_v44 = vpop.f32.mrf.mxu1  ;;  %16553 = vmatpush1.bf16.msra.mxu0 %v18644_v63  ;;  %16507 = vmatprep.subr.bf16.mxu1 %v18533_v22  ;;  %v18717_v63 = vcombine.high %v13211_v62, %v13215_v42  ;;  %v13099_v22 = vld [vmem:[#allocation18 + $0x798] sm:$0xff]  ;;  %v18612_v20 = vcombine.low %v13107_v35, %v13111_v38  ;;  %v18716_v33 = vcombine.low %v13211_v62, %v13215_v42 }
 0xad1   :  { %16554 = vmatprep.subr.bf16.mxu0 %v18637_v6  ;;  %v13103_v40 = vld [vmem:[#allocation18 + $0x7b8] sm:$0xff] }
 0xad2   :  { %v13203_v6 = vld [vmem:[#allocation18 + $0xad8] sm:$0xff]  ;;  %v18605_v37 = vcombine.high %v13099_v22, %v13103_v40 }
 0xad3   :  { %16508 = vmatpush1.bf16.msra.mxu1 %v18532_v54  ;;  %v13207_v8 = vld [vmem:[#allocation18 + $0xaf8] sm:$0xff] }
 0xad4   :  { %16555 = vmatpush1.bf16.msra.mxu0 %v18636_v30  ;;  %16509 = vmatprep.subr.bf16.mxu1 %v18525_v55  ;;  %v18709_v41 = vcombine.high %v13203_v6, %v13207_v8  ;;  %v13091_v54 = vld [vmem:[#allocation18 + $0x758] sm:$0xff]  ;;  %v18708_v7 = vcombine.low %v13203_v6, %v13207_v8 }
 0xad5   :  { %16556 = vmatprep.subr.bf16.mxu0 %v18629_v56  ;;  %v13095_v44 = vld [vmem:[#allocation18 + $0x778] sm:$0xff]  ;;  %v18604_v56 = vcombine.low %v13099_v22, %v13103_v40 }
 0xad6   :  { %v13195_v30 = vld [vmem:[#allocation18 + $0xa98] sm:$0xff]  ;;  %v18597_v18 = vcombine.high %v13091_v54, %v13095_v44 }
 0xad7   :  { %16510 = vmatpush1.bf16.msra.mxu1 %v18524_v21  ;;  %v13199_v55 = vld [vmem:[#allocation18 + $0xab8] sm:$0xff] }
 0xad8   :  { %16557 = vmatpush1.bf16.msra.mxu0 %v18628_v3  ;;  %16511 = vmatprep.subr.bf16.mxu1 %v18517_v15  ;;  %v18701_v57 = vcombine.high %v13195_v30, %v13199_v55  ;;  %v13083_v29 = vld [vmem:[#allocation18 + $0x718] sm:$0xff]  ;;  %v18700_v25 = vcombine.low %v13195_v30, %v13199_v55 }
 0xad9   :  { %16558 = vmatprep.subr.bf16.mxu0 %v18621_v16  ;;  %v13087_v21 = vld [vmem:[#allocation18 + $0x738] sm:$0xff]  ;;  %v18596_v16 = vcombine.low %v13091_v54, %v13095_v44 }
 0xada   :  { %v13187_v3 = vld [vmem:[#allocation18 + $0xa58] sm:$0xff]  ;;  %v18589_v23 = vcombine.high %v13083_v29, %v13087_v21 }
 0xadb   :  { %16512 = vmatpush1.bf16.msra.mxu1 %v18516_v60  ;;  %v13191_v15 = vld [vmem:[#allocation18 + $0xa78] sm:$0xff] }
 0xadc   :  { %16559 = vmatpush1.bf16.msra.mxu0 %v18620_v12  ;;  %16513 = vmatprep.subr.bf16.mxu1 %v18509_v45  ;;  %v18693_v4 = vcombine.high %v13187_v3, %v13191_v15  ;;  %v13079_v60 = vld [vmem:[#allocation18 + $0x6f8] sm:$0xff]  ;;  %v18692_v39 = vcombine.low %v13187_v3, %v13191_v15 }
 0xadd   :  { %16560 = vmatprep.subr.bf16.mxu0 %v18741_v59  ;;  %v13179_v12 = vld [vmem:[#allocation18 + $0xa18] sm:$0xff]  ;;  %v18588_v59 = vcombine.low %v13083_v29, %v13087_v21  ;;  %v18581_v50 = vcombine.high %v13075_v28, %v13079_v60 }
 0xade   :  { %v13183_v45 = vld [vmem:[#allocation18 + $0xa38] sm:$0xff] }
 0xadf   :  { %16514 = vmatpush1.bf16.msra.mxu1 %v18508_v14  ;;  %v18685_v1 = vcombine.high %v13179_v12, %v13183_v45  ;;  %v13067_v24 = vld [vmem:[#allocation18 + $0x698] sm:$0xff] }
 0xae0   :  { %16561 = vmatpush2.bf16.msra.mxu0 %v18740_v52  ;;  %16515 = vmatprep.subr.bf16.mxu1 %v18501_v36  ;;  %v13071_v14 = vld [vmem:[#allocation18 + $0x6b8] sm:$0xff]  ;;  %v18580_v52 = vcombine.low %v13075_v28, %v13079_v60  ;;  %v18684_v36 = vcombine.low %v13179_v12, %v13183_v45 }
 0xae1   :  { %16562 = vmatprep.subr.bf16.mxu0 %v18733_v51  ;;  %v18573_v51 = vcombine.high %v13067_v24, %v13071_v14  ;;  %v13059_v27 = vld [vmem:[#allocation18 + $0x658] sm:$0xff]  ;;  %v18572_v10 = vcombine.low %v13067_v24, %v13071_v14 }
 0xae2   :  { %v13063_v2 = vld [vmem:[#allocation18 + $0x678] sm:$0xff] }
 0xae3   :  { %16516 = vmatpush1.bf16.msra.mxu1 %v18500_v46  ;;  %v18565_v5 = vcombine.high %v13059_v27, %v13063_v2  ;;  %v13051_v46 = vld [vmem:[#allocation18 + $0x618] sm:$0xff] }
 0xae4   :  { %16563 = vmatpush2.bf16.msra.mxu0 %v18732_v43  ;;  %16517 = vmatprep.subr.bf16.mxu1 %v18493_v11  ;;  %v13055_v43 = vld [vmem:[#allocation18 + $0x638] sm:$0xff] }
 0xae5   :  { %16564 = vmatprep.subr.bf16.mxu0 %v18725_v34  ;;  %v18564_v34 = vcombine.low %v13059_v27, %v13063_v2  ;;  %v18557_v35 = vcombine.high %v13051_v46, %v13055_v43  ;;  %v13299_v62 = vld [vmem:[#allocation18 + $0xdd8] sm:$0xff] }
 0xae6   :  { %v13303_v42 = vld [vmem:[#allocation18 + $0xdf8] sm:$0xff] }
 0xae7   :  { %16518 = vmatpush1.bf16.msra.mxu1 %v18492_v48  ;;  %v13291_v22 = vld [vmem:[#allocation18 + $0xd98] sm:$0xff]  ;;  %v18804_v6 = vcombine.low %v13299_v62, %v13303_v42 }
 0xae8   :  { %16565 = vmatpush2.bf16.msra.mxu0 %v18724_v49  ;;  %16519 = vmatprep.subr.bf16.mxu1 %v18613_v26  ;;  %v18556_v49 = vcombine.low %v13051_v46, %v13055_v43  ;;  %v18805_v26 = vcombine.high %v13299_v62, %v13303_v42  ;;  %v13295_v40 = vld [vmem:[#allocation18 + $0xdb8] sm:$0xff] }
 0xae9   :  { %16566 = vmatprep.subr.bf16.mxu0 %v18717_v63  ;;  %v18797_v8 = vcombine.high %v13291_v22, %v13295_v40  ;;  %v13267_v21 = vld [vmem:[#allocation18 + $0xcd8] sm:$0xff] }
 0xaea   :  { %v13255_v28 = vld [vmem:[#allocation18 + $0xc78] sm:$0xff] }
 0xaeb   :  { %16520 = vmatpush2.bf16.msra.mxu1 %v18612_v20  ;;  %v13287_v20 = vld [vmem:[#allocation18 + $0xd78] sm:$0xff] }
 0xaec   :  { %16567 = vmatpush2.bf16.msra.mxu0 %v18716_v33  ;;  %16521 = vmatprep.subr.bf16.mxu1 %v18605_v37 }
 0xaed   :  { %16568 = vmatprep.subr.bf16.mxu0 %v18709_v41  ;;  %v18796_v41 = vcombine.low %v13291_v22, %v13295_v40 }
 0xaef   :  { %16522 = vmatpush2.bf16.msra.mxu1 %v18604_v56  ;;  %v13275_v56 = vld [vmem:[#allocation18 + $0xd18] sm:$0xff] }
 0xaf0   :  { %16569 = vmatpush2.bf16.msra.mxu0 %v18708_v7  ;;  %16523 = vmatprep.subr.bf16.mxu1 %v18597_v18  ;;  %v13279_v7 = vld [vmem:[#allocation18 + $0xd38] sm:$0xff] }
 0xaf1   :  { %16570 = vmatprep.subr.bf16.mxu0 %v18701_v57  ;;  %v18780_v3 = vcombine.low %v13275_v56, %v13279_v7 }
 0xaf3   :  { %16524 = vmatpush2.bf16.msra.mxu1 %v18596_v16  ;;  %v13259_v16 = vld [vmem:[#allocation18 + $0xc98] sm:$0xff] }
 0xaf4   :  { %16571 = vmatpush2.bf16.msra.mxu0 %v18700_v25  ;;  %16525 = vmatprep.subr.bf16.mxu1 %v18589_v23  ;;  %v13263_v25 = vld [vmem:[#allocation18 + $0xcb8] sm:$0xff] }
 0xaf5   :  { %16572 = vmatprep.subr.bf16.mxu0 %v18693_v4  ;;  %v18765_v23 = vcombine.high %v13259_v16, %v13263_v25  ;;  %v13251_v4 = vld [vmem:[#allocation18 + $0xc58] sm:$0xff]  ;;  %v18764_v60 = vcombine.low %v13259_v16, %v13263_v25  ;;  %v13393_v16 = vrot.slane %v20021_v19, %v19618_v53 }
 0xaf6   :  { %v18757_v45 = vcombine.high %v13251_v4, %v13255_v28  ;;  %v18756_v14 = vcombine.low %v13251_v4, %v13255_v28 }
 0xaf7   :  { %16526 = vmatpush2.bf16.msra.mxu1 %v18588_v59 }
 0xaf8   :  { %16573 = vmatpush2.bf16.msra.mxu0 %v18692_v39  ;;  %16527 = vmatprep.subr.bf16.mxu1 %v18581_v50  ;;  %v13243_v39 = vld [vmem:[#allocation18 + $0xc18] sm:$0xff] }
 0xaf9   :  { %16574 = vmatprep.subr.bf16.mxu0 %v18685_v1  ;;  %v13247_v50 = vld [vmem:[#allocation18 + $0xc38] sm:$0xff] }
 0xafa   :  { %v18748_v27 = vcombine.low %v13243_v39, %v13247_v50 }
 0xafb   :  { %16528 = vmatpush2.bf16.msra.mxu1 %v18580_v52  ;;  %v18749_v52 = vcombine.high %v13243_v39, %v13247_v50 }
 0xafc   :  { %16575 = vmatpush2.bf16.msra.mxu0 %v18684_v36  ;;  %16529 = vmatprep.subr.bf16.mxu1 %v18573_v51  ;;  %v13363_v36 = vld [vmem:[#allocation18 + $0xfd8] sm:$0xff] }
 0xafd   :  { %v13367_v51 = vld [vmem:[#allocation18 + $0xff8] sm:$0xff] }
 0xafe   :  { %v18869_v2 = vcombine.high %v13363_v36, %v13367_v51  ;;  %v18868_v46 = vcombine.low %v13363_v36, %v13367_v51 }
 0xaff   :  { %v20036_v11 = vpop.f32.mrf.mxu0  ;;  %16530 = vmatpush2.bf16.msra.mxu1 %v18572_v10  ;;  %16577 = vmatmul.mubr.bf16.vlgmr.msra.gmra.mxu0 %v19951_v0  ;;  %v13283_v0 = vld [vmem:[#allocation18 + $0xd58] sm:$0xff] }
 0xb00   :  { %16531 = vmatprep.subr.bf16.mxu1 %v18565_v5  ;;  %v18789_v44 = vcombine.high %v13283_v0, %v13287_v20  ;;  %v18788_v29 = vcombine.low %v13283_v0, %v13287_v20  ;;  %v13355_v10 = vld [vmem:[#allocation18 + $0xf98] sm:$0xff] }
 0xb01   :  { %v20039_v38 = vpop.f32.mrf.mxu0  ;;  %v13359_v5 = vld [vmem:[#allocation18 + $0xfb8] sm:$0xff] }
 0xb02   :  { %v18861_v43 = vcombine.high %v13355_v10, %v13359_v5  ;;  %v18860_v62 = vcombine.low %v13355_v10, %v13359_v5 }
 0xb03   :  { %v16336_v48 = vpop.f32.mrf.mxu0  ;;  %16532 = vmatpush2.bf16.msra.mxu1 %v18564_v34  ;;  %v13347_v34 = vld [vmem:[#allocation18 + $0xf58] sm:$0xff] }
 0xb04   :  { %16533 = vmatprep.subr.bf16.mxu1 %v18557_v35  ;;  %v13351_v35 = vld [vmem:[#allocation18 + $0xf78] sm:$0xff] }
 0xb05   :  { %v16337_v63 = vpop.f32.mrf.mxu0  ;;  %v18853_v48 = vcombine.high %v13347_v34, %v13351_v35  ;;  %v18852_v22 = vcombine.low %v13347_v34, %v13351_v35 }
 0xb07   :  { %16534 = vmatpush2.bf16.msra.mxu1 %v18556_v49  ;;  %v13339_v49 = vld [vmem:[#allocation18 + $0xf18] sm:$0xff] }
 0xb08   :  { %16585 = vmatprep.subr.bf16.mxu1 %v18805_v26  ;;  %v13343_v26 = vld [vmem:[#allocation18 + $0xf38] sm:$0xff] }
 0xb09   :  { %v18845_v40 = vcombine.high %v13339_v49, %v13343_v26  ;;  %v18844_v0 = vcombine.low %v13339_v49, %v13343_v26  ;;  %v13401_v49 = vrot.slane %v20021_v19, %v19666_v47 }
 0xb0a   :  { %v16291_v33 = vpop.f32.mrf.mxu1  ;;  %16536 = vmatmul.mubr.bf16.vlgmr.msra.gmra.mxu1 %v19928_v32 }
 0xb0b   :  { %v16292_v37 = vadd.f32 %v16291_v33, %v20032_v61  ;;  %16586 = vmatpush1.bf16.msra.mxu1 %v18804_v6  ;;  %16617 = vmatprep.mubr.bf16.mxu1 %v19971_v31  ;;  %v18781_v61 = vcombine.high %v13275_v56, %v13279_v7  ;;  %v13271_v31 = vld [vmem:[#allocation18 + $0xcf8] sm:$0xff] }
 0xb0c   :  { %v16293_v54 = vpop.f32.mrf.mxu1  ;;  %16587 = vmatprep.subr.bf16.mxu1 %v18797_v8  ;;  %v18773_v15 = vcombine.high %v13267_v21, %v13271_v31  ;;  %v13331_v6 = vld [vmem:[#allocation18 + $0xed8] sm:$0xff] }
 0xb0d   :  { %v18872_v30 = vmul.f32 -1.442695, %v16292_v37  ;;  %v16294_v55 = vadd.f32 %v16293_v54, %v20034_v9  ;;  %v18772_v9 = vcombine.low %v13267_v21, %v13271_v31  ;;  %v13335_v8 = vld [vmem:[#allocation18 + $0xef8] sm:$0xff] }
 0xb0e   :  { %v16295_v18 = vpop.f32.mrf.mxu1  ;;  %v18837_v20 = vcombine.high %v13331_v6, %v13335_v8  ;;  %v13323_v33 = vld [vmem:[#allocation18 + $0xe98] sm:$0xff] }
 0xb0f   :  { %19055 = vpow2.f32 %v18872_v30  ;;  %v18873_v57 = vmul.f32 -1.442695, %v16294_v55  ;;  %16588 = vmatpush1.bf16.msra.mxu1 %v18796_v41  ;;  %v13327_v37 = vld [vmem:[#allocation18 + $0xeb8] sm:$0xff]  ;;  %v18836_v41 = vcombine.low %v13331_v6, %v13335_v8 }
 0xb10   :  { %v16296_v32 = vpop.f32.mrf.mxu1  ;;  %16589 = vmatprep.subr.bf16.mxu1 %v18789_v44  ;;  %v18829_v54 = vcombine.high %v13323_v33, %v13327_v37  ;;  %v13315_v44 = vld [vmem:[#allocation18 + $0xe58] sm:$0xff]  ;;  %v18828_v55 = vcombine.low %v13323_v33, %v13327_v37 }
 0xb11   :  { %19057 = vpow2.f32 %v18873_v57  ;;  %v13319_v30 = vld [vmem:[#allocation18 + $0xe78] sm:$0xff] }
 0xb12   :  { %v18821_v56 = vcombine.high %v13315_v44, %v13319_v30  ;;  %v13307_v7 = vld [vmem:[#allocation18 + $0xe18] sm:$0xff] }
 0xb13   :  { %16590 = vmatpush1.bf16.msra.mxu1 %v18788_v29  ;;  %v13311_v18 = vld [vmem:[#allocation18 + $0xe38] sm:$0xff]  ;;  %v18820_v29 = vcombine.low %v13315_v44, %v13319_v30 }
 0xb14   :  { %16591 = vmatprep.subr.bf16.mxu1 %v18781_v61  ;;  %v18813_v32 = vcombine.high %v13307_v7, %v13311_v18  ;;  %v18812_v31 = vcombine.low %v13307_v7, %v13311_v18 }
 0xb17   :  { %16592 = vmatpush1.bf16.msra.mxu1 %v18780_v3  ;;  %v13389_v3 = vrot.slane %v20021_v19, %v19596_v17 }
 0xb18   :  { %16593 = vmatprep.subr.bf16.mxu1 %v18773_v15 }
 0xb19   :  { %v16333_v25 = vadd.f32 %v20036_v11, %v13389_v3 }
 0xb1b   :  { %16594 = vmatpush1.bf16.msra.mxu1 %v18772_v9 }
 0xb1c   :  { %v19056_v12 = vpop.eup %19055  ;;  %16595 = vmatprep.subr.bf16.mxu1 %v18765_v23  ;;  %v16335_v23 = vadd.f32 %v20039_v38, %v13393_v16 }
 0xb1d   :  { %v16652_v59 = vadd.f32 1.0, %v19056_v12 }
 0xb1e   :  { %v19058_v1 = vpop.eup %19057 }
 0xb1f   :  { %19059 = vrcp.f32 %v16652_v59  ;;  %v16653_v24 = vadd.f32 1.0, %v19058_v1  ;;  %16596 = vmatpush1.bf16.msra.mxu1 %v18764_v60 }
 0xb20   :  { %16597 = vmatprep.subr.bf16.mxu1 %v18757_v45 }
 0xb21   :  { %19061 = vrcp.f32 %v16653_v24 }
 0xb23   :  { %16598 = vmatpush1.bf16.msra.mxu1 %v18756_v14 }
 0xb24   :  { %16599 = vmatprep.subr.bf16.mxu1 %v18749_v52 }
 0xb27   :  { %16600 = vmatpush1.bf16.msra.mxu1 %v18748_v27 }
 0xb28   :  { %16601 = vmatprep.subr.bf16.mxu1 %v18869_v2 }
 0xb2b   :  { %16602 = vmatpush2.bf16.msra.mxu1 %v18868_v46 }
 0xb2c   :  { %v19060_v42 = vpop.eup %19059  ;;  %16603 = vmatprep.subr.bf16.mxu1 %v18861_v43 }
 0xb2d   :  { %16676 = vst [vmem:[%s20087_s13 + $0x10] sm:$0xff] %v19060_v42  ;;  %v13397_v42 = vrot.slane %v20021_v19, %v19663_v58 }
 0xb2e   :  { %v19062_v63 = vpop.eup %19061 }
 0xb2f   :  { %16677 = vst [vmem:[%s20087_s13 + $0x18] sm:$0xff] %v19062_v63  ;;  %16604 = vmatpush2.bf16.msra.mxu1 %v18860_v62 }
 0xb30   :  { %16605 = vmatprep.subr.bf16.mxu1 %v18853_v48 }
 0xb33   :  { %16606 = vmatpush2.bf16.msra.mxu1 %v18852_v22 }
 0xb34   :  { %16607 = vmatprep.subr.bf16.mxu1 %v18845_v40 }
 0xb37   :  { %16608 = vmatpush2.bf16.msra.mxu1 %v18844_v0 }
 0xb38   :  { %16609 = vmatprep.subr.bf16.mxu1 %v18837_v20 }
 0xb3b   :  { %16610 = vmatpush2.bf16.msra.mxu1 %v18836_v41 }
 0xb3c   :  { %16611 = vmatprep.subr.bf16.mxu1 %v18829_v54 }
 0xb3f   :  { %v16414_v57 = vpop.f32.mrf.mxu0  ;;  %16612 = vmatpush2.bf16.msra.mxu1 %v18828_v55 }
 0xb40   :  { %16613 = vmatprep.subr.bf16.mxu1 %v18821_v56 }
 0xb41   :  { %v16416_v61 = vpop.f32.mrf.mxu0 }
 0xb43   :  { %v16418_v21 = vpop.f32.mrf.mxu0  ;;  %16614 = vmatpush2.bf16.msra.mxu1 %v18820_v29 }
 0xb44   :  { %16615 = vmatprep.subr.bf16.mxu1 %v18813_v32 }
 0xb45   :  { %v16419_v15 = vpop.f32.mrf.mxu0 }
 0xb47   :  { %16616 = vmatpush2.bf16.msra.mxu1 %v18812_v31 }
 0xb4a   :  { %v16373_v9 = vpop.f32.mrf.mxu1  ;;  %16618 = vmatmul.mubr.bf16.vlgmr.msra.gmra.mxu1 %v19973_v13 }
 0xb4b   :  { %v16374_v4 = vadd.f32 %v16373_v9, %v16333_v25 }
 0xb4c   :  { %v16375_v28 = vpop.f32.mrf.mxu1 }
 0xb4d   :  { %v16376_v60 = vadd.f32 %v16375_v28, %v16335_v23  ;;  %v16415_v12 = vadd.f32 %v16414_v57, %v16374_v4 }
 0xb4e   :  { %v16377_v45 = vpop.f32.mrf.mxu1 }
 0xb4f   :  { %v16417_v59 = vadd.f32 %v16416_v61, %v16376_v60 }
 0xb50   :  { %v16378_v39 = vpop.f32.mrf.mxu1 }
 0xb7f   :  { %v16496_v17 = vpop.f32.mrf.mxu0 }
 0xb80   :  { %v16497_v26 = vadd.f32 %v16496_v17, %v13397_v42 }
 0xb81   :  { %v16498_v50 = vpop.f32.mrf.mxu0 }
 0xb82   :  { %v16499_v22 = vadd.f32 %v16498_v50, %v13401_v49 }
 0xb83   :  { %v16500_v1 = vpop.f32.mrf.mxu0 }
 0xb85   :  { %v16501_v24 = vpop.f32.mrf.mxu0 }
 0xb8a   :  { %v16455_v53 = vpop.f32.mrf.mxu1 }
 0xb8b   :  { %v16456_v14 = vadd.f32 %v16455_v53, %v16415_v12 }
 0xb8c   :  { %v16457_v52 = vpop.f32.mrf.mxu1 }
 0xb8d   :  { %v18874_v11 = vmul.f32 -1.442695, %v16456_v14  ;;  %v16458_v36 = vadd.f32 %v16457_v52, %v16417_v59 }
 0xb8e   :  { %v16459_v51 = vpop.f32.mrf.mxu1 }
 0xb8f   :  { %19063 = vpow2.f32 %v18874_v11  ;;  %v18875_v13 = vmul.f32 -1.442695, %v16458_v36 }
 0xb90   :  { %v16460_v38 = vpop.f32.mrf.mxu1 }
 0xb91   :  { %19065 = vpow2.f32 %v18875_v13 }
 0xb9c   :  { %v19064_v27 = vpop.eup %19063 }
 0xb9d   :  { %v16654_v2 = vadd.f32 1.0, %v19064_v27 }
 0xb9e   :  { %v19066_v10 = vpop.eup %19065 }
 0xb9f   :  { %19067 = vrcp.f32 %v16654_v2  ;;  %v16655_v5 = vadd.f32 1.0, %v19066_v10 }
 0xba1   :  { %19069 = vrcp.f32 %v16655_v5 }
 0xbac   :  { %v19068_v46 = vpop.eup %19067 }
 0xbad   :  { %16678 = vst [vmem:[%s20087_s13 + $0x20] sm:$0xff] %v19068_v46 }
 0xbae   :  { %v19070_v43 = vpop.eup %19069 }
 0xbaf   :  { %16679 = vst [vmem:[%s20087_s13 + $0x28] sm:$0xff] %v19070_v43 }
 0xbbf   :  { %v16578_v34 = vpop.f32.mrf.mxu0 }
 0xbc1   :  { %v16580_v35 = vpop.f32.mrf.mxu0 }
 0xbc3   :  { %v16582_v62 = vpop.f32.mrf.mxu0 }
 0xbc5   :  { %v16583_v48 = vpop.f32.mrf.mxu0 }
 0xbca   :  { %v16537_v63 = vpop.f32.mrf.mxu1 }
 0xbcb   :  { %v16538_v40 = vadd.f32 %v16537_v63, %v16497_v26 }
 0xbcc   :  { %v16539_v6 = vpop.f32.mrf.mxu1 }
 0xbcd   :  { %v16540_v8 = vadd.f32 %v16539_v6, %v16499_v22  ;;  %v16579_v0 = vadd.f32 %v16578_v34, %v16538_v40 }
 0xbce   :  { %v16541_v20 = vpop.f32.mrf.mxu1 }
 0xbcf   :  { %v16581_v33 = vadd.f32 %v16580_v35, %v16540_v8 }
 0xbd0   :  { %v16542_v37 = vpop.f32.mrf.mxu1 }
 0xc0a   :  { %v16619_v41 = vpop.f32.mrf.mxu1 }
 0xc0b   :  { %v16620_v54 = vadd.f32 %v16619_v41, %v16579_v0 }
 0xc0c   :  { %v16621_v44 = vpop.f32.mrf.mxu1 }
 0xc0d   :  { %v18876_v30 = vmul.f32 -1.442695, %v16620_v54  ;;  %v16622_v55 = vadd.f32 %v16621_v44, %v16581_v33 }
 0xc0e   :  { %v16623_v58 = vpop.f32.mrf.mxu1 }
 0xc0f   :  { %19071 = vpow2.f32 %v18876_v30  ;;  %v18877_v56 = vmul.f32 -1.442695, %v16622_v55 }
 0xc10   :  { %v16624_v7 = vpop.f32.mrf.mxu1 }
 0xc11   :  { %19073 = vpow2.f32 %v18877_v56 }
 0xc1c   :  { %v19072_v47 = vpop.eup %19071 }
 0xc1d   :  { %v16656_v19 = vadd.f32 1.0, %v19072_v47 }
 0xc1e   :  { %v19074_v18 = vpop.eup %19073 }
 0xc1f   :  { %19075 = vrcp.f32 %v16656_v19  ;;  %v16657_v57 = vadd.f32 1.0, %v19074_v18 }
 0xc21   :  { %19077 = vrcp.f32 %v16657_v57 }
 0xc2c   :  { %v19076_v29 = vpop.eup %19075 }
 0xc2d   :  { %16680 = vst [vmem:[%s20087_s13 + $0x30] sm:$0xff] %v19076_v29 }
 0xc2e   :  { %v19078_v32 = vpop.eup %19077 }
 0xc2f   :  { %16681 = vst [vmem:[%s20087_s13 + $0x38] sm:$0xff] %v19078_v32 }
 0xc30   :  { %16686 = vsyncpa [#allocation3], 1 }
 0xc31   :  { %16687 = vsyncpa [#allocation5], 1 }
 0xc32   :  { %16688 = vsyncpa [#allocation8], 1 }
 0xc33   :  { %16689 = vsyncpa [#allocation11], 1 }
 0xc34   :  { %16690 = vsyncpa [#allocation14], 1 }
 0xc35   :  { %16691 = vsyncpa [#allocation17], 1 }
 0xc36   :  { %16692 = vsyncpa [#allocation20], 1 }

</bundles_post_ra>
